<compile_context>
chip_gen: v6e
topology: v6e:2x2x1
jax: 0.10.0
libtpu: 0.0.40
codegen_flags: <defaults>
</compile_context>

<pallas_src>
import functools

import jax
import jax.numpy as jnp
import numpy as np
from jax import lax
from jax.experimental import pallas as pl
from jax.experimental.pallas import tpu as pltpu

IMAGE_SIZE = 16      # small stand-in for the original 128
IN_CHANNELS = 4
HIDDEN = 64
NUM_CLASSES = 10
BATCH = 2

VMEM_LIMIT = 48 * 1024 * 1024


# --------------------------- fused encoder kernel -------------------------- #
def _fused_encoder_kernel(xp_ref, w1_ref, b1_ref, w2_ref, b2_ref,
                          wseg_ref, bseg_ref, h2_ref, seg_ref, h1p_ref,
                          *, H, W, cin, hidden):
    HW = H * W
    pad = W + 1   # zero margin (rows) above/below the flattened image

    # Row index r = h*W + w  ->  column-position masks for horizontal taps.
    col = lax.broadcasted_iota(jnp.int32, (HW, 1), 0) % W
    not_left = col != 0            # tap dw == -1 is invalid at w == 0
    not_right = col != (W - 1)     # tap dw == +1 is invalid at w == W-1

    def conv3x3(p_ref, w_ref, c_in):
        # 3x3 "same" conv as 9 shifted, masked, accumulating MXU dots on the
        # row-flattened (H*W, C) layout.  p_ref rows [pad, pad+HW) hold data;
        # the margins are zero (vertical padding); horizontal wrap-around is
        # killed with the column masks.  Activations cast to bf16 so the MXU
        # runs a single bf16 pass with an f32 accumulator.
        acc = jnp.zeros((HW, hidden), jnp.float32)
        for dh in (-1, 0, 1):
            for dw in (-1, 0, 1):
                t = (dh + 1) * 3 + (dw + 1)
                a = p_ref[pl.ds(pad + dh * W + dw, HW), :]
                if dw == -1:
                    a = jnp.where(not_left, a, jnp.zeros_like(a))
                elif dw == 1:
                    a = jnp.where(not_right, a, jnp.zeros_like(a))
                acc = acc + jnp.dot(
                    a.astype(jnp.bfloat16),
                    w_ref[pl.ds(t * c_in, c_in), :],
                    preferred_element_type=jnp.float32)
        return acc

    # conv1 + ReLU (f32 epilogue); result stays on-chip only.
    h1 = jnp.maximum(conv3x3(xp_ref, w1_ref, cin) + b1_ref[...], 0.0)

    # Stage h1 into the padded VMEM scratch for conv2 (zero the margins).
    h1p_ref[pl.ds(0, pad), :] = jnp.zeros((pad, hidden), jnp.float32)
    h1p_ref[pl.ds(pad + HW, pad), :] = jnp.zeros((pad, hidden), jnp.float32)
    h1p_ref[pl.ds(pad, HW), :] = h1

    # conv2 + ReLU.
    h2 = jnp.maximum(conv3x3(h1p_ref, w2_ref, hidden) + b2_ref[...], 0.0)
    h2_ref[...] = h2.astype(h2_ref.dtype)

    # Fused segmentation head: 1x1 conv == channel-weighted reduction.
    seg = jnp.sum(h2 * wseg_ref[...], axis=-1, keepdims=True) + bseg_ref[...]
    seg_ref[...] = seg.astype(seg_ref.dtype)


def fused_encoder(xp, w1, b1, w2, b2, wseg, bseg, *, H, W):
    N, R, cin = xp.shape
    HW = H * W
    hidden = w1.shape[1]
    kernel = functools.partial(_fused_encoder_kernel,
                               H=H, W=W, cin=cin, hidden=hidden)
    flops = 2 * N * HW * 9 * (cin + hidden) * hidden + 2 * N * HW * hidden
    bytes_accessed = (xp.size * 4 + w1.size * 2 + w2.size * 2
                      + N * HW * hidden * 2 + N * HW * 4)
    return pl.pallas_call(
        kernel,
        grid=(N,),
        in_specs=[
            pl.BlockSpec((None, R, cin), lambda n: (n, 0, 0)),
            pl.BlockSpec((9 * cin, hidden), lambda n: (0, 0)),
            pl.BlockSpec((1, hidden), lambda n: (0, 0)),
            pl.BlockSpec((9 * hidden, hidden), lambda n: (0, 0)),
            pl.BlockSpec((1, hidden), lambda n: (0, 0)),
            pl.BlockSpec((1, hidden), lambda n: (0, 0)),
            pl.BlockSpec((1, 1), lambda n: (0, 0)),
        ],
        out_specs=(
            pl.BlockSpec((None, HW, hidden), lambda n: (n, 0, 0)),
            pl.BlockSpec((None, HW, 1), lambda n: (n, 0, 0)),
        ),
        out_shape=(
            jax.ShapeDtypeStruct((N, HW, hidden), jnp.bfloat16),
            jax.ShapeDtypeStruct((N, HW, 1), jnp.float32),
        ),
        scratch_shapes=[pltpu.VMEM((R, hidden), jnp.float32)],
        compiler_params=pltpu.CompilerParams(
            dimension_semantics=("parallel",),
            vmem_limit_bytes=VMEM_LIMIT,
        ),
        cost_estimate=pl.CostEstimate(flops=flops, transcendentals=0,
                                      bytes_accessed=bytes_accessed),
    )(xp, w1, b1, w2, b2, wseg, bseg)


# ---------------------------- classifier kernel ---------------------------- #
def _classifier_kernel(a_ref, w_ref, b_ref, o_ref, acc_ref):
    k = pl.program_id(0)

    @pl.when(k == 0)
    def _():
        acc_ref[...] = jnp.zeros_like(acc_ref)

    acc_ref[...] += jnp.dot(a_ref[...], w_ref[...],
                            preferred_element_type=jnp.float32)

    @pl.when(k == pl.num_programs(0) - 1)
    def _():
        o_ref[...] = (acc_ref[...] + b_ref[...]).astype(o_ref.dtype)


def classifier(a, w, b, *, tk=8192):
    M, K = a.shape
    _, C = w.shape
    tk = min(tk, K)
    assert K % tk == 0, (K, tk)
    flops = 2 * M * K * C
    bytes_accessed = a.size * 2 + w.size * 2 + M * C * 4
    return pl.pallas_call(
        _classifier_kernel,
        grid=(K // tk,),
        in_specs=[
            pl.BlockSpec((M, tk), lambda k: (0, k)),
            pl.BlockSpec((tk, C), lambda k: (k, 0)),
            pl.BlockSpec((1, C), lambda k: (0, 0)),
        ],
        out_specs=pl.BlockSpec((M, C), lambda k: (0, 0)),
        out_shape=jax.ShapeDtypeStruct((M, C), jnp.float32),
        scratch_shapes=[pltpu.VMEM((M, C), jnp.float32)],
        compiler_params=pltpu.CompilerParams(
            dimension_semantics=("arbitrary",),
            vmem_limit_bytes=VMEM_LIMIT,
        ),
        cost_estimate=pl.CostEstimate(flops=flops, transcendentals=0,
                                      bytes_accessed=bytes_accessed),
    )(a, w, b)


# ------------------------------ glue / params ------------------------------ #
def conv_w_to_mat(w_oihw):
    """(Cout, Cin, 3, 3) -> (9*Cin, Cout), rows ordered (kh, kw, cin)."""
    cout, cin, kh, kw = w_oihw.shape
    return jnp.transpose(w_oihw, (2, 3, 1, 0)).reshape(kh * kw * cin, cout)


def prepare_params(params):
    """One-time repack into kernel-friendly layouts / dtypes (bf16 weights,
    f32 biases, classifier columns permuted to NHWC (h,w,c) flatten order)."""
    lw = params["lin_w"].reshape(NUM_CLASSES, HIDDEN, IMAGE_SIZE, IMAGE_SIZE)
    lw = jnp.transpose(lw, (2, 3, 1, 0))
    lw = lw.reshape(IMAGE_SIZE * IMAGE_SIZE * HIDDEN, NUM_CLASSES)
    return {
        "w1": conv_w_to_mat(params["conv1_w"]).astype(jnp.bfloat16),
        "b1": params["conv1_b"].reshape(1, HIDDEN).astype(jnp.float32),
        "w2": conv_w_to_mat(params["conv2_w"]).astype(jnp.bfloat16),
        "b2": params["conv2_b"].reshape(1, HIDDEN).astype(jnp.float32),
        "wseg": params["seg_w"].reshape(1, HIDDEN).astype(jnp.float32),
        "bseg": params["seg_b"].reshape(1, 1).astype(jnp.float32),
        "lin_w": lw.astype(jnp.bfloat16),
        "lin_b": params["lin_b"].reshape(1, NUM_CLASSES).astype(jnp.float32),
    }


def forward(x_nchw, p):
    """Matches MultiTaskUNet.forward: returns (seg_output NCHW, class_output)."""
    N, cin, H, W = x_nchw.shape
    HW = H * W
    pad = W + 1
    # NHWC, row-flattened, vertically zero-padded margin of W+1 rows.
    x_flat = jnp.transpose(x_nchw, (0, 2, 3, 1)).reshape(N, HW, cin)
    xp = jnp.pad(x_flat, ((0, 0), (pad, pad), (0, 0)))

    h2, seg = fused_encoder(xp, p["w1"], p["b1"], p["w2"], p["b2"],
                            p["wseg"], p["bseg"], H=H, W=W)

    seg_nchw = seg.reshape(N, H, W)[:, None, :, :]        # tiny layout fixup

    # Classifier: h2 is already in (h, w, c) flatten order -> no transpose.
    cls = classifier(h2.reshape(N, HW * HIDDEN), p["lin_w"], p["lin_b"])
    return seg_nchw, cls


# ------------------------- pure-JAX reference check ------------------------ #
def reference(x, params):
    dn = ("NCHW", "OIHW", "NCHW")
    prec = jax.lax.Precision.HIGHEST
    h = jax.lax.conv_general_dilated(x, params["conv1_w"], (1, 1), "SAME",
                                     dimension_numbers=dn, precision=prec)
    h = jax.nn.relu(h + params["conv1_b"].reshape(1, -1, 1, 1))
    h = jax.lax.conv_general_dilated(h, params["conv2_w"], (1, 1), "SAME",
                                     dimension_numbers=dn, precision=prec)
    h = jax.nn.relu(h + params["conv2_b"].reshape(1, -1, 1, 1))
    seg = jax.lax.conv_general_dilated(h, params["seg_w"], (1, 1), "SAME",
                                       dimension_numbers=dn, precision=prec)
    seg = seg + params["seg_b"].reshape(1, -1, 1, 1)
    flat = h.reshape(h.shape[0], -1)
    cls = jnp.dot(flat, params["lin_w"].T, precision=prec) + params["lin_b"]
    return seg, cls


# --------------------------------- main ------------------------------------ #
def init_params(key):
    ks = jax.random.split(key, 8)
    s = 0.05
    return {
        "conv1_w": s * jax.random.normal(ks[0], (HIDDEN, IN_CHANNELS, 3, 3), jnp.float32),
        "conv1_b": s * jax.random.normal(ks[1], (HIDDEN,), jnp.float32),
        "conv2_w": s * jax.random.normal(ks[2], (HIDDEN, HIDDEN, 3, 3), jnp.float32),
        "conv2_b": s * jax.random.normal(ks[3], (HIDDEN,), jnp.float32),
        "seg_w":   s * jax.random.normal(ks[4], (1, HIDDEN, 1, 1), jnp.float32),
        "seg_b":   s * jax.random.normal(ks[5], (1,), jnp.float32),
        "lin_w":   s * jax.random.normal(ks[6], (NUM_CLASSES, HIDDEN * IMAGE_SIZE * IMAGE_SIZE), jnp.float32),
        "lin_b":   s * jax.random.normal(ks[7], (NUM_CLASSES,), jnp.float32),
    }


if __name__ == "__main__":
    key = jax.random.PRNGKey(0)
    kp, kx = jax.random.split(key)
    params = init_params(kp)
    x = jax.random.normal(kx, (BATCH, IN_CHANNELS, IMAGE_SIZE, IMAGE_SIZE), jnp.float32)

    prep = prepare_params(params)
    seg_out, cls_out = jax.jit(forward)(x, prep)
    jax.block_until_ready((seg_out, cls_out))

    assert seg_out.shape == (BATCH, 1, IMAGE_SIZE, IMAGE_SIZE)
    assert cls_out.shape == (BATCH, NUM_CLASSES)

    seg_ref, cls_ref = reference(x, params)
    np.testing.assert_allclose(np.asarray(seg_out), np.asarray(seg_ref), rtol=2e-2, atol=2e-2)
    np.testing.assert_allclose(np.asarray(cls_out), np.asarray(cls_ref), rtol=2e-2, atol=2e-2)

    print("KERNEL_OK")
</pallas_src>

<mosaic_0001>
module attributes {stable_mosaic.version = 11 : i64} {
  func.func @_fused_encoder_kernel(%arg0: i32, %arg1: memref<1x290x4xf32, #tpu.memory_space<vmem>>, %arg2: memref<36x64xbf16, #tpu.memory_space<vmem>>, %arg3: memref<1x64xf32, #tpu.memory_space<vmem>>, %arg4: memref<576x64xbf16, #tpu.memory_space<vmem>>, %arg5: memref<1x64xf32, #tpu.memory_space<vmem>>, %arg6: memref<1x64xf32, #tpu.memory_space<vmem>>, %arg7: memref<1x1xf32, #tpu.memory_space<vmem>>, %arg8: memref<1x256x64xbf16, #tpu.memory_space<vmem>>, %arg9: memref<1x256x1xf32, #tpu.memory_space<vmem>>, %arg10: memref<290x64xf32, #tpu.memory_space<vmem>>) attributes {dimension_semantics = [#tpu.dimension_semantics<parallel>], iteration_bounds = array<i64: 2>, scalar_prefetch = 0 : i64, scratch_operands = 1 : i64, tpu.core_type = #tpu.core_type<tc>, window_params = [{transform_indices = @transform_0, window_bounds = array<i64: 1, 290, 4>}, {pipeline_mode = #tpu.pipeline_mode<synchronous>, transform_indices = @transform_1, window_bounds = array<i64: 36, 64>}, {pipeline_mode = #tpu.pipeline_mode<synchronous>, transform_indices = @transform_2, window_bounds = array<i64: 1, 64>}, {pipeline_mode = #tpu.pipeline_mode<synchronous>, transform_indices = @transform_3, window_bounds = array<i64: 576, 64>}, {pipeline_mode = #tpu.pipeline_mode<synchronous>, transform_indices = @transform_4, window_bounds = array<i64: 1, 64>}, {pipeline_mode = #tpu.pipeline_mode<synchronous>, transform_indices = @transform_5, window_bounds = array<i64: 1, 64>}, {pipeline_mode = #tpu.pipeline_mode<synchronous>, transform_indices = @transform_6, window_bounds = array<i64: 1, 1>}, {transform_indices = @transform_7, window_bounds = array<i64: 1, 256, 64>}, {transform_indices = @transform_8, window_bounds = array<i64: 1, 256, 1>}]} {
    %0 = tpu.iota {dimensions = array<i32: 0>} : vector<256x1xi32>
    %c16_i32 = arith.constant 16 : i32
    %c0_i32 = arith.constant 0 : i32
    %1 = arith.cmpi eq, %c16_i32, %c0_i32 : i32
    %c1_i32 = arith.constant 1 : i32
    %2 = arith.select %1, %c1_i32, %c16_i32 : i32
    %3 = vector.broadcast %2 : i32 to vector<256x1xi32>
    %4 = arith.remsi %0, %3 : vector<256x1xi32>
    %c0_i32_0 = arith.constant 0 : i32
    %5 = vector.broadcast %c0_i32_0 : i32 to vector<256x1xi32>
    %6 = arith.cmpi ne, %4, %5 : vector<256x1xi32>
    %c0_i32_1 = arith.constant 0 : i32
    %7 = vector.broadcast %c0_i32_1 : i32 to vector<256x1xi32>
    %8 = arith.cmpi slt, %4, %7 : vector<256x1xi32>
    %c0_i32_2 = arith.constant 0 : i32
    %9 = arith.cmpi slt, %2, %c0_i32_2 : i32
    %10 = vector.broadcast %9 : i1 to vector<256x1xi1>
    %11 = vector.broadcast %10 : vector<256x1xi1> to vector<256x1xi1>
    %12 = arith.xori %8, %11 : vector<256x1xi1>
    %13 = arith.andi %12, %6 : vector<256x1xi1>
    %14 = vector.broadcast %2 : i32 to vector<256x1xi32>
    %15 = arith.addi %4, %14 : vector<256x1xi32>
    %16 = arith.select %13, %15, %4 : vector<256x1xi1>, vector<256x1xi32>
    %c0_i32_3 = arith.constant 0 : i32
    %17 = vector.broadcast %c0_i32_3 : i32 to vector<256x1xi32>
    %18 = arith.cmpi ne, %16, %17 : vector<256x1xi32>
    %c15_i32 = arith.constant 15 : i32
    %19 = vector.broadcast %c15_i32 : i32 to vector<256x1xi32>
    %20 = arith.cmpi ne, %16, %19 : vector<256x1xi32>
    %cst = arith.constant 0.000000e+00 : f32
    %21 = vector.broadcast %cst : f32 to vector<256x64xf32>
    %c0 = arith.constant 0 : index
    %c0_4 = arith.constant 0 : index
    %c0_5 = arith.constant 0 : index
    %22 = vector.load %arg1[%c0, %c0_4, %c0_5] : memref<1x290x4xf32, #tpu.memory_space<vmem>>, vector<1x256x4xf32>
    %23 = vector.shape_cast %22 : vector<1x256x4xf32> to vector<256x4xf32>
    %cst_6 = arith.constant 0.000000e+00 : f32
    %24 = vector.broadcast %cst_6 : f32 to vector<256x4xf32>
    %25 = vector.shape_cast %18 : vector<256x1xi1> to vector<256x1xi1>
    %26 = vector.broadcast %25 : vector<256x1xi1> to vector<256x4xi1>
    %27 = arith.select %26, %23, %24 : vector<256x4xi1>, vector<256x4xf32>
    %28 = arith.truncf %27 : vector<256x4xf32> to vector<256x4xbf16>
    %c0_7 = arith.constant 0 : index
    %c0_8 = arith.constant 0 : index
    %29 = vector.load %arg2[%c0_7, %c0_8] : memref<36x64xbf16, #tpu.memory_space<vmem>>, vector<4x64xbf16>
    %cst_9 = arith.constant dense<0.000000e+00> : vector<256x64xf32>
    %30 = tpu.matmul %28, %29, %cst_9 {dimension_numbers = #tpu.dot_dimension_numbers<[1], [0], [0], [1], [0, 0, 1, 1], [], []>} : vector<256x4xbf16>, vector<4x64xbf16>, vector<256x64xf32> -> vector<256x64xf32>
    %31 = arith.addf %21, %30 : vector<256x64xf32>
    %c0_10 = arith.constant 0 : index
    %c1 = arith.constant 1 : index
    %c0_11 = arith.constant 0 : index
    %32 = vector.load %arg1[%c0_10, %c1, %c0_11] : memref<1x290x4xf32, #tpu.memory_space<vmem>>, vector<1x256x4xf32>
    %33 = vector.shape_cast %32 : vector<1x256x4xf32> to vector<256x4xf32>
    %34 = arith.truncf %33 : vector<256x4xf32> to vector<256x4xbf16>
    %c4 = arith.constant 4 : index
    %c0_12 = arith.constant 0 : index
    %35 = vector.load %arg2[%c4, %c0_12] : memref<36x64xbf16, #tpu.memory_space<vmem>>, vector<4x64xbf16>
    %cst_13 = arith.constant dense<0.000000e+00> : vector<256x64xf32>
    %36 = tpu.matmul %34, %35, %cst_13 {dimension_numbers = #tpu.dot_dimension_numbers<[1], [0], [0], [1], [0, 0, 1, 1], [], []>} : vector<256x4xbf16>, vector<4x64xbf16>, vector<256x64xf32> -> vector<256x64xf32>
    %37 = arith.addf %31, %36 : vector<256x64xf32>
    %c0_14 = arith.constant 0 : index
    %c2 = arith.constant 2 : index
    %c0_15 = arith.constant 0 : index
    %38 = vector.load %arg1[%c0_14, %c2, %c0_15] : memref<1x290x4xf32, #tpu.memory_space<vmem>>, vector<1x256x4xf32>
    %39 = vector.shape_cast %38 : vector<1x256x4xf32> to vector<256x4xf32>
    %cst_16 = arith.constant 0.000000e+00 : f32
    %40 = vector.broadcast %cst_16 : f32 to vector<256x4xf32>
    %41 = vector.shape_cast %20 : vector<256x1xi1> to vector<256x1xi1>
    %42 = vector.broadcast %41 : vector<256x1xi1> to vector<256x4xi1>
    %43 = arith.select %42, %39, %40 : vector<256x4xi1>, vector<256x4xf32>
    %44 = arith.truncf %43 : vector<256x4xf32> to vector<256x4xbf16>
    %c8 = arith.constant 8 : index
    %c0_17 = arith.constant 0 : index
    %45 = vector.load %arg2[%c8, %c0_17] : memref<36x64xbf16, #tpu.memory_space<vmem>>, vector<4x64xbf16>
    %cst_18 = arith.constant dense<0.000000e+00> : vector<256x64xf32>
    %46 = tpu.matmul %44, %45, %cst_18 {dimension_numbers = #tpu.dot_dimension_numbers<[1], [0], [0], [1], [0, 0, 1, 1], [], []>} : vector<256x4xbf16>, vector<4x64xbf16>, vector<256x64xf32> -> vector<256x64xf32>
    %47 = arith.addf %37, %46 : vector<256x64xf32>
    %c0_19 = arith.constant 0 : index
    %c16 = arith.constant 16 : index
    %c0_20 = arith.constant 0 : index
    %48 = vector.load %arg1[%c0_19, %c16, %c0_20] : memref<1x290x4xf32, #tpu.memory_space<vmem>>, vector<1x256x4xf32>
    %49 = vector.shape_cast %48 : vector<1x256x4xf32> to vector<256x4xf32>
    %cst_21 = arith.constant 0.000000e+00 : f32
    %50 = vector.broadcast %cst_21 : f32 to vector<256x4xf32>
    %51 = vector.shape_cast %18 : vector<256x1xi1> to vector<256x1xi1>
    %52 = vector.broadcast %51 : vector<256x1xi1> to vector<256x4xi1>
    %53 = arith.select %52, %49, %50 : vector<256x4xi1>, vector<256x4xf32>
    %54 = arith.truncf %53 : vector<256x4xf32> to vector<256x4xbf16>
    %c12 = arith.constant 12 : index
    %c0_22 = arith.constant 0 : index
    %55 = vector.load %arg2[%c12, %c0_22] : memref<36x64xbf16, #tpu.memory_space<vmem>>, vector<4x64xbf16>
    %cst_23 = arith.constant dense<0.000000e+00> : vector<256x64xf32>
    %56 = tpu.matmul %54, %55, %cst_23 {dimension_numbers = #tpu.dot_dimension_numbers<[1], [0], [0], [1], [0, 0, 1, 1], [], []>} : vector<256x4xbf16>, vector<4x64xbf16>, vector<256x64xf32> -> vector<256x64xf32>
    %57 = arith.addf %47, %56 : vector<256x64xf32>
    %c0_24 = arith.constant 0 : index
    %c17 = arith.constant 17 : index
    %c0_25 = arith.constant 0 : index
    %58 = vector.load %arg1[%c0_24, %c17, %c0_25] : memref<1x290x4xf32, #tpu.memory_space<vmem>>, vector<1x256x4xf32>
    %59 = vector.shape_cast %58 : vector<1x256x4xf32> to vector<256x4xf32>
    %60 = arith.truncf %59 : vector<256x4xf32> to vector<256x4xbf16>
    %c16_26 = arith.constant 16 : index
    %c0_27 = arith.constant 0 : index
    %61 = vector.load %arg2[%c16_26, %c0_27] : memref<36x64xbf16, #tpu.memory_space<vmem>>, vector<4x64xbf16>
    %cst_28 = arith.constant dense<0.000000e+00> : vector<256x64xf32>
    %62 = tpu.matmul %60, %61, %cst_28 {dimension_numbers = #tpu.dot_dimension_numbers<[1], [0], [0], [1], [0, 0, 1, 1], [], []>} : vector<256x4xbf16>, vector<4x64xbf16>, vector<256x64xf32> -> vector<256x64xf32>
    %63 = arith.addf %57, %62 : vector<256x64xf32>
    %c0_29 = arith.constant 0 : index
    %c18 = arith.constant 18 : index
    %c0_30 = arith.constant 0 : index
    %64 = vector.load %arg1[%c0_29, %c18, %c0_30] : memref<1x290x4xf32, #tpu.memory_space<vmem>>, vector<1x256x4xf32>
    %65 = vector.shape_cast %64 : vector<1x256x4xf32> to vector<256x4xf32>
    %cst_31 = arith.constant 0.000000e+00 : f32
    %66 = vector.broadcast %cst_31 : f32 to vector<256x4xf32>
    %67 = vector.shape_cast %20 : vector<256x1xi1> to vector<256x1xi1>
    %68 = vector.broadcast %67 : vector<256x1xi1> to vector<256x4xi1>
    %69 = arith.select %68, %65, %66 : vector<256x4xi1>, vector<256x4xf32>
    %70 = arith.truncf %69 : vector<256x4xf32> to vector<256x4xbf16>
    %c20 = arith.constant 20 : index
    %c0_32 = arith.constant 0 : index
    %71 = vector.load %arg2[%c20, %c0_32] : memref<36x64xbf16, #tpu.memory_space<vmem>>, vector<4x64xbf16>
    %cst_33 = arith.constant dense<0.000000e+00> : vector<256x64xf32>
    %72 = tpu.matmul %70, %71, %cst_33 {dimension_numbers = #tpu.dot_dimension_numbers<[1], [0], [0], [1], [0, 0, 1, 1], [], []>} : vector<256x4xbf16>, vector<4x64xbf16>, vector<256x64xf32> -> vector<256x64xf32>
    %73 = arith.addf %63, %72 : vector<256x64xf32>
    %c0_34 = arith.constant 0 : index
    %c32 = arith.constant 32 : index
    %c0_35 = arith.constant 0 : index
    %74 = vector.load %arg1[%c0_34, %c32, %c0_35] : memref<1x290x4xf32, #tpu.memory_space<vmem>>, vector<1x256x4xf32>
    %75 = vector.shape_cast %74 : vector<1x256x4xf32> to vector<256x4xf32>
    %cst_36 = arith.constant 0.000000e+00 : f32
    %76 = vector.broadcast %cst_36 : f32 to vector<256x4xf32>
    %77 = vector.shape_cast %18 : vector<256x1xi1> to vector<256x1xi1>
    %78 = vector.broadcast %77 : vector<256x1xi1> to vector<256x4xi1>
    %79 = arith.select %78, %75, %76 : vector<256x4xi1>, vector<256x4xf32>
    %80 = arith.truncf %79 : vector<256x4xf32> to vector<256x4xbf16>
    %c24 = arith.constant 24 : index
    %c0_37 = arith.constant 0 : index
    %81 = vector.load %arg2[%c24, %c0_37] : memref<36x64xbf16, #tpu.memory_space<vmem>>, vector<4x64xbf16>
    %cst_38 = arith.constant dense<0.000000e+00> : vector<256x64xf32>
    %82 = tpu.matmul %80, %81, %cst_38 {dimension_numbers = #tpu.dot_dimension_numbers<[1], [0], [0], [1], [0, 0, 1, 1], [], []>} : vector<256x4xbf16>, vector<4x64xbf16>, vector<256x64xf32> -> vector<256x64xf32>
    %83 = arith.addf %73, %82 : vector<256x64xf32>
    %c0_39 = arith.constant 0 : index
    %c33 = arith.constant 33 : index
    %c0_40 = arith.constant 0 : index
    %84 = vector.load %arg1[%c0_39, %c33, %c0_40] : memref<1x290x4xf32, #tpu.memory_space<vmem>>, vector<1x256x4xf32>
    %85 = vector.shape_cast %84 : vector<1x256x4xf32> to vector<256x4xf32>
    %86 = arith.truncf %85 : vector<256x4xf32> to vector<256x4xbf16>
    %c28 = arith.constant 28 : index
    %c0_41 = arith.constant 0 : index
    %87 = vector.load %arg2[%c28, %c0_41] : memref<36x64xbf16, #tpu.memory_space<vmem>>, vector<4x64xbf16>
    %cst_42 = arith.constant dense<0.000000e+00> : vector<256x64xf32>
    %88 = tpu.matmul %86, %87, %cst_42 {dimension_numbers = #tpu.dot_dimension_numbers<[1], [0], [0], [1], [0, 0, 1, 1], [], []>} : vector<256x4xbf16>, vector<4x64xbf16>, vector<256x64xf32> -> vector<256x64xf32>
    %89 = arith.addf %83, %88 : vector<256x64xf32>
    %c0_43 = arith.constant 0 : index
    %c34 = arith.constant 34 : index
    %c0_44 = arith.constant 0 : index
    %90 = vector.load %arg1[%c0_43, %c34, %c0_44] : memref<1x290x4xf32, #tpu.memory_space<vmem>>, vector<1x256x4xf32>
    %91 = vector.shape_cast %90 : vector<1x256x4xf32> to vector<256x4xf32>
    %cst_45 = arith.constant 0.000000e+00 : f32
    %92 = vector.broadcast %cst_45 : f32 to vector<256x4xf32>
    %93 = vector.shape_cast %20 : vector<256x1xi1> to vector<256x1xi1>
    %94 = vector.broadcast %93 : vector<256x1xi1> to vector<256x4xi1>
    %95 = arith.select %94, %91, %92 : vector<256x4xi1>, vector<256x4xf32>
    %96 = arith.truncf %95 : vector<256x4xf32> to vector<256x4xbf16>
    %c32_46 = arith.constant 32 : index
    %c0_47 = arith.constant 0 : index
    %97 = vector.load %arg2[%c32_46, %c0_47] : memref<36x64xbf16, #tpu.memory_space<vmem>>, vector<4x64xbf16>
    %cst_48 = arith.constant dense<0.000000e+00> : vector<256x64xf32>
    %98 = tpu.matmul %96, %97, %cst_48 {dimension_numbers = #tpu.dot_dimension_numbers<[1], [0], [0], [1], [0, 0, 1, 1], [], []>} : vector<256x4xbf16>, vector<4x64xbf16>, vector<256x64xf32> -> vector<256x64xf32>
    %99 = arith.addf %89, %98 : vector<256x64xf32>
    %c0_49 = arith.constant 0 : index
    %c0_50 = arith.constant 0 : index
    %100 = vector.load %arg3[%c0_49, %c0_50] : memref<1x64xf32, #tpu.memory_space<vmem>>, vector<1x64xf32>
    %101 = vector.broadcast %100 : vector<1x64xf32> to vector<256x64xf32>
    %102 = arith.addf %99, %101 : vector<256x64xf32>
    %cst_51 = arith.constant 0.000000e+00 : f32
    %103 = vector.broadcast %cst_51 : f32 to vector<256x64xf32>
    %104 = arith.maximumf %102, %103 : vector<256x64xf32>
    %cst_52 = arith.constant 0.000000e+00 : f32
    %105 = vector.broadcast %cst_52 : f32 to vector<17x64xf32>
    %c0_53 = arith.constant 0 : index
    %c0_54 = arith.constant 0 : index
    %106 = vector.load %arg10[%c0_53, %c0_54] : memref<290x64xf32, #tpu.memory_space<vmem>>, vector<17x64xf32>
    tpu.vector_store %arg10[%c0_53, %c0_54], %105 {strides = array<i32>} : memref<290x64xf32, #tpu.memory_space<vmem>>, vector<17x64xf32>,
    %cst_55 = arith.constant 0.000000e+00 : f32
    %107 = vector.broadcast %cst_55 : f32 to vector<17x64xf32>
    %c273 = arith.constant 273 : index
    %c0_56 = arith.constant 0 : index
    %108 = vector.load %arg10[%c273, %c0_56] : memref<290x64xf32, #tpu.memory_space<vmem>>, vector<17x64xf32>
    tpu.vector_store %arg10[%c273, %c0_56], %107 {strides = array<i32>} : memref<290x64xf32, #tpu.memory_space<vmem>>, vector<17x64xf32>,
    %c17_57 = arith.constant 17 : index
    %c0_58 = arith.constant 0 : index
    %109 = vector.load %arg10[%c17_57, %c0_58] : memref<290x64xf32, #tpu.memory_space<vmem>>, vector<256x64xf32>
    tpu.vector_store %arg10[%c17_57, %c0_58], %104 {strides = array<i32>} : memref<290x64xf32, #tpu.memory_space<vmem>>, vector<256x64xf32>,
    %cst_59 = arith.constant 0.000000e+00 : f32
    %110 = vector.broadcast %cst_59 : f32 to vector<256x64xf32>
    %c0_60 = arith.constant 0 : index
    %c0_61 = arith.constant 0 : index
    %111 = vector.load %arg10[%c0_60, %c0_61] : memref<290x64xf32, #tpu.memory_space<vmem>>, vector<256x64xf32>
    %cst_62 = arith.constant 0.000000e+00 : f32
    %112 = vector.broadcast %cst_62 : f32 to vector<256x64xf32>
    %113 = vector.shape_cast %18 : vector<256x1xi1> to vector<256x1xi1>
    %114 = vector.broadcast %113 : vector<256x1xi1> to vector<256x64xi1>
    %115 = arith.select %114, %111, %112 : vector<256x64xi1>, vector<256x64xf32>
    %116 = arith.truncf %115 : vector<256x64xf32> to vector<256x64xbf16>
    %c0_63 = arith.constant 0 : index
    %c0_64 = arith.constant 0 : index
    %117 = vector.load %arg4[%c0_63, %c0_64] : memref<576x64xbf16, #tpu.memory_space<vmem>>, vector<64x64xbf16>
    %cst_65 = arith.constant dense<0.000000e+00> : vector<256x64xf32>
    %118 = tpu.matmul %116, %117, %cst_65 {dimension_numbers = #tpu.dot_dimension_numbers<[1], [0], [0], [1], [0, 0, 1, 1], [], []>} : vector<256x64xbf16>, vector<64x64xbf16>, vector<256x64xf32> -> vector<256x64xf32>
    %119 = arith.addf %110, %118 : vector<256x64xf32>
    %c1_66 = arith.constant 1 : index
    %c0_67 = arith.constant 0 : index
    %120 = vector.load %arg10[%c1_66, %c0_67] : memref<290x64xf32, #tpu.memory_space<vmem>>, vector<256x64xf32>
    %121 = arith.truncf %120 : vector<256x64xf32> to vector<256x64xbf16>
    %c64 = arith.constant 64 : index
    %c0_68 = arith.constant 0 : index
    %122 = vector.load %arg4[%c64, %c0_68] : memref<576x64xbf16, #tpu.memory_space<vmem>>, vector<64x64xbf16>
    %cst_69 = arith.constant dense<0.000000e+00> : vector<256x64xf32>
    %123 = tpu.matmul %121, %122, %cst_69 {dimension_numbers = #tpu.dot_dimension_numbers<[1], [0], [0], [1], [0, 0, 1, 1], [], []>} : vector<256x64xbf16>, vector<64x64xbf16>, vector<256x64xf32> -> vector<256x64xf32>
    %124 = arith.addf %119, %123 : vector<256x64xf32>
    %c2_70 = arith.constant 2 : index
    %c0_71 = arith.constant 0 : index
    %125 = vector.load %arg10[%c2_70, %c0_71] : memref<290x64xf32, #tpu.memory_space<vmem>>, vector<256x64xf32>
    %cst_72 = arith.constant 0.000000e+00 : f32
    %126 = vector.broadcast %cst_72 : f32 to vector<256x64xf32>
    %127 = vector.shape_cast %20 : vector<256x1xi1> to vector<256x1xi1>
    %128 = vector.broadcast %127 : vector<256x1xi1> to vector<256x64xi1>
    %129 = arith.select %128, %125, %126 : vector<256x64xi1>, vector<256x64xf32>
    %130 = arith.truncf %129 : vector<256x64xf32> to vector<256x64xbf16>
    %c128 = arith.constant 128 : index
    %c0_73 = arith.constant 0 : index
    %131 = vector.load %arg4[%c128, %c0_73] : memref<576x64xbf16, #tpu.memory_space<vmem>>, vector<64x64xbf16>
    %cst_74 = arith.constant dense<0.000000e+00> : vector<256x64xf32>
    %132 = tpu.matmul %130, %131, %cst_74 {dimension_numbers = #tpu.dot_dimension_numbers<[1], [0], [0], [1], [0, 0, 1, 1], [], []>} : vector<256x64xbf16>, vector<64x64xbf16>, vector<256x64xf32> -> vector<256x64xf32>
    %133 = arith.addf %124, %132 : vector<256x64xf32>
    %c16_75 = arith.constant 16 : index
    %c0_76 = arith.constant 0 : index
    %134 = vector.load %arg10[%c16_75, %c0_76] : memref<290x64xf32, #tpu.memory_space<vmem>>, vector<256x64xf32>
    %cst_77 = arith.constant 0.000000e+00 : f32
    %135 = vector.broadcast %cst_77 : f32 to vector<256x64xf32>
    %136 = vector.shape_cast %18 : vector<256x1xi1> to vector<256x1xi1>
    %137 = vector.broadcast %136 : vector<256x1xi1> to vector<256x64xi1>
    %138 = arith.select %137, %134, %135 : vector<256x64xi1>, vector<256x64xf32>
    %139 = arith.truncf %138 : vector<256x64xf32> to vector<256x64xbf16>
    %c192 = arith.constant 192 : index
    %c0_78 = arith.constant 0 : index
    %140 = vector.load %arg4[%c192, %c0_78] : memref<576x64xbf16, #tpu.memory_space<vmem>>, vector<64x64xbf16>
    %cst_79 = arith.constant dense<0.000000e+00> : vector<256x64xf32>
    %141 = tpu.matmul %139, %140, %cst_79 {dimension_numbers = #tpu.dot_dimension_numbers<[1], [0], [0], [1], [0, 0, 1, 1], [], []>} : vector<256x64xbf16>, vector<64x64xbf16>, vector<256x64xf32> -> vector<256x64xf32>
    %142 = arith.addf %133, %141 : vector<256x64xf32>
    %c17_80 = arith.constant 17 : index
    %c0_81 = arith.constant 0 : index
    %143 = vector.load %arg10[%c17_80, %c0_81] : memref<290x64xf32, #tpu.memory_space<vmem>>, vector<256x64xf32>
    %144 = arith.truncf %143 : vector<256x64xf32> to vector<256x64xbf16>
    %c256 = arith.constant 256 : index
    %c0_82 = arith.constant 0 : index
    %145 = vector.load %arg4[%c256, %c0_82] : memref<576x64xbf16, #tpu.memory_space<vmem>>, vector<64x64xbf16>
    %cst_83 = arith.constant dense<0.000000e+00> : vector<256x64xf32>
    %146 = tpu.matmul %144, %145, %cst_83 {dimension_numbers = #tpu.dot_dimension_numbers<[1], [0], [0], [1], [0, 0, 1, 1], [], []>} : vector<256x64xbf16>, vector<64x64xbf16>, vector<256x64xf32> -> vector<256x64xf32>
    %147 = arith.addf %142, %146 : vector<256x64xf32>
    %c18_84 = arith.constant 18 : index
    %c0_85 = arith.constant 0 : index
    %148 = vector.load %arg10[%c18_84, %c0_85] : memref<290x64xf32, #tpu.memory_space<vmem>>, vector<256x64xf32>
    %cst_86 = arith.constant 0.000000e+00 : f32
    %149 = vector.broadcast %cst_86 : f32 to vector<256x64xf32>
    %150 = vector.shape_cast %20 : vector<256x1xi1> to vector<256x1xi1>
    %151 = vector.broadcast %150 : vector<256x1xi1> to vector<256x64xi1>
    %152 = arith.select %151, %148, %149 : vector<256x64xi1>, vector<256x64xf32>
    %153 = arith.truncf %152 : vector<256x64xf32> to vector<256x64xbf16>
    %c320 = arith.constant 320 : index
    %c0_87 = arith.constant 0 : index
    %154 = vector.load %arg4[%c320, %c0_87] : memref<576x64xbf16, #tpu.memory_space<vmem>>, vector<64x64xbf16>
    %cst_88 = arith.constant dense<0.000000e+00> : vector<256x64xf32>
    %155 = tpu.matmul %153, %154, %cst_88 {dimension_numbers = #tpu.dot_dimension_numbers<[1], [0], [0], [1], [0, 0, 1, 1], [], []>} : vector<256x64xbf16>, vector<64x64xbf16>, vector<256x64xf32> -> vector<256x64xf32>
    %156 = arith.addf %147, %155 : vector<256x64xf32>
    %c32_89 = arith.constant 32 : index
    %c0_90 = arith.constant 0 : index
    %157 = vector.load %arg10[%c32_89, %c0_90] : memref<290x64xf32, #tpu.memory_space<vmem>>, vector<256x64xf32>
    %cst_91 = arith.constant 0.000000e+00 : f32
    %158 = vector.broadcast %cst_91 : f32 to vector<256x64xf32>
    %159 = vector.shape_cast %18 : vector<256x1xi1> to vector<256x1xi1>
    %160 = vector.broadcast %159 : vector<256x1xi1> to vector<256x64xi1>
    %161 = arith.select %160, %157, %158 : vector<256x64xi1>, vector<256x64xf32>
    %162 = arith.truncf %161 : vector<256x64xf32> to vector<256x64xbf16>
    %c384 = arith.constant 384 : index
    %c0_92 = arith.constant 0 : index
    %163 = vector.load %arg4[%c384, %c0_92] : memref<576x64xbf16, #tpu.memory_space<vmem>>, vector<64x64xbf16>
    %cst_93 = arith.constant dense<0.000000e+00> : vector<256x64xf32>
    %164 = tpu.matmul %162, %163, %cst_93 {dimension_numbers = #tpu.dot_dimension_numbers<[1], [0], [0], [1], [0, 0, 1, 1], [], []>} : vector<256x64xbf16>, vector<64x64xbf16>, vector<256x64xf32> -> vector<256x64xf32>
    %165 = arith.addf %156, %164 : vector<256x64xf32>
    %c33_94 = arith.constant 33 : index
    %c0_95 = arith.constant 0 : index
    %166 = vector.load %arg10[%c33_94, %c0_95] : memref<290x64xf32, #tpu.memory_space<vmem>>, vector<256x64xf32>
    %167 = arith.truncf %166 : vector<256x64xf32> to vector<256x64xbf16>
    %c448 = arith.constant 448 : index
    %c0_96 = arith.constant 0 : index
    %168 = vector.load %arg4[%c448, %c0_96] : memref<576x64xbf16, #tpu.memory_space<vmem>>, vector<64x64xbf16>
    %cst_97 = arith.constant dense<0.000000e+00> : vector<256x64xf32>
    %169 = tpu.matmul %167, %168, %cst_97 {dimension_numbers = #tpu.dot_dimension_numbers<[1], [0], [0], [1], [0, 0, 1, 1], [], []>} : vector<256x64xbf16>, vector<64x64xbf16>, vector<256x64xf32> -> vector<256x64xf32>
    %170 = arith.addf %165, %169 : vector<256x64xf32>
    %c34_98 = arith.constant 34 : index
    %c0_99 = arith.constant 0 : index
    %171 = vector.load %arg10[%c34_98, %c0_99] : memref<290x64xf32, #tpu.memory_space<vmem>>, vector<256x64xf32>
    %cst_100 = arith.constant 0.000000e+00 : f32
    %172 = vector.broadcast %cst_100 : f32 to vector<256x64xf32>
    %173 = vector.shape_cast %20 : vector<256x1xi1> to vector<256x1xi1>
    %174 = vector.broadcast %173 : vector<256x1xi1> to vector<256x64xi1>
    %175 = arith.select %174, %171, %172 : vector<256x64xi1>, vector<256x64xf32>
    %176 = arith.truncf %175 : vector<256x64xf32> to vector<256x64xbf16>
    %c512 = arith.constant 512 : index
    %c0_101 = arith.constant 0 : index
    %177 = vector.load %arg4[%c512, %c0_101] : memref<576x64xbf16, #tpu.memory_space<vmem>>, vector<64x64xbf16>
    %cst_102 = arith.constant dense<0.000000e+00> : vector<256x64xf32>
    %178 = tpu.matmul %176, %177, %cst_102 {dimension_numbers = #tpu.dot_dimension_numbers<[1], [0], [0], [1], [0, 0, 1, 1], [], []>} : vector<256x64xbf16>, vector<64x64xbf16>, vector<256x64xf32> -> vector<256x64xf32>
    %179 = arith.addf %170, %178 : vector<256x64xf32>
    %c0_103 = arith.constant 0 : index
    %c0_104 = arith.constant 0 : index
    %180 = vector.load %arg5[%c0_103, %c0_104] : memref<1x64xf32, #tpu.memory_space<vmem>>, vector<1x64xf32>
    %181 = vector.broadcast %180 : vector<1x64xf32> to vector<256x64xf32>
    %182 = arith.addf %179, %181 : vector<256x64xf32>
    %cst_105 = arith.constant 0.000000e+00 : f32
    %183 = vector.broadcast %cst_105 : f32 to vector<256x64xf32>
    %184 = arith.maximumf %182, %183 : vector<256x64xf32>
    %185 = arith.truncf %184 : vector<256x64xf32> to vector<256x64xbf16>
    %c0_106 = arith.constant 0 : index
    %c0_107 = arith.constant 0 : index
    %c0_108 = arith.constant 0 : index
    %186 = vector.load %arg8[%c0_106, %c0_107, %c0_108] : memref<1x256x64xbf16, #tpu.memory_space<vmem>>, vector<1x256x64xbf16>
    %187 = vector.shape_cast %186 : vector<1x256x64xbf16> to vector<256x64xbf16>
    %188 = vector.shape_cast %185 : vector<256x64xbf16> to vector<1x256x64xbf16>
    tpu.vector_store %arg8[%c0_106, %c0_107, %c0_108], %188 {strides = array<i32>} : memref<1x256x64xbf16, #tpu.memory_space<vmem>>, vector<1x256x64xbf16>,
    %c0_109 = arith.constant 0 : index
    %c0_110 = arith.constant 0 : index
    %189 = vector.load %arg6[%c0_109, %c0_110] : memref<1x64xf32, #tpu.memory_space<vmem>>, vector<1x64xf32>
    %190 = vector.broadcast %189 : vector<1x64xf32> to vector<256x64xf32>
    %191 = arith.mulf %184, %190 : vector<256x64xf32>
    %cst_111 = arith.constant dense<0.000000e+00> : vector<256xf32>
    %192 = vector.multi_reduction <add>, %191, %cst_111 [1] : vector<256x64xf32> to vector<256xf32>
    %193 = vector.shape_cast %192 : vector<256xf32> to vector<256x1xf32>
    %c0_112 = arith.constant 0 : index
    %c0_113 = arith.constant 0 : index
    %194 = vector.load %arg7[%c0_112, %c0_113] : memref<1x1xf32, #tpu.memory_space<vmem>>, vector<1x1xf32>
    %195 = vector.broadcast %194 : vector<1x1xf32> to vector<256x1xf32>
    %196 = arith.addf %193, %195 : vector<256x1xf32>
    %c0_114 = arith.constant 0 : index
    %c0_115 = arith.constant 0 : index
    %c0_116 = arith.constant 0 : index
    %197 = vector.load %arg9[%c0_114, %c0_115, %c0_116] : memref<1x256x1xf32, #tpu.memory_space<vmem>>, vector<1x256x1xf32>
    %198 = vector.shape_cast %197 : vector<1x256x1xf32> to vector<256x1xf32>
    %199 = vector.shape_cast %196 : vector<256x1xf32> to vector<1x256x1xf32>
    tpu.vector_store %arg9[%c0_114, %c0_115, %c0_116], %199 {strides = array<i32>} : memref<1x256x1xf32, #tpu.memory_space<vmem>>, vector<1x256x1xf32>,
    return
  }
  func.func @transform_0(%arg0: i32) -> (i32, i32, i32) {
    %c0_i32 = arith.constant 0 : i32
    %c0_i32_0 = arith.constant 0 : i32
    %c0_i32_1 = arith.constant 0 : i32
    return %arg0, %c0_i32, %c0_i32_0 : i32, i32, i32
  }
  func.func @transform_1(%arg0: i32) -> (i32, i32) {
    %c0_i32 = arith.constant 0 : i32
    %c0_i32_0 = arith.constant 0 : i32
    %c0_i32_1 = arith.constant 0 : i32
    return %c0_i32, %c0_i32_0 : i32, i32
  }
  func.func @transform_2(%arg0: i32) -> (i32, i32) {
    %c0_i32 = arith.constant 0 : i32
    %c0_i32_0 = arith.constant 0 : i32
    %c0_i32_1 = arith.constant 0 : i32
    return %c0_i32, %c0_i32_0 : i32, i32
  }
  func.func @transform_3(%arg0: i32) -> (i32, i32) {
    %c0_i32 = arith.constant 0 : i32
    %c0_i32_0 = arith.constant 0 : i32
    %c0_i32_1 = arith.constant 0 : i32
    return %c0_i32, %c0_i32_0 : i32, i32
  }
  func.func @transform_4(%arg0: i32) -> (i32, i32) {
    %c0_i32 = arith.constant 0 : i32
    %c0_i32_0 = arith.constant 0 : i32
    %c0_i32_1 = arith.constant 0 : i32
    return %c0_i32, %c0_i32_0 : i32, i32
  }
  func.func @transform_5(%arg0: i32) -> (i32, i32) {
    %c0_i32 = arith.constant 0 : i32
    %c0_i32_0 = arith.constant 0 : i32
    %c0_i32_1 = arith.constant 0 : i32
    return %c0_i32, %c0_i32_0 : i32, i32
  }
  func.func @transform_6(%arg0: i32) -> (i32, i32) {
    %c0_i32 = arith.constant 0 : i32
    %c0_i32_0 = arith.constant 0 : i32
    %c0_i32_1 = arith.constant 0 : i32
    return %c0_i32, %c0_i32_0 : i32, i32
  }
  func.func @transform_7(%arg0: i32) -> (i32, i32, i32) {
    %c0_i32 = arith.constant 0 : i32
    %c0_i32_0 = arith.constant 0 : i32
    %c0_i32_1 = arith.constant 0 : i32
    return %arg0, %c0_i32, %c0_i32_0 : i32, i32, i32
  }
  func.func @transform_8(%arg0: i32) -> (i32, i32, i32) {
    %c0_i32 = arith.constant 0 : i32
    %c0_i32_0 = arith.constant 0 : i32
    %c0_i32_1 = arith.constant 0 : i32
    return %arg0, %c0_i32, %c0_i32_0 : i32, i32, i32
  }
}

module attributes {stable_mosaic.version = 11 : i64} {
  func.func @_classifier_kernel(%arg0: i32, %arg1: memref<2x8192xbf16, #tpu.memory_space<vmem>>, %arg2: memref<8192x10xbf16, #tpu.memory_space<vmem>>, %arg3: memref<1x10xf32, #tpu.memory_space<vmem>>, %arg4: memref<2x10xf32, #tpu.memory_space<vmem>>, %arg5: memref<2x10xf32, #tpu.memory_space<vmem>>) attributes {dimension_semantics = [#tpu.dimension_semantics<arbitrary>], iteration_bounds = array<i64: 2>, scalar_prefetch = 0 : i64, scratch_operands = 1 : i64, tpu.core_type = #tpu.core_type<tc>, window_params = [{transform_indices = @transform_0, window_bounds = array<i64: 2, 8192>}, {transform_indices = @transform_1, window_bounds = array<i64: 8192, 10>}, {pipeline_mode = #tpu.pipeline_mode<synchronous>, transform_indices = @transform_2, window_bounds = array<i64: 1, 10>}, {pipeline_mode = #tpu.pipeline_mode<synchronous>, transform_indices = @transform_3, window_bounds = array<i64: 2, 10>}]} {
    %c0_i32 = arith.constant 0 : i32
    %0 = arith.cmpi eq, %arg0, %c0_i32 : i32
    %1 = arith.extui %0 : i1 to i32
    %c0_i32_0 = arith.constant 0 : i32
    %2 = arith.cmpi ne, %1, %c0_i32_0 : i32
    scf.if %2 {
      %cst_9 = arith.constant 0.000000e+00 : f32
      %12 = vector.broadcast %cst_9 : f32 to vector<2x10xf32>
      %c0_10 = arith.constant 0 : index
      %c0_11 = arith.constant 0 : index
      %13 = vector.load %arg5[%c0_10, %c0_11] : memref<2x10xf32, #tpu.memory_space<vmem>>, vector<2x10xf32>
      tpu.vector_store %arg5[%c0_10, %c0_11], %12 {strides = array<i32>} : memref<2x10xf32, #tpu.memory_space<vmem>>, vector<2x10xf32>,
    } else {
    }
    %c0 = arith.constant 0 : index
    %c0_1 = arith.constant 0 : index
    %3 = vector.load %arg5[%c0, %c0_1] : memref<2x10xf32, #tpu.memory_space<vmem>>, vector<2x10xf32>
    %c0_2 = arith.constant 0 : index
    %c0_3 = arith.constant 0 : index
    %4 = vector.load %arg1[%c0_2, %c0_3] : memref<2x8192xbf16, #tpu.memory_space<vmem>>, vector<2x8192xbf16>
    %c0_4 = arith.constant 0 : index
    %c0_5 = arith.constant 0 : index
    %5 = vector.load %arg2[%c0_4, %c0_5] : memref<8192x10xbf16, #tpu.memory_space<vmem>>, vector<8192x10xbf16>
    %cst = arith.constant dense<0.000000e+00> : vector<2x10xf32>
    %6 = tpu.matmul %4, %5, %cst {dimension_numbers = #tpu.dot_dimension_numbers<[1], [0], [0], [1], [0, 0, 1, 1], [], []>} : vector<2x8192xbf16>, vector<8192x10xbf16>, vector<2x10xf32> -> vector<2x10xf32>
    %7 = arith.addf %3, %6 : vector<2x10xf32>
    %c0_6 = arith.constant 0 : index
    %c0_7 = arith.constant 0 : index
    %8 = vector.load %arg5[%c0_6, %c0_7] : memref<2x10xf32, #tpu.memory_space<vmem>>, vector<2x10xf32>
    tpu.vector_store %arg5[%c0_6, %c0_7], %7 {strides = array<i32>} : memref<2x10xf32, #tpu.memory_space<vmem>>, vector<2x10xf32>,
    %c1_i32 = arith.constant 1 : i32
    %9 = arith.cmpi eq, %arg0, %c1_i32 : i32
    %10 = arith.extui %9 : i1 to i32
    %c0_i32_8 = arith.constant 0 : i32
    %11 = arith.cmpi ne, %10, %c0_i32_8 : i32
    scf.if %11 {
      %c0_9 = arith.constant 0 : index
      %c0_10 = arith.constant 0 : index
      %12 = vector.load %arg5[%c0_9, %c0_10] : memref<2x10xf32, #tpu.memory_space<vmem>>, vector<2x10xf32>
      %c0_11 = arith.constant 0 : index
      %c0_12 = arith.constant 0 : index
      %13 = vector.load %arg3[%c0_11, %c0_12] : memref<1x10xf32, #tpu.memory_space<vmem>>, vector<1x10xf32>
      %14 = vector.broadcast %13 : vector<1x10xf32> to vector<2x10xf32>
      %15 = arith.addf %12, %14 : vector<2x10xf32>
      %c0_13 = arith.constant 0 : index
      %c0_14 = arith.constant 0 : index
      %16 = vector.load %arg4[%c0_13, %c0_14] : memref<2x10xf32, #tpu.memory_space<vmem>>, vector<2x10xf32>
      tpu.vector_store %arg4[%c0_13, %c0_14], %15 {strides = array<i32>} : memref<2x10xf32, #tpu.memory_space<vmem>>, vector<2x10xf32>,
    } else {
    }
    return
  }
  func.func @transform_0(%arg0: i32) -> (i32, i32) {
    %c0_i32 = arith.constant 0 : i32
    %c0_i32_0 = arith.constant 0 : i32
    return %c0_i32, %arg0 : i32, i32
  }
  func.func @transform_1(%arg0: i32) -> (i32, i32) {
    %c0_i32 = arith.constant 0 : i32
    %c0_i32_0 = arith.constant 0 : i32
    return %arg0, %c0_i32 : i32, i32
  }
  func.func @transform_2(%arg0: i32) -> (i32, i32) {
    %c0_i32 = arith.constant 0 : i32
    %c0_i32_0 = arith.constant 0 : i32
    %c0_i32_1 = arith.constant 0 : i32
    return %c0_i32, %c0_i32_0 : i32, i32
  }
  func.func @transform_3(%arg0: i32) -> (i32, i32) {
    %c0_i32 = arith.constant 0 : i32
    %c0_i32_0 = arith.constant 0 : i32
    %c0_i32_1 = arith.constant 0 : i32
    return %c0_i32, %c0_i32_0 : i32, i32
  }
}

</mosaic_0001>

<bundles_post_ra>
// kernel: forward.2
= control target key start
LH: loop header
LB: loop body
LE: loop exit
PB: predicated region body
PF: predicated region fallthrough
CT: control target
= control target key end

     0   :  { %s12736_s0 = inlined_call_operand.vmem [shape: f32[2,290,4], index: 0, kind: input, shape index: {}]   ;;  %s12737_s1 = inlined_call_operand.hbm [shape: bf16[36,64], index: 1, kind: input, shape index: {}]   ;;  %s12738_s2 = inlined_call_operand.hbm [shape: f32[1,64], index: 2, kind: input, shape index: {}]   ;;  %s12739_s3 = inlined_call_operand.vmem [shape: bf16[576,64], index: 3, kind: input, shape index: {}]   ;;  %s12740_s4 = inlined_call_operand.hbm [shape: f32[1,64], index: 4, kind: input, shape index: {}]   ;;  %s12741_s5 = inlined_call_operand.hbm [shape: f32[1,64], index: 5, kind: input, shape index: {}]   ;;  %s12742_s6 = inlined_call_operand.<no memory space> [shape: f32[1,1], index: 6, kind: input, shape index: {}]   ;;  %s12743_s7 = inlined_call_operand.vmem [shape: bf16[2,256,64], index: 7, kind: output, shape index: {0}]   ;;  %s12744_s8 = inlined_call_operand.vmem [shape: f32[2,256,1], index: 8, kind: output, shape index: {1}]  }
   0x1   :  { %v14_v0 = vstv %s12742_s6 }
   0x2   :  { %15 = vst [vmem:[#allocation3] sm:$0x1] %v14_v0 }
   0x3   :  { %16 = vsyncpa [#allocation5], 0 }
   0x4   :  { %17 = vsyncpa [#allocation7], 0 }
   0x5   :  { %18 = vsyncpa [#allocation10], 0  ;;  %s9161_s29 = smov 0  }
   0x6 LB: > { %s9106_s30 = smov [#allocation6]   ;;  %s9167_s10 = sadd.s32 4294967295, %s9104_s29   ;;  %s9104_s29 = sphi %s9161_s29, %s24_s29  }
   0x7   : > { %s259_s9 = sshll.u32 %s9106_s30, 4  ;;  %p7465_p0 = scmp.ge.s32.totalorder %s9104_s29, 1  ;;  %s260_s9 = int_to_ptr.vmem [resolvable:$true] %s259_s9 }
   0x8   : > { %p233_p1 = scmp.lt.s32.totalorder %s9104_s29, 3  ;;  %p8919_p2 = scmp.eq.s32.totalorder %s9167_s10, 0 }
   0x9   : > { %s9107_s11 = smov [#allocation4]   ;;  %s9108_s14 = smov [#allocation8]  }
   0xa   : > { %p9172_p3 = pnand %p7465_p0, %p233_p1  ;;  %s245_s12 = sshll.u32 %s9107_s11, 4  ;;  %s9178_s12 = int_to_ptr.vmem [resolvable:$true] %s245_s12 }
   0xb   : > { %s273_s15 = sshll.u32 %s9108_s14, 4  ;;  %s9109_s16 = smov [#allocation9]   ;;  %s9186_s15 = int_to_ptr.vmem [resolvable:$true] %s273_s15 }
   0xc   : > { %p8906_p4 = pneg %p9172_p3  ;;  %s9188_s17 = sshll.u32 %s9109_s16, 4  ;;  %s285_s17 = int_to_ptr.vmem [resolvable:$true] %s9188_s17 }
   0xd   : > { %s8993_s18 = scalar_lea.vmem %s260_s9, 16  ;;  %s9000_s19 = scalar_lea.vmem %s260_s9, 32 }
   0xe   : > { %p9182_p5 = pnand %p8919_p2, %p8906_p4  ;;  %p8994_p7 = scmp.ne.s32.totalorder %s260_s9, %s8993_s18 }
   0xf   : > { %p9001_p10 = scmp.lt.s32.totalorder %s260_s9, %s260_s9  ;;  %p9002_p11 = scmp.lt.s32.totalorder %s9000_s19, %s8993_s18 }
  0x10   : > { %p8984_p6 = pneg %p9182_p5 }
  0x11   : > { %p9003_p12 = por %p9002_p11, %p9001_p10 }
  0x12   : > { %p8996_p8 = pnand %p8994_p7, %p8984_p6 }
  0x14   : > { %p8997_p9 = pneg %p8996_p8 }
  0x16   : > { %p9004_p13 = pnand %p9003_p12, %p8997_p9 }
  0x18   : > { %9007 = shalt.err (!%p9004_p13)
}
  0x19   : > { %8912 = dma.hbm_to_vmem [thread:$0]  (!%p9182_p5), %s12738_s2, 16, %s260_s9, [#allocation7]  }
  0x1a   : > { %s9019_s22 = scalar_lea.vmem %s9178_s12, 320  ;;  %p9027_p7 = scmp.lt.s32.totalorder %s9178_s12, %s9178_s12 }
  0x1b   : > { %p9020_p0 = scmp.ne.s32.totalorder %s9178_s12, %s9019_s22  ;;  %p9028_p8 = scmp.lt.s32.totalorder %s9019_s22, %s9019_s22 }
  0x1d   : > { %p9022_p1 = pnand %p9020_p0, %p8984_p6  ;;  %p9029_p9 = por %p9028_p8, %p9027_p7 }
  0x1f   : > { %p9023_p4 = pneg %p9022_p1 }
  0x21   : > { %p9030_p10 = pnand %p9029_p9, %p9023_p4 }
  0x23   : > { %9033 = shalt.err (!%p9030_p10)
}
  0x24   : > { %s9110_s23 = smov 64   ;;  %s9111_s24 = smov 4  }
  0x25   : > { %8909 = dma.hbm_to_vmem [thread:$0]  (!%p9182_p5), %s12737_s1, 320, %s9178_s12, [#allocation5], %s9110_s23, %s9110_s23, %s9111_s24  }
  0x26   : > { %s9045_s27 = scalar_lea.vmem %s9186_s15, 16  ;;  %s9052_s28 = scalar_lea.vmem %s9186_s15, 32 }
  0x27   : > { %p9046_p11 = scmp.ne.s32.totalorder %s9186_s15, %s9045_s27  ;;  %p9053_p0 = scmp.lt.s32.totalorder %s9186_s15, %s9186_s15 }
  0x28   : > { %p9054_p1 = scmp.lt.s32.totalorder %s9052_s28, %s9045_s27 }
  0x29   : > { %p9048_p12 = pnand %p9046_p11, %p8984_p6 }
  0x2a   : > { %p9055_p4 = por %p9054_p1, %p9053_p0 }
  0x2b   : > { %p9049_p13 = pneg %p9048_p12 }
  0x2d   : > { %p9056_p7 = pnand %p9055_p4, %p9049_p13 }
  0x2f   : > { %9059 = shalt.err (!%p9056_p7)
}
  0x30   : > { %8915 = dma.hbm_to_vmem [thread:$0]  (!%p9182_p5), %s12740_s4, 16, %s9186_s15, [#allocation7]  }
  0x31   : > { %s9071_s11 = scalar_lea.vmem %s285_s17, 16  ;;  %s9078_s12 = scalar_lea.vmem %s285_s17, 32 }
  0x32   : > { %p9072_p8 = scmp.ne.s32.totalorder %s285_s17, %s9071_s11  ;;  %p9079_p11 = scmp.lt.s32.totalorder %s285_s17, %s285_s17 }
  0x33   : > { %p9080_p12 = scmp.lt.s32.totalorder %s9078_s12, %s9071_s11 }
  0x34   : > { %p9074_p9 = pnand %p9072_p8, %p8984_p6 }
  0x35   : > { %p9081_p13 = por %p9080_p12, %p9079_p11 }
  0x36   : > { %p9075_p10 = pneg %p9074_p9 }
  0x38   : > { %p9082_p0 = pnand %p9081_p13, %p9075_p10 }
  0x3a   : > { %9085 = shalt.err (!%p9082_p0)
}
  0x3b   : > { %8918 = dma.hbm_to_vmem [thread:$0]  (!%p9182_p5), %s12741_s5, 16, %s285_s17, [#allocation10]  }
  0x3c   : > { %308 = sbr.rel (%p9172_p3) target bundleno = 1225 (0x4c9), region = 48 }
  0x41   : > { %9091 = dma.done.wait (%p8919_p2), [#allocation5], 320  }
  0x42   : > { %9093 = vsyncadd (%p8919_p2), [#allocation5], 4294966976 }
  0x43   : > { %9095 = dma.done.wait (%p8919_p2), [#allocation7], 32  }
  0x44   : > { %9097 = vsyncadd (%p8919_p2), [#allocation7], 4294967264 }
  0x45   : > { %9099 = dma.done.wait (%p8919_p2), [#allocation10], 16  }
  0x46   : > { %9101 = vsyncadd (%p8919_p2), [#allocation10], 4294967280  ;;  %p359_p3 = scmp.lt.s32.totalorder %s9167_s10, 1  ;;  %v375_v1 = vlaneseq  ;;  %vm12746_vm0 = vcmask 1041408   ;;  %vm12756_vm1 = vcmask 31744   ;;  %v12927_v8 = vmov 0 }
  0x47   : > { %v8942_v12 = vld [vmem:[#allocation4] ss:$0 sps:$4 sm:$0xcc]   ;;  %v12930_v17 = vmov 0  ;;  %v12933_v18 = vmov 0  ;;  %v12938_v42 = vmov 0 }
  0x48   : > { %s13788_s10 = smov (!%p359_p3, %s9167_s10), 1  ;;  %v9254_v2 = vshrl.u32 %v375_v1, 7  ;;  %v1000_v14 = vld [vmem:[#allocation4] sm:$0x3]  ;;  %v1053_v19 = vrot.slane %v8942_v12, 2  ;;  %v12941_v46 = vmov 0 }
  0x49   : > { %s8889_s6 = smul.u32 296, %s13788_s10  ;;  %8881 = vmatprep.subr.msk.bf16.mxu1 %vm12746_vm0, %v1000_v14  ;;  %v1317_v20 = vsel %vm12746_vm0, %v1000_v14, 0  ;;  %v1624_v29 = vld [vmem:[#allocation4 + $0x4] sm:$0x3]  ;;  %v12946_v63 = vmov 0  ;;  %s7847_s27 = sshll.u32 %s13788_s10, 7 }
  0x4a   : > { %v412_v3 = vand.u32 15, %v9254_v2  ;;  %v378_v4 = vadd.s32 16, %v9254_v2  ;;  %v380_v5 = vadd.s32 32, %v9254_v2  ;;  %v382_v6 = vadd.s32 48, %v9254_v2  ;;  %8249 = vmatpush3.bf16.msra.mxu1 %v1317_v20  ;;  %8880 = vmatprep.subr.msk.bf16.mxu0 %vm12746_vm0, %v1053_v19  ;;  %s12370_s9 = scalar_lea.vmem %s12743_s7, %s7847_s27  ;;  %s7848_s11 = sshll.u32 %s13788_s10, 8 }
  0x4b   : > { %v384_v7 = vadd.s32 64, %v9254_v2  ;;  %s9265_s17 = scalar_lea.vmem %s12736_s0, %s8889_s6  ;;  %v1105_v31 = vsel %vm12746_vm0, %v1053_v19, 0  ;;  %v386_v37 = vadd.s32 80, %v9254_v2  ;;  %v1674_v43 = vsel %vm12746_vm0, %v1624_v29, 0  ;;  %s12635_s16 = scalar_lea.vmem %s12744_s8, %s7848_s11 }
  0x4c   : > { %vm9267_vm2 = vcmp.ne.s32.totalorder %v412_v3, 0  ;;  %v426_v9 = vand.u32 15, %v378_v4  ;;  %v440_v10 = vand.u32 15, %v380_v5  ;;  %v454_v11 = vand.u32 15, %v382_v6  ;;  %v1001_v13 = vld [vmem:[%s9265_s17 + $0x1] sm:$0xff]  ;;  %v1002_v15 = vld [vmem:[%s9265_s17 + $0x9] sm:$0xff]  ;;  %8215 = vmatpush3.bf16.msra.mxu0 %v1105_v31 }
  0x4d   : > { %v12928_v8 = vsel %vm9267_vm2, 4294967295, %v12927_v8  ;;  %v856_v16 = vld [vmem:[%s9265_s17] sm:$0xff]  ;;  %v1033_v21 = vpack.c.bf16 %v1002_v15, %v1001_v13  ;;  %v857_v22 = vld [vmem:[%s9265_s17 + $0x8] sm:$0xff]  ;;  %v1003_v24 = vld [vmem:[%s9265_s17 + $0x11] sm:$0xff]  ;;  %v468_v30 = vand.u32 15, %v384_v7  ;;  %8882 = vmatprep.subr.msk.bf16.mxu0 %vm12746_vm0, %v1624_v29  ;;  %v388_v47 = vadd.s32 96, %v9254_v2 }
  0x4e   : > { %12929 = vst [vmem:[#allocation14_spill] sm:$0xff] %v12928_v8  ;;  %vm9274_vm3 = vcmp.ne.s32.totalorder %v426_v9, 0  ;;  %vm9278_vm4 = vcmp.ne.s32.totalorder %v440_v10, 0  ;;  %v952_v23 = vsel %vm9267_vm2, %v856_v16, 0.0  ;;  %v1004_v25 = vld [vmem:[%s9265_s17 + $0x19] sm:$0xff]  ;;  %v9290_v27 = vld [vmem:[%s9265_s17 + $0x10] sm:$0xff] }
  0x4f   : > { %v12931_v17 = vsel %vm9274_vm3, 4294967295, %v12930_v17  ;;  %v12934_v18 = vsel %vm9278_vm4, 4294967295, %v12933_v18  ;;  %v984_v26 = vpack.c.bf16 %v857_v22, %v952_v23  ;;  %v9293_v28 = vld [vmem:[%s9265_s17 + $0x18] sm:$0xff]  ;;  %8216 = vmatprep.mubr.msk.bf16.mxu0 %vm12756_vm1, %v1033_v21  ;;  %v9298_v32 = vpack.c.bf16 %v1004_v25, %v1003_v24  ;;  %v1005_v34 = vld [vmem:[%s9265_s17 + $0x21] sm:$0xff]  ;;  %v1006_v35 = vld [vmem:[%s9265_s17 + $0x29] sm:$0xff] }
  0x50   : > { %12932 = vst [vmem:[#allocation15_spill] sm:$0xff] %v12931_v17  ;;  %12935 = vst [vmem:[#allocation16_spill] sm:$0xff] %v12934_v18  ;;  %v954_v33 = vsel %vm9274_vm3, %v9290_v27, 0.0  ;;  %v9306_v36 = vld [vmem:[%s9265_s17 + $0x20] sm:$0xff]  ;;  %v9311_v39 = vpack.c.bf16 %v1006_v35, %v1005_v34  ;;  %v9314_v40 = vld [vmem:[%s9265_s17 + $0x28] sm:$0xff]  ;;  %vm9319_vm5 = vcmp.ne.s32.totalorder %v454_v11, 0 }
  0x51   : > { %12936 = vst [vmem:[#allocation17_spill] sm:$0xff] %v9298_v32  ;;  %8250 = vmatprep.mubr.msk.bf16.mxu1 %vm12756_vm1, %v984_v26  ;;  %v985_v38 = vpack.c.bf16 %v9293_v28, %v954_v33  ;;  %v956_v41 = vsel %vm9278_vm4, %v9306_v36, 0.0  ;;  %v12939_v42 = vsel %vm9319_vm5, 4294967295, %v12938_v42  ;;  %v9327_v45 = vld [vmem:[%s9265_s17 + $0x30] sm:$0xff]  ;;  %vm9329_vm6 = vcmp.ne.s32.totalorder %v468_v30, 0  ;;  %v9336_v48 = vld [vmem:[%s9265_s17 + $0x40] sm:$0xff]  ;;  %8217 = vmatmul.mubr.msk.bf16.vlgmr.msra.gmra.mxu0 %vm12756_vm1, %v9298_v32 }
  0x52   : > { %12937 = vst [vmem:[#allocation18_spill] sm:$0xff] %v9311_v39  ;;  %12940 = vst [vmem:[#allocation19_spill] sm:$0xff] %v12939_v42  ;;  %v986_v44 = vpack.c.bf16 %v9314_v40, %v956_v41  ;;  %v12942_v46 = vsel %vm9329_vm6, 4294967295, %v12941_v46  ;;  %v9342_v49 = vld [vmem:[%s9265_s17 + $0x38] sm:$0xff]  ;;  %v958_v50 = vsel %vm9319_vm5, %v9327_v45, 0.0  ;;  %8283 = vmatpush3.bf16.msra.mxu0 %v1674_v43  ;;  %8220 = vmatprep.mubr.msk.bf16.mxu0 %vm12756_vm1, %v9311_v39  ;;  %v9352_v53 = vld [vmem:[%s9265_s17 + $0x48] sm:$0xff] }
  0x53   : > { %12943 = vst [vmem:[#allocation20_spill] sm:$0xff] %v12942_v46  ;;  %8251 = vmatmul.mubr.msk.bf16.vlgmr.msra.gmra.mxu1 %vm12756_vm1, %v985_v38  ;;  %v1007_v51 = vld [vmem:[%s9265_s17 + $0x31] sm:$0xff]  ;;  %v1008_v52 = vld [vmem:[%s9265_s17 + $0x39] sm:$0xff]  ;;  %v960_v54 = vsel %vm9329_vm6, %v9336_v48, 0.0  ;;  %v482_v55 = vand.u32 15, %v386_v37  ;;  %v1009_v56 = vld [vmem:[%s9265_s17 + $0x41] sm:$0xff]  ;;  %v987_v59 = vpack.c.bf16 %v9342_v49, %v958_v50 }
  0x54   : > { %8254 = vmatprep.mubr.msk.bf16.mxu1 %vm12756_vm1, %v986_v44  ;;  %v1010_v57 = vld [vmem:[%s9265_s17 + $0x49] sm:$0xff]  ;;  %v496_v58 = vand.u32 15, %v388_v47  ;;  %v9360_v60 = vpack.c.bf16 %v1008_v52, %v1007_v51  ;;  %v988_v61 = vpack.c.bf16 %v9352_v53, %v960_v54  ;;  %v390_v1 = vadd.s32 112, %v9254_v2  ;;  %v9378_v4 = vld [vmem:[%s9265_s17 + $0x60] sm:$0xff]  ;;  %v9386_v6 = vld [vmem:[%s9265_s17 + $0x58] sm:$0xff] }
  0x55   : > { %v9363_v62 = vpack.c.bf16 %v1010_v57, %v1009_v56  ;;  %vm9365_vm7 = vcmp.ne.s32.totalorder %v482_v55, 0  ;;  %v9370_v0 = vld [vmem:[%s9265_s17 + $0x50] sm:$0xff]  ;;  %v12949_v3 = vmov 0  ;;  %v392_v5 = vadd.s32 128, %v9254_v2  ;;  %v1012_v10 = vld [vmem:[%s9265_s17 + $0x59] sm:$0xff]  ;;  %v9396_v11 = vld [vmem:[%s9265_s17 + $0x68] sm:$0xff] }
  0x56   : > { %12944 = vst [vmem:[#allocation21_spill] sm:$0xff] %v9360_v60  ;;  %v12947_v63 = vsel %vm9365_vm7, 4294967295, %v12946_v63  ;;  %vm9373_vm8 = vcmp.ne.s32.totalorder %v496_v58, 0  ;;  %v962_v7 = vsel %vm9365_vm7, %v9370_v0, 0.0  ;;  %v1011_v9 = vld [vmem:[%s9265_s17 + $0x51] sm:$0xff]  ;;  %v510_v13 = vand.u32 15, %v390_v1 }
  0x57   : > { %12945 = vst [vmem:[#allocation22_spill] sm:$0xff] %v9363_v62  ;;  %12948 = vst [vmem:[#allocation23_spill] sm:$0xff] %v12947_v63  ;;  %v12950_v3 = vsel %vm9373_vm8, 4294967295, %v12949_v3  ;;  %v964_v12 = vsel %vm9373_vm8, %v9378_v4, 0.0  ;;  %v1013_v14 = vld [vmem:[%s9265_s17 + $0x61] sm:$0xff]  ;;  %v1014_v15 = vld [vmem:[%s9265_s17 + $0x69] sm:$0xff]  ;;  %v989_v19 = vpack.c.bf16 %v9386_v6, %v962_v7  ;;  %v9404_v20 = vpack.c.bf16 %v1012_v10, %v1011_v9 }
  0x58   : > { %12951 = vst [vmem:[#allocation24_spill] sm:$0xff] %v12950_v3  ;;  %v524_v16 = vand.u32 15, %v392_v5  ;;  %v990_v21 = vpack.c.bf16 %v9396_v11, %v964_v12  ;;  %v9407_v22 = vpack.c.bf16 %v1014_v15, %v1013_v14  ;;  %vm9409_vm9 = vcmp.ne.s32.totalorder %v510_v13, 0  ;;  %v9414_v24 = vld [vmem:[%s9265_s17 + $0x70] sm:$0xff]  ;;  %v9422_v29 = vld [vmem:[%s9265_s17 + $0x80] sm:$0xff]  ;;  %v9432_v35 = vld [vmem:[%s9265_s17 + $0x78] sm:$0xff] }
  0x59   : > { %8221 = vmatmul.mubr.msk.bf16.gmra.mxu0 %vm12756_vm1, %v9360_v60  ;;  %12952 = vst [vmem:[#allocation25_spill] sm:$0xff] %v9404_v20  ;;  %v12954_v23 = vmov 0  ;;  %v394_v25 = vadd.s32 144, %v9254_v2  ;;  %v12957_v26 = vmov 0  ;;  %v396_v30 = vadd.s32 160, %v9254_v2  ;;  %v1015_v33 = vld [vmem:[%s9265_s17 + $0x71] sm:$0xff] }
  0x5a   : > { %8224 = vmatprep.mubr.msk.bf16.mxu0 %vm12756_vm1, %v9363_v62  ;;  %12953 = vst [vmem:[#allocation26_spill] sm:$0xff] %v9407_v22  ;;  %v12955_v23 = vsel %vm9409_vm9, 4294967295, %v12954_v23  ;;  %vm9417_vm10 = vcmp.ne.s32.totalorder %v524_v16, 0  ;;  %v8943_v31 = vld [vmem:[#allocation4 + $0x4] ss:$0 sps:$4 sm:$0xcc]  }
  0x5b   : > { %8255 = vmatmul.mubr.msk.bf16.gmra.mxu1 %vm12756_vm1, %v987_v59  ;;  %12956 = vst [vmem:[#allocation27_spill] sm:$0xff] %v12955_v23  ;;  %v12958_v26 = vsel %vm9417_vm10, 4294967295, %v12957_v26  ;;  %v1016_v34 = vld [vmem:[%s9265_s17 + $0x79] sm:$0xff]  ;;  %v966_v37 = vsel %vm9409_vm9, %v9414_v24, 0.0  ;;  %v9440_v38 = vld [vmem:[%s9265_s17 + $0x88] sm:$0xff]  ;;  %v968_v41 = vsel %vm9417_vm10, %v9422_v29, 0.0 }
  0x5c   : > { %8258 = vmatprep.mubr.msk.bf16.mxu1 %vm12756_vm1, %v988_v61  ;;  %12959 = vst [vmem:[#allocation28_spill] sm:$0xff] %v12958_v26  ;;  %v538_v43 = vand.u32 15, %v394_v25  ;;  %v1953_v44 = vrot.slane %v8943_v31, 2  ;;  %v9445_v47 = vld [vmem:[#allocation4 + $0x8] sm:$0x3]  ;;  %v1017_v50 = vld [vmem:[%s9265_s17 + $0x81] sm:$0xff]  ;;  %v991_v54 = vpack.c.bf16 %v9432_v35, %v966_v37  ;;  %v9454_v56 = vpack.c.bf16 %v1016_v34, %v1015_v33 }
  0x5d   : > { %v1018_v51 = vld [vmem:[%s9265_s17 + $0x89] sm:$0xff]  ;;  %v552_v52 = vand.u32 15, %v396_v30  ;;  %8884 = vmatprep.subr.msk.bf16.mxu0 %vm12746_vm0, %v9445_v47  ;;  %v992_v57 = vpack.c.bf16 %v9440_v38, %v968_v41  ;;  %v12962_v59 = vmov 0  ;;  %v398_v1 = vadd.s32 176, %v9254_v2  ;;  %v9472_v7 = vld [vmem:[%s9265_s17 + $0xa0] sm:$0xff]  ;;  %v9480_v10 = vld [vmem:[%s9265_s17 + $0x98] sm:$0xff] }
  0x5e   : > { %8883 = vmatprep.subr.msk.bf16.mxu1 %vm12746_vm0, %v1953_v44  ;;  %v2003_v55 = vsel %vm12746_vm0, %v1953_v44, 0  ;;  %12960 = vst [vmem:[#allocation29_spill] sm:$0xff] %v9454_v56  ;;  %v9457_v58 = vpack.c.bf16 %v1018_v51, %v1017_v50  ;;  %vm9459_vm11 = vcmp.ne.s32.totalorder %v538_v43, 0  ;;  %v9464_v61 = vld [vmem:[%s9265_s17 + $0x90] sm:$0xff]  ;;  %v12965_v5 = vmov 0  ;;  %v1020_v14 = vld [vmem:[%s9265_s17 + $0x99] sm:$0xff] }
  0x5f   : > { %8317 = vmatpush3.bf16.msra.mxu1 %v2003_v55  ;;  %v12963_v59 = vsel %vm9459_vm11, 4294967295, %v12962_v59  ;;  %vm9467_vm12 = vcmp.ne.s32.totalorder %v552_v52, 0  ;;  %v400_v9 = vadd.s32 192, %v9254_v2  ;;  %v970_v12 = vsel %vm9459_vm11, %v9464_v61, 0.0  ;;  %v1019_v13 = vld [vmem:[%s9265_s17 + $0x91] sm:$0xff]  ;;  %v9490_v15 = vld [vmem:[%s9265_s17 + $0xa8] sm:$0xff] }
  0x60   : > { %12961 = vst [vmem:[#allocation30_spill] sm:$0xff] %v9457_v58  ;;  %12964 = vst [vmem:[#allocation31_spill] sm:$0xff] %v12963_v59  ;;  %v12966_v5 = vsel %vm9467_vm12, 4294967295, %v12965_v5  ;;  %v972_v16 = vsel %vm9467_vm12, %v9472_v7, 0.0  ;;  %v1022_v25 = vld [vmem:[%s9265_s17 + $0xa9] sm:$0xff]  ;;  %v993_v31 = vpack.c.bf16 %v9480_v10, %v970_v12  ;;  %v9498_v33 = vpack.c.bf16 %v1020_v14, %v1019_v13  ;;  %v9516_v51 = vld [vmem:[%s9265_s17 + $0xc0] sm:$0xff] }
  0x61   : > { %8225 = vmatmul.mubr.msk.bf16.gmra.mxu0 %vm12756_vm1, %v9404_v20  ;;  %12967 = vst [vmem:[#allocation32_spill] sm:$0xff] %v12966_v5  ;;  %v580_v30 = vand.u32 15, %v400_v9  ;;  %v994_v34 = vpack.c.bf16 %v9490_v15, %v972_v16  ;;  %v12970_v41 = vmov 0  ;;  %v9508_v43 = vld [vmem:[%s9265_s17 + $0xb0] sm:$0xff]  ;;  %v402_v44 = vadd.s32 208, %v9254_v2  ;;  %v9525_v55 = vld [vmem:[%s9265_s17 + $0xb8] sm:$0xff] }
  0x62   : > { %8228 = vmatprep.mubr.msk.bf16.mxu0 %vm12756_vm1, %v9407_v22  ;;  %12968 = vst [vmem:[#allocation33_spill] sm:$0xff] %v9498_v33  ;;  %v12973_v50 = vmov 0  ;;  %v404_v52 = vadd.s32 224, %v9254_v2  ;;  %v9534_v9 = vld [vmem:[%s9265_s17 + $0xc8] sm:$0xff]  ;;  %v385_v8 = vadd.s32 72, %v9254_v2  ;;  %v1907_v17 = vsel %vm9319_vm5, %v9336_v48, 0.0 }
  0x63   : > { %8259 = vmatmul.mubr.msk.bf16.gmra.mxu1 %vm12756_vm1, %v989_v19  ;;  %v566_v19 = vand.u32 15, %v398_v1  ;;  %vm9511_vm14 = vcmp.ne.s32.totalorder %v580_v30, 0  ;;  %v1024_v1 = vld [vmem:[%s9265_s17 + $0xb9] sm:$0xff]  ;;  %v594_v13 = vand.u32 15, %v402_v44  ;;  %v1025_v14 = vld [vmem:[%s9265_s17 + $0xc1] sm:$0xff]  ;;  %v1026_v16 = vld [vmem:[%s9265_s17 + $0xc9] sm:$0xff] }
  0x64   : > { %8262 = vmatprep.mubr.msk.bf16.mxu1 %vm12756_vm1, %v990_v21  ;;  %v1021_v21 = vld [vmem:[%s9265_s17 + $0xa1] sm:$0xff]  ;;  %v12974_v50 = vsel %vm9511_vm14, 4294967295, %v12973_v50  ;;  %v976_v12 = vsel %vm9511_vm14, %v9516_v51, 0.0  ;;  %v406_v44 = vadd.s32 240, %v9254_v2  ;;  %v9704_v48 = vld [vmem:[#allocation4 + $0xc] sm:$0x3] }
  0x65   : > { %v9501_v37 = vpack.c.bf16 %v1022_v25, %v1021_v21  ;;  %vm9503_vm13 = vcmp.ne.s32.totalorder %v566_v19, 0  ;;  %12975 = vst [vmem:[#allocation36_spill] sm:$0xff] %v12974_v50  ;;  %v608_v19 = vand.u32 15, %v404_v52  ;;  %v996_v30 = vpack.c.bf16 %v9534_v9, %v976_v12  ;;  %v9565_v12 = vld [vmem:[#allocation4 + $0x8] ss:$0 sps:$4 sm:$0xcc]  }
  0x66   : > { %v12971_v41 = vsel %vm9503_vm13, 4294967295, %v12970_v41  ;;  %vm9550_vm15 = vcmp.ne.s32.totalorder %v594_v13, 0  ;;  %v12981_v52 = vmov 0  ;;  %v9571_v13 = vld [vmem:[%s9265_s17 + $0xd8] sm:$0xff]  ;;  %v2575_v62 = vrot.slane %v9565_v12, 2 }
  0x67   : > { %12969 = vst [vmem:[#allocation34_spill] sm:$0xff] %v9501_v37  ;;  %12972 = vst [vmem:[#allocation35_spill] sm:$0xff] %v12971_v41  ;;  %vm9555_vm0 = vcmp.ne.s32.totalorder %v608_v19, 0  ;;  %v9580_v19 = vld [vmem:[%s9265_s17 + $0xe8] sm:$0xff]  ;;  %v13030_v63 = vmov 0  ;;  %v9820_v26 = vld [vmem:[%s9265_s17 + $0x9a] sm:$0xff] }
  0x68   : > { %v12982_v52 = vsel %vm9555_vm0, 4294967295, %v12981_v52  ;;  %12984 = vst [vmem:[#allocation41_spill] sm:$0xff] %v9580_v19  ;;  %v399_v23 = vadd.s32 184, %v9254_v2  ;;  %v403_v59 = vadd.s32 216, %v9254_v2 }
  0x69   : > { %8229 = vmatmul.mubr.msk.bf16.gmra.mxu0 %vm12756_vm1, %v9454_v56  ;;  %12983 = vst [vmem:[#allocation40_spill] sm:$0xff] %v12982_v52 }
  0x6a   : > { %8232 = vmatprep.mubr.msk.bf16.mxu0 %vm12756_vm1, %v9457_v58 }
  0x6b   : > { %8263 = vmatmul.mubr.msk.bf16.gmra.mxu1 %vm12756_vm1, %v991_v54  ;;  %v1023_v54 = vld [vmem:[%s9265_s17 + $0xb1] sm:$0xff] }
  0x6c   : > { %8266 = vmatprep.mubr.msk.bf16.mxu1 %vm12756_vm1, %v992_v57  ;;  %v974_v57 = vsel %vm9503_vm13, %v9508_v43, 0.0  ;;  %v9542_v25 = vpack.c.bf16 %v1024_v1, %v1023_v54  ;;  %v9560_v54 = vld [vmem:[%s9265_s17 + $0xe0] sm:$0xff]  ;;  %v377_v1 = vadd.s32 8, %v9254_v2 }
  0x6d   : > { %v995_v21 = vpack.c.bf16 %v9525_v55, %v974_v57  ;;  %v1027_v57 = vld [vmem:[%s9265_s17 + $0xd1] sm:$0xff] }
  0x6e   : > { %12976 = vst [vmem:[#allocation37_spill] sm:$0xff] %v9542_v25  ;;  %v419_v56 = vand.u32 15, %v377_v1  ;;  %v1481_v1 = vld [vmem:[%s9265_s17 + $0xa] sm:$0xff] }
  0x70   : > { %vm9604_vm14 = vcmp.ne.s32.totalorder %v419_v56, 15  ;;  %v1031_v56 = vld [vmem:[%s9265_s17 + $0xf1] sm:$0xff] }
  0x71   : > { %8233 = vmatmul.mubr.msk.bf16.gmra.mxu0 %vm12756_vm1, %v9498_v33  ;;  %v1029_v33 = vld [vmem:[%s9265_s17 + $0xe1] sm:$0xff] }
  0x72   : > { %8236 = vmatprep.mubr.msk.bf16.mxu0 %vm12756_vm1, %v9501_v37  ;;  %v12978_v37 = vmov 0 }
  0x73   : > { %8267 = vmatmul.mubr.msk.bf16.gmra.mxu1 %vm12756_vm1, %v993_v31  ;;  %v9546_v31 = vld [vmem:[%s9265_s17 + $0xd0] sm:$0xff]  ;;  %v12979_v37 = vsel %vm9550_vm15, 4294967295, %v12978_v37 }
  0x74   : > { %8270 = vmatprep.mubr.msk.bf16.mxu1 %vm12756_vm1, %v994_v34  ;;  %v9548_v34 = vpack.c.bf16 %v1026_v16, %v1025_v14  ;;  %12980 = vst [vmem:[#allocation39_spill] sm:$0xff] %v12979_v37  ;;  %v978_v14 = vsel %vm9550_vm15, %v9546_v31, 0.0  ;;  %v1028_v16 = vld [vmem:[%s9265_s17 + $0xd9] sm:$0xff]  ;;  %vm12991_vm15 = vcmask 31744  }
  0x75   : > { %v997_v58 = vpack.c.bf16 %v9571_v13, %v978_v14  ;;  %v9588_v22 = vpack.c.bf16 %v1028_v16, %v1027_v57  ;;  %v379_v14 = vadd.s32 24, %v9254_v2  ;;  %v12992_v57 = vmov 0  ;;  %vm12995_vm13 = vmmov %vm12991_vm15 }
  0x76   : > { %12977 = vst [vmem:[#allocation38_spill] sm:$0xff] %v9548_v34  ;;  %v12993_v57 = vsel %vm9604_vm14, 4294967295, %v12992_v57  ;;  %vm12996_vm12 = vmmov %vm12995_vm13 }
  0x77   : > { %12985 = vst [vmem:[#allocation42_spill] sm:$0xff] %v9588_v22  ;;  %12994 = vst [vmem:[#allocation45_spill] sm:$0xff] %v12993_v57  ;;  %v433_v16 = vand.u32 15, %v379_v14  ;;  %v383_v14 = vadd.s32 56, %v9254_v2 }
  0x79   : > { %8237 = vmatmul.mubr.msk.bf16.gmra.mxu0 %vm12756_vm1, %v9542_v25  ;;  %v622_v25 = vand.u32 15, %v406_v44  ;;  %v12987_v44 = vmov 0 }
  0x7a   : > { %8240 = vmatprep.mubr.msk.bf16.mxu0 %vm12756_vm1, %v9548_v34  ;;  %v9592_v34 = vld [vmem:[%s9265_s17 + $0xf0] sm:$0xff] }
  0x7b   : > { %8271 = vmatmul.mubr.msk.bf16.gmra.mxu1 %vm12756_vm1, %v995_v21  ;;  %v980_v21 = vsel %vm9555_vm0, %v9560_v54, 0.0  ;;  %vm12990_vm0 = vcmask 1041408  }
  0x7c   : > { %8274 = vmatprep.mubr.msk.bf16.mxu1 %vm12756_vm1, %v996_v30  ;;  %v1030_v30 = vld [vmem:[%s9265_s17 + $0xe9] sm:$0xff]  ;;  %v998_v20 = vpack.c.bf16 %v9580_v19, %v980_v21  ;;  %vm9597_vm1 = vcmp.ne.s32.totalorder %v622_v25, 0  ;;  %8885 = vmatprep.subr.msk.bf16.mxu1 %vm12990_vm0, %v2575_v62  ;;  %v9614_v25 = vld [vmem:[%s9265_s17 + $0xf8] sm:$0xff]  ;;  %vm12997_vm0 = vmmov %vm12996_vm12  ;;  %v1901_v21 = vsel %vm9267_vm2, %v9290_v27, 0.0  ;;  %v12999_v27 = vmov 0 }
  0x7d   : > { %v9595_v60 = vpack.c.bf16 %v1030_v30, %v1029_v33  ;;  %v12988_v44 = vsel %vm9597_vm1, 4294967295, %v12987_v44  ;;  %v381_v33 = vadd.s32 40, %v9254_v2  ;;  %v982_v12 = vsel %vm9597_vm1, %v9592_v34, 0.0  ;;  %v1480_v30 = vld [vmem:[%s9265_s17 + $0x2] sm:$0xff]  ;;  %vm13006_vm2 = vmmov %vm12997_vm0 }
  0x7e   : > { %12989 = vst [vmem:[#allocation44_spill] sm:$0xff] %v12988_v44  ;;  %v1933_v44 = vpack.c.bf16 %v9293_v28, %v1901_v21  ;;  %v9653_v28 = vld [vmem:[%s9265_s17 + $0x12] sm:$0xff]  ;;  %v387_v21 = vadd.s32 88, %v9254_v2 }
  0x7f   : > { %12986 = vst [vmem:[#allocation43_spill] sm:$0xff] %v9595_v60  ;;  %v447_v39 = vand.u32 15, %v381_v33  ;;  %v9648_v33 = vld [vmem:[%s9265_s17 + $0x2a] sm:$0xff] }
  0x81   : > { %8241 = vmatmul.mubr.msk.bf16.gmra.mxu0 %vm12995_vm13, %v9588_v22  ;;  %v999_v22 = vpack.c.bf16 %v9614_v25, %v982_v12  ;;  %vm13002_vm13 = vmmov %vm12997_vm0 }
  0x82   : > { %8244 = vmatprep.mubr.msk.bf16.mxu0 %vm12997_vm0, %v9595_v60  ;;  %v9633_v60 = vld [vmem:[%s9265_s17 + $0x1a] sm:$0xff] }
  0x83   : > { %8275 = vmatmul.mubr.msk.bf16.gmra.mxu1 %vm12991_vm15, %v997_v58  ;;  %v1032_v58 = vld [vmem:[%s9265_s17 + $0xf9] sm:$0xff]  ;;  %vm9643_vm15 = vcmp.ne.s32.totalorder %v447_v39, 15  ;;  %v1903_v39 = vsel %vm9274_vm3, %v9306_v36, 0.0 }
  0x84   : > { %8278 = vmatprep.mubr.msk.bf16.mxu1 %vm12996_vm12, %v998_v20  ;;  %v1577_v20 = vsel %vm9604_vm14, %v1481_v1, 0.0  ;;  %v9630_v32 = vpack.c.bf16 %v1032_v58, %v1031_v56  ;;  %vm9637_vm12 = vcmp.ne.s32.totalorder %v433_v16, 15  ;;  %v13003_v1 = vmov 0 }
  0x85   : > { %v1608_v19 = vpack.c.bf16 %v1577_v20, %v1480_v30  ;;  %v13000_v27 = vsel %vm9637_vm12, 4294967295, %v12999_v27  ;;  %v13004_v1 = vsel %vm9643_vm15, 4294967295, %v13003_v1  ;;  %v1579_v12 = vsel %vm9637_vm12, %v9633_v60, 0.0  ;;  %v9670_v30 = vld [vmem:[#allocation4 + $0xc] ss:$0 sps:$4 sm:$0xcc]  }
  0x86   : > { %12998 = vst [vmem:[#allocation46_spill] sm:$0xff] %v9630_v32  ;;  %13001 = vst [vmem:[#allocation47_spill] sm:$0xff] %v13000_v27  ;;  %v461_v56 = vand.u32 15, %v383_v14  ;;  %v1905_v58 = vsel %vm9278_vm4, %v9327_v45, 0.0  ;;  %v475_v16 = vand.u32 15, %v385_v8  ;;  %v1581_v36 = vsel %vm9643_vm15, %v9648_v33, 0.0 }
  0x87   : > { %13005 = vst [vmem:[#allocation48_spill] sm:$0xff] %v13004_v1  ;;  %v1934_v20 = vpack.c.bf16 %v9314_v40, %v1903_v39  ;;  %v1609_v14 = vpack.c.bf16 %v1579_v12, %v9653_v28  ;;  %v1935_v8 = vpack.c.bf16 %v9342_v49, %v1905_v58  ;;  %v13009_v40 = vmov 0  ;;  %v9701_v49 = vld [vmem:[%s9265_s17 + $0x32] sm:$0xff] }
  0x88   : > { %v13012_v12 = vmov 0  ;;  %vm13016_vm4 = vcmask 1041408  }
  0x89   : > { %8245 = vmatmul.mubr.msk.bf16.gmra.mxu0 %vm12997_vm0, %v9630_v32  ;;  %v9689_v32 = vld [vmem:[%s9265_s17 + $0x4a] sm:$0xff]  ;;  %v2625_v58 = vsel %vm13016_vm4, %v2575_v62, 0  ;;  %v1909_v62 = vsel %vm9329_vm6, %v9370_v0, 0.0 }
  0x8b   : > { %8279 = vmatmul.mubr.msk.bf16.gmra.mxu1 %vm13002_vm13, %v999_v22  ;;  %v9663_v22 = vld [vmem:[%s9265_s17 + $0x22] sm:$0xff]  ;;  %vm13007_vm13 = vmmov %vm12997_vm0  ;;  %vm9691_vm0 = vcmp.ne.s32.totalorder %v461_v56, 15  ;;  %v12791_v56 = vrot.slane %v9670_v30, 2 }
  0x8c   : > { %8318 = vmatprep.mubr.msk.bf16.mxu1 %vm13006_vm2, %v1933_v44  ;;  %8284 = vmatprep.mubr.msk.bf16.mxu0 %vm13007_vm13, %v1608_v19  ;;  %v389_v44 = vadd.s32 104, %v9254_v2  ;;  %vm13008_vm2 = vcmask 1041408   ;;  %v9681_v19 = vld [vmem:[%s9265_s17 + $0x3a] sm:$0xff]  ;;  %v1610_v18 = vpack.c.bf16 %v1581_v36, %v9663_v22  ;;  %v13010_v40 = vsel %vm9691_vm0, 4294967295, %v13009_v40 }
  0x8d   : > { %v2296_v45 = vsel %vm13008_vm2, %v9445_v47, 0  ;;  %13011 = vst [vmem:[#allocation49_spill] sm:$0xff] %v13010_v40  ;;  %vm9695_vm13 = vcmp.ne.s32.totalorder %v475_v16, 15  ;;  %v489_v47 = vand.u32 15, %v387_v21  ;;  %vm13015_vm2 = vcmask 31744   ;;  %v9710_v16 = vld [vmem:[%s9265_s17 + $0x42] sm:$0xff] }
  0x8e   : > { %v13013_v12 = vsel %vm9695_vm13, 4294967295, %v13012_v12  ;;  %v503_v39 = vand.u32 15, %v389_v44  ;;  %vm13017_vm5 = vmmov %vm13015_vm2  ;;  %v1583_v21 = vsel %vm9691_vm0, %v9681_v19, 0.0  ;;  %v1585_v36 = vsel %vm9695_vm13, %v9689_v32, 0.0  ;;  %v9723_v44 = vld [vmem:[%s9265_s17 + $0x5a] sm:$0xff] }
  0x8f   : > { %13014 = vst [vmem:[#allocation50_spill] sm:$0xff] %v13013_v12  ;;  %vm13018_vm3 = vmmov %vm13015_vm2  ;;  %v1611_v0 = vpack.c.bf16 %v1583_v21, %v9701_v49  ;;  %v3453_v12 = vld [vmem:[%s9265_s17 + $0x7a] sm:$0xff] }
  0x90   : > { %vm13019_vm15 = vmmov %vm13015_vm2 }
  0x91   : > { %8285 = vmatmul.mubr.msk.bf16.vlgmr.msra.gmra.mxu0 %vm13017_vm5, %v1609_v14  ;;  %v391_v14 = vadd.s32 120, %v9254_v2  ;;  %vm13038_vm6 = vmmov %vm13015_vm2 }
  0x92   : > { %8351 = vmatpush3.bf16.msra.mxu0 %v2296_v45  ;;  %8288 = vmatprep.mubr.msk.bf16.mxu0 %vm13019_vm15, %v1610_v18  ;;  %v1936_v18 = vpack.c.bf16 %v9352_v53, %v1907_v17  ;;  %v1937_v45 = vpack.c.bf16 %v9386_v6, %v1909_v62  ;;  %vm9738_vm15 = vcmp.ne.s32.totalorder %v503_v39, 15  ;;  %v9743_v17 = vld [vmem:[%s9265_s17 + $0x6a] sm:$0xff]  ;;  %v1612_v53 = vpack.c.bf16 %v1585_v36, %v9710_v16  ;;  %v9754_v6 = vld [vmem:[%s9265_s17 + $0x52] sm:$0xff] }
  0x93   : > { %8319 = vmatmul.mubr.msk.bf16.vlgmr.msra.gmra.mxu1 %vm13015_vm2, %v1934_v20  ;;  %v13021_v20 = vmov 0  ;;  %v1589_v39 = vsel %vm9738_vm15, %v9743_v17, 0.0  ;;  %v517_v21 = vand.u32 15, %v391_v14  ;;  %v1913_v62 = vsel %vm9373_vm8, %v9414_v24, 0.0 }
  0x94   : > { %8322 = vmatprep.mubr.msk.bf16.mxu1 %vm13018_vm3, %v1935_v8  ;;  %8385 = vmatpush3.bf16.msra.mxu1 %v2625_v58  ;;  %vm13020_vm3 = vmmov %vm13016_vm4  ;;  %vm9728_vm4 = vcmp.ne.s32.totalorder %v489_v47, 15  ;;  %v13025_v8 = vmov 0  ;;  %v1911_v58 = vsel %vm9365_vm7, %v9378_v4, 0.0  ;;  %v393_v36 = vadd.s32 136, %v9254_v2  ;;  %v9766_v4 = vld [vmem:[%s9265_s17 + $0x62] sm:$0xff] }
  0x95   : > { %8886 = vmatprep.subr.msk.bf16.mxu0 %vm13020_vm3, %v9704_v48  ;;  %v13022_v20 = vsel %vm9728_vm4, 4294967295, %v13021_v20  ;;  %vm13024_vm5 = vmmov %vm13020_vm3  ;;  %v13026_v8 = vsel %vm9738_vm15, 4294967295, %v13025_v8  ;;  %v1587_v47 = vsel %vm9728_vm4, %v9723_v44, 0.0  ;;  %v1939_v3 = vpack.c.bf16 %v9432_v35, %v1913_v62 }
  0x96   : > { %13023 = vst [vmem:[#allocation51_spill] sm:$0xff] %v13022_v20  ;;  %8887 = vmatprep.subr.msk.bf16.mxu1 %vm13024_vm5, %v12791_v56  ;;  %13027 = vst [vmem:[#allocation52_spill] sm:$0xff] %v13026_v8  ;;  %v531_v56 = vand.u32 15, %v393_v36  ;;  %v1613_v14 = vpack.c.bf16 %v1587_v47, %v9754_v6  ;;  %v1614_v24 = vpack.c.bf16 %v1589_v39, %v9766_v4  ;;  %vm9773_vm8 = vcmp.ne.s32.totalorder %v517_v21, 15  ;;  %v9806_v21 = vld [vmem:[%s9265_s17 + $0x82] sm:$0xff]  ;;  %v3457_v8 = vld [vmem:[%s9265_s17 + $0x9a] sm:$0xff] }
  0x97   : > { %vm13028_vm3 = vmmov %vm13015_vm2  ;;  %v13031_v63 = vsel %vm9773_vm8, 4294967295, %v13030_v63  ;;  %v397_v35 = vadd.s32 168, %v9254_v2  ;;  %v1915_v47 = vsel %vm9409_vm9, %v9422_v29, 0.0  ;;  %v1917_v39 = vsel %vm9417_vm10, %v9464_v61, 0.0 }
  0x98   : > { %vm13029_vm5 = vmmov %vm13015_vm2  ;;  %13032 = vst [vmem:[#allocation53_spill] sm:$0xff] %v13031_v63  ;;  %v1940_v62 = vpack.c.bf16 %v9440_v38, %v1915_v47  ;;  %v13039_v61 = vmov 0  ;;  %v13043_v38 = vmov 0  ;;  %v9839_v47 = vld [vmem:[%s9265_s17 + $0x92] sm:$0xff] }
  0x99   : > { %8289 = vmatmul.mubr.msk.bf16.gmra.mxu0 %vm13028_vm3, %v1611_v0  ;;  %v9778_v0 = vld [vmem:[%s9265_s17 + $0x7a] sm:$0xff]  ;;  %vm13033_vm3 = vmmov %vm13015_vm2  ;;  %v559_v36 = vand.u32 15, %v397_v35  ;;  %v1919_v35 = vsel %vm9459_vm11, %v9472_v7, 0.0  ;;  %v573_v7 = vand.u32 15, %v399_v23  ;;  %v13053_v23 = vmov 0 }
  0x9a   : > { %8292 = vmatprep.mubr.msk.bf16.mxu0 %vm13015_vm2, %v1612_v53  ;;  %v9787_v53 = vld [vmem:[%s9265_s17 + $0x8a] sm:$0xff]  ;;  %vm13037_vm7 = vmmov %vm13015_vm2 }
  0x9b   : > { %8323 = vmatmul.mubr.msk.bf16.gmra.mxu1 %vm13015_vm2, %v1936_v18  ;;  %v1938_v18 = vpack.c.bf16 %v9396_v11, %v1911_v58  ;;  %v13034_v11 = vmov 0  ;;  %v9797_v58 = vld [vmem:[%s9265_s17 + $0x72] sm:$0xff]  ;;  %vm13046_vm10 = vmmov %vm13015_vm2 }
  0x9c   : > { %8326 = vmatprep.mubr.msk.bf16.mxu1 %vm13029_vm5, %v1937_v45  ;;  %v395_v45 = vadd.s32 152, %v9254_v2  ;;  %vm9782_vm5 = vcmp.ne.s32.totalorder %v531_v56, 15  ;;  %v1591_v56 = vsel %vm9773_vm8, %v9778_v0, 0.0  ;;  %vm13047_vm9 = vmmov %vm13015_vm2 }
  0x9d   : > { %v13035_v11 = vsel %vm9782_vm5, 4294967295, %v13034_v11 }
  0x9e   : > { %13036 = vst [vmem:[#allocation54_spill] sm:$0xff] %v13035_v11  ;;  %v545_v29 = vand.u32 15, %v395_v45  ;;  %v9829_v45 = vld [vmem:[%s9265_s17 + $0xaa] sm:$0xff] }
  0xa1   : > { %8293 = vmatmul.mubr.msk.bf16.gmra.mxu0 %vm13015_vm2, %v1613_v14  ;;  %v1941_v14 = vpack.c.bf16 %v9480_v10, %v1917_v39  ;;  %v401_v10 = vadd.s32 200, %v9254_v2 }
  0xa2   : > { %8296 = vmatprep.mubr.msk.bf16.mxu0 %vm13038_vm6, %v1614_v24  ;;  %vm9815_vm6 = vcmp.ne.s32.totalorder %v545_v29, 15 }
  0xa3   : > { %8327 = vmatmul.mubr.msk.bf16.gmra.mxu1 %vm13033_vm3, %v1938_v18  ;;  %v1615_v18 = vpack.c.bf16 %v1591_v56, %v9797_v58  ;;  %v13040_v61 = vsel %vm9815_vm6, 4294967295, %v13039_v61  ;;  %vm9824_vm3 = vcmp.ne.s32.totalorder %v559_v36, 15  ;;  %v1595_v56 = vsel %vm9815_vm6, %v9820_v26, 0.0 }
  0xa4   : > { %8330 = vmatprep.mubr.msk.bf16.mxu1 %vm13037_vm7, %v1939_v3  ;;  %v1593_v3 = vsel %vm9782_vm5, %v9787_v53, 0.0  ;;  %13041 = vst [vmem:[#allocation55_spill] sm:$0xff] %v13040_v61  ;;  %vm13042_vm7 = vmmov %vm13015_vm2  ;;  %v13044_v38 = vsel %vm9824_vm3, 4294967295, %v13043_v38  ;;  %v1597_v29 = vsel %vm9824_vm3, %v9829_v45, 0.0  ;;  %v587_v36 = vand.u32 15, %v401_v10 }
  0xa5   : > { %v1616_v24 = vpack.c.bf16 %v1593_v3, %v9806_v21  ;;  %13045 = vst [vmem:[#allocation56_spill] sm:$0xff] %v13044_v38  ;;  %v9848_v3 = vld [vmem:[%s9265_s17 + $0xa2] sm:$0xff]  ;;  %vm13058_vm3 = vnez %v12971_v41  ;;  %v407_v41 = vadd.s32 248, %v9254_v2 }
  0xa6   : > { %v1923_v10 = vsel %vm13058_vm3, %v9516_v51, 0.0  ;;  %v601_v51 = vand.u32 15, %v403_v59  ;;  %v13064_v59 = vmov 0 }
  0xa9   : > { %8297 = vmatmul.mubr.msk.bf16.gmra.mxu0 %vm13015_vm2, %v1615_v18  ;;  %v1617_v18 = vpack.c.bf16 %v1595_v56, %v9839_v47 }
  0xaa   : > { %8300 = vmatprep.mubr.msk.bf16.mxu0 %vm13047_vm9, %v1616_v24  ;;  %v1618_v24 = vpack.c.bf16 %v1597_v29, %v9848_v3  ;;  %vm9857_vm9 = vcmp.ne.s32.totalorder %v573_v7, 15  ;;  %v9890_v29 = vld [vmem:[%s9265_s17 + $0xc2] sm:$0xff] }
  0xab   : > { %8331 = vmatmul.mubr.msk.bf16.gmra.mxu1 %vm13042_vm7, %v1940_v62  ;;  %vm13048_vm7 = vnez %v12966_v5  ;;  %v1942_v62 = vpack.c.bf16 %v9490_v15, %v1919_v35  ;;  %v9862_v5 = vld [vmem:[%s9265_s17 + $0xba] sm:$0xff]  ;;  %v9871_v15 = vld [vmem:[%s9265_s17 + $0xca] sm:$0xff]  ;;  %v9881_v35 = vld [vmem:[%s9265_s17 + $0xb2] sm:$0xff] }
  0xac   : > { %8334 = vmatprep.mubr.msk.bf16.mxu1 %vm13046_vm10, %v1941_v14  ;;  %v1921_v39 = vsel %vm13048_vm7, %v9508_v43, 0.0  ;;  %v13049_v43 = vmov 0  ;;  %vm13052_vm10 = vmmov %vm13015_vm2  ;;  %vm9866_vm2 = vcmp.ne.s32.totalorder %v587_v36, 15  ;;  %v1599_v56 = vsel %vm9857_vm9, %v9862_v5, 0.0 }
  0xad   : > { %v1943_v14 = vpack.c.bf16 %v9525_v55, %v1921_v39  ;;  %v13050_v43 = vsel %vm9857_vm9, 4294967295, %v13049_v43  ;;  %v13054_v23 = vsel %vm9866_vm2, 4294967295, %v13053_v23  ;;  %v405_v55 = vadd.s32 232, %v9254_v2  ;;  %vm13056_vm7 = vmmov %vm13052_vm10  ;;  %v9922_v2 = vld [vmem:[%s9265_s17 + $0xd2] sm:$0xff] }
  0xae   : > { %13051 = vst [vmem:[#allocation57_spill] sm:$0xff] %v13050_v43  ;;  %13055 = vst [vmem:[#allocation58_spill] sm:$0xff] %v13054_v23  ;;  %v1601_v7 = vsel %vm9866_vm2, %v9871_v15, 0.0  ;;  %vm13069_vm2 = vnez %v12979_v37 }
  0xaf   : > { %vm13057_vm11 = vmmov %vm13056_vm7  ;;  %v615_v36 = vand.u32 15, %v405_v55 }
  0xb0   : > { %vm13059_vm6 = vmmov %vm13056_vm7 }
  0xb1   : > { %8301 = vmatmul.mubr.msk.bf16.gmra.mxu0 %vm13056_vm7, %v1617_v18  ;;  %v1619_v18 = vpack.c.bf16 %v1599_v56, %v9881_v35  ;;  %vm9908_vm7 = vcmp.ne.s32.totalorder %v615_v36, 15  ;;  %vm13068_vm3 = vmmov %vm13059_vm6  ;;  %v9931_v56 = vld [vmem:[%s9265_s17 + $0xe2] sm:$0xff] }
  0xb2   : > { %8304 = vmatprep.mubr.msk.bf16.mxu0 %vm13059_vm6, %v1618_v24  ;;  %v1620_v24 = vpack.c.bf16 %v1601_v7, %v9890_v29  ;;  %v13065_v59 = vsel %vm9908_vm7, 4294967295, %v13064_v59  ;;  %vm13070_vm9 = vmmov %vm13068_vm3  ;;  %v13072_v7 = vld [vmem:[#allocation41_spill] sm:$0xff] }
  0xb3   : > { %8335 = vmatmul.mubr.msk.bf16.gmra.mxu1 %vm13052_vm10, %v1942_v62  ;;  %vm13060_vm10 = vnez %v12974_v50  ;;  %v1944_v62 = vpack.c.bf16 %v9534_v9, %v1923_v10  ;;  %v9904_v50 = vld [vmem:[%s9265_s17 + $0xda] sm:$0xff]  ;;  %13066 = vst [vmem:[#allocation60_spill] sm:$0xff] %v13065_v59  ;;  %v9913_v9 = vld [vmem:[%s9265_s17 + $0xea] sm:$0xff] }
  0xb4   : > { %8338 = vmatprep.mubr.msk.bf16.mxu1 %vm13057_vm11, %v1943_v14  ;;  %v1925_v39 = vsel %vm13060_vm10, %v9546_v31, 0.0  ;;  %vm9899_vm11 = vcmp.ne.s32.totalorder %v601_v51, 15  ;;  %v13061_v31 = vmov 0  ;;  %vm13067_vm10 = vmmov %vm13059_vm6  ;;  %v8949_v59 = vld [vmem:[%s12739_s3 + $0x20] sm:$0xff]  }
  0xb5   : > { %v1945_v14 = vpack.c.bf16 %v9571_v13, %v1925_v39  ;;  %v13062_v31 = vsel %vm9899_vm11, 4294967295, %v13061_v31  ;;  %v1927_v13 = vsel %vm13069_vm2, %v9560_v54, 0.0  ;;  %v1603_v55 = vsel %vm9899_vm11, %v9904_v50, 0.0 }
  0xb6   : > { %13063 = vst [vmem:[#allocation59_spill] sm:$0xff] %v13062_v31  ;;  %v1605_v54 = vsel %vm9908_vm7, %v9913_v9, 0.0  ;;  %v629_v39 = vand.u32 15, %v407_v41  ;;  %v1946_v51 = vpack.c.bf16 %v13072_v7, %v1927_v13  ;;  %v9954_v41 = vld [vmem:[%s9265_s17 + $0x108] sm:$0xff]  ;;  %v8953_v31 = vld [vmem:[%s12739_s3] sm:$0xff]  }
  0xb9   : > { %8305 = vmatmul.mubr.msk.bf16.gmra.mxu0 %vm13067_vm10, %v1619_v18  ;;  %v1622_v18 = vpack.c.bf16 %v1605_v54, %v9931_v56  ;;  %vm13076_vm10 = vmmov %vm13070_vm9  ;;  %v2524_v54 = vsel %vm9604_vm14, %v9633_v60, 0.0  ;;  %vm13084_vm14 = vnez %v13004_v1 }
  0xba   : > { %8308 = vmatprep.mubr.msk.bf16.mxu0 %vm13070_vm9, %v1620_v24  ;;  %v9948_v24 = vld [vmem:[%s9265_s17 + $0xfa] sm:$0xff]  ;;  %v2528_v60 = vsel %vm13084_vm14, %v9681_v19, 0.0 }
  0xbb   : > { %8339 = vmatmul.mubr.msk.bf16.gmra.mxu1 %vm13059_vm6, %v1944_v62  ;;  %vm13071_vm6 = vnez %v12982_v52  ;;  %v1621_v62 = vpack.c.bf16 %v1603_v55, %v9922_v2  ;;  %v9961_v55 = vld [vmem:[%s9265_s17 + $0xf2] sm:$0xff]  ;;  %v13092_v19 = vld [vmem:[#allocation21_spill] sm:$0xff] }
  0xbc   : > { %8342 = vmatprep.mubr.msk.bf16.mxu1 %vm13068_vm3, %v1945_v14  ;;  %v1929_v10 = vsel %vm13071_vm6, %v9592_v34, 0.0  ;;  %v9941_v14 = vld [vmem:[%s9265_s17 + $0x100] sm:$0xff]  ;;  %vm9943_vm3 = vcmp.ne.s32.totalorder %v629_v39, 15  ;;  %v13073_v34 = vmov 0  ;;  %vm13077_vm6 = vmmov %vm13070_vm9 }
  0xbd   : > { %v1947_v36 = vpack.c.bf16 %v9614_v25, %v1929_v10  ;;  %v13074_v34 = vsel %vm9943_vm3, 4294967295, %v13073_v34  ;;  %v1931_v13 = vsel %vm9597_vm1, %v9941_v14, 0.0  ;;  %vm13079_vm2 = vmmov %vm13077_vm6  ;;  %v1607_v10 = vsel %vm9943_vm3, %v9948_v24, 0.0 }
  0xbe   : > { %13075 = vst [vmem:[#allocation41_spill] sm:$0xff] %v13074_v34  ;;  %v1948_v39 = vpack.c.bf16 %v9954_v41, %v1931_v13  ;;  %v1623_v7 = vpack.c.bf16 %v1607_v10, %v9961_v55  ;;  %v13087_v10 = vrot.slane %v9670_v30, 2  ;;  %v2532_v30 = vsel %vm9695_vm13, %v9723_v44, 0.0  ;;  %v13099_v44 = vld [vmem:[#allocation25_spill] sm:$0xff] }
  0xc1   : > { %8309 = vmatmul.mubr.msk.bf16.gmra.mxu0 %vm13076_vm10, %v1621_v62  ;;  %v2526_v62 = vsel %vm9637_vm12, %v9648_v33, 0.0  ;;  %vm13083_vm10 = vmmov %vm13079_vm2 }
  0xc2   : > { %8312 = vmatprep.mubr.msk.bf16.mxu0 %vm13079_vm2, %v1622_v18  ;;  %v2556_v18 = vpack.c.bf16 %v2526_v62, %v9663_v22  ;;  %v2530_v22 = vsel %vm9691_vm0, %v9689_v32, 0.0  ;;  %v2534_v32 = vsel %vm9728_vm4, %v9743_v17, 0.0  ;;  %v13102_v62 = vld [vmem:[#allocation26_spill] sm:$0xff]  ;;  %v2538_v17 = vsel %vm9773_vm8, %v9787_v53, 0.0 }
  0xc3   : > { %8343 = vmatmul.mubr.msk.bf16.gmra.mxu1 %vm13070_vm9, %v1946_v51  ;;  %v2555_v51 = vpack.c.bf16 %v2524_v54, %v9653_v28  ;;  %vm13081_vm9 = vmmov %vm13079_vm2  ;;  %v2557_v28 = vpack.c.bf16 %v2528_v60, %v9701_v49  ;;  %v9991_v54 = vld [vmem:[#allocation4 + $0x10] sm:$0x3]  ;;  %v2558_v49 = vpack.c.bf16 %v2530_v22, %v9710_v16  ;;  %v2536_v16 = vsel %vm9738_vm15, %v9778_v0, 0.0  ;;  %v13107_v60 = vld [vmem:[#allocation30_spill] sm:$0xff] }
  0xc4   : > { %8346 = vmatprep.mubr.msk.bf16.mxu1 %vm13077_vm6, %v1947_v36  ;;  %vm13080_vm6 = vmmov %vm13079_vm2  ;;  %v13082_v36 = vld [vmem:[#allocation17_spill] sm:$0xff]  ;;  %v2562_v0 = vpack.c.bf16 %v2538_v17, %v9806_v21  ;;  %v2822_v17 = vld [vmem:[%s9265_s17 + $0x30] sm:$0xff] }
  0xc5   : > { %v2820_v22 = vld [vmem:[%s9265_s17 + $0x20] sm:$0xff] }
  0xc9   : > { %8313 = vmatmul.mubr.msk.bf16.gmra.mxu0 %vm13081_vm9, %v1623_v7  ;;  %vm13086_vm9 = vmmov %vm13079_vm2  ;;  %v13096_v7 = vld [vmem:[#allocation22_spill] sm:$0xff] }
  0xca   : > { %8352 = vmatprep.mubr.msk.bf16.mxu0 %vm13083_vm10, %v13082_v36  ;;  %vm13090_vm10 = vmmov %vm13086_vm9  ;;  %v13104_v36 = vld [vmem:[#allocation29_spill] sm:$0xff] }
  0xcb   : > { %8347 = vmatmul.mubr.msk.bf16.gmra.mxu1 %vm13080_vm6, %v1948_v39  ;;  %vm13085_vm6 = vcmask 1041408   ;;  %v13089_v39 = vld [vmem:[#allocation18_spill] sm:$0xff]  ;;  %vm13091_vm12 = vmmov %vm13086_vm9 }
  0xcc   : > { %8386 = vmatprep.mubr.msk.bf16.mxu1 %vm13079_vm2, %v2555_v51  ;;  %v2950_v13 = vsel %vm13085_vm6, %v9704_v48, 0  ;;  %vm13088_vm2 = vmmov %vm13085_vm6  ;;  %v2559_v48 = vpack.c.bf16 %v2532_v30, %v9754_v6  ;;  %v2560_v6 = vpack.c.bf16 %v2534_v32, %v9766_v4  ;;  %v2561_v51 = vpack.c.bf16 %v2536_v16, %v9797_v58  ;;  %v10088_v30 = vld [vmem:[%s9265_s17 + $0x102] sm:$0xff] }
  0xcd   : > { %v3247_v33 = vsel %vm13088_vm2, %v13087_v10, 0  ;;  %vm13093_vm6 = vmmov %vm13086_vm9  ;;  %v2540_v4 = vsel %vm9782_vm5, %v9820_v26, 0.0  ;;  %vm13113_vm5 = vnez %v13044_v38  ;;  %v13121_v10 = vld [vmem:[#allocation38_spill] sm:$0xff] }
  0xce   : > { %v2563_v58 = vpack.c.bf16 %v2540_v4, %v9839_v47  ;;  %v2544_v26 = vsel %vm13113_vm5, %v9862_v5, 0.0  ;;  %vm13120_vm5 = vnez %v13054_v23  ;;  %v13131_v32 = vld [vmem:[#allocation14_spill] sm:$0xff]  ;;  %v3147_v4 = vld [vmem:[%s9265_s17 + $0x31] sm:$0xff] }
  0xcf   : > { %v2565_v47 = vpack.c.bf16 %v2544_v26, %v9881_v35  ;;  %v2548_v5 = vsel %vm13120_vm5, %v9904_v50, 0.0  ;;  %v2552_v50 = vsel %vm9908_vm7, %v9948_v24, 0.0  ;;  %v13129_v24 = vld [vmem:[#allocation46_spill] sm:$0xff] }
  0xd0   : > { %v2567_v35 = vpack.c.bf16 %v2548_v5, %v9922_v2  ;;  %v2569_v2 = vpack.c.bf16 %v2552_v50, %v9961_v55  ;;  %v2229_v55 = vld [vmem:[%s9265_s17 + $0x109] sm:$0xff] }
  0xd1   : > { %8353 = vmatmul.mubr.msk.bf16.vlgmr.msra.gmra.mxu0 %vm13090_vm10, %v13089_v39  ;;  %v10079_v39 = vld [vmem:[%s9265_s17 + $0x10a] sm:$0xff] }
  0xd2   : > { %8419 = vmatpush3.bf16.msra.mxu0 %v2950_v13  ;;  %8356 = vmatprep.mubr.msk.bf16.mxu0 %vm13093_vm6, %v13092_v19  ;;  %v13118_v13 = vld [vmem:[#allocation37_spill] sm:$0xff]  ;;  %v13126_v19 = vld [vmem:[#allocation43_spill] sm:$0xff] }
  0xd3   : > { %8387 = vmatmul.mubr.msk.bf16.vlgmr.msra.gmra.mxu1 %vm13086_vm9, %v2556_v18  ;;  %vm13094_vm9 = vmmov %vm13088_vm2  ;;  %v13111_v18 = vld [vmem:[#allocation33_spill] sm:$0xff]  ;;  %v3150_v26 = vld [vmem:[%s9265_s17 + $0x49] sm:$0xff] }
  0xd4   : > { %8390 = vmatprep.mubr.msk.bf16.mxu1 %vm13091_vm12, %v2557_v28  ;;  %8453 = vmatpush3.bf16.msra.mxu1 %v3247_v33  ;;  %vm13095_vm12 = vmmov %vm13093_vm6  ;;  %v13114_v28 = vld [vmem:[#allocation34_spill] sm:$0xff] }
  0xd5   : > { %8888 = vmatprep.subr.msk.bf16.mxu0 %vm13094_vm9, %v9991_v54  ;;  %vm13097_vm2 = vmmov %vm13093_vm6  ;;  %v13124_v33 = vld [vmem:[#allocation42_spill] sm:$0xff] }
  0xd6   : > { %vm13098_vm10 = vmmov %vm13097_vm2 }
  0xd7   : > { %vm13100_vm6 = vmmov %vm13097_vm2 }
  0xd8   : > { %vm13101_vm9 = vmmov %vm13097_vm2 }
  0xd9   : > { %8357 = vmatmul.mubr.msk.bf16.gmra.mxu0 %vm13097_vm2, %v13096_v7  ;;  %v2821_v7 = vld [vmem:[%s9265_s17 + $0x28] sm:$0xff] }
  0xda   : > { %8360 = vmatprep.mubr.msk.bf16.mxu0 %vm13100_vm6, %v13099_v44  ;;  %vm13106_vm6 = vmmov %vm13097_vm2 }
  0xdb   : > { %8391 = vmatmul.mubr.msk.bf16.gmra.mxu1 %vm13095_vm12, %v2558_v49  ;;  %vm13103_vm12 = vmmov %vm13097_vm2  ;;  %v3145_v49 = vld [vmem:[%s9265_s17 + $0x21] sm:$0xff] }
  0xdc   : > { %8394 = vmatprep.mubr.msk.bf16.mxu1 %vm13098_vm10, %v2559_v48  ;;  %vm13105_vm10 = vmmov %vm13097_vm2  ;;  %v3146_v48 = vld [vmem:[%s9265_s17 + $0x29] sm:$0xff] }
  0xe1   : > { %8361 = vmatmul.mubr.msk.bf16.gmra.mxu0 %vm13103_vm12, %v13102_v62  ;;  %vm13109_vm12 = vmmov %vm13097_vm2 }
  0xe2   : > { %8364 = vmatprep.mubr.msk.bf16.mxu0 %vm13105_vm10, %v13104_v36  ;;  %vm13112_vm10 = vmmov %vm13106_vm6  ;;  %v2824_v36 = vld [vmem:[%s9265_s17 + $0x40] sm:$0xff] }
  0xe3   : > { %8395 = vmatmul.mubr.msk.bf16.gmra.mxu1 %vm13101_vm9, %v2560_v6  ;;  %vm13108_vm9 = vmmov %vm13097_vm2 }
  0xe4   : > { %8398 = vmatprep.mubr.msk.bf16.mxu1 %vm13097_vm2, %v2561_v51  ;;  %vm13110_vm2 = vnez %v13040_v61  ;;  %v3177_v51 = vpack.c.bf16 %v3146_v48, %v3145_v49  ;;  %v2829_v49 = vld [vmem:[%s9265_s17 + $0x68] sm:$0xff] }
  0xe5   : > { %v2542_v53 = vsel %vm13110_vm2, %v9829_v45, 0.0  ;;  %vm13117_vm2 = vnez %v13050_v43  ;;  %v3469_v43 = vld [vmem:[%s9265_s17 + $0xfa] sm:$0xff] }
  0xe6   : > { %v2564_v21 = vpack.c.bf16 %v2542_v53, %v9848_v3  ;;  %v2546_v45 = vsel %vm13117_vm2, %v9871_v15, 0.0  ;;  %v2550_v15 = vsel %vm9899_vm11, %v9913_v9, 0.0  ;;  %v2228_v9 = vld [vmem:[%s9265_s17 + $0x101] sm:$0xff] }
  0xe7   : > { %v2566_v3 = vpack.c.bf16 %v2546_v45, %v9890_v29  ;;  %v2568_v29 = vpack.c.bf16 %v2550_v15, %v9931_v56  ;;  %v2554_v56 = vsel %vm9943_vm3, %v10079_v39, 0.0  ;;  %v10102_v6 = vpack.c.bf16 %v2229_v55, %v2228_v9 }
  0xe8   : > { %v2570_v16 = vpack.c.bf16 %v2554_v56, %v10088_v30  ;;  %v3153_v56 = vld [vmem:[%s9265_s17 + $0x61] sm:$0xff] }
  0xe9   : > { %8365 = vmatmul.mubr.msk.bf16.gmra.mxu0 %vm13108_vm9, %v13107_v60  ;;  %vm13115_vm9 = vmmov %vm13106_vm6  ;;  %v13136_v60 = vld [vmem:[#allocation15_spill] sm:$0xff] }
  0xea   : > { %8368 = vmatprep.mubr.msk.bf16.mxu0 %vm13112_vm10, %v13111_v18  ;;  %vm13119_vm10 = vmmov %vm13106_vm6  ;;  %vm13137_vm3 = vnez %v13136_v60  ;;  %v3149_v18 = vld [vmem:[%s9265_s17 + $0x41] sm:$0xff] }
  0xeb   : > { %8399 = vmatmul.mubr.msk.bf16.gmra.mxu1 %vm13106_vm6, %v2562_v0  ;;  %v3148_v0 = vld [vmem:[%s9265_s17 + $0x39] sm:$0xff]  ;;  %v2854_v53 = vsel %vm13137_vm3, %v2822_v17, 0.0  ;;  %v3179_v5 = vpack.c.bf16 %v3150_v26, %v3149_v18  ;;  %vm13144_vm3 = vnez %v12939_v42 }
  0xec   : > { %8402 = vmatprep.mubr.msk.bf16.mxu1 %vm13109_vm12, %v2563_v58  ;;  %vm13116_vm12 = vmmov %vm13106_vm6  ;;  %v2823_v58 = vld [vmem:[%s9265_s17 + $0x38] sm:$0xff]  ;;  %v3178_v45 = vpack.c.bf16 %v3148_v0, %v3147_v4 }
  0xf1   : > { %8369 = vmatmul.mubr.msk.bf16.gmra.mxu0 %vm13115_vm9, %v13114_v28  ;;  %vm13122_vm9 = vmmov %vm13106_vm6 }
  0xf2   : > { %8372 = vmatprep.mubr.msk.bf16.mxu0 %vm13119_vm10, %v13118_v13  ;;  %vm13125_vm10 = vmmov %vm13106_vm6  ;;  %v2885_v13 = vpack.c.bf16 %v2823_v58, %v2854_v53  ;;  %v2830_v53 = vld [vmem:[%s9265_s17 + $0x70] sm:$0xff] }
  0xf3   : > { %8403 = vmatmul.mubr.msk.bf16.gmra.mxu1 %vm13106_vm6, %v2564_v21  ;;  %v2825_v21 = vld [vmem:[%s9265_s17 + $0x48] sm:$0xff] }
  0xf4   : > { %8406 = vmatprep.mubr.msk.bf16.mxu1 %vm13116_vm12, %v2565_v47  ;;  %vm13123_vm12 = vmmov %vm13106_vm6  ;;  %v13138_v47 = vld [vmem:[#allocation16_spill] sm:$0xff] }
  0xf9   : > { %8373 = vmatmul.mubr.msk.bf16.gmra.mxu0 %vm13122_vm9, %v13121_v10  ;;  %vm13127_vm9 = vmmov %vm13106_vm6  ;;  %v2826_v10 = vld [vmem:[%s9265_s17 + $0x50] sm:$0xff] }
  0xfa   : > { %8376 = vmatprep.mubr.msk.bf16.mxu0 %vm13125_vm10, %v13124_v33  ;;  %vm13130_vm10 = vmmov %vm13106_vm6  ;;  %v2828_v33 = vld [vmem:[%s9265_s17 + $0x60] sm:$0xff]  ;;  %v2858_v9 = vsel %vm13144_vm3, %v2826_v10, 0.0  ;;  %v13149_v10 = vld [vmem:[#allocation23_spill] sm:$0xff] }
  0xfb   : > { %8407 = vmatmul.mubr.msk.bf16.gmra.mxu1 %vm13106_vm6, %v2566_v3  ;;  %vm13150_vm3 = vnez %v13149_v10 }
  0xfc   : > { %8410 = vmatprep.mubr.msk.bf16.mxu1 %vm13123_vm12, %v2567_v35  ;;  %vm13128_vm12 = vmmov %vm13106_vm6 }
 0x101   : > { %8377 = vmatmul.mubr.msk.bf16.gmra.mxu0 %vm13127_vm9, %v13126_v19 }
 0x102   : > { %8380 = vmatprep.mubr.msk.bf16.mxu0 %vm13130_vm10, %v13129_v24  ;;  %vm13134_vm10 = vmmov %vm13127_vm9  ;;  %v3154_v24 = vld [vmem:[%s9265_s17 + $0x69] sm:$0xff] }
 0x103   : > { %8411 = vmatmul.mubr.msk.bf16.gmra.mxu1 %vm13106_vm6, %v2568_v29  ;;  %vm13132_vm6 = vnez %v13131_v32  ;;  %v3151_v29 = vld [vmem:[%s9265_s17 + $0x51] sm:$0xff]  ;;  %v3181_v17 = vpack.c.bf16 %v3154_v24, %v3153_v56 }
 0x104   : > { %8414 = vmatprep.mubr.msk.bf16.mxu1 %vm13128_vm12, %v2569_v2  ;;  %v2852_v44 = vsel %vm13132_vm6, %v2820_v22, 0.0  ;;  %vm13133_vm12 = vmmov %vm13127_vm9  ;;  %v3152_v2 = vld [vmem:[%s9265_s17 + $0x59] sm:$0xff]  ;;  %v2846_v32 = vld [vmem:[%s9265_s17 + $0xf0] sm:$0xff] }
 0x105   : > { %v2884_v62 = vpack.c.bf16 %v2821_v7, %v2852_v44  ;;  %vm13135_vm6 = vmmov %vm13127_vm9 }
 0x109   : > { %8381 = vmatmul.mubr.msk.bf16.gmra.mxu0 %vm13133_vm12, %v10102_v6  ;;  %vm13140_vm12 = vcmask 1041408  }
 0x10a   : > { %8420 = vmatprep.mubr.msk.bf16.mxu0 %vm13135_vm6, %v2884_v62  ;;  %v3572_v35 = vsel %vm13140_vm12, %v9991_v54, 0  ;;  %vm13143_vm12 = vmmov %vm13135_vm6  ;;  %v2827_v54 = vld [vmem:[%s9265_s17 + $0x58] sm:$0xff] }
 0x10b   : > { %8415 = vmatmul.mubr.msk.bf16.gmra.mxu1 %vm13127_vm9, %v2570_v16  ;;  %vm13139_vm9 = vnez %v13138_v47  ;;  %v3180_v16 = vpack.c.bf16 %v3152_v2, %v3151_v29  ;;  %v2887_v62 = vpack.c.bf16 %v2827_v54, %v2858_v9  ;;  %v2833_v2 = vld [vmem:[%s9265_s17 + $0x88] sm:$0xff] }
 0x10c   : > { %8454 = vmatprep.mubr.msk.bf16.mxu1 %vm13134_vm10, %v3177_v51  ;;  %v2856_v28 = vsel %vm13139_vm9, %v2824_v36, 0.0  ;;  %vm13141_vm10 = vmmov %vm13135_vm6 }
 0x10d   : > { %v2886_v3 = vpack.c.bf16 %v2825_v21, %v2856_v28  ;;  %vm13142_vm9 = vmmov %vm13135_vm6  ;;  %v2832_v21 = vld [vmem:[%s9265_s17 + $0x80] sm:$0xff] }
 0x111   : > { %v8218_v50 = vpop.f32.mrf.mxu0  ;;  %8421 = vmatmul.mubr.msk.bf16.vlgmr.msra.gmra.mxu0 %vm13141_vm10, %v2885_v13  ;;  %vm13146_vm10 = vmmov %vm13142_vm9  ;;  %v3156_v13 = vld [vmem:[%s9265_s17 + $0x79] sm:$0xff] }
 0x112   : > { %8487 = vmatpush3.bf16.msra.mxu0 %v3572_v35  ;;  %8424 = vmatprep.mubr.msk.bf16.mxu0 %vm13143_vm12, %v2886_v3  ;;  %vm13147_vm12 = vmmov %vm13142_vm9  ;;  %v2831_v35 = vld [vmem:[%s9265_s17 + $0x78] sm:$0xff] }
 0x113   : > { %v8252_v15 = vpop.f32.mrf.mxu1  ;;  %8455 = vmatmul.mubr.msk.bf16.vlgmr.msra.gmra.mxu1 %vm13135_vm6, %v3178_v45  ;;  %v1141_v55 = vpop.f32.mrf.mxu0  ;;  %vm13145_vm6 = vnez %v12942_v46  ;;  %v3155_v45 = vld [vmem:[%s9265_s17 + $0x71] sm:$0xff] }
 0x114   : > { %8458 = vmatprep.mubr.msk.bf16.mxu1 %vm13142_vm9, %v3179_v5  ;;  %v10130_v22 = vadd.f32 %v8252_v15, %v8218_v50  ;;  %v2860_v48 = vsel %vm13145_vm6, %v2828_v33, 0.0  ;;  %vm13148_vm6 = vmmov %vm13142_vm9  ;;  %v2862_v15 = vsel %vm13150_vm3, %v2830_v53, 0.0  ;;  %v3157_v33 = vld [vmem:[%s9265_s17 + $0x81] sm:$0xff]  ;;  %v3158_v50 = vld [vmem:[%s9265_s17 + $0x89] sm:$0xff]  ;;  %v3182_v24 = vpack.c.bf16 %v3156_v13, %v3155_v45 }
 0x115   : > { %v1353_v19 = vpop.f32.mrf.mxu1  ;;  %v8219_v51 = vpop.f32.mrf.mxu0  ;;  %v2888_v0 = vpack.c.bf16 %v2829_v49, %v2860_v48  ;;  %v2889_v49 = vpack.c.bf16 %v2831_v35, %v2862_v15  ;;  %v3183_v48 = vpack.c.bf16 %v3158_v50, %v3157_v33  ;;  %v2835_v13 = vld [vmem:[%s9265_s17 + $0x98] sm:$0xff]  ;;  %v3161_v15 = vld [vmem:[%s9265_s17 + $0xa1] sm:$0xff]  ;;  %v3162_v33 = vld [vmem:[%s9265_s17 + $0xa9] sm:$0xff] }
 0x116   : > { %v10141_v7 = vadd.f32 %v1353_v19, %v1141_v55  ;;  %v13151_v19 = vld [vmem:[#allocation24_spill] sm:$0xff] }
 0x117   : > { %v8253_v44 = vpop.f32.mrf.mxu1  ;;  %v1144_v58 = vpop.f32.mrf.mxu0  ;;  %v2842_v46 = vld [vmem:[%s9265_s17 + $0xd0] sm:$0xff] }
 0x118   : > { %v10143_v36 = vadd.f32 %v8253_v44, %v8219_v51 }
 0x119   : > { %v1356_v4 = vpop.f32.mrf.mxu1  ;;  %v8222_v28 = vpop.f32.mrf.mxu0  ;;  %8425 = vmatmul.mubr.msk.bf16.gmra.mxu0 %vm13146_vm10, %v2887_v62  ;;  %vm13153_vm10 = vmmov %vm13148_vm6 }
 0x11a   : > { %v10146_v18 = vadd.f32 %v1356_v4, %v1144_v58  ;;  %8428 = vmatprep.mubr.msk.bf16.mxu0 %vm13148_vm6, %v2888_v0  ;;  %v2836_v58 = vld [vmem:[%s9265_s17 + $0xa0] sm:$0xff] }
 0x11b   : > { %v8256_v26 = vpop.f32.mrf.mxu1  ;;  %8459 = vmatmul.mubr.msk.bf16.gmra.mxu1 %vm13142_vm9, %v3180_v16  ;;  %v1157_v29 = vpop.f32.mrf.mxu0  ;;  %vm13152_vm9 = vnez %v13151_v19 }
 0x11c   : > { %8462 = vmatprep.mubr.msk.bf16.mxu1 %vm13147_vm12, %v3181_v17  ;;  %v10154_v5 = vadd.f32 %v8256_v26, %v8222_v28  ;;  %v2864_v54 = vsel %vm13152_vm9, %v2832_v21, 0.0  ;;  %v2834_v17 = vld [vmem:[%s9265_s17 + $0x90] sm:$0xff]  ;;  %vm13154_vm12 = vmmov %vm13148_vm6  ;;  %v3160_v21 = vld [vmem:[%s9265_s17 + $0x99] sm:$0xff] }
 0x11d   : > { %v1369_v3 = vpop.f32.mrf.mxu1  ;;  %v8223_v55 = vpop.f32.mrf.mxu0  ;;  %v2890_v51 = vpack.c.bf16 %v2833_v2, %v2864_v54  ;;  %v3159_v26 = vld [vmem:[%s9265_s17 + $0x91] sm:$0xff]  ;;  %vm13155_vm9 = vmmov %vm13148_vm6 }
 0x11e   : > { %v10165_v9 = vadd.f32 %v1369_v3, %v1157_v29  ;;  %v13156_v3 = vld [vmem:[#allocation27_spill] sm:$0xff]  ;;  %v13158_v2 = vld [vmem:[#allocation28_spill] sm:$0xff] }
 0x11f   : > { %v8257_v56 = vpop.f32.mrf.mxu1  ;;  %v1160_v62 = vpop.f32.mrf.mxu0  ;;  %vm13157_vm3 = vnez %v13156_v3  ;;  %v2837_v29 = vld [vmem:[%s9265_s17 + $0xa8] sm:$0xff] }
 0x120   : > { %v10167_v44 = vadd.f32 %v8257_v56, %v8223_v55  ;;  %v2866_v35 = vsel %vm13157_vm3, %v2834_v17, 0.0  ;;  %v3184_v55 = vpack.c.bf16 %v3160_v21, %v3159_v26  ;;  %v2840_v26 = vld [vmem:[%s9265_s17 + $0xc0] sm:$0xff] }
 0x121   : > { %v1372_v16 = vpop.f32.mrf.mxu1  ;;  %v8226_v53 = vpop.f32.mrf.mxu0  ;;  %8429 = vmatmul.mubr.msk.bf16.gmra.mxu0 %vm13153_vm10, %v2889_v49  ;;  %vm13160_vm10 = vmmov %vm13155_vm9 }
 0x122   : > { %v10170_v4 = vadd.f32 %v1372_v16, %v1160_v62  ;;  %8432 = vmatprep.mubr.msk.bf16.mxu0 %vm13155_vm9, %v2890_v51  ;;  %v3185_v16 = vpack.c.bf16 %v3162_v33, %v3161_v15  ;;  %v2839_v33 = vld [vmem:[%s9265_s17 + $0xb8] sm:$0xff] }
 0x123   : > { %v8260_v0 = vpop.f32.mrf.mxu1  ;;  %8463 = vmatmul.mubr.msk.bf16.gmra.mxu1 %vm13148_vm6, %v3182_v24  ;;  %v1173_v50 = vpop.f32.mrf.mxu0  ;;  %vm13159_vm6 = vnez %v13158_v2 }
 0x124   : > { %8466 = vmatprep.mubr.msk.bf16.mxu1 %vm13154_vm12, %v3183_v48  ;;  %v10178_v28 = vadd.f32 %v8260_v0, %v8226_v53  ;;  %v2868_v54 = vsel %vm13159_vm6, %v2836_v58, 0.0  ;;  %v2891_v48 = vpack.c.bf16 %v2835_v13, %v2866_v35  ;;  %v2838_v53 = vld [vmem:[%s9265_s17 + $0xb0] sm:$0xff]  ;;  %vm13161_vm12 = vmmov %vm13155_vm9  ;;  %v3164_v13 = vld [vmem:[%s9265_s17 + $0xb9] sm:$0xff] }
 0x125   : > { %v1385_v45 = vpop.f32.mrf.mxu1  ;;  %v8227_v49 = vpop.f32.mrf.mxu0  ;;  %v2892_v17 = vpack.c.bf16 %v2837_v29, %v2868_v54  ;;  %vm13162_vm6 = vmmov %vm13155_vm9  ;;  %v3165_v54 = vld [vmem:[%s9265_s17 + $0xc1] sm:$0xff] }
 0x126   : > { %v10189_v56 = vadd.f32 %v1385_v45, %v1173_v50  ;;  %v3163_v45 = vld [vmem:[%s9265_s17 + $0xb1] sm:$0xff] }
 0x127   : > { %v8261_v24 = vpop.f32.mrf.mxu1  ;;  %v1176_v0 = vpop.f32.mrf.mxu0  ;;  %v13163_v50 = vld [vmem:[#allocation31_spill] sm:$0xff] }
 0x128   : > { %v10191_v51 = vadd.f32 %v8261_v24, %v8227_v49  ;;  %vm13164_vm3 = vnez %v13163_v50  ;;  %v3166_v24 = vld [vmem:[%s9265_s17 + $0xc9] sm:$0xff] }
 0x129   : > { %v1388_v62 = vpop.f32.mrf.mxu1  ;;  %v8230_v21 = vpop.f32.mrf.mxu0  ;;  %8433 = vmatmul.mubr.msk.bf16.gmra.mxu0 %vm13160_vm10, %v2891_v48  ;;  %v2870_v29 = vsel %vm13164_vm3, %v2838_v53, 0.0  ;;  %v2841_v49 = vld [vmem:[%s9265_s17 + $0xc8] sm:$0xff]  ;;  %v3187_v3 = vpack.c.bf16 %v3166_v24, %v3165_v54  ;;  %vm13167_vm10 = vmmov %vm13162_vm6  ;;  %v2843_v24 = vld [vmem:[%s9265_s17 + $0xd8] sm:$0xff] }
 0x12a   : > { %v10194_v2 = vadd.f32 %v1388_v62, %v1176_v0  ;;  %8436 = vmatprep.mubr.msk.bf16.mxu0 %vm13162_vm6, %v2892_v17  ;;  %v13165_v62 = vld [vmem:[#allocation32_spill] sm:$0xff]  ;;  %v2893_v17 = vpack.c.bf16 %v2839_v33, %v2870_v29 }
 0x12b   : > { %v8264_v58 = vpop.f32.mrf.mxu1  ;;  %8467 = vmatmul.mubr.msk.bf16.gmra.mxu1 %vm13155_vm9, %v3184_v55  ;;  %v1189_v55 = vpop.f32.mrf.mxu0  ;;  %vm13166_vm9 = vnez %v13165_v62  ;;  %v3168_v33 = vld [vmem:[%s9265_s17 + $0xd9] sm:$0xff] }
 0x12c   : > { %8470 = vmatprep.mubr.msk.bf16.mxu1 %vm13161_vm12, %v3185_v16  ;;  %v10202_v35 = vadd.f32 %v8264_v58, %v8230_v21  ;;  %v2872_v48 = vsel %vm13166_vm9, %v2840_v26, 0.0  ;;  %v3186_v58 = vpack.c.bf16 %v3164_v13, %v3163_v45  ;;  %v2844_v45 = vld [vmem:[%s9265_s17 + $0xe0] sm:$0xff]  ;;  %vm13168_vm12 = vmmov %vm13162_vm6 }
 0x12d   : > { %v1401_v15 = vpop.f32.mrf.mxu1  ;;  %v8231_v21 = vpop.f32.mrf.mxu0  ;;  %v2894_v19 = vpack.c.bf16 %v2841_v49, %v2872_v48  ;;  %vm13169_vm9 = vmmov %vm13162_vm6  ;;  %v3169_v49 = vld [vmem:[%s9265_s17 + $0xe1] sm:$0xff]  ;;  %v3170_v48 = vld [vmem:[%s9265_s17 + $0xe9] sm:$0xff] }
 0x12e   : > { %v10213_v16 = vadd.f32 %v1401_v15, %v1189_v55  ;;  %v3167_v15 = vld [vmem:[%s9265_s17 + $0xd1] sm:$0xff]  ;;  %v3189_v42 = vpack.c.bf16 %v3170_v48, %v3169_v49 }
 0x12f   : > { %v8265_v0 = vpop.f32.mrf.mxu1  ;;  %v1192_v10 = vpop.f32.mrf.mxu0 }
 0x130   : > { %v10215_v50 = vadd.f32 %v8265_v0, %v8231_v21  ;;  %v13172_v21 = vld [vmem:[#allocation36_spill] sm:$0xff] }
 0x131   : > { %v1404_v53 = vpop.f32.mrf.mxu1  ;;  %v8234_v13 = vpop.f32.mrf.mxu0  ;;  %8437 = vmatmul.mubr.msk.bf16.gmra.mxu0 %vm13167_vm10, %v2893_v17  ;;  %vm13174_vm10 = vmmov %vm13169_vm9 }
 0x132   : > { %v10218_v62 = vadd.f32 %v1404_v53, %v1192_v10  ;;  %8440 = vmatprep.mubr.msk.bf16.mxu0 %vm13169_vm9, %v2894_v19  ;;  %v13170_v10 = vld [vmem:[#allocation35_spill] sm:$0xff] }
 0x133   : > { %v8268_v26 = vpop.f32.mrf.mxu1  ;;  %8471 = vmatmul.mubr.msk.bf16.gmra.mxu1 %vm13162_vm6, %v3186_v58  ;;  %vm13171_vm3 = vnez %v13170_v10  ;;  %v1205_v0 = vpop.f32.mrf.mxu0  ;;  %v2845_v58 = vld [vmem:[%s9265_s17 + $0xe8] sm:$0xff]  ;;  %vm13173_vm6 = vnez %v13172_v21 }
 0x134   : > { %8474 = vmatprep.mubr.msk.bf16.mxu1 %vm13168_vm12, %v3187_v3  ;;  %v10226_v29 = vadd.f32 %v8268_v26, %v8234_v13  ;;  %v2874_v55 = vsel %vm13171_vm3, %v2842_v46, 0.0  ;;  %v2876_v17 = vsel %vm13173_vm6, %v2844_v45, 0.0  ;;  %v3188_v26 = vpack.c.bf16 %v3168_v33, %v3167_v15  ;;  %vm13175_vm12 = vmmov %vm13169_vm9  ;;  %v3171_v15 = vld [vmem:[%s9265_s17 + $0xf1] sm:$0xff]  ;;  %v3172_v33 = vld [vmem:[%s9265_s17 + $0xf9] sm:$0xff] }
 0x135   : > { %v1417_v54 = vpop.f32.mrf.mxu1  ;;  %v8235_v13 = vpop.f32.mrf.mxu0  ;;  %v2895_v19 = vpack.c.bf16 %v2843_v24, %v2874_v55  ;;  %v2896_v47 = vpack.c.bf16 %v2845_v58, %v2876_v17  ;;  %vm13176_vm6 = vmmov %vm13169_vm9  ;;  %v2847_v55 = vld [vmem:[%s9265_s17 + $0xf8] sm:$0xff]  ;;  %vm13177_vm3 = vnez %v12979_v37 }
 0x136   : > { %v10237_v3 = vadd.f32 %v1417_v54, %v1205_v0  ;;  %v2878_v49 = vsel %vm13177_vm3, %v2846_v32, 0.0  ;;  %v3445_v37 = vld [vmem:[%s9265_s17 + $0x3a] sm:$0xff] }
 0x137   : > { %v8269_v53 = vpop.f32.mrf.mxu1  ;;  %v10243_v60 = vpop.f32.mrf.mxu0 }
 0x138   : > { %v10239_v10 = vadd.f32 %v8269_v53, %v8235_v13  ;;  %v2897_v53 = vpack.c.bf16 %v2847_v55, %v2878_v49 }
 0x139   : > { %v10241_v46 = vpop.f32.mrf.mxu1  ;;  %v8238_v45 = vpop.f32.mrf.mxu0  ;;  %8441 = vmatmul.mubr.msk.bf16.gmra.mxu0 %vm13174_vm10, %v2895_v19  ;;  %v2850_v19 = vld [vmem:[%s9265_s17 + $0x110] sm:$0xff]  ;;  %vm13180_vm10 = vmmov %vm13176_vm6 }
 0x13a   : > { %8444 = vmatprep.mubr.msk.bf16.mxu0 %vm13176_vm6, %v2896_v47 }
 0x13b   : > { %v8272_v21 = vpop.f32.mrf.mxu1  ;;  %8475 = vmatmul.mubr.msk.bf16.gmra.mxu1 %vm13169_vm9, %v3188_v26  ;;  %v1221_v48 = vpop.f32.mrf.mxu0  ;;  %vm13178_vm9 = vnez %v12982_v52 }
 0x13c   : > { %8478 = vmatprep.mubr.msk.bf16.mxu1 %vm13175_vm12, %v3189_v42  ;;  %v10251_v54 = vadd.f32 %v8272_v21, %v8238_v45  ;;  %v2880_v0 = vsel %vm13178_vm9, %v9941_v14, 0.0  ;;  %v3190_v21 = vpack.c.bf16 %v3172_v33, %v3171_v15  ;;  %v3443_v45 = vld [vmem:[%s9265_s17 + $0x2a] sm:$0xff]  ;;  %vm13181_vm12 = vmmov %vm13176_vm6  ;;  %v3176_v33 = vld [vmem:[%s9265_s17 + $0x119] sm:$0xff] }
 0x13d   : > { %v1433_v24 = vpop.f32.mrf.mxu1  ;;  %v8239_v17 = vpop.f32.mrf.mxu0  ;;  %v2898_v32 = vpack.c.bf16 %v9954_v41, %v2880_v0  ;;  %v3175_v15 = vld [vmem:[%s9265_s17 + $0x111] sm:$0xff]  ;;  %vm13182_vm9 = vmmov %vm13176_vm6 }
 0x13e   : > { %v10260_v58 = vadd.f32 %v1433_v24, %v1221_v48  ;;  %v2851_v41 = vld [vmem:[%s9265_s17 + $0x118] sm:$0xff]  ;;  %v2882_v48 = vsel %vm9597_vm1, %v2850_v19, 0.0  ;;  %vm13188_vm1 = vnez %v13000_v27 }
 0x13f   : > { %v8273_v42 = vpop.f32.mrf.mxu1  ;;  %v10267_v13 = vpop.f32.mrf.mxu0 }
 0x140   : > { %v10262_v26 = vadd.f32 %v8273_v42, %v8239_v17  ;;  %v3442_v42 = vld [vmem:[%s9265_s17 + $0x22] sm:$0xff] }
 0x141   : > { %v10264_v47 = vpop.f32.mrf.mxu1  ;;  %v8242_v24 = vpop.f32.mrf.mxu0  ;;  %8445 = vmatmul.mubr.msk.bf16.gmra.mxu0 %vm13180_vm10, %v2897_v53  ;;  %v3192_v53 = vpack.c.bf16 %v3176_v33, %v3175_v15  ;;  %vm13186_vm10 = vmmov %vm13182_vm9 }
 0x142   : > { %13179 = vst [vmem:[#allocation17_spill] sm:$0xff] %v10264_v47  ;;  %8448 = vmatprep.mubr.msk.bf16.mxu0 %vm13182_vm9, %v2898_v32 }
 0x143   : > { %v8276_v14 = vpop.f32.mrf.mxu1  ;;  %8479 = vmatmul.mubr.msk.bf16.gmra.mxu1 %vm13176_vm6, %v3190_v21  ;;  %v1237_v0 = vpop.f32.mrf.mxu0  ;;  %vm13183_vm6 = vnez %v12993_v57 }
 0x144   : > { %8482 = vmatprep.mubr.msk.bf16.mxu1 %vm13181_vm12, %v10102_v6  ;;  %v10277_v55 = vadd.f32 %v8276_v14, %v8242_v24  ;;  %v3475_v21 = vsel %vm13183_vm6, %v3443_v45, 0.0  ;;  %v2899_v24 = vpack.c.bf16 %v2851_v41, %v2882_v48  ;;  %v3447_v45 = vld [vmem:[%s9265_s17 + $0x4a] sm:$0xff]  ;;  %vm13187_vm12 = vmmov %vm13182_vm9  ;;  %v3444_v41 = vld [vmem:[%s9265_s17 + $0x32] sm:$0xff]  ;;  %v3477_v48 = vsel %vm13188_vm1, %v3445_v37, 0.0 }
 0x145   : > { %v1449_v49 = vpop.f32.mrf.mxu1  ;;  %v8243_v14 = vpop.f32.mrf.mxu0  ;;  %v3506_v25 = vpack.c.bf16 %v3475_v21, %v3442_v42  ;;  %v3446_v42 = vld [vmem:[%s9265_s17 + $0x42] sm:$0xff]  ;;  %v3479_v21 = vsel %vm13084_vm14, %v3447_v45, 0.0  ;;  %v3449_v37 = vld [vmem:[%s9265_s17 + $0x5a] sm:$0xff] }
 0x146   : > { %v10286_v17 = vadd.f32 %v1449_v49, %v1237_v0 }
 0x147   : > { %v8277_v6 = vpop.f32.mrf.mxu1  ;;  %v10292_v19 = vpop.f32.mrf.mxu0 }
 0x148   : > { %v10288_v52 = vadd.f32 %v8277_v6, %v8243_v14  ;;  %13185 = vst [vmem:[#allocation21_spill] sm:$0xff] %v10292_v19  ;;  %v3507_v14 = vpack.c.bf16 %v3477_v48, %v3444_v41  ;;  %v3448_v41 = vld [vmem:[%s9265_s17 + $0x52] sm:$0xff]  ;;  %v3481_v48 = vsel %vm9691_vm0, %v3449_v37, 0.0 }
 0x149   : > { %v10290_v32 = vpop.f32.mrf.mxu1  ;;  %v8246_v49 = vpop.f32.mrf.mxu0  ;;  %8449 = vmatmul.mubr.msk.bf16.gmra.mxu0 %vm13186_vm10, %v2899_v24  ;;  %vm13190_vm10 = vmmov %vm13182_vm9 }
 0x14a   : > { %13184 = vst [vmem:[#allocation18_spill] sm:$0xff] %v10290_v32  ;;  %8488 = vmatprep.mubr.msk.bf16.mxu0 %vm13187_vm12, %v3506_v25  ;;  %v3451_v32 = vld [vmem:[%s9265_s17 + $0x6a] sm:$0xff]  ;;  %vm13191_vm12 = vmmov %vm13182_vm9 }
 0x14b   : > { %v8280_v47 = vpop.f32.mrf.mxu1  ;;  %8483 = vmatmul.mubr.msk.bf16.gmra.mxu1 %vm13182_vm9, %v3192_v53  ;;  %v1253_v0 = vpop.f32.mrf.mxu0 }
 0x14c   : > { %v10298_v15 = vadd.f32 %v8280_v47, %v8246_v49  ;;  %v3508_v49 = vpack.c.bf16 %v3479_v21, %v3446_v42  ;;  %v3450_v42 = vld [vmem:[%s9265_s17 + $0x62] sm:$0xff]  ;;  %v3483_v21 = vsel %vm9695_vm13, %v3451_v32, 0.0  ;;  %vm13348_vm13 = vcmask 523264  }
 0x14d   : > { %v1465_v33 = vpop.f32.mrf.mxu1  ;;  %v8247_v47 = vpop.f32.mrf.mxu0  ;;  %v3510_v37 = vpack.c.bf16 %v3483_v21, %v3450_v42 }
 0x14e   : > { %v10307_v6 = vadd.f32 %v1465_v33, %v1253_v0 }
 0x14f   : > { %v8281_v53 = vpop.f32.mrf.mxu1  ;;  %v10313_v57 = vpop.f32.mrf.mxu0 }
 0x150   : > { %v10309_v24 = vadd.f32 %v8281_v53, %v8247_v47 }
 0x151   : > { %v10311_v25 = vpop.f32.mrf.mxu1  ;;  %v8286_v19 = vpop.f32.mrf.mxu0  ;;  %8489 = vmatmul.mubr.msk.bf16.vlgmr.msra.gmra.mxu0 %vm13182_vm9, %v3507_v14 }
 0x152   : > { %13189 = vst [vmem:[#allocation22_spill] sm:$0xff] %v10311_v25  ;;  %v1839_v45 = vadd.f32 %v8286_v19, %v10130_v22  ;;  %8492 = vmatprep.mubr.msk.bf16.mxu0 %vm13190_vm10, %v3508_v49  ;;  %v3509_v19 = vpack.c.bf16 %v3481_v48, %v3448_v41  ;;  %v3452_v41 = vld [vmem:[%s9265_s17 + $0x72] sm:$0xff]  ;;  %v3485_v48 = vsel %vm9728_vm4, %v3453_v12, 0.0  ;;  %vm13192_vm10 = vmmov %vm13182_vm9 }
 0x153   : > { %v8320_v27 = vpop.f32.mrf.mxu1  ;;  %v1710_v0 = vpop.f32.mrf.mxu0 }
 0x154   : > { %v1837_v53 = vadd.f32 %v1710_v0, %v10141_v7  ;;  %v10327_v47 = vadd.f32 %v8320_v27, %v1839_v45  ;;  %v3455_v45 = vld [vmem:[%s9265_s17 + $0x8a] sm:$0xff] }
 0x155   : > { %v2039_v33 = vpop.f32.mrf.mxu1  ;;  %v8287_v22 = vpop.f32.mrf.mxu0 }
 0x156   : > { %v1840_v49 = vadd.f32 %v8287_v22, %v10143_v36  ;;  %v10330_v1 = vadd.f32 %v2039_v33, %v1837_v53  ;;  %v3511_v22 = vpack.c.bf16 %v3485_v48, %v3452_v41  ;;  %v3456_v41 = vld [vmem:[%s9265_s17 + $0x92] sm:$0xff]  ;;  %v3489_v48 = vsel %vm9773_vm8, %v3457_v8, 0.0 }
 0x157   : > { %v8321_v14 = vpop.f32.mrf.mxu1  ;;  %v1713_v25 = vpop.f32.mrf.mxu0 }
 0x158   : > { %v10336_v32 = vadd.f32 %v1713_v25, %v10146_v18  ;;  %v10338_v7 = vadd.f32 %v8321_v14, %v1840_v49  ;;  %v3454_v18 = vld [vmem:[%s9265_s17 + $0x82] sm:$0xff]  ;;  %v3487_v25 = vsel %vm9738_vm15, %v3455_v45, 0.0  ;;  %vm13197_vm15 = vnez %v13044_v38 }
 0x159   : > { %v10332_v40 = vpop.f32.mrf.mxu1  ;;  %v8290_v0 = vpop.f32.mrf.mxu0  ;;  %8493 = vmatmul.mubr.msk.bf16.gmra.mxu0 %vm13191_vm12, %v3509_v19  ;;  %v3512_v12 = vpack.c.bf16 %v3487_v25, %v3454_v18  ;;  %vm13193_vm12 = vmmov %vm13182_vm9 }
 0x15a   : > { %v1843_v36 = vadd.f32 %v8290_v0, %v10154_v5  ;;  %8496 = vmatprep.mubr.msk.bf16.mxu0 %vm13182_vm9, %v3510_v37  ;;  %vm13194_vm9 = vnez %v13035_v11  ;;  %v3461_v11 = vld [vmem:[%s9265_s17 + $0xba] sm:$0xff] }
 0x15b   : > { %v8324_v27 = vpop.f32.mrf.mxu1  ;;  %v1726_v42 = vpop.f32.mrf.mxu0 }
 0x15c   : > { %v1841_v21 = vadd.f32 %v1726_v42, %v10165_v9  ;;  %v10351_v53 = vadd.f32 %v8324_v27, %v1843_v36  ;;  %v3459_v36 = vld [vmem:[%s9265_s17 + $0xaa] sm:$0xff] }
 0x15d   : > { %v2055_v33 = vpop.f32.mrf.mxu1  ;;  %v8291_v5 = vpop.f32.mrf.mxu0  ;;  %v3491_v25 = vsel %vm13194_vm9, %v3459_v36, 0.0  ;;  %vm13196_vm9 = vnez %v13040_v61 }
 0x15e   : > { %v1844_v19 = vadd.f32 %v8291_v5, %v10167_v44  ;;  %v10354_v49 = vadd.f32 %v2055_v33, %v1841_v21 }
 0x15f   : > { %v8325_v14 = vpop.f32.mrf.mxu1  ;;  %v1729_v0 = vpop.f32.mrf.mxu0 }
 0x160   : > { %v10360_v45 = vadd.f32 %v1729_v0, %v10170_v4  ;;  %v10362_v9 = vadd.f32 %v8325_v14, %v1844_v19  ;;  %v3458_v4 = vld [vmem:[%s9265_s17 + $0xa2] sm:$0xff] }
 0x161   : > { %v10356_v37 = vpop.f32.mrf.mxu1  ;;  %v8294_v42 = vpop.f32.mrf.mxu0  ;;  %8497 = vmatmul.mubr.msk.bf16.gmra.mxu0 %vm13192_vm10, %v3511_v22  ;;  %v3513_v22 = vpack.c.bf16 %v3489_v48, %v3456_v41  ;;  %v3514_v8 = vpack.c.bf16 %v3491_v25, %v3458_v4  ;;  %v3462_v25 = vld [vmem:[%s9265_s17 + $0xc2] sm:$0xff] }
 0x162   : > { %v1847_v44 = vadd.f32 %v8294_v42, %v10178_v28  ;;  %8500 = vmatprep.mubr.msk.bf16.mxu0 %vm13193_vm12, %v3512_v12  ;;  %vm13195_vm12 = vmmov %vm13192_vm10 }
 0x163   : > { %v8328_v27 = vpop.f32.mrf.mxu1  ;;  %v1742_v18 = vpop.f32.mrf.mxu0 }
 0x164   : > { %v1845_v21 = vadd.f32 %v1742_v18, %v10189_v56  ;;  %v10375_v14 = vadd.f32 %v8328_v27, %v1847_v44  ;;  %v3463_v44 = vld [vmem:[%s9265_s17 + $0xca] sm:$0xff]  ;;  %v3460_v18 = vld [vmem:[%s9265_s17 + $0xb2] sm:$0xff] }
 0x165   : > { %v2071_v33 = vpop.f32.mrf.mxu1  ;;  %v8295_v28 = vpop.f32.mrf.mxu0 }
 0x166   : > { %v1848_v19 = vadd.f32 %v8295_v28, %v10191_v51  ;;  %v10378_v12 = vadd.f32 %v2071_v33, %v1845_v21  ;;  %v8946_v51 = vld [vmem:[%s12739_s3 + $0x38] sm:$0xff]   ;;  %v3495_v21 = vsel %vm13197_vm15, %v3463_v44, 0.0 }
 0x167   : > { %v8329_v5 = vpop.f32.mrf.mxu1  ;;  %v1745_v42 = vpop.f32.mrf.mxu0  ;;  %8520 = vmatprep.subr.bf16.mxu1 %v8946_v51  ;;  %v3465_v44 = vld [vmem:[%s9265_s17 + $0xda] sm:$0xff] }
 0x168   : > { %v10384_v36 = vadd.f32 %v1745_v42, %v10194_v2  ;;  %v10386_v56 = vadd.f32 %v8329_v5, %v1848_v19  ;;  %v3493_v2 = vsel %vm13196_vm9, %v3461_v11, 0.0  ;;  %8521 = vmatpush3.bf16.msra.mxu1 %v8946_v51 }
 0x169   : > { %v10380_v0 = vpop.f32.mrf.mxu1  ;;  %v8298_v41 = vpop.f32.mrf.mxu0  ;;  %8501 = vmatmul.mubr.msk.bf16.gmra.mxu0 %vm13192_vm10, %v3513_v22  ;;  %v3515_v19 = vpack.c.bf16 %v3493_v2, %v3460_v18  ;;  %v3464_v18 = vld [vmem:[%s9265_s17 + $0xd2] sm:$0xff]  ;;  %v3497_v2 = vsel %vm13117_vm2, %v3465_v44, 0.0 }
 0x16a   : > { %v1851_v33 = vadd.f32 %v8298_v41, %v10202_v35  ;;  %8504 = vmatprep.mubr.msk.bf16.mxu0 %vm13195_vm12, %v3514_v8  ;;  %v3516_v41 = vpack.c.bf16 %v3495_v21, %v3462_v25  ;;  %vm13198_vm12 = vmmov %vm13192_vm10 }
 0x16b   : > { %v8332_v27 = vpop.f32.mrf.mxu1  ;;  %v1758_v4 = vpop.f32.mrf.mxu0 }
 0x16c   : > { %v1849_v5 = vadd.f32 %v1758_v4, %v10213_v16  ;;  %v10402_v28 = vadd.f32 %v8332_v27, %v1851_v33  ;;  %v3467_v33 = vld [vmem:[%s9265_s17 + $0xea] sm:$0xff] }
 0x16d   : > { %v2087_v48 = vpop.f32.mrf.mxu1  ;;  %v8299_v22 = vpop.f32.mrf.mxu0 }
 0x16e   : > { %v1852_v8 = vadd.f32 %v8299_v22, %v10215_v50  ;;  %v10405_v11 = vadd.f32 %v2087_v48, %v1849_v5 }
 0x16f   : > { %v8333_v35 = vpop.f32.mrf.mxu1  ;;  %v1761_v38 = vpop.f32.mrf.mxu0 }
 0x170   : > { %v10411_v51 = vadd.f32 %v1761_v38, %v10218_v62  ;;  %v10413_v16 = vadd.f32 %v8333_v35, %v1852_v8  ;;  %v3466_v38 = vld [vmem:[%s9265_s17 + $0xe2] sm:$0xff]  ;;  %v3499_v62 = vsel %vm13120_vm5, %v3467_v33, 0.0  ;;  %vm13201_vm5 = vnez %v13074_v34 }
 0x171   : > { %v10407_v42 = vpop.f32.mrf.mxu1  ;;  %v8302_v4 = vpop.f32.mrf.mxu0  ;;  %8505 = vmatmul.mubr.msk.bf16.gmra.mxu0 %vm13192_vm10, %v3515_v19  ;;  %v3518_v44 = vpack.c.bf16 %v3499_v62, %v3466_v38 }
 0x172   : > { %v1855_v50 = vadd.f32 %v8302_v4, %v10226_v29  ;;  %8508 = vmatprep.mubr.msk.bf16.mxu0 %vm13198_vm12, %v3516_v41  ;;  %v3517_v29 = vpack.c.bf16 %v3497_v2, %v3464_v18  ;;  %vm13199_vm12 = vmmov %vm13192_vm10  ;;  %v3501_v18 = vsel %vm9899_vm11, %v3469_v43, 0.0 }
 0x173   : > { %v8336_v27 = vpop.f32.mrf.mxu1  ;;  %v1774_v25 = vpop.f32.mrf.mxu0 }
 0x174   : > { %v1853_v21 = vadd.f32 %v1774_v25, %v10237_v3  ;;  %v10426_v5 = vadd.f32 %v8336_v27, %v1855_v50  ;;  %v8947_v3 = vld [vmem:[%s12739_s3 + $0x30] sm:$0xff]   ;;  %v3503_v25 = vsel %vm9908_vm7, %v10079_v39, 0.0  ;;  %v3473_v39 = vld [vmem:[%s9265_s17 + $0x11a] sm:$0xff] }
 0x175   : > { %v2103_v48 = vpop.f32.mrf.mxu1  ;;  %v8303_v22 = vpop.f32.mrf.mxu0  ;;  %8522 = vmatprep.subr.bf16.mxu1 %v8947_v3 }
 0x176   : > { %v1856_v19 = vadd.f32 %v8303_v22, %v10239_v10  ;;  %v10429_v8 = vadd.f32 %v2103_v48, %v1853_v21  ;;  %v3468_v48 = vld [vmem:[%s9265_s17 + $0xf2] sm:$0xff]  ;;  %8523 = vmatpush3.bf16.msra.mxu1 %v8947_v3 }
 0x177   : > { %v8337_v35 = vpop.f32.mrf.mxu1  ;;  %v10433_v4 = vpop.f32.mrf.mxu0 }
 0x178   : > { %v10436_v23 = vadd.f32 %v8337_v35, %v1856_v19  ;;  %v3519_v35 = vpack.c.bf16 %v3501_v18, %v3468_v48  ;;  %v3520_v19 = vpack.c.bf16 %v3503_v25, %v10088_v30 }
 0x179   : > { %v10431_v41 = vpop.f32.mrf.mxu1  ;;  %v8306_v27 = vpop.f32.mrf.mxu0  ;;  %8509 = vmatmul.mubr.msk.bf16.gmra.mxu0 %vm13192_vm10, %v3517_v29 }
 0x17a   : > { %v1859_v10 = vadd.f32 %v8306_v27, %v10251_v54  ;;  %8512 = vmatprep.mubr.msk.bf16.mxu0 %vm13199_vm12, %v3518_v44  ;;  %vm13200_vm12 = vmmov %vm13192_vm10 }
 0x17b   : > { %v8340_v33 = vpop.f32.mrf.mxu1  ;;  %v1790_v2 = vpop.f32.mrf.mxu0 }
 0x17c   : > { %v1857_v38 = vadd.f32 %v1790_v2, %v10260_v58  ;;  %v10451_v62 = vadd.f32 %v8340_v33, %v1859_v10 }
 0x17d   : > { %v2119_v50 = vpop.f32.mrf.mxu1  ;;  %v8307_v21 = vpop.f32.mrf.mxu0 }
 0x17e   : > { %v1860_v22 = vadd.f32 %v8307_v21, %v10262_v26  ;;  %v10454_v29 = vadd.f32 %v2119_v50, %v1857_v38  ;;  %v3472_v26 = vld [vmem:[%s9265_s17 + $0x112] sm:$0xff]  ;;  %v3505_v50 = vsel %vm13201_vm5, %v3473_v39, 0.0 }
 0x17f   : > { %v8341_v54 = vpop.f32.mrf.mxu1  ;;  %v10459_v44 = vpop.f32.mrf.mxu0  ;;  %v3521_v38 = vpack.c.bf16 %v3505_v50, %v3472_v26 }
 0x180   : > { %v10462_v3 = vadd.f32 %v8341_v54, %v1860_v22 }
 0x181   : > { %v10456_v43 = vpop.f32.mrf.mxu1  ;;  %v8310_v33 = vpop.f32.mrf.mxu0  ;;  %8513 = vmatmul.mubr.msk.bf16.gmra.mxu0 %vm13192_vm10, %v3519_v35 }
 0x182   : > { %v1863_v27 = vadd.f32 %v8310_v33, %v10277_v55  ;;  %8516 = vmatprep.mubr.msk.bf16.mxu0 %vm13200_vm12, %v3520_v19  ;;  %vm12884_vm12 = vcmask 523264  }
 0x183   : > { %v8344_v58 = vpop.f32.mrf.mxu1  ;;  %v1806_v48 = vpop.f32.mrf.mxu0 }
 0x184   : > { %v1861_v30 = vadd.f32 %v1806_v48, %v10286_v17  ;;  %v10471_v18 = vadd.f32 %v8344_v58, %v1863_v27  ;;  %v8948_v17 = vld [vmem:[%s12739_s3 + $0x28] sm:$0xff]  }
 0x185   : > { %v2135_v10 = vpop.f32.mrf.mxu1  ;;  %v8311_v25 = vpop.f32.mrf.mxu0  ;;  %8524 = vmatprep.subr.bf16.mxu1 %v8948_v17 }
 0x186   : > { %v1864_v54 = vadd.f32 %v8311_v25, %v10288_v52  ;;  %v10474_v21 = vadd.f32 %v2135_v10, %v1861_v30  ;;  %8525 = vmatpush3.bf16.msra.mxu1 %v8948_v17 }
 0x187   : > { %v8345_v2 = vpop.f32.mrf.mxu1  ;;  %v10478_v35 = vpop.f32.mrf.mxu0  ;;  %8526 = vmatprep.subr.bf16.mxu1 %v8949_v59 }
 0x188   : > { %v10480_v22 = vadd.f32 %v8345_v2, %v1864_v54 }
 0x189   : > { %v10476_v55 = vpop.f32.mrf.mxu1  ;;  %v8314_v39 = vpop.f32.mrf.mxu0  ;;  %8517 = vmatmul.mubr.msk.bf16.gmra.mxu0 %vm13192_vm10, %v3521_v38  ;;  %vm3841_vm10 = vcmask 516096  }
 0x18a   : > { %v1867_v58 = vadd.f32 %v8314_v39, %v10298_v15  ;;  %8527 = vmatpush3.bf16.msra.mxu1 %v8949_v59 }
 0x18b   : > { %v8348_v19 = vpop.f32.mrf.mxu1  ;;  %v1822_v52 = vpop.f32.mrf.mxu0 }
 0x18c   : > { %v1865_v27 = vadd.f32 %v1822_v52, %v10307_v6  ;;  %v10488_v10 = vadd.f32 %v8348_v19, %v1867_v58 }
 0x18d   : > { %v2151_v33 = vpop.f32.mrf.mxu1  ;;  %v8315_v50 = vpop.f32.mrf.mxu0 }
 0x18e   : > { %v1868_v48 = vadd.f32 %v8315_v50, %v10309_v24  ;;  %v10491_v30 = vadd.f32 %v2151_v33, %v1865_v27  ;;  %v8950_v27 = vld [vmem:[%s12739_s3 + $0x18] sm:$0xff]  }
 0x18f   : > { %v8349_v26 = vpop.f32.mrf.mxu1  ;;  %v10495_v25 = vpop.f32.mrf.mxu0  ;;  %8560 = vmatprep.subr.bf16.mxu0 %v8950_v27 }
 0x190   : > { %v10497_v38 = vadd.f32 %v8349_v26, %v1868_v48  ;;  %8561 = vmatpush3.bf16.msra.mxu0 %v8950_v27  ;;  %v8951_v48 = vld [vmem:[%s12739_s3 + $0x10] sm:$0xff]  }
 0x191   : > { %v10493_v2 = vpop.f32.mrf.mxu1  ;;  %v8354_v54 = vpop.f32.mrf.mxu0  ;;  %8562 = vmatprep.subr.bf16.mxu0 %v8951_v48 }
 0x192   : > { %13202 = vst [vmem:[#allocation25_spill] sm:$0xff] %v10493_v2  ;;  %v10502_v17 = vadd.f32 %v8354_v54, %v10327_v47  ;;  %v9112_v54 = vmov 0.0  }
 0x193   : > { %v10499_v15 = vpop.f32.mrf.mxu1  ;;  %v2332_v19 = vpop.f32.mrf.mxu0  ;;  %3839 = vst.msk [vmem:[#allocation2] sm:$0xff] %vm12884_vm12, %v9112_v54  ;;  %3840 = vst.msk [vmem:[#allocation2 + $0x8] sm:$0xff] %vm12884_vm12, %v9112_v54 }
 0x194   : > { %v10507_v39 = vadd.f32 %v2332_v19, %v10330_v1  ;;  %3842 = vst.msk [vmem:[#allocation2 + $0x10] sm:$0x1] %vm3841_vm10, %v9112_v54  ;;  %3845 = vst.msk [vmem:[#allocation2 + $0x121] sm:$0x1] %vm3841_vm10, %v9112_v54  ;;  %8563 = vmatpush3.bf16.msra.mxu0 %v8951_v48 }
 0x195   : > { %v10504_v6 = vpop.f32.mrf.mxu1  ;;  %v8355_v58 = vpop.f32.mrf.mxu0  ;;  %3843 = vst.msk [vmem:[#allocation2 + $0x111] sm:$0xff] %vm12884_vm12, %v9112_v54  ;;  %3844 = vst.msk [vmem:[#allocation2 + $0x119] sm:$0xff] %vm12884_vm12, %v9112_v54  ;;  %v8952_v54 = vld [vmem:[%s12739_s3 + $0x8] sm:$0xff]  }
 0x196   : > { %v10512_v33 = vadd.f32 %v8355_v58, %v10338_v7  ;;  %8564 = vmatprep.subr.bf16.mxu0 %v8952_v54 }
 0x197   : > { %v10509_v24 = vpop.f32.mrf.mxu1  ;;  %v10519_v47 = vpop.f32.mrf.mxu0 }
 0x198   : > { %8565 = vmatpush3.bf16.msra.mxu0 %v8952_v54 }
 0x199   : > { %v10514_v52 = vpop.f32.mrf.mxu1  ;;  %v8358_v50 = vpop.f32.mrf.mxu0  ;;  %8566 = vmatprep.subr.bf16.mxu0 %v8953_v31 }
 0x19a   : > { %v10524_v1 = vadd.f32 %v8358_v50, %v10351_v53  ;;  %v3878_v63 = vld [vmem:[#allocation2] sm:$0xff]  ;;  %v3879_v54 = vld [vmem:[#allocation2 + $0x8] sm:$0xff] }
 0x19b   : > { %v10521_v26 = vpop.f32.mrf.mxu1  ;;  %v2348_v19 = vpop.f32.mrf.mxu0  ;;  %v3967_v59 = vld [vmem:[#allocation2 + $0x9] sm:$0xff] }
 0x19c   : > { %v10536_v53 = vadd.f32 %v2348_v19, %v10354_v49  ;;  %8567 = vmatpush3.bf16.msra.mxu0 %v8953_v31 }
 0x19d   : > { %v10526_v7 = vpop.f32.mrf.mxu1  ;;  %v8359_v27 = vpop.f32.mrf.mxu0 }
 0x19e   : > { %v10541_v50 = vadd.f32 %v8359_v27, %v10362_v9 }
 0x19f   : > { %v10538_v58 = vpop.f32.mrf.mxu1  ;;  %v10551_v49 = vpop.f32.mrf.mxu0 }
 0x1a0   : > { %13203 = vst [vmem:[#allocation26_spill] sm:$0xff] %v10538_v58  ;;  %13204 = vst [vmem:[#allocation29_spill] sm:$0xff] %v10541_v50  ;;  %v13210_v58 = vld [vmem:[#allocation14_spill] sm:$0xff] }
 0x1a1   : > { %v10543_v34 = vpop.f32.mrf.mxu1  ;;  %v8362_v48 = vpop.f32.mrf.mxu0  ;;  %vm13211_vm10 = vnez %v13210_v58 }
 0x1a2   : > { %13205 = vst [vmem:[#allocation30_spill] sm:$0xff] %v10543_v34  ;;  %v10556_v9 = vadd.f32 %v8362_v48, %v10375_v14  ;;  %v3966_v34 = vld [vmem:[#allocation2 + $0x1] sm:$0xff]  ;;  %v3910_v14 = vsel %vm13211_vm10, %v3878_v63, 0.0 }
 0x1a3   : > { %v10553_v19 = vpop.f32.mrf.mxu1  ;;  %v2364_v61 = vpop.f32.mrf.mxu0 }
 0x1a4   : > { %13206 = vst [vmem:[#allocation33_spill] sm:$0xff] %v10553_v19  ;;  %13207 = vst [vmem:[#allocation34_spill] sm:$0xff] %v10556_v9  ;;  %v10564_v20 = vadd.f32 %v2364_v61, %v10378_v12  ;;  %v3942_v9 = vpack.c.bf16 %v3879_v54, %v3910_v14 }
 0x1a5   : > { %v10558_v27 = vpop.f32.mrf.mxu1  ;;  %v8363_v48 = vpop.f32.mrf.mxu0 }
 0x1a6   : > { %13208 = vst [vmem:[#allocation37_spill] sm:$0xff] %v10558_v27  ;;  %v3998_v27 = vpack.c.bf16 %v3967_v59, %v3966_v34  ;;  %v10571_v50 = vadd.f32 %v8363_v48, %v10386_v56  ;;  %8568 = vmatprep.mubr.msk.bf16.mxu0 %vm12884_vm12, %v3942_v9  ;;  %v10599_v9 = vld [vmem:[%s12739_s3 + $0x58] sm:$0xff]  }
 0x1a7   : > { %v10566_v19 = vpop.f32.mrf.mxu1  ;;  %v10575_v61 = vpop.f32.mrf.mxu0  ;;  %13217 = vst [vmem:[#allocation63_spill] sm:$0xff] %v10599_v9  ;;  %8600 = vmatprep.subr.bf16.mxu1 %v10599_v9 }
 0x1a8   : > { %13209 = vst [vmem:[#allocation38_spill] sm:$0xff] %v10566_v19  ;;  %8528 = vmatprep.mubr.msk.bf16.mxu1 %vm12884_vm12, %v3998_v27 }
 0x1a9   : > { %v10573_v2 = vpop.f32.mrf.mxu1  ;;  %v8366_v19 = vpop.f32.mrf.mxu0 }
 0x1aa   : > { %v10582_v63 = vadd.f32 %v8366_v19, %v10402_v28 }
 0x1ab   : > { %v10579_v12 = vpop.f32.mrf.mxu1  ;;  %v2380_v34 = vpop.f32.mrf.mxu0 }
 0x1ac   : > { %v10587_v56 = vadd.f32 %v2380_v34, %v10405_v11 }
 0x1ad   : > { %v10584_v31 = vpop.f32.mrf.mxu1  ;;  %v8367_v54 = vpop.f32.mrf.mxu0 }
 0x1ae   : > { %13212 = vst [vmem:[#allocation42_spill] sm:$0xff] %v10584_v31  ;;  %13213 = vst [vmem:[#allocation43_spill] sm:$0xff] %v10587_v56  ;;  %v10592_v14 = vadd.f32 %v8367_v54, %v10413_v16 }
 0x1af   : > { %v10589_v59 = vpop.f32.mrf.mxu1  ;;  %v10601_v28 = vpop.f32.mrf.mxu0 }
 0x1b0   : > { %13214 = vst [vmem:[#allocation46_spill] sm:$0xff] %v10589_v59  ;;  %13215 = vst [vmem:[#allocation61_spill] sm:$0xff] %v10592_v14 }
 0x1b1   : > { %v10594_v27 = vpop.f32.mrf.mxu1  ;;  %v8370_v11 = vpop.f32.mrf.mxu0 }
 0x1b2   : > { %13216 = vst [vmem:[#allocation62_spill] sm:$0xff] %v10594_v27  ;;  %v10607_v48 = vadd.f32 %v8370_v11, %v10426_v5 }
 0x1b3   : > { %v10603_v19 = vpop.f32.mrf.mxu1  ;;  %v2396_v16 = vpop.f32.mrf.mxu0 }
 0x1b4   : > { %13218 = vst [vmem:[#allocation64_spill] sm:$0xff] %v10603_v19  ;;  %13219 = vst [vmem:[#allocation65_spill] sm:$0xff] %v10607_v48  ;;  %v10612_v54 = vadd.f32 %v2396_v16, %v10429_v8 }
 0x1b5   : > { %v10609_v34 = vpop.f32.mrf.mxu1  ;;  %v8371_v27 = vpop.f32.mrf.mxu0 }
 0x1b6   : > { %13220 = vst [vmem:[#allocation66_spill] sm:$0xff] %v10609_v34  ;;  %13221 = vst [vmem:[#allocation67_spill] sm:$0xff] %v10612_v54  ;;  %v10617_v59 = vadd.f32 %v8371_v27, %v10436_v23 }
 0x1b7   : > { %v10614_v58 = vpop.f32.mrf.mxu1  ;;  %v10621_v19 = vpop.f32.mrf.mxu0 }
 0x1b8   : > { %13222 = vst [vmem:[#allocation68_spill] sm:$0xff] %v10614_v58  ;;  %13223 = vst [vmem:[#allocation69_spill] sm:$0xff] %v10617_v59 }
 0x1b9   : > { %v10619_v14 = vpop.f32.mrf.mxu1  ;;  %13225 = vst [vmem:[#allocation71_spill] sm:$0xff] %v10621_v19  ;;  %v8374_v5 = vpop.f32.mrf.mxu0 }
 0x1ba   : > { %13224 = vst [vmem:[#allocation70_spill] sm:$0xff] %v10619_v14  ;;  %v10626_v11 = vadd.f32 %v8374_v5, %v10451_v62 }
 0x1bb   : > { %v10623_v9 = vpop.f32.mrf.mxu1  ;;  %v2412_v8 = vpop.f32.mrf.mxu0 }
 0x1bc   : > { %13226 = vst [vmem:[#allocation72_spill] sm:$0xff] %v10623_v9  ;;  %13227 = vst [vmem:[#allocation73_spill] sm:$0xff] %v10626_v11  ;;  %v10631_v16 = vadd.f32 %v2412_v8, %v10454_v29 }
 0x1bd   : > { %v10628_v34 = vpop.f32.mrf.mxu1  ;;  %v8375_v23 = vpop.f32.mrf.mxu0 }
 0x1be   : > { %13228 = vst [vmem:[#allocation74_spill] sm:$0xff] %v10628_v34  ;;  %13229 = vst [vmem:[#allocation75_spill] sm:$0xff] %v10631_v16  ;;  %v10636_v27 = vadd.f32 %v8375_v23, %v10462_v3 }
 0x1bf   : > { %v10633_v58 = vpop.f32.mrf.mxu1  ;;  %v10640_v59 = vpop.f32.mrf.mxu0 }
 0x1c0   : > { %13230 = vst [vmem:[#allocation76_spill] sm:$0xff] %v10633_v58  ;;  %13231 = vst [vmem:[#allocation77_spill] sm:$0xff] %v10636_v27 }
 0x1c1   : > { %v10638_v14 = vpop.f32.mrf.mxu1  ;;  %13233 = vst [vmem:[#allocation79_spill] sm:$0xff] %v10640_v59  ;;  %v8378_v62 = vpop.f32.mrf.mxu0 }
 0x1c2   : > { %13232 = vst [vmem:[#allocation78_spill] sm:$0xff] %v10638_v14  ;;  %v10645_v5 = vadd.f32 %v8378_v62, %v10471_v18 }
 0x1c3   : > { %v10642_v9 = vpop.f32.mrf.mxu1  ;;  %v2428_v29 = vpop.f32.mrf.mxu0 }
 0x1c4   : > { %13234 = vst [vmem:[#allocation80_spill] sm:$0xff] %v10642_v9  ;;  %13235 = vst [vmem:[#allocation81_spill] sm:$0xff] %v10645_v5  ;;  %v10650_v8 = vadd.f32 %v2428_v29, %v10474_v21 }
 0x1c5   : > { %v10647_v34 = vpop.f32.mrf.mxu1  ;;  %v8379_v3 = vpop.f32.mrf.mxu0 }
 0x1c6   : > { %13236 = vst [vmem:[#allocation82_spill] sm:$0xff] %v10647_v34  ;;  %13237 = vst [vmem:[#allocation83_spill] sm:$0xff] %v10650_v8  ;;  %v10655_v23 = vadd.f32 %v8379_v3, %v10480_v22 }
 0x1c7   : > { %v10652_v58 = vpop.f32.mrf.mxu1  ;;  %v10659_v27 = vpop.f32.mrf.mxu0 }
 0x1c8   : > { %13238 = vst [vmem:[#allocation84_spill] sm:$0xff] %v10652_v58  ;;  %13239 = vst [vmem:[#allocation85_spill] sm:$0xff] %v10655_v23 }
 0x1c9   : > { %v10657_v14 = vpop.f32.mrf.mxu1  ;;  %13241 = vst [vmem:[#allocation87_spill] sm:$0xff] %v10659_v27  ;;  %v8382_v18 = vpop.f32.mrf.mxu0 }
 0x1ca   : > { %13240 = vst [vmem:[#allocation86_spill] sm:$0xff] %v10657_v14  ;;  %v10664_v62 = vadd.f32 %v8382_v18, %v10488_v10 }
 0x1cb   : > { %v10661_v9 = vpop.f32.mrf.mxu1  ;;  %v2444_v21 = vpop.f32.mrf.mxu0 }
 0x1cc   : > { %13242 = vst [vmem:[#allocation88_spill] sm:$0xff] %v10661_v9  ;;  %13243 = vst [vmem:[#allocation89_spill] sm:$0xff] %v10664_v62  ;;  %v10669_v29 = vadd.f32 %v2444_v21, %v10491_v30 }
 0x1cd   : > { %v10666_v34 = vpop.f32.mrf.mxu1  ;;  %v8383_v22 = vpop.f32.mrf.mxu0 }
 0x1ce   : > { %13244 = vst [vmem:[#allocation90_spill] sm:$0xff] %v10666_v34  ;;  %13245 = vst [vmem:[#allocation91_spill] sm:$0xff] %v10669_v29  ;;  %v10674_v3 = vadd.f32 %v8383_v22, %v10497_v38  ;;  %v10693_v38 = vld [vmem:[%s12739_s3 + $0x78] sm:$0xff]  }
 0x1cf   : > { %v10671_v58 = vpop.f32.mrf.mxu1  ;;  %v10678_v23 = vpop.f32.mrf.mxu0  ;;  %13250 = vst [vmem:[#allocation96_spill] sm:$0xff] %v10693_v38  ;;  %8640 = vmatprep.subr.bf16.mxu0 %v10693_v38 }
 0x1d0   : > { %13246 = vst [vmem:[#allocation92_spill] sm:$0xff] %v10671_v58  ;;  %13247 = vst [vmem:[#allocation93_spill] sm:$0xff] %v10674_v3 }
 0x1d1   : > { %v10676_v14 = vpop.f32.mrf.mxu1  ;;  %13249 = vst [vmem:[#allocation95_spill] sm:$0xff] %v10678_v23  ;;  %v8422_v10 = vpop.f32.mrf.mxu0 }
 0x1d2   : > { %13248 = vst [vmem:[#allocation94_spill] sm:$0xff] %v10676_v14 }
 0x1d3   : > { %v10680_v9 = vpop.f32.mrf.mxu1  ;;  %v2986_v34 = vpop.f32.mrf.mxu0 }
 0x1d5   : > { %v10682_v18 = vpop.f32.mrf.mxu1  ;;  %v10684_v62 = vpop.f32.mrf.mxu0 }
 0x1d7   : > { %v10686_v30 = vpop.f32.mrf.mxu1  ;;  %v10688_v21 = vpop.f32.mrf.mxu0 }
 0x1d9   : > { %v10695_v22 = vpop.f32.mrf.mxu0  ;;  %v10698_v14 = vpop.f32.mrf.mxu1 }
 0x1db   : > { %v10700_v58 = vpop.f32.mrf.mxu0  ;;  %v10704_v29 = vpop.f32.mrf.mxu1 }
 0x1dd   : > { %v10702_v3 = vpop.f32.mrf.mxu0  ;;  %v10710_v8 = vpop.f32.mrf.mxu1 }
 0x1df   : > { %v10706_v23 = vpop.f32.mrf.mxu0  ;;  %v10716_v16 = vpop.f32.mrf.mxu1 }
 0x1e0   : > { %13254 = vst [vmem:[#allocation100_spill] sm:$0xff] %v10716_v16 }
 0x1e1   : > { %v10708_v27 = vpop.f32.mrf.mxu0  ;;  %v10722_v54 = vpop.f32.mrf.mxu1 }
 0x1e2   : > { %13251 = vst [vmem:[#allocation97_spill] sm:$0xff] %v10708_v27  ;;  %13257 = vst [vmem:[#allocation103_spill] sm:$0xff] %v10722_v54 }
 0x1e3   : > { %v10712_v5 = vpop.f32.mrf.mxu0  ;;  %v10728_v31 = vpop.f32.mrf.mxu1 }
 0x1e4   : > { %13252 = vst [vmem:[#allocation98_spill] sm:$0xff] %v10712_v5  ;;  %13260 = vst [vmem:[#allocation106_spill] sm:$0xff] %v10728_v31 }
 0x1e5   : > { %v10714_v59 = vpop.f32.mrf.mxu0  ;;  %v10734_v5 = vpop.f32.mrf.mxu1 }
 0x1e6   : > { %13253 = vst [vmem:[#allocation99_spill] sm:$0xff] %v10714_v59  ;;  %13263 = vst [vmem:[#allocation109_spill] sm:$0xff] %v10734_v5 }
 0x1e7   : > { %v10718_v38 = vpop.f32.mrf.mxu0 }
 0x1e8   : > { %13255 = vst [vmem:[#allocation101_spill] sm:$0xff] %v10718_v38  ;;  %v10740_v38 = vpop.f32.mrf.mxu1 }
 0x1e9   : > { %v10720_v11 = vpop.f32.mrf.mxu0  ;;  %13266 = vst [vmem:[#allocation112_spill] sm:$0xff] %v10740_v38 }
 0x1ea   : > { %13256 = vst [vmem:[#allocation102_spill] sm:$0xff] %v10720_v11 }
 0x1eb   : > { %v10724_v48 = vpop.f32.mrf.mxu0 }
 0x1ec   : > { %13258 = vst [vmem:[#allocation104_spill] sm:$0xff] %v10724_v48  ;;  %v10746_v48 = vpop.f32.mrf.mxu1 }
 0x1ed   : > { %v10726_v19 = vpop.f32.mrf.mxu0 }
 0x1ee   : > { %13259 = vst [vmem:[#allocation105_spill] sm:$0xff] %v10726_v19 }
 0x1ef   : > { %v10730_v27 = vpop.f32.mrf.mxu0 }
 0x1f0   : > { %13261 = vst [vmem:[#allocation107_spill] sm:$0xff] %v10730_v27  ;;  %v10752_v27 = vpop.f32.mrf.mxu1 }
 0x1f1   : > { %v10732_v56 = vpop.f32.mrf.mxu0  ;;  %13271 = vst [vmem:[#allocation117_spill] sm:$0xff] %v10752_v27 }
 0x1f2   : > { %13262 = vst [vmem:[#allocation108_spill] sm:$0xff] %v10732_v56 }
 0x1f3   : > { %v10736_v59 = vpop.f32.mrf.mxu0 }
 0x1f4   : > { %13264 = vst [vmem:[#allocation110_spill] sm:$0xff] %v10736_v59  ;;  %v10758_v59 = vpop.f32.mrf.mxu1 }
 0x1f5   : > { %v10738_v16 = vpop.f32.mrf.mxu0  ;;  %13274 = vst [vmem:[#allocation120_spill] sm:$0xff] %v10758_v59 }
 0x1f6   : > { %13265 = vst [vmem:[#allocation111_spill] sm:$0xff] %v10738_v16 }
 0x1f7   : > { %v10742_v11 = vpop.f32.mrf.mxu0 }
 0x1f8   : > { %13267 = vst [vmem:[#allocation113_spill] sm:$0xff] %v10742_v11  ;;  %v10764_v11 = vpop.f32.mrf.mxu1 }
 0x1f9   : > { %v10744_v54 = vpop.f32.mrf.mxu0  ;;  %13277 = vst [vmem:[#allocation123_spill] sm:$0xff] %v10764_v11  ;;  %v13282_v11 = vld [vmem:[#allocation21_spill] sm:$0xff] }
 0x1fa   : > { %13268 = vst [vmem:[#allocation114_spill] sm:$0xff] %v10744_v54  ;;  %v10774_v27 = vpop.f32.mrf.mxu1 }
 0x1fb   : > { %v10748_v19 = vpop.f32.mrf.mxu0 }
 0x1fc   : > { %13269 = vst [vmem:[#allocation115_spill] sm:$0xff] %v10748_v19  ;;  %v2167_v19 = vadd.f32 %v10332_v40, %v10336_v32  ;;  %v13281_v40 = vld [vmem:[#allocation17_spill] sm:$0xff] }
 0x1fd   : > { %v10750_v31 = vpop.f32.mrf.mxu0  ;;  %v1437_v32 = vadd.f32 %v13281_v40, %v10267_v13 }
 0x1fe   : > { %13270 = vst [vmem:[#allocation116_spill] sm:$0xff] %v10750_v31 }
 0x1ff   : > { %v10754_v56 = vpop.f32.mrf.mxu0 }
 0x200   : > { %13272 = vst [vmem:[#allocation118_spill] sm:$0xff] %v10754_v56  ;;  %v2790_v56 = vadd.f32 %v10499_v15, %v10502_v17  ;;  %v13283_v15 = vld [vmem:[#allocation18_spill] sm:$0xff] }
 0x201   : > { %v10756_v5 = vpop.f32.mrf.mxu0  ;;  %v1453_v17 = vadd.f32 %v13283_v15, %v13282_v11  ;;  %v2171_v11 = vadd.f32 %v10356_v37, %v10360_v45  ;;  %v2179_v37 = vadd.f32 %v10407_v42, %v10411_v51  ;;  %v13288_v15 = vld [vmem:[#allocation30_spill] sm:$0xff] }
 0x202   : > { %13273 = vst [vmem:[#allocation119_spill] sm:$0xff] %v10756_v5  ;;  %v2460_v5 = vadd.f32 %v10519_v47, %v2167_v19  ;;  %v2791_v47 = vadd.f32 %v10509_v24, %v10512_v33 }
 0x203   : > { %v10760_v16 = vpop.f32.mrf.mxu0  ;;  %v1862_v33 = vadd.f32 %v10478_v35, %v1453_v17  ;;  %v13289_v17 = vld [vmem:[#allocation34_spill] sm:$0xff] }
 0x204   : > { %13275 = vst [vmem:[#allocation121_spill] sm:$0xff] %v10760_v16  ;;  %v3115_v16 = vadd.f32 %v8422_v10, %v2790_v56  ;;  %v3116_v24 = vadd.f32 %v10684_v62, %v2791_v47  ;;  %v13290_v47 = vld [vmem:[#allocation33_spill] sm:$0xff] }
 0x205   : > { %v10762_v38 = vpop.f32.mrf.mxu0  ;;  %v10829_v62 = vadd.f32 %v10476_v55, %v1862_v33 }
 0x206   : > { %13276 = vst [vmem:[#allocation122_spill] sm:$0xff] %v10762_v38  ;;  %v2788_v38 = vadd.f32 %v10504_v6, %v10507_v39  ;;  %v13284_v6 = vld [vmem:[#allocation22_spill] sm:$0xff]  ;;  %v3412_v10 = vadd.f32 %v10680_v9, %v3115_v16 }
 0x207   : > { %v10766_v54 = vpop.f32.mrf.mxu0  ;;  %v1469_v39 = vadd.f32 %v13284_v6, %v10313_v57  ;;  %v2794_v57 = vadd.f32 %v10521_v26, %v10524_v1  ;;  %v2464_v1 = vadd.f32 %v10551_v49, %v2171_v11  ;;  %v13291_v11 = vld [vmem:[#allocation37_spill] sm:$0xff] }
 0x208   : > { %13278 = vst [vmem:[#allocation124_spill] sm:$0xff] %v10766_v54  ;;  %v1421_v54 = vadd.f32 %v10241_v46, %v10243_v60  ;;  %v3113_v19 = vadd.f32 %v2986_v34, %v2788_v38  ;;  %v1858_v60 = vadd.f32 %v10459_v44, %v1437_v32  ;;  %v2789_v46 = vadd.f32 %v10514_v52, %v2460_v5  ;;  %v10809_v52 = vld [vmem:[#allocation6] ss:$0 sm:$0xff] }
 0x209   : > { %v10770_v31 = vpop.f32.mrf.mxu0  ;;  %v1866_v34 = vadd.f32 %v10495_v25, %v1469_v39  ;;  %v3119_v16 = vadd.f32 %v10695_v22, %v2794_v57  ;;  %v2793_v55 = vadd.f32 %v13288_v15, %v2464_v1 }
 0x20a   : > { %13279 = vst [vmem:[#allocation125_spill] sm:$0xff] %v10770_v31  ;;  %v1854_v56 = vadd.f32 %v10433_v4, %v1421_v54  ;;  %v3114_v4 = vadd.f32 %v10688_v21, %v2789_v46  ;;  %v2175_v54 = vadd.f32 %v10380_v0, %v10384_v36  ;;  %v3410_v45 = vadd.f32 %v10682_v18, %v3113_v19  ;;  %v13287_v21 = vld [vmem:[#allocation26_spill] sm:$0xff] }
 0x20b   : > { %v10777_v59 = vpop.f32.mrf.mxu0  ;;  %v10820_v26 = vadd.f32 %v10456_v43, %v1858_v60  ;;  %v2792_v0 = vadd.f32 %v10526_v7, %v10536_v53  ;;  %v3413_v36 = vadd.f32 %v10686_v30, %v3116_v24  ;;  %v13286_v43 = vld [vmem:[#allocation29_spill] sm:$0xff]  ;;  %v2798_v19 = vadd.f32 %v13290_v47, %v13289_v17  ;;  %v13292_v24 = vld [vmem:[#allocation38_spill] sm:$0xff]  ;;  %v13304_v17 = vld [vmem:[#allocation64_spill] sm:$0xff] }
 0x20c   : > { %13280 = vst [vmem:[#allocation126_spill] sm:$0xff] %v10777_v59  ;;  %v10791_v59 = vpop.f32.mrf.mxu1  ;;  %v2183_v25 = vadd.f32 %v10431_v41, %v1854_v56  ;;  %v13285_v41 = vld [vmem:[#allocation25_spill] sm:$0xff]  ;;  %v2795_v49 = vadd.f32 %v13287_v21, %v13286_v43  ;;  %v3411_v38 = vadd.f32 %v10698_v14, %v3114_v4  ;;  %v2468_v6 = vadd.f32 %v10575_v61, %v2175_v54  ;;  %v13301_v21 = vld [vmem:[#allocation103_spill] sm:$0xff] }
 0x20d   : > { %v10785_v31 = vpop.f32.mrf.mxu0  ;;  %v10832_v18 = vadd.f32 %v13285_v41, %v1866_v34  ;;  %v3117_v40 = vadd.f32 %v10700_v58, %v2792_v0  ;;  %v3416_v39 = vadd.f32 %v10704_v29, %v3119_v16  ;;  %v2799_v33 = vadd.f32 %v13292_v24, %v10571_v50  ;;  %v13299_v41 = vld [vmem:[#allocation62_spill] sm:$0xff] }
 0x20e   : > { %v10816_v9 = vpop.f32.mrf.mxu1  ;;  %v3120_v14 = vadd.f32 %v10702_v3, %v2795_v49  ;;  %v2472_v34 = vadd.f32 %v10601_v28, %v2179_v37  ;;  %v3118_v61 = vadd.f32 %v10706_v23, %v2793_v55  ;;  %v2802_v50 = vadd.f32 %v10579_v12, %v10582_v63  ;;  %v13294_v28 = vld [vmem:[#allocation42_spill] sm:$0xff]  ;;  %v13295_v23 = vld [vmem:[#allocation97_spill] sm:$0xff]  ;;  %v13300_v12 = vld [vmem:[#allocation71_spill] sm:$0xff] }
 0x20f   : > { %v10798_v13 = vpop.f32.mrf.mxu0  ;;  %v3414_v57 = vadd.f32 %v10710_v8, %v3117_v40  ;;  %v13296_v8 = vld [vmem:[#allocation100_spill] sm:$0xff]  ;;  %v2476_v63 = vadd.f32 %v13300_v12, %v2183_v25  ;;  %v13303_v55 = vld [vmem:[#allocation65_spill] sm:$0xff]  ;;  %v13319_v12 = vld [vmem:[#allocation79_spill] sm:$0xff] }
 0x210   : > { %v10838_v7 = vpop.f32.mrf.mxu1  ;;  %v3417_v16 = vadd.f32 %v13296_v8, %v3120_v14  ;;  %v2801_v43 = vadd.f32 %v13299_v41, %v2472_v34  ;;  %v3415_v49 = vadd.f32 %v13301_v21, %v3118_v61  ;;  %v10881_v47 = vadd.f32 %v13304_v17, %v13303_v55  ;;  %v13308_v14 = vld [vmem:[#allocation99_spill] sm:$0xff]  ;;  %v13310_v61 = vld [vmem:[#allocation69_spill] sm:$0xff]  ;;  %v13321_v21 = vld [vmem:[#allocation76_spill] sm:$0xff] }
 0x211   : > { %v8490_v44 = vpop.f32.mrf.mxu0 }
 0x212   : > { %v3737_v35 = vadd.f32 %v8490_v44, %v3412_v10  ;;  %v2796_v10 = vadd.f32 %v13291_v11, %v10564_v20  ;;  %v10856_v3 = vpop.f32.mrf.mxu1  ;;  %v2797_v20 = vadd.f32 %v10573_v2, %v2468_v6  ;;  %v13306_v6 = vld [vmem:[#allocation66_spill] sm:$0xff] }
 0x213   : > { %v3608_v5 = vpop.f32.mrf.mxu0 }
 0x214   : > { %v3776_v42 = vadd.f32 %v10809_v52, %v3737_v35  ;;  %v3735_v51 = vadd.f32 %v3608_v5, %v3410_v45  ;;  %v13293_v45 = vld [vmem:[#allocation43_spill] sm:$0xff]  ;;  %v3123_v35 = vadd.f32 %v13295_v23, %v2798_v19 }
 0x215   : > { %v8491_v22 = vpop.f32.mrf.mxu0  ;;  %v2800_v37 = vadd.f32 %v13294_v28, %v13293_v45  ;;  %v13305_v19 = vld [vmem:[#allocation67_spill] sm:$0xff]  ;;  %v13314_v45 = vld [vmem:[#allocation72_spill] sm:$0xff] }
 0x216   : > { %v3808_v53 = vmax.f32 %v3776_v42, 0.0  ;;  %v3774_v30 = vadd.f32 %v10809_v52, %v3735_v51  ;;  %v3738_v32 = vadd.f32 %v8491_v22, %v3413_v36  ;;  %v13297_v42 = vld [vmem:[#allocation61_spill] sm:$0xff]  ;;  %v13298_v51 = vld [vmem:[#allocation46_spill] sm:$0xff]  ;;  %v10885_v25 = vadd.f32 %v13306_v6, %v13305_v19  ;;  %v13323_v6 = vld [vmem:[#allocation104_spill] sm:$0xff] }
 0x217   : > { %v3611_v56 = vpop.f32.mrf.mxu0  ;;  %v2803_v2 = vadd.f32 %v13298_v51, %v13297_v42  ;;  %v13302_v22 = vld [vmem:[#allocation98_spill] sm:$0xff]  ;;  %v13317_v42 = vld [vmem:[#allocation75_spill] sm:$0xff] }
 0x218   : > { %3848 = vst.msk [vmem:[#allocation2 + $0x21] sm:$0xff] %vm12884_vm12, %v3808_v53  ;;  %v3806_v58 = vmax.f32 %v3774_v30, 0.0  ;;  %v3777_v60 = vadd.f32 %v10809_v52, %v3738_v32  ;;  %v3736_v46 = vadd.f32 %v3611_v56, %v3411_v38  ;;  %v3121_v40 = vadd.f32 %v13302_v22, %v2796_v10  ;;  %v10875_v53 = vpop.f32.mrf.mxu1  ;;  %v13318_v51 = vld [vmem:[#allocation74_spill] sm:$0xff] }
 0x219   : > { %v8494_v29 = vpop.f32.mrf.mxu0  ;;  %v10913_v41 = vadd.f32 %v13318_v51, %v13317_v42 }
 0x21a   : > { %3846 = vst.msk [vmem:[#allocation2 + $0x11] sm:$0xff] %vm12884_vm12, %v3806_v58  ;;  %v3809_v4 = vmax.f32 %v3777_v60, 0.0  ;;  %v3775_v44 = vadd.f32 %v10809_v52, %v3736_v46  ;;  %v3741_v54 = vadd.f32 %v8494_v29, %v3416_v39  ;;  %v13307_v39 = vld [vmem:[#allocation106_spill] sm:$0xff]  ;;  %v3124_v58 = vadd.f32 %v13308_v14, %v2799_v33  ;;  %v13309_v46 = vld [vmem:[#allocation101_spill] sm:$0xff]  ;;  %v13311_v29 = vld [vmem:[#allocation68_spill] sm:$0xff]  ;;  %v10905_v8 = vpop.f32.mrf.mxu1 }
 0x21b   : > { %v3624_v1 = vpop.f32.mrf.mxu0  ;;  %v3420_v56 = vadd.f32 %v13307_v39, %v3123_v35  ;;  %v3122_v11 = vadd.f32 %v13309_v46, %v2797_v20  ;;  %v13315_v33 = vld [vmem:[#allocation102_spill] sm:$0xff]  ;;  %v13316_v35 = vld [vmem:[#allocation109_spill] sm:$0xff]  ;;  %v3125_v39 = vadd.f32 %v13323_v6, %v2800_v37 }
 0x21c   : > { %3849 = vst.msk [vmem:[#allocation2 + $0x29] sm:$0xff] %vm12884_vm12, %v3809_v4  ;;  %v3807_v5 = vmax.f32 %v3775_v44, 0.0  ;;  %v3780_v0 = vadd.f32 %v10809_v52, %v3741_v54  ;;  %v3739_v36 = vadd.f32 %v3624_v1, %v3414_v57  ;;  %v10894_v57 = vadd.f32 %v13311_v29, %v13310_v61  ;;  %v13312_v4 = vld [vmem:[#allocation70_spill] sm:$0xff]  ;;  %v13313_v54 = vld [vmem:[#allocation73_spill] sm:$0xff] }
 0x21d   : > { %v8495_v38 = vpop.f32.mrf.mxu0  ;;  %v10897_v44 = vadd.f32 %v13312_v4, %v2476_v63  ;;  %v10901_v28 = vadd.f32 %v13314_v45, %v13313_v54  ;;  %v3127_v23 = vadd.f32 %v13315_v33, %v2802_v50  ;;  %v3418_v1 = vadd.f32 %v13316_v35, %v3121_v40  ;;  %v13320_v63 = vld [vmem:[#allocation77_spill] sm:$0xff]  ;;  %v13329_v54 = vld [vmem:[#allocation107_spill] sm:$0xff] }
 0x21e   : > { %3847 = vst.msk [vmem:[#allocation2 + $0x19] sm:$0xff] %vm12884_vm12, %v3807_v5  ;;  %v3812_v30 = vmax.f32 %v3780_v0, 0.0  ;;  %v3778_v32 = vadd.f32 %v10809_v52, %v3739_v36  ;;  %v3742_v15 = vadd.f32 %v8495_v38, %v3417_v16  ;;  %v2480_v50 = vadd.f32 %v13319_v12, %v10820_v26  ;;  %v13322_v38 = vld [vmem:[#allocation112_spill] sm:$0xff]  ;;  %v13324_v26 = vld [vmem:[#allocation117_spill] sm:$0xff] }
 0x21f   : > { %v3627_v60 = vpop.f32.mrf.mxu0  ;;  %v3421_v22 = vadd.f32 %v13322_v38, %v3124_v58  ;;  %v13325_v14 = vld [vmem:[#allocation105_spill] sm:$0xff]  ;;  %v3126_v45 = vadd.f32 %v13329_v54, %v2801_v43  ;;  %v8959_v12 = vld [vmem:[%s12739_s3 + $0x70] sm:$0xff]  }
 0x220   : > { %3852 = vst.msk [vmem:[#allocation2 + $0x41] sm:$0xff] %vm12884_vm12, %v3812_v30  ;;  %v3810_v10 = vmax.f32 %v3778_v32, 0.0  ;;  %v3781_v24 = vadd.f32 %v10809_v52, %v3742_v15  ;;  %v3740_v34 = vadd.f32 %v3627_v60, %v3415_v49  ;;  %v10919_v49 = vadd.f32 %v13321_v21, %v13320_v63  ;;  %v13333_v63 = vld [vmem:[#allocation78_spill] sm:$0xff]  ;;  %v13334_v38 = vld [vmem:[#allocation81_spill] sm:$0xff]  ;;  %v13342_v54 = vld [vmem:[#allocation96_spill] sm:$0xff] }
 0x221   : > { %v8498_v20 = vpop.f32.mrf.mxu0  ;;  %v10909_v36 = vld [vmem:[#allocation2 + $0x10] sm:$0xff]  ;;  %v3419_v30 = vadd.f32 %v10746_v48, %v3122_v11  ;;  %v3128_v60 = vadd.f32 %v13325_v14, %v2803_v2  ;;  %v3970_v2 = vld [vmem:[#allocation2 + $0x21] sm:$0xff]  ;;  %v10962_v21 = vadd.f32 %v13333_v63, %v2480_v50 }
 0x222   : > { %3850 = vst.msk [vmem:[#allocation2 + $0x31] sm:$0xff] %vm12884_vm12, %v3810_v10  ;;  %v3813_v16 = vmax.f32 %v3781_v24, 0.0  ;;  %v3779_v5 = vadd.f32 %v10809_v52, %v3740_v34  ;;  %v3745_v0 = vadd.f32 %v8498_v20, %v3420_v56  ;;  %v3968_v17 = vld [vmem:[#allocation2 + $0x11] sm:$0xff]  ;;  %v3424_v56 = vadd.f32 %v13324_v26, %v3127_v23  ;;  %v10935_v34 = vpop.f32.mrf.mxu1 }
 0x223   : > { %v3640_v40 = vpop.f32.mrf.mxu0  ;;  %v3971_v19 = vld [vmem:[#allocation2 + $0x29] sm:$0xff] }
 0x224   : > { %3853 = vst.msk [vmem:[#allocation2 + $0x49] sm:$0xff] %vm12884_vm12, %v3813_v16  ;;  %v3811_v32 = vmax.f32 %v3779_v5, 0.0  ;;  %v3784_v15 = vadd.f32 %v10809_v52, %v3745_v0  ;;  %v3743_v55 = vadd.f32 %v3640_v40, %v3418_v1  ;;  %v13326_v48 = vld [vmem:[#allocation15_spill] sm:$0xff]  ;;  %v10943_v20 = vpack.c.bf16 %v3971_v19, %v3970_v2  ;;  %v13331_v1 = vld [vmem:[#allocation16_spill] sm:$0xff]  ;;  %v10974_v19 = vpop.f32.mrf.mxu1 }
 0x225   : > { %v8499_v46 = vpop.f32.mrf.mxu0  ;;  %v3969_v10 = vld [vmem:[#allocation2 + $0x19] sm:$0xff]  ;;  %vm13327_vm5 = vnez %v13326_v48  ;;  %v10945_v35 = vld [vmem:[#allocation2 + $0x28] sm:$0xff]  ;;  %vm13332_vm15 = vnez %v13331_v1  ;;  %v8955_v5 = vld [vmem:[%s12739_s3 + $0x50] sm:$0xff]  }
 0x226   : > { %v10928_v58 = vld [vmem:[#allocation2 + $0x18] sm:$0xff]  ;;  %v3912_v11 = vsel %vm13327_vm5, %v10909_v36, 0.0  ;;  %v10933_v24 = vld [vmem:[#allocation2 + $0x20] sm:$0xff]  ;;  %3851 = vst.msk [vmem:[#allocation2 + $0x39] sm:$0xff] %vm12884_vm12, %v3811_v32  ;;  %v3816_v61 = vmax.f32 %v3784_v15, 0.0  ;;  %v3782_v37 = vadd.f32 %v10809_v52, %v3743_v55  ;;  %v3746_v29 = vadd.f32 %v8499_v46, %v3421_v22  ;;  %13330 = vst [vmem:[#allocation21_spill] sm:$0xff] %v10943_v20 }
 0x227   : > { %v10939_v4 = vpack.c.bf16 %v3969_v10, %v3968_v17  ;;  %v3643_v33 = vpop.f32.mrf.mxu0  ;;  %v3943_v23 = vpack.c.bf16 %v10928_v58, %v3912_v11  ;;  %v3914_v16 = vsel %vm13332_vm15, %v10933_v24, 0.0  ;;  %v13335_v22 = vld [vmem:[#allocation80_spill] sm:$0xff]  ;;  %v13338_v14 = vld [vmem:[#allocation63_spill] sm:$0xff]  ;;  %v13340_v11 = vld [vmem:[#allocation82_spill] sm:$0xff] }
 0x228   : > { %3856 = vst.msk [vmem:[#allocation2 + $0x61] sm:$0xff] %vm12884_vm12, %v3816_v61  ;;  %v3814_v0 = vmax.f32 %v3782_v37, 0.0  ;;  %v3785_v43 = vadd.f32 %v10809_v52, %v3746_v29  ;;  %v3744_v42 = vadd.f32 %v3643_v33, %v3419_v30  ;;  %v3944_v51 = vpack.c.bf16 %v10945_v35, %v3914_v16  ;;  %v13336_v32 = vld [vmem:[#allocation108_spill] sm:$0xff]  ;;  %v13339_v10 = vld [vmem:[#allocation83_spill] sm:$0xff]  ;;  %v13343_v33 = vld [vmem:[#allocation110_spill] sm:$0xff] }
 0x229   : > { %13328 = vst [vmem:[#allocation17_spill] sm:$0xff] %v10939_v4  ;;  %8529 = vmatmul.mubr.msk.bf16.vlgmr.msra.gmra.mxu1 %vm12884_vm12, %v10939_v4  ;;  %v10966_v40 = vadd.f32 %v13335_v22, %v13334_v38  ;;  %v3131_v15 = vadd.f32 %v13336_v32, %v10881_v47  ;;  %8569 = vmatmul.mubr.msk.bf16.vlgmr.msra.gmra.mxu0 %vm12884_vm12, %v3943_v23  ;;  %v8502_v30 = vpop.f32.mrf.mxu0  ;;  %v13337_v55 = vld [vmem:[#allocation120_spill] sm:$0xff]  ;;  %v10982_v46 = vld [vmem:[#allocation2 + $0x2a] sm:$0xff] }
 0x22a   : > { %8532 = vmatprep.mubr.msk.bf16.mxu1 %vm12884_vm12, %v10943_v20  ;;  %v3422_v17 = vadd.f32 %v13337_v55, %v3125_v39  ;;  %3854 = vst.msk [vmem:[#allocation2 + $0x51] sm:$0xff] %vm12884_vm12, %v3814_v0  ;;  %v3817_v50 = vmax.f32 %v3785_v43, 0.0  ;;  %v3783_v6 = vadd.f32 %v10809_v52, %v3744_v42  ;;  %v3749_v26 = vadd.f32 %v8502_v30, %v3424_v56  ;;  %v10980_v47 = vld [vmem:[#allocation2 + $0x30] sm:$0xff]  ;;  %v8956_v56 = vld [vmem:[%s12739_s3 + $0x48] sm:$0xff]  }
 0x22b   : > { %8572 = vmatprep.mubr.msk.bf16.mxu0 %vm12884_vm12, %v3944_v51  ;;  %8601 = vmatpush3.bf16.msra.mxu1 %v13338_v14  ;;  %v10986_v61 = vadd.f32 %v13340_v11, %v13339_v10  ;;  %v13341_v39 = vld [vmem:[#allocation123_spill] sm:$0xff]  ;;  %v3423_v29 = vadd.f32 %v10774_v27, %v3126_v45  ;;  %v3656_v2 = vpop.f32.mrf.mxu0  ;;  %v3129_v23 = vadd.f32 %v13343_v33, %v10885_v25  ;;  %v3974_v14 = vld [vmem:[#allocation2 + $0x41] sm:$0xff] }
 0x22c   : > { %v3425_v37 = vadd.f32 %v13341_v39, %v3128_v60  ;;  %8602 = vmatprep.subr.bf16.mxu1 %v8955_v5  ;;  %8641 = vmatpush3.bf16.msra.mxu0 %v13342_v54  ;;  %3857 = vst.msk [vmem:[#allocation2 + $0x69] sm:$0xff] %vm12884_vm12, %v3817_v50  ;;  %v3815_v16 = vmax.f32 %v3783_v6, 0.0  ;;  %v3788_v0 = vadd.f32 %v10809_v52, %v3749_v26  ;;  %v3972_v60 = vld [vmem:[#allocation2 + $0x31] sm:$0xff]  ;;  %v3975_v42 = vld [vmem:[#allocation2 + $0x49] sm:$0xff]  ;;  %v5550_v50 = vsel %vm13188_vm1, %v10982_v46, 0.0  ;;  %v11014_v6 = vpop.f32.mrf.mxu1  ;;  %v13350_v10 = vld [vmem:[#allocation113_spill] sm:$0xff] }
 0x22d   : > { %v3747_v43 = vadd.f32 %v3656_v2, %v3422_v17  ;;  %8642 = vmatprep.subr.bf16.mxu0 %v8959_v12  ;;  %v8960_v27 = vld [vmem:[%s12739_s3 + $0x68] sm:$0xff]   ;;  %v3428_v45 = vadd.f32 %v10791_v59, %v3131_v15  ;;  %v8503_v38 = vpop.f32.mrf.mxu0  ;;  %v3973_v25 = vld [vmem:[#allocation2 + $0x39] sm:$0xff]  ;;  %v3130_v11 = vadd.f32 %v13350_v10, %v10897_v44  ;;  %v11023_v54 = vpack.c.bf16 %v3975_v42, %v3974_v14 }
 0x22e   : > { %v13344_v51 = vld [vmem:[#allocation111_spill] sm:$0xff]  ;;  %v11004_v22 = vld [vmem:[#allocation2 + $0x38] sm:$0xff]  ;;  %v11009_v55 = vld [vmem:[#allocation2 + $0x40] sm:$0xff]  ;;  %3855 = vst.msk [vmem:[#allocation2 + $0x59] sm:$0xff] %vm13348_vm13, %v3815_v16  ;;  %v3820_v59 = vmax.f32 %v3788_v0, 0.0  ;;  %v3750_v15 = vadd.f32 %v8503_v38, %v3425_v37  ;;  %v11018_v26 = vpack.c.bf16 %v3973_v25, %v3972_v60 }
 0x22f   : > { %v3132_v63 = vadd.f32 %v13344_v51, %v10894_v57  ;;  %v13345_v32 = vld [vmem:[#allocation19_spill] sm:$0xff]  ;;  %v3786_v57 = vadd.f32 %v10809_v52, %v3747_v43  ;;  %8603 = vmatpush3.bf16.msra.mxu1 %v8955_v5  ;;  %v3659_v39 = vpop.f32.mrf.mxu0  ;;  %13351 = vst [vmem:[#allocation22_spill] sm:$0xff] %v11023_v54  ;;  %v13352_v16 = vld [vmem:[#allocation20_spill] sm:$0xff]  ;;  %v8957_v37 = vld [vmem:[%s12739_s3 + $0x40] sm:$0xff]  }
 0x230   : > { %vm13346_vm12 = vnez %v13345_v32  ;;  %13349 = vst [vmem:[#allocation18_spill] sm:$0xff] %v11018_v26  ;;  %v11025_v33 = vld [vmem:[#allocation2 + $0x48] sm:$0xff]  ;;  %vm13353_vm13 = vnez %v13352_v16  ;;  %8604 = vmatprep.subr.bf16.mxu1 %v8956_v56  ;;  %8643 = vmatpush3.bf16.msra.mxu0 %v8959_v12  ;;  %v3789_v5 = vadd.f32 %v10809_v52, %v3750_v15  ;;  %v3748_v43 = vadd.f32 %v3659_v39, %v3423_v29  ;;  %v8961_v42 = vld [vmem:[%s12739_s3 + $0x60] sm:$0xff]   ;;  %v11056_v15 = vpop.f32.mrf.mxu1 }
 0x231   : > { %v3916_v30 = vsel %vm13346_vm12, %v10980_v47, 0.0  ;;  %v3918_v0 = vsel %vm13353_vm13, %v11009_v55, 0.0  ;;  %vm13354_vm12 = vcmask 523264   ;;  %v3818_v44 = vmax.f32 %v3786_v57, 0.0  ;;  %8644 = vmatprep.subr.bf16.mxu0 %v8960_v27  ;;  %v11041_v51 = vld [vmem:[#allocation2 + $0x22] sm:$0xff]  ;;  %v13356_v12 = vld [vmem:[#allocation87_spill] sm:$0xff]  ;;  %v8506_v29 = vpop.f32.mrf.mxu0 }
 0x232   : > { %v3945_v2 = vpack.c.bf16 %v11004_v22, %v3916_v30  ;;  %3860 = vst.msk [vmem:[#allocation2 + $0x81] sm:$0xff] %vm13354_vm12, %v3820_v59  ;;  %vm13355_vm7 = vmmov %vm13354_vm12  ;;  %v3946_v60 = vpack.c.bf16 %v11025_v33, %v3918_v0  ;;  %v11045_v38 = vadd.f32 %v13356_v12, %v10829_v62  ;;  %v13357_v25 = vld [vmem:[#allocation114_spill] sm:$0xff]  ;;  %v11053_v59 = vpack.c.bf16 %v5550_v50, %v11041_v51  ;;  %v13363_v50 = vld [vmem:[#allocation84_spill] sm:$0xff] }
 0x233   : > { %8533 = vmatmul.mubr.msk.bf16.gmra.mxu1 %vm13355_vm7, %v11018_v26  ;;  %v3135_v30 = vadd.f32 %v13357_v25, %v10901_v28  ;;  %vm13358_vm12 = vmmov %vm13355_vm7  ;;  %v3426_v57 = vadd.f32 %v10816_v9, %v3129_v23  ;;  %v3821_v62 = vmax.f32 %v3789_v5, 0.0  ;;  %v3787_v14 = vadd.f32 %v10809_v52, %v3748_v43  ;;  %v11061_v28 = vld [vmem:[#allocation2 + $0x50] sm:$0xff] }
 0x234   : > { %8573 = vmatmul.mubr.msk.bf16.gmra.mxu0 %vm13358_vm12, %v3945_v2  ;;  %8536 = vmatprep.mubr.msk.bf16.mxu1 %vm13355_vm7, %v11023_v54  ;;  %13359 = vst [vmem:[#allocation25_spill] sm:$0xff] %v11053_v59  ;;  %vm13360_vm13 = vmmov %vm13355_vm7  ;;  %v3753_v10 = vadd.f32 %v8506_v29, %v3428_v45  ;;  %v11063_v39 = vld [vmem:[#allocation2 + $0x4a] sm:$0xff]  ;;  %v13362_v2 = vld [vmem:[#allocation85_spill] sm:$0xff]  ;;  %v3429_v9 = vadd.f32 %v10838_v7, %v3132_v63 }
 0x235   : > { %3858 = vst.msk [vmem:[#allocation2 + $0x71] sm:$0xff] %vm13360_vm13, %v3818_v44  ;;  %vm13361_vm15 = vmmov %vm13355_vm7  ;;  %8605 = vmatpush3.bf16.msra.mxu1 %v8956_v56  ;;  %v11067_v0 = vadd.f32 %v13363_v50, %v13362_v2  ;;  %v3427_v23 = vadd.f32 %v10856_v3, %v3130_v11  ;;  %v3672_v44 = vpop.f32.mrf.mxu0  ;;  %8645 = vmatpush3.bf16.msra.mxu0 %v8960_v27  ;;  %v11074_v45 = vld [vmem:[%s12739_s3 + $0x98] sm:$0xff]   ;;  %v13364_v56 = vld [vmem:[#allocation115_spill] sm:$0xff]  ;;  %v3819_v43 = vmax.f32 %v3787_v14, 0.0  ;;  %v5554_v50 = vsel %vm9691_vm0, %v11063_v39, 0.0 }
 0x236   : > { %8576 = vmatprep.mubr.msk.bf16.mxu0 %vm13361_vm15, %v3946_v60  ;;  %8606 = vmatprep.subr.bf16.mxu1 %v8957_v37  ;;  %v3133_v5 = vadd.f32 %v13364_v56, %v10913_v41  ;;  %vm13365_vm15 = vmmov %vm13355_vm7  ;;  %v3792_v60 = vadd.f32 %v10809_v52, %v3753_v10  ;;  %v3751_v12 = vadd.f32 %v3672_v44, %v3426_v57  ;;  %v3976_v7 = vld [vmem:[#allocation2 + $0x51] sm:$0xff]  ;;  %v3979_v63 = vld [vmem:[#allocation2 + $0x69] sm:$0xff]  ;;  %v11098_v44 = vpop.f32.mrf.mxu1 }
 0x237   : > { %3861 = vst.msk [vmem:[#allocation2 + $0x89] sm:$0xff] %vm13365_vm15, %v3821_v62  ;;  %8646 = vmatprep.subr.bf16.mxu0 %v8961_v42  ;;  %v11083_v3 = vld [vmem:[%s12739_s3 + $0xb8] sm:$0xff]   ;;  %v3432_v27 = vadd.f32 %v10875_v53, %v3135_v30  ;;  %v8507_v41 = vpop.f32.mrf.mxu0  ;;  %v13367_v14 = vld [vmem:[#allocation23_spill] sm:$0xff]  ;;  %v11093_v10 = vld [vmem:[#allocation2 + $0x60] sm:$0xff] }
 0x238   : > { %v13366_v11 = vld [vmem:[#allocation116_spill] sm:$0xff]  ;;  %vm13368_vm13 = vnez %v13367_v14  ;;  %vm13370_vm12 = vmmov %vm13355_vm7  ;;  %v3824_v53 = vmax.f32 %v3792_v60, 0.0  ;;  %v3754_v30 = vadd.f32 %v8507_v41, %v3429_v9  ;;  %v13372_v54 = vld [vmem:[#allocation118_spill] sm:$0xff] }
 0x239   : > { %v3136_v25 = vadd.f32 %v13366_v11, %v10919_v49  ;;  %v3977_v29 = vld [vmem:[#allocation2 + $0x59] sm:$0xff]  ;;  %v3920_v57 = vsel %vm13368_vm13, %v11061_v28, 0.0  ;;  %3859 = vst.msk [vmem:[#allocation2 + $0x79] sm:$0xff] %vm13370_vm12, %v3819_v43  ;;  %v3790_v49 = vadd.f32 %v10809_v52, %v3751_v12  ;;  %v3978_v11 = vld [vmem:[#allocation2 + $0x61] sm:$0xff]  ;;  %8607 = vmatpush3.bf16.msra.mxu1 %v8957_v37  ;;  %v3134_v26 = vadd.f32 %v13372_v54, %v10962_v21  ;;  %v3675_v59 = vpop.f32.mrf.mxu0  ;;  %vm13376_vm15 = vmmov %vm13370_vm12 }
 0x23a   : > { %v11088_v62 = vld [vmem:[#allocation2 + $0x58] sm:$0xff]  ;;  %v11102_v56 = vpack.c.bf16 %v3977_v29, %v3976_v7  ;;  %v11107_v4 = vpack.c.bf16 %v3979_v63, %v3978_v11  ;;  %v11109_v14 = vld [vmem:[#allocation2 + $0x68] sm:$0xff]  ;;  %8647 = vmatpush3.bf16.msra.mxu0 %v8961_v42  ;;  %8680 = vmatprep.subr.bf16.mxu1 %v11074_v45  ;;  %3864 = vst.msk [vmem:[#allocation2 + $0xa1] sm:$0xff] %vm13376_vm15, %v3824_v53  ;;  %vm13379_vm15 = vmmov %vm13370_vm12 }
 0x23b   : > { %v3947_v20 = vpack.c.bf16 %v11088_v62, %v3920_v57  ;;  %v13374_v43 = vld [vmem:[#allocation24_spill] sm:$0xff]  ;;  %v3822_v37 = vmax.f32 %v3790_v49, 0.0  ;;  %v3793_v9 = vadd.f32 %v10809_v52, %v3754_v30  ;;  %v3752_v21 = vadd.f32 %v3675_v59, %v3427_v23  ;;  %v11120_v12 = vld [vmem:[#allocation2 + $0x42] sm:$0xff]  ;;  %8720 = vmatprep.subr.bf16.mxu0 %v11083_v3  ;;  %v13378_v63 = vld [vmem:[#allocation119_spill] sm:$0xff]  ;;  %v8510_v29 = vpop.f32.mrf.mxu0  ;;  %v11134_v57 = vpop.f32.mrf.mxu1 }
 0x23c   : > { %13371 = vst [vmem:[#allocation29_spill] sm:$0xff] %v11102_v56  ;;  %13373 = vst [vmem:[#allocation26_spill] sm:$0xff] %v11107_v4  ;;  %vm13375_vm7 = vnez %v13374_v43  ;;  %8537 = vmatmul.mubr.msk.bf16.gmra.mxu1 %vm13370_vm12, %v11102_v56  ;;  %v13377_v7 = vld [vmem:[#allocation86_spill] sm:$0xff]  ;;  %v3139_v41 = vadd.f32 %v13378_v63, %v10966_v40  ;;  %v11131_v59 = vpack.c.bf16 %v5554_v50, %v11120_v12  ;;  %v13385_v30 = vld [vmem:[#allocation89_spill] sm:$0xff] }
 0x23d   : > { %v3922_v60 = vsel %vm13375_vm7, %v11093_v10, 0.0  ;;  %v2813_v42 = vadd.f32 %v13377_v7, %v11045_v38  ;;  %8577 = vmatmul.mubr.msk.bf16.gmra.mxu0 %vm13379_vm15, %v3947_v20  ;;  %vm13380_vm7 = vmmov %vm13370_vm12  ;;  %v3430_v23 = vadd.f32 %v10905_v8, %v3133_v5  ;;  %v3825_v53 = vmax.f32 %v3793_v9, 0.0  ;;  %v11139_v20 = vld [vmem:[#allocation2 + $0x70] sm:$0xff]  ;;  %v3688_v9 = vpop.f32.mrf.mxu0 }
 0x23e   : > { %v3948_v54 = vpack.c.bf16 %v11109_v14, %v3922_v60  ;;  %8540 = vmatprep.mubr.msk.bf16.mxu1 %vm13380_vm7, %v11107_v4  ;;  %13381 = vst [vmem:[#allocation30_spill] sm:$0xff] %v11131_v59  ;;  %vm13382_vm12 = vmmov %vm13380_vm7  ;;  %v3791_v38 = vadd.f32 %v10809_v52, %v3752_v21  ;;  %v3757_v49 = vadd.f32 %v8510_v29, %v3432_v27  ;;  %v11141_v40 = vld [vmem:[#allocation2 + $0x6a] sm:$0xff]  ;;  %v13386_v11 = vld [vmem:[#allocation88_spill] sm:$0xff] }
 0x23f   : > { %3862 = vst.msk [vmem:[#allocation2 + $0x91] sm:$0xff] %vm13382_vm12, %v3822_v37  ;;  %vm13383_vm13 = vmmov %vm13380_vm7  ;;  %v2818_v50 = vadd.f32 %v13386_v11, %v13385_v30  ;;  %v13387_v60 = vld [vmem:[#allocation95_spill] sm:$0xff]  ;;  %v3433_v5 = vadd.f32 %v10935_v34, %v3136_v25  ;;  %v3431_v37 = vadd.f32 %v10974_v19, %v3134_v26  ;;  %v13388_v21 = vld [vmem:[#allocation121_spill] sm:$0xff]  ;;  %v3755_v63 = vadd.f32 %v3688_v9, %v3430_v23  ;;  %v8511_v34 = vpop.f32.mrf.mxu0 }
 0x240   : > { %8580 = vmatprep.mubr.msk.bf16.mxu0 %vm13383_vm13, %v3948_v54  ;;  %13384 = vst [vmem:[#allocation34_spill] sm:$0xff] %v11139_v20  ;;  %v2488_v8 = vadd.f32 %v13387_v60, %v10832_v18  ;;  %v3137_v27 = vadd.f32 %v13388_v21, %v10986_v61  ;;  %3865 = vst.msk [vmem:[#allocation2 + $0xa9] sm:$0xff] %vm13380_vm7, %v3825_v53  ;;  %v3823_v54 = vmax.f32 %v3791_v38, 0.0  ;;  %v3980_v29 = vld [vmem:[#allocation2 + $0x71] sm:$0xff]  ;;  %v3983_v4 = vld [vmem:[#allocation2 + $0x89] sm:$0xff]  ;;  %v5558_v23 = vsel %vm9728_vm4, %v11141_v40, 0.0 }
 0x241   : > { %v3796_v7 = vadd.f32 %v10809_v52, %v3757_v49  ;;  %v3436_v30 = vadd.f32 %v11014_v6, %v3139_v41  ;;  %v13389_v18 = vld [vmem:[#allocation122_spill] sm:$0xff]  ;;  %v3981_v25 = vld [vmem:[#allocation2 + $0x79] sm:$0xff]  ;;  %v13390_v26 = vld [vmem:[#allocation27_spill] sm:$0xff]  ;;  %v8484_v49 = vpop.f32.mrf.mxu1  ;;  %v3758_v41 = vadd.f32 %v8511_v34, %v3433_v5  ;;  %v3691_v56 = vpop.f32.mrf.mxu0 }
 0x242   : > { %v3140_v11 = vadd.f32 %v13389_v18, %v11067_v0  ;;  %v11156_v19 = vld [vmem:[#allocation2 + $0x78] sm:$0xff]  ;;  %vm13391_vm13 = vnez %v13390_v26  ;;  %v11161_v53 = vld [vmem:[#allocation2 + $0x80] sm:$0xff]  ;;  %v13392_v38 = vld [vmem:[#allocation51_spill] sm:$0xff]  ;;  %v3794_v0 = vadd.f32 %v10809_v52, %v3755_v63  ;;  %v11168_v60 = vpack.c.bf16 %v3981_v25, %v3980_v29 }
 0x243   : > { %v3924_v61 = vsel %vm13391_vm13, %v11139_v20, 0.0  ;;  %vm13393_vm15 = vmmov %vm13380_vm7  ;;  %v3828_v6 = vmax.f32 %v3796_v7, 0.0  ;;  %v3982_v9 = vld [vmem:[#allocation2 + $0x81] sm:$0xff]  ;;  %v13395_v21 = vld [vmem:[#allocation124_spill] sm:$0xff]  ;;  %v3797_v5 = vadd.f32 %v10809_v52, %v3758_v41  ;;  %v3756_v63 = vadd.f32 %v3691_v56, %v3431_v37  ;;  %v8514_v25 = vpop.f32.mrf.mxu0  ;;  %v3395_v37 = vpop.f32.mrf.mxu1 }
 0x244   : > { %3863 = vst.msk [vmem:[#allocation2 + $0x99] sm:$0xff] %vm13393_vm15, %v3823_v54  ;;  %13394 = vst [vmem:[#allocation33_spill] sm:$0xff] %v11168_v60  ;;  %v3138_v18 = vadd.f32 %v13395_v21, %v2813_v42  ;;  %v3949_v59 = vpack.c.bf16 %v11156_v19, %v3924_v61  ;;  %v11172_v26 = vpack.c.bf16 %v3983_v4, %v3982_v9  ;;  %v11174_v43 = vld [vmem:[#allocation2 + $0x88] sm:$0xff]  ;;  %v13398_v20 = vld [vmem:[#allocation28_spill] sm:$0xff]  ;;  %v3826_v7 = vmax.f32 %v3794_v0, 0.0 }
 0x245   : > { %13397 = vst [vmem:[#allocation38_spill] sm:$0xff] %v11174_v43  ;;  %vm13399_vm12 = vnez %v13398_v20  ;;  %3868 = vst.msk [vmem:[#allocation2 + $0xc1] sm:$0xff] %vm13380_vm7, %v3828_v6  ;;  %v11184_v29 = vld [vmem:[#allocation2 + $0x62] sm:$0xff]  ;;  %v3434_v56 = vadd.f32 %v11056_v15, %v3137_v27  ;;  %v3829_v6 = vmax.f32 %v3797_v5, 0.0  ;;  %v3795_v0 = vadd.f32 %v10809_v52, %v3756_v63  ;;  %v13407_v9 = vld [vmem:[#allocation91_spill] sm:$0xff]  ;;  %v3704_v5 = vpop.f32.mrf.mxu0 }
 0x246   : > { %13396 = vst [vmem:[#allocation37_spill] sm:$0xff] %v11172_v26  ;;  %v3926_v54 = vsel %vm13399_vm12, %v11161_v53, 0.0  ;;  %vm13400_vm15 = vmmov %vm13380_vm7  ;;  %v13401_v4 = vld [vmem:[#allocation125_spill] sm:$0xff]  ;;  %v11191_v61 = vpack.c.bf16 %v5558_v23, %v11184_v29  ;;  %v3761_v41 = vadd.f32 %v8514_v25, %v3436_v30  ;;  %v13408_v21 = vld [vmem:[#allocation90_spill] sm:$0xff]  ;;  %v3435_v63 = vadd.f32 %v11134_v57, %v3138_v18 }
 0x247   : > { %8541 = vmatmul.mubr.msk.bf16.gmra.mxu1 %vm13400_vm15, %v11168_v60  ;;  %v3950_v42 = vpack.c.bf16 %v11174_v43, %v3926_v54  ;;  %v3143_v34 = vadd.f32 %v13401_v4, %v2818_v50  ;;  %vm13402_vm13 = vmmov %vm13380_vm7  ;;  %3866 = vst.msk [vmem:[#allocation2 + $0xb1] sm:$0xff] %vm13380_vm7, %v3826_v7  ;;  %v11197_v50 = vld [vmem:[#allocation2 + $0x90] sm:$0xff]  ;;  %v2816_v54 = vadd.f32 %v13408_v21, %v13407_v9  ;;  %v13409_v23 = vld [vmem:[#allocation93_spill] sm:$0xff]  ;;  %v3827_v30 = vmax.f32 %v3795_v0, 0.0  ;;  %v8515_v43 = vpop.f32.mrf.mxu0 }
 0x248   : > { %8581 = vmatmul.mubr.msk.bf16.gmra.mxu0 %vm13402_vm13, %v3949_v59  ;;  %vm13403_vm12 = vmmov %vm13380_vm7  ;;  %13404 = vst [vmem:[#allocation43_spill] sm:$0xff] %v11191_v61  ;;  %v11199_v59 = vld [vmem:[#allocation2 + $0x8a] sm:$0xff]  ;;  %v13410_v4 = vld [vmem:[#allocation92_spill] sm:$0xff]  ;;  %v3437_v7 = vadd.f32 %v11098_v44, %v3140_v11  ;;  %v3759_v25 = vadd.f32 %v3704_v5, %v3434_v56  ;;  %v8485_v56 = vpop.f32.mrf.mxu1 }
 0x249   : > { %8544 = vmatprep.mubr.msk.bf16.mxu1 %vm13403_vm12, %v11172_v26  ;;  %vm13405_vm15 = vmmov %vm13380_vm7  ;;  %13406 = vst [vmem:[#allocation42_spill] sm:$0xff] %v11197_v50  ;;  %v2819_v26 = vadd.f32 %v13410_v4, %v13409_v23  ;;  %v13411_v15 = vld [vmem:[#allocation94_spill] sm:$0xff]  ;;  %v3984_v60 = vld [vmem:[#allocation2 + $0x91] sm:$0xff]  ;;  %v3440_v21 = vadd.f32 %v8484_v49, %v3143_v34  ;;  %v5562_v18 = vsel %vm9773_vm8, %v11199_v59, 0.0 }
 0x24a   : > { %8584 = vmatprep.mubr.msk.bf16.mxu0 %vm13405_vm15, %v3950_v42  ;;  %v2817_v27 = vadd.f32 %v13411_v15, %v2488_v8  ;;  %vm13412_vm13 = vmmov %vm13380_vm7  ;;  %v3800_v42 = vadd.f32 %v10809_v52, %v3761_v41  ;;  %v3987_v61 = vld [vmem:[#allocation2 + $0xa9] sm:$0xff]  ;;  %v13416_v11 = vld [vmem:[#allocation53_spill] sm:$0xff]  ;;  %3867 = vst.msk [vmem:[#allocation2 + $0xb9] sm:$0xff] %vm13380_vm7, %v3827_v30  ;;  %v3762_v49 = vadd.f32 %v8515_v43, %v3437_v7 }
 0x24b   : > { %3869 = vst.msk [vmem:[#allocation2 + $0xc9] sm:$0xff] %vm13412_vm13, %v3829_v6  ;;  %v13413_v20 = vld [vmem:[#allocation126_spill] sm:$0xff]  ;;  %v3985_v23 = vld [vmem:[#allocation2 + $0x99] sm:$0xff]  ;;  %v13414_v44 = vld [vmem:[#allocation31_spill] sm:$0xff]  ;;  %v3144_v41 = vadd.f32 %v10785_v31, %v2819_v26 }
 0x24c   : > { %v3141_v9 = vadd.f32 %v13413_v20, %v2816_v54  ;;  %v11211_v4 = vld [vmem:[#allocation2 + $0x98] sm:$0xff]  ;;  %vm13415_vm12 = vnez %v13414_v44  ;;  %v11216_v57 = vld [vmem:[#allocation2 + $0xa0] sm:$0xff]  ;;  %v3832_v6 = vmax.f32 %v3800_v42, 0.0  ;;  %v3798_v20 = vadd.f32 %v10809_v52, %v3759_v25  ;;  %v3707_v54 = vpop.f32.mrf.mxu0  ;;  %v11229_v44 = vld [vmem:[#allocation2 + $0xa8] sm:$0xff] }
 0x24d   : > { %v3928_v8 = vsel %vm13415_vm12, %v11197_v50, 0.0  ;;  %v11223_v34 = vpack.c.bf16 %v3985_v23, %v3984_v60  ;;  %v3986_v0 = vld [vmem:[#allocation2 + $0xa1] sm:$0xff]  ;;  %v13419_v50 = vld [vmem:[#allocation32_spill] sm:$0xff]  ;;  %vm13421_vm13 = vmmov %vm13380_vm7  ;;  %v3801_v43 = vadd.f32 %v10809_v52, %v3762_v49  ;;  %v3760_v60 = vadd.f32 %v3707_v54, %v3435_v63  ;;  %v3398_v63 = vpop.f32.mrf.mxu1 }
 0x24e   : > { %v3951_v15 = vpack.c.bf16 %v11211_v4, %v3928_v8  ;;  %v11227_v5 = vpack.c.bf16 %v3987_v61, %v3986_v0  ;;  %vm13420_vm15 = vnez %v13419_v50  ;;  %3872 = vst.msk [vmem:[#allocation2 + $0xe1] sm:$0xff] %vm13421_vm13, %v3832_v6  ;;  %v3830_v42 = vmax.f32 %v3798_v20, 0.0  ;;  %v11239_v26 = vld [vmem:[#allocation2 + $0x82] sm:$0xff]  ;;  %vm13422_vm12 = vmmov %vm13380_vm7  ;;  %v8518_v7 = vpop.f32.mrf.mxu0  ;;  %v3988_v54 = vld [vmem:[#allocation2 + $0xb1] sm:$0xff] }
 0x24f   : > { %13417 = vst [vmem:[#allocation97_spill] sm:$0xff] %v11223_v34  ;;  %v3930_v30 = vsel %vm13420_vm15, %v11216_v57, 0.0  ;;  %8545 = vmatmul.mubr.msk.bf16.gmra.mxu1 %vm13380_vm7, %v11223_v34  ;;  %v3142_v61 = vadd.f32 %v10798_v13, %v2817_v27  ;;  %vm13423_vm15 = vmmov %vm13380_vm7  ;;  %v11246_v25 = vpack.c.bf16 %v5562_v18, %v11239_v26  ;;  %v3438_v23 = vadd.f32 %v3395_v37, %v3141_v9  ;;  %v11251_v13 = vld [vmem:[#allocation2 + $0xb0] sm:$0xff] }
 0x250   : > { %13418 = vst [vmem:[#allocation100_spill] sm:$0xff] %v11227_v5  ;;  %v3952_v31 = vpack.c.bf16 %v11229_v44, %v3930_v30  ;;  %8585 = vmatmul.mubr.msk.bf16.gmra.mxu0 %vm13422_vm12, %v3951_v15  ;;  %8548 = vmatprep.mubr.msk.bf16.mxu1 %vm13423_vm15, %v11227_v5  ;;  %vm13425_vm13 = vmmov %vm13380_vm7  ;;  %v3833_v8 = vmax.f32 %v3801_v43, 0.0  ;;  %v3799_v6 = vadd.f32 %v10809_v52, %v3760_v60  ;;  %v11253_v27 = vld [vmem:[#allocation2 + $0xaa] sm:$0xff]  ;;  %v3720_v49 = vpop.f32.mrf.mxu0 }
 0x251   : > { %13424 = vst [vmem:[#allocation61_spill] sm:$0xff] %v11246_v25  ;;  %3870 = vst.msk [vmem:[#allocation2 + $0xd1] sm:$0xff] %vm13425_vm13, %v3830_v42  ;;  %v3765_v20 = vadd.f32 %v8518_v7, %v3440_v21  ;;  %v3441_v0 = vadd.f32 %v8485_v56, %v3144_v41  ;;  %v3763_v9 = vadd.f32 %v3720_v49, %v3438_v23  ;;  %v3989_v43 = vld [vmem:[#allocation2 + $0xb9] sm:$0xff]  ;;  %v13427_v60 = vld [vmem:[#allocation35_spill] sm:$0xff]  ;;  %v5566_v41 = vsel %vm13196_vm9, %v11253_v27, 0.0 }
 0x252   : > { %8588 = vmatprep.mubr.msk.bf16.mxu0 %vm13380_vm7, %v3952_v31  ;;  %vm13426_vm12 = vmmov %vm13380_vm7  ;;  %v3831_v18 = vmax.f32 %v3799_v6, 0.0  ;;  %v3991_v15 = vld [vmem:[#allocation2 + $0xc9] sm:$0xff]  ;;  %v3439_v30 = vadd.f32 %v3398_v63, %v3142_v61  ;;  %v8519_v42 = vpop.f32.mrf.mxu0  ;;  %v11257_v21 = vld [vmem:[#allocation2 + $0xb8] sm:$0xff]  ;;  %vm13428_vm15 = vnez %v13427_v60  ;;  %v11269_v63 = vpack.c.bf16 %v3989_v43, %v3988_v54 }
 0x253   : > { %3873 = vst.msk [vmem:[#allocation2 + $0xe9] sm:$0xff] %vm13426_vm12, %v3833_v8  ;;  %v3804_v37 = vadd.f32 %v10809_v52, %v3765_v20  ;;  %v3932_v31 = vsel %vm13428_vm15, %v11251_v13, 0.0  ;;  %v11262_v7 = vld [vmem:[#allocation2 + $0xc0] sm:$0xff]  ;;  %v13429_v56 = vld [vmem:[#allocation55_spill] sm:$0xff]  ;;  %vm13430_vm13 = vmmov %vm13380_vm7  ;;  %v3802_v8 = vadd.f32 %v10809_v52, %v3763_v9  ;;  %v3766_v61 = vadd.f32 %v8519_v42, %v3441_v0 }
 0x254   : > { %3871 = vst.msk [vmem:[#allocation2 + $0xd9] sm:$0xff] %vm13430_vm13, %v3831_v18  ;;  %13431 = vst [vmem:[#allocation46_spill] sm:$0xff] %v11269_v63  ;;  %v3990_v6 = vld [vmem:[#allocation2 + $0xc1] sm:$0xff]  ;;  %v3723_v20 = vpop.f32.mrf.mxu0  ;;  %v3953_v49 = vpack.c.bf16 %v11257_v21, %v3932_v31  ;;  %v13433_v25 = vld [vmem:[#allocation36_spill] sm:$0xff] }
 0x255   : > { %v3836_v23 = vmax.f32 %v3804_v37, 0.0  ;;  %v11272_v5 = vpack.c.bf16 %v3991_v15, %v3990_v6  ;;  %v11274_v34 = vld [vmem:[#allocation2 + $0xc8] sm:$0xff]  ;;  %vm13434_vm7 = vnez %v13433_v25  ;;  %v3834_v18 = vmax.f32 %v3802_v8, 0.0  ;;  %vm13435_vm13 = vmmov %vm13426_vm12 }
 0x256   : > { %v3934_v60 = vsel %vm13434_vm7, %v11262_v7, 0.0  ;;  %v3805_v37 = vadd.f32 %v10809_v52, %v3766_v61  ;;  %v3764_v0 = vadd.f32 %v3723_v20, %v3439_v30  ;;  %v11284_v54 = vld [vmem:[#allocation2 + $0xa2] sm:$0xff]  ;;  %vm13436_vm15 = vmmov %vm13426_vm12 }
 0x257   : > { %13432 = vst [vmem:[#allocation62_spill] sm:$0xff] %v11272_v5  ;;  %3876 = vst.msk [vmem:[#allocation2 + $0x101] sm:$0xff] %vm13426_vm12, %v3836_v23  ;;  %8549 = vmatmul.mubr.msk.bf16.gmra.mxu1 %vm13435_vm13, %v11269_v63  ;;  %v3954_v9 = vpack.c.bf16 %v11274_v34, %v3934_v60  ;;  %v11292_v42 = vpack.c.bf16 %v5566_v41, %v11284_v54  ;;  %v11299_v31 = vld [vmem:[#allocation2 + $0xc2] sm:$0xff] }
 0x258   : > { %8589 = vmatmul.mubr.msk.bf16.gmra.mxu0 %vm13436_vm15, %v3953_v49  ;;  %vm13437_vm9 = vmmov %vm13426_vm12  ;;  %v11289_v15 = vld [vmem:[#allocation2 + $0xca] sm:$0xff]  ;;  %v3837_v30 = vmax.f32 %v3805_v37, 0.0  ;;  %v3803_v43 = vadd.f32 %v10809_v52, %v3764_v0  ;;  %v13441_v23 = vld [vmem:[#allocation57_spill] sm:$0xff] }
 0x259   : > { %8552 = vmatprep.mubr.msk.bf16.mxu1 %vm13437_vm9, %v11272_v5  ;;  %13438 = vst [vmem:[#allocation71_spill] sm:$0xff] %v11292_v42  ;;  %vm13439_vm12 = vmmov %vm13437_vm9  ;;  %v11297_v60 = vld [vmem:[#allocation2 + $0xd0] sm:$0xff]  ;;  %v5570_v8 = vsel %vm13117_vm2, %v11289_v15, 0.0 }
 0x25a   : > { %3874 = vst.msk [vmem:[#allocation2 + $0xf1] sm:$0xff] %vm13439_vm12, %v3834_v18  ;;  %vm13440_vm13 = vmmov %vm13437_vm9  ;;  %v3835_v61 = vmax.f32 %v3803_v43, 0.0  ;;  %v3992_v41 = vld [vmem:[#allocation2 + $0xd1] sm:$0xff]  ;;  %v3995_v6 = vld [vmem:[#allocation2 + $0xe9] sm:$0xff]  ;;  %v11306_v20 = vpack.c.bf16 %v5570_v8, %v11299_v31  ;;  %v3936_v37 = vsel %vm13177_vm3, %v11297_v60, 0.0 }
 0x25b   : > { %8592 = vmatprep.mubr.msk.bf16.mxu0 %vm13440_vm13, %v3954_v9  ;;  %3877 = vst.msk [vmem:[#allocation2 + $0x109] sm:$0xff] %vm13437_vm9, %v3837_v30  ;;  %v3993_v49 = vld [vmem:[#allocation2 + $0xd9] sm:$0xff]  ;;  %vm13446_vm15 = vmmov %vm13437_vm9  ;;  %v3994_v43 = vld [vmem:[#allocation2 + $0xe1] sm:$0xff] }
 0x25c   : > { %13442 = vst [vmem:[#allocation103_spill] sm:$0xff] %v11306_v20  ;;  %v11308_v52 = vld [vmem:[#allocation2 + $0xd8] sm:$0xff]  ;;  %v11313_v0 = vld [vmem:[#allocation2 + $0xe0] sm:$0xff]  ;;  %3875 = vst.msk [vmem:[#allocation2 + $0xf9] sm:$0xff] %vm13446_vm15, %v3835_v61  ;;  %v11316_v9 = vpack.c.bf16 %v3993_v49, %v3992_v41  ;;  %v11324_v63 = vpack.c.bf16 %v3995_v6, %v3994_v43 }
 0x25d   : > { %13443 = vst [vmem:[#allocation98_spill] sm:$0xff] %v11308_v52  ;;  %13445 = vst [vmem:[#allocation65_spill] sm:$0xff] %v11313_v0  ;;  %v3955_v30 = vpack.c.bf16 %v11308_v52, %v3936_v37  ;;  %v11319_v5 = vld [vmem:[#allocation2 + $0xe8] sm:$0xff]  ;;  %v13449_v8 = vld [vmem:[#allocation40_spill] sm:$0xff] }
 0x25e   : > { %13447 = vst [vmem:[#allocation64_spill] sm:$0xff] %v11316_v9  ;;  %13448 = vst [vmem:[#allocation67_spill] sm:$0xff] %v11319_v5  ;;  %vm13450_vm12 = vnez %v13449_v8  ;;  %v4489_v61 = vld [vmem:[#allocation2 + $0xa] sm:$0xff]  ;;  %v11337_v37 = vld [vmem:[#allocation2 + $0xe2] sm:$0xff] }
 0x25f   : > { %v3938_v20 = vsel %vm13450_vm12, %v11313_v0, 0.0  ;;  %13451 = vst [vmem:[#allocation66_spill] sm:$0xff] %v11324_v63  ;;  %vm13452_vm13 = vmmov %vm13437_vm9 }
 0x260   : > { %v3956_v42 = vpack.c.bf16 %v11319_v5, %v3938_v20  ;;  %8553 = vmatmul.mubr.msk.bf16.gmra.mxu1 %vm13452_vm13, %v11316_v9  ;;  %8593 = vmatmul.mubr.msk.bf16.gmra.mxu0 %vm13437_vm9, %v3955_v30  ;;  %vm13453_vm15 = vmmov %vm13437_vm9  ;;  %13456 = vst [vmem:[#allocation99_spill] sm:$0xff] %v11337_v37  ;;  %v4488_v30 = vld [vmem:[#allocation2 + $0x2] sm:$0xff]  ;;  %v11361_v9 = vld [vmem:[#allocation2 + $0x1a] sm:$0xff] }
 0x261   : > { %8556 = vmatprep.mubr.msk.bf16.mxu1 %vm13453_vm15, %v11324_v63  ;;  %v11332_v41 = vld [vmem:[#allocation2 + $0xea] sm:$0xff]  ;;  %vm13455_vm3 = vmmov %vm13437_vm9  ;;  %v4521_v63 = vsel %vm13183_vm6, %v4489_v61, 0.0 }
 0x262   : > { %13454 = vst [vmem:[#allocation106_spill] sm:$0xff] %v11332_v41  ;;  %8596 = vmatprep.mubr.msk.bf16.mxu0 %vm13455_vm3, %v3956_v42  ;;  %v11335_v49 = vld [vmem:[#allocation2 + $0xf0] sm:$0xff]  ;;  %v5574_v20 = vsel %vm9899_vm11, %v11332_v41, 0.0  ;;  %v4552_v41 = vpack.c.bf16 %v4521_v63, %v4488_v30  ;;  %vm13463_vm13 = vmmov %vm13437_vm9  ;;  %v11373_v63 = vld [vmem:[#allocation2 + $0x108] sm:$0xff] }
 0x263   : > { %v11343_v43 = vpack.c.bf16 %v5574_v20, %v11337_v37  ;;  %v3996_v5 = vld [vmem:[#allocation2 + $0xf1] sm:$0xff]  ;;  %v3997_v18 = vld [vmem:[#allocation2 + $0xf9] sm:$0xff]  ;;  %v13462_v20 = vld [vmem:[#allocation14_spill] sm:$0xff] }
 0x264   : > { %v11347_v0 = vld [vmem:[#allocation2 + $0xf8] sm:$0xff]  ;;  %v11352_v25 = vpack.c.bf16 %v3997_v18, %v3996_v5  ;;  %v11363_v37 = vld [vmem:[#allocation2 + $0x100] sm:$0xff]  ;;  %vm13464_vm15 = vmmov %vm13437_vm9 }
 0x265   : > { %13458 = vst [vmem:[#allocation101_spill] sm:$0xff] %v11343_v43  ;;  %v13460_v42 = vld [vmem:[#allocation44_spill] sm:$0xff]  ;;  %v4873_v43 = vsel %vm13211_vm10, %v10909_v36, 0.0  ;;  %vm13465_vm6 = vmmov %vm13437_vm9  ;;  %v4523_v36 = vsel %vm13188_vm1, %v11361_v9, 0.0  ;;  %vm13504_vm10 = vnez %v13429_v56  ;;  %v6551_v18 = vld [vmem:[#allocation2 + $0x6a] sm:$0xff] }
 0x266   : > { %vm13461_vm3 = vnez %v13460_v42  ;;  %v4905_v61 = vpack.c.bf16 %v10928_v58, %v4873_v43  ;;  %v11368_v5 = vld [vmem:[#allocation2 + $0x12] sm:$0xff]  ;;  %v5928_v58 = vsel %vm13450_vm12, %v11363_v37, 0.0  ;;  %vm13471_vm1 = vmmov %vm13437_vm9  ;;  %v6545_v42 = vld [vmem:[#allocation2 + $0x3a] sm:$0xff] }
 0x267   : > { %v3940_v52 = vsel %vm13461_vm3, %v11335_v49, 0.0  ;;  %v4553_v43 = vpack.c.bf16 %v4523_v36, %v11368_v5  ;;  %v11403_v36 = vld [vmem:[#allocation2 + $0x10a] sm:$0xff]  ;;  %v4903_v8 = vsel %vm13461_vm3, %v11363_v37, 0.0 }
 0x268   : > { %v3957_v6 = vpack.c.bf16 %v11347_v0, %v3940_v52  ;;  %8557 = vmatmul.mubr.msk.bf16.gmra.mxu1 %vm13463_vm13, %v11352_v25  ;;  %v4875_v52 = vsel %vm13327_vm5, %v10933_v24, 0.0  ;;  %v8963_v24 = vld [vmem:[%s12739_s3 + $0x90] sm:$0xff]   ;;  %vm13469_vm13 = vmmov %vm13437_vm9 }
 0x269   : > { %8608 = vmatprep.mubr.msk.bf16.mxu1 %vm13464_vm15, %v4552_v41  ;;  %v4525_v41 = vsel %vm13084_vm14, %v10982_v46, 0.0  ;;  %v4906_v30 = vpack.c.bf16 %v10945_v35, %v4875_v52  ;;  %v8967_v35 = vld [vmem:[%s12739_s3 + $0xb0] sm:$0xff]   ;;  %vm13470_vm15 = vmmov %vm13437_vm9 }
 0x26a   : > { %8597 = vmatmul.mubr.msk.bf16.gmra.mxu0 %vm13437_vm9, %v3957_v6  ;;  %v11385_v6 = vpack.c.bf16 %v11373_v63, %v5928_v58  ;;  %v11398_v58 = vld [vmem:[#allocation2 + $0x3a] sm:$0xff] }
 0x26b   : > { %8648 = vmatprep.mubr.msk.bf16.mxu0 %vm13465_vm6, %v4905_v61  ;;  %v4554_v61 = vpack.c.bf16 %v4525_v41, %v11041_v51  ;;  %vm13468_vm6 = vnez %v13331_v1  ;;  %v11411_v51 = vld [vmem:[#allocation2 + $0x32] sm:$0xff]  ;;  %v5552_v37 = vsel %vm13084_vm14, %v11398_v58, 0.0 }
 0x26c   : > { %13467 = vst [vmem:[#allocation69_spill] sm:$0xff] %v11385_v6  ;;  %v4877_v17 = vsel %vm13468_vm6, %v10980_v47, 0.0  ;;  %v11407_v47 = vld [vmem:[#allocation2 + $0x102] sm:$0xff]  ;;  %v13472_v52 = vld [vmem:[#allocation60_spill] sm:$0xff] }
 0x26d   : > { %v4907_v46 = vpack.c.bf16 %v11004_v22, %v4877_v17  ;;  %v4527_v22 = vsel %vm9691_vm0, %v11398_v58, 0.0  ;;  %v8964_v17 = vld [vmem:[%s12739_s3 + $0x88] sm:$0xff]   ;;  %vm13479_vm0 = vcmask 523264  }
 0x26e   : > { %vm13482_vm5 = vmmov %vm13479_vm0  ;;  %v8972_v58 = vld [vmem:[%s12739_s3 + $0xc8] sm:$0xff]  }
 0x270   : > { %8609 = vmatmul.mubr.msk.bf16.vlgmr.msra.gmra.mxu1 %vm13469_vm13, %v4553_v43  ;;  %vm13473_vm13 = vnez %v13472_v52  ;;  %v13475_v43 = vld [vmem:[#allocation50_spill] sm:$0xff] }
 0x271   : > { %8612 = vmatprep.mubr.msk.bf16.mxu1 %vm13470_vm15, %v4554_v61  ;;  %8681 = vmatpush3.bf16.msra.mxu1 %v11074_v45  ;;  %v6603_v41 = vsel %vm13473_vm13, %v11403_v36, 0.0  ;;  %v8968_v61 = vld [vmem:[%s12739_s3 + $0xa8] sm:$0xff]   ;;  %vm13478_vm15 = vnez %v13352_v16 }
 0x272   : > { %8649 = vmatmul.mubr.msk.bf16.vlgmr.msra.gmra.mxu0 %vm13437_vm9, %v4906_v30  ;;  %8682 = vmatprep.subr.bf16.mxu1 %v8963_v24  ;;  %vm13476_vm9 = vnez %v13475_v43 }
 0x273   : > { %8652 = vmatprep.mubr.msk.bf16.mxu0 %vm13471_vm1, %v4907_v46  ;;  %8721 = vmatpush3.bf16.msra.mxu0 %v11083_v3  ;;  %vm13474_vm1 = vnez %v13345_v32  ;;  %v4529_v30 = vsel %vm13476_vm9, %v11063_v39, 0.0  ;;  %v11433_v46 = vpack.c.bf16 %v6603_v41, %v11407_v47  ;;  %v4555_v3 = vpack.c.bf16 %v4527_v22, %v11411_v51  ;;  %v8965_v39 = vld [vmem:[%s12739_s3 + $0x80] sm:$0xff]  }
 0x274   : > { %v4879_v45 = vsel %vm13474_vm1, %v11009_v55, 0.0  ;;  %8722 = vmatprep.subr.bf16.mxu0 %v8967_v35  ;;  %v4556_v6 = vpack.c.bf16 %v4529_v30, %v11120_v12  ;;  %v4881_v55 = vsel %vm13478_vm15, %v11061_v28, 0.0  ;;  %v11446_v22 = vld [vmem:[#allocation2 + $0x5a] sm:$0xff]  ;;  %vm13480_vm1 = vmmov %vm13479_vm0  ;;  %v11454_v28 = vld [vmem:[#allocation2 + $0x52] sm:$0xff] }
 0x275   : > { %13477 = vst [vmem:[#allocation68_spill] sm:$0xff] %v11433_v46  ;;  %8683 = vmatpush3.bf16.msra.mxu1 %v8963_v24  ;;  %v4908_v2 = vpack.c.bf16 %v11025_v33, %v4879_v45  ;;  %v4909_v41 = vpack.c.bf16 %v11088_v62, %v4881_v55  ;;  %v8969_v33 = vld [vmem:[%s12739_s3 + $0xa0] sm:$0xff]   ;;  %vm13481_vm15 = vmmov %vm13479_vm0  ;;  %v4531_v62 = vsel %vm9728_vm4, %v11446_v22, 0.0  ;;  %v11462_v12 = vld [vmem:[%s12739_s3 + $0xd8] sm:$0xff]  }
 0x276   : > { %8684 = vmatprep.subr.bf16.mxu1 %v8964_v17  ;;  %v13485_v24 = vld [vmem:[#allocation52_spill] sm:$0xff]  ;;  %v4557_v45 = vpack.c.bf16 %v4531_v62, %v11454_v28  ;;  %vm13490_vm4 = vmmov %vm13481_vm15 }
 0x277   : > { %8723 = vmatpush3.bf16.msra.mxu0 %v8967_v35  ;;  %v13488_v55 = vld [vmem:[#allocation24_spill] sm:$0xff] }
 0x278   : > { %8613 = vmatmul.mubr.msk.bf16.gmra.mxu1 %vm13479_vm0, %v4555_v3  ;;  %8724 = vmatprep.subr.bf16.mxu0 %v8968_v61  ;;  %v13487_v3 = vld [vmem:[#allocation34_spill] sm:$0xff]  ;;  %v11509_v46 = vld [vmem:[#allocation2 + $0x9a] sm:$0xff] }
 0x279   : > { %8616 = vmatprep.mubr.msk.bf16.mxu1 %vm13481_vm15, %v4556_v6  ;;  %8685 = vmatpush3.bf16.msra.mxu1 %v8964_v17  ;;  %v11473_v17 = vld [vmem:[%s12739_s3 + $0xf8] sm:$0xff]  }
 0x27a   : > { %8653 = vmatmul.mubr.msk.bf16.gmra.mxu0 %vm13480_vm1, %v4908_v2  ;;  %8686 = vmatprep.subr.bf16.mxu1 %v8965_v39  ;;  %v13483_v2 = vld [vmem:[#allocation23_spill] sm:$0xff]  ;;  %vm13489_vm1 = vnez %v13488_v55 }
 0x27b   : > { %8656 = vmatprep.mubr.msk.bf16.mxu0 %vm13482_vm5, %v4909_v41  ;;  %8725 = vmatpush3.bf16.msra.mxu0 %v8968_v61  ;;  %vm13484_vm0 = vnez %v13483_v2  ;;  %vm13486_vm5 = vnez %v13485_v24  ;;  %v11484_v41 = vld [vmem:[#allocation2 + $0x7a] sm:$0xff] }
 0x27c   : > { %v4883_v6 = vsel %vm13484_vm0, %v11093_v10, 0.0  ;;  %v4533_v35 = vsel %vm13486_vm5, %v11141_v40, 0.0  ;;  %8726 = vmatprep.subr.bf16.mxu0 %v8969_v33  ;;  %v4885_v10 = vsel %vm13489_vm1, %v13487_v3, 0.0  ;;  %vm13491_vm0 = vmmov %vm13490_vm4  ;;  %v13499_v3 = vld [vmem:[#allocation28_spill] sm:$0xff] }
 0x27d   : > { %8687 = vmatpush3.bf16.msra.mxu1 %v8965_v39  ;;  %v4910_v30 = vpack.c.bf16 %v11109_v14, %v4883_v6  ;;  %v4558_v61 = vpack.c.bf16 %v4533_v35, %v11184_v29  ;;  %v4911_v40 = vpack.c.bf16 %v11156_v19, %v4885_v10  ;;  %vm13492_vm6 = vmmov %vm13491_vm0  ;;  %v11490_v14 = vld [vmem:[#allocation2 + $0x72] sm:$0xff]  ;;  %v4535_v29 = vsel %vm9773_vm8, %v11484_v41, 0.0  ;;  %v13497_v35 = vld [vmem:[#allocation38_spill] sm:$0xff] }
 0x27e   : > { %8760 = vmatprep.subr.bf16.mxu1 %v11462_v12  ;;  %v13493_v39 = vld [vmem:[#allocation27_spill] sm:$0xff]  ;;  %v4559_v6 = vpack.c.bf16 %v4535_v29, %v11490_v14  ;;  %vm13502_vm8 = vmmov %vm13491_vm0 }
 0x27f   : > { %8727 = vmatpush3.bf16.msra.mxu0 %v8969_v33  ;;  %v13495_v33 = vld [vmem:[#allocation54_spill] sm:$0xff] }
 0x280   : > { %8617 = vmatmul.mubr.msk.bf16.gmra.mxu1 %vm13481_vm15, %v4557_v45  ;;  %8800 = vmatprep.subr.bf16.mxu0 %v11473_v17  ;;  %vm13494_vm15 = vnez %v13493_v39  ;;  %vm13496_vm1 = vnez %v13495_v33 }
 0x281   : > { %8620 = vmatprep.mubr.msk.bf16.mxu1 %vm13491_vm0, %v4558_v61  ;;  %v4887_v19 = vsel %vm13494_vm15, %v11161_v53, 0.0  ;;  %v4537_v62 = vsel %vm13496_vm1, %v11199_v59, 0.0  ;;  %v13498_v61 = vld [vmem:[#allocation42_spill] sm:$0xff]  ;;  %vm13503_vm15 = vmmov %vm13491_vm0  ;;  %v11514_v53 = vld [vmem:[#allocation2 + $0x92] sm:$0xff]  ;;  %v4539_v59 = vsel %vm13504_vm10, %v11509_v46, 0.0 }
 0x282   : > { %8657 = vmatmul.mubr.msk.bf16.gmra.mxu0 %vm13490_vm4, %v4910_v30  ;;  %v4912_v45 = vpack.c.bf16 %v13497_v35, %v4887_v19  ;;  %v4560_v30 = vpack.c.bf16 %v4537_v62, %v11239_v26  ;;  %vm13500_vm4 = vnez %v13499_v3  ;;  %v13505_v26 = vld [vmem:[#allocation31_spill] sm:$0xff]  ;;  %v4561_v62 = vpack.c.bf16 %v4539_v59, %v11514_v53  ;;  %vm13511_vm10 = vmmov %vm13491_vm0 }
 0x283   : > { %8660 = vmatprep.mubr.msk.bf16.mxu0 %vm13492_vm6, %v4911_v40  ;;  %v4889_v10 = vsel %vm13500_vm4, %v13498_v61, 0.0  ;;  %vm13501_vm6 = vmmov %vm13491_vm0  ;;  %vm13506_vm4 = vnez %v13505_v26  ;;  %v11533_v61 = vld [vmem:[#allocation2 + $0xba] sm:$0xff] }
 0x284   : > { %v4913_v40 = vpack.c.bf16 %v11211_v4, %v4889_v10  ;;  %v4891_v29 = vsel %vm13506_vm4, %v11216_v57, 0.0  ;;  %v13507_v4 = vld [vmem:[#allocation56_spill] sm:$0xff]  ;;  %vm13512_vm4 = vmmov %vm13491_vm0 }
 0x285   : > { %v11538_v57 = vld [vmem:[#allocation2 + $0xb2] sm:$0xff] }
 0x288   : > { %8621 = vmatmul.mubr.msk.bf16.gmra.mxu1 %vm13501_vm6, %v4559_v6  ;;  %vm13508_vm6 = vnez %v13507_v4  ;;  %v4914_v6 = vpack.c.bf16 %v11229_v44, %v4891_v29  ;;  %v4543_v44 = vsel %vm13117_vm2, %v11533_v61, 0.0  ;;  %vm13521_vm2 = vmmov %vm13491_vm0 }
 0x289   : > { %8624 = vmatprep.mubr.msk.bf16.mxu1 %vm13502_vm8, %v4560_v30  ;;  %v4541_v19 = vsel %vm13508_vm6, %v11253_v27, 0.0  ;;  %vm13509_vm8 = vnez %v13419_v50  ;;  %v4563_v10 = vpack.c.bf16 %v4543_v44, %v11538_v57 }
 0x28a   : > { %8661 = vmatmul.mubr.msk.bf16.gmra.mxu0 %vm13491_vm0, %v4912_v45  ;;  %v4562_v35 = vpack.c.bf16 %v4541_v19, %v11284_v54  ;;  %v4893_v45 = vsel %vm13509_vm8, %v11251_v13, 0.0  ;;  %v13513_v13 = vld [vmem:[#allocation35_spill] sm:$0xff]  ;;  %v4897_v19 = vsel %vm13434_vm7, %v11297_v60, 0.0 }
 0x28b   : > { %8664 = vmatprep.mubr.msk.bf16.mxu0 %vm13503_vm15, %v4913_v40  ;;  %vm13510_vm15 = vmmov %vm13491_vm0  ;;  %v4915_v30 = vpack.c.bf16 %v11257_v21, %v4893_v45  ;;  %vm13514_vm8 = vnez %v13513_v13  ;;  %v13515_v21 = vld [vmem:[#allocation58_spill] sm:$0xff]  ;;  %v13524_v60 = vld [vmem:[#allocation39_spill] sm:$0xff] }
 0x28c   : > { %v4895_v27 = vsel %vm13514_vm8, %v11262_v7, 0.0  ;;  %v11562_v7 = vld [vmem:[#allocation2 + $0xd2] sm:$0xff]  ;;  %vm13525_vm8 = vnez %v13524_v60  ;;  %v6543_v60 = vld [vmem:[#allocation2 + $0x2a] sm:$0xff] }
 0x28d   : > { %v4916_v40 = vpack.c.bf16 %v11274_v34, %v4895_v27  ;;  %v13522_v34 = vld [vmem:[#allocation59_spill] sm:$0xff] }
 0x290   : > { %8625 = vmatmul.mubr.msk.bf16.gmra.mxu1 %vm13510_vm15, %v4561_v62  ;;  %vm13516_vm15 = vnez %v13515_v21  ;;  %v13519_v62 = vld [vmem:[#allocation98_spill] sm:$0xff] }
 0x291   : > { %8628 = vmatprep.mubr.msk.bf16.mxu1 %vm13511_vm10, %v4562_v35  ;;  %v4545_v54 = vsel %vm13516_vm15, %v11289_v15, 0.0  ;;  %vm13518_vm10 = vmmov %vm13491_vm0  ;;  %v11557_v35 = vld [vmem:[#allocation2 + $0xda] sm:$0xff] }
 0x292   : > { %8665 = vmatmul.mubr.msk.bf16.gmra.mxu0 %vm13491_vm0, %v4914_v6  ;;  %v4564_v59 = vpack.c.bf16 %v4545_v54, %v11299_v31  ;;  %v4917_v6 = vpack.c.bf16 %v13519_v62, %v4897_v19  ;;  %v4547_v15 = vsel %vm9899_vm11, %v11557_v35, 0.0  ;;  %v13523_v31 = vld [vmem:[#allocation65_spill] sm:$0xff]  ;;  %v13527_v54 = vld [vmem:[#allocation67_spill] sm:$0xff]  ;;  %v4901_v19 = vsel %vm13450_vm12, %v11335_v49, 0.0 }
 0x293   : > { %8668 = vmatprep.mubr.msk.bf16.mxu0 %vm13512_vm4, %v4915_v30  ;;  %vm13520_vm4 = vmmov %vm13491_vm0  ;;  %v4899_v45 = vsel %vm13525_vm8, %v13523_v31, 0.0  ;;  %v13526_v30 = vld [vmem:[#allocation106_spill] sm:$0xff]  ;;  %v4565_v27 = vpack.c.bf16 %v4547_v15, %v11562_v7  ;;  %v4919_v62 = vpack.c.bf16 %v11347_v0, %v4901_v19  ;;  %v11586_v15 = vld [vmem:[#allocation2 + $0xf2] sm:$0xff]  ;;  %v5556_v19 = vsel %vm13476_vm9, %v11446_v22, 0.0 }
 0x294   : > { %v4549_v44 = vsel %vm13473_vm13, %v13526_v30, 0.0  ;;  %v13532_v31 = vld [vmem:[#allocation41_spill] sm:$0xff] }
 0x295   : > { %vm13533_vm11 = vnez %v13532_v31  ;;  %v13534_v0 = vld [vmem:[#allocation45_spill] sm:$0xff] }
 0x296   : > { %vm13535_vm12 = vnez %v13534_v0  ;;  %v13550_v22 = vld [vmem:[#allocation29_spill] sm:$0xff]  ;;  %v5578_v52 = vsel %vm13533_vm11, %v11403_v36, 0.0 }
 0x297   : > { %v5548_v49 = vsel %vm13535_vm12, %v11361_v9, 0.0  ;;  %v8971_v9 = vld [vmem:[%s12739_s3 + $0xd0] sm:$0xff]   ;;  %vm13541_vm12 = vmmov %vm13491_vm0  ;;  %v5872_v36 = vld [vmem:[#allocation2 + $0x40] sm:$0xff] }
 0x298   : > { %8629 = vmatmul.mubr.msk.bf16.gmra.mxu1 %vm13518_vm10, %v4563_v10  ;;  %v4918_v10 = vpack.c.bf16 %v13527_v54, %v4899_v45  ;;  %vm13530_vm10 = vmmov %vm13491_vm0  ;;  %v13538_v54 = vld [vmem:[#allocation17_spill] sm:$0xff] }
 0x299   : > { %8632 = vmatprep.mubr.msk.bf16.mxu1 %vm13491_vm0, %v4564_v59 }
 0x29a   : > { %8669 = vmatmul.mubr.msk.bf16.gmra.mxu0 %vm13520_vm4, %v4916_v40  ;;  %v13528_v40 = vld [vmem:[#allocation99_spill] sm:$0xff]  ;;  %vm13531_vm4 = vmmov %vm13491_vm0 }
 0x29b   : > { %8672 = vmatprep.mubr.msk.bf16.mxu0 %vm13521_vm2, %v4917_v6  ;;  %v4566_v59 = vpack.c.bf16 %v4549_v44, %v13528_v40  ;;  %vm13529_vm2 = vmmov %vm13491_vm0  ;;  %v11581_v6 = vld [vmem:[#allocation2 + $0xfa] sm:$0xff]  ;;  %v4920_v44 = vpack.c.bf16 %v11373_v63, %v4903_v8  ;;  %v13549_v8 = vld [vmem:[#allocation30_spill] sm:$0xff] }
 0x29c   : > { %v4551_v45 = vsel %vm13533_vm11, %v11581_v6, 0.0  ;;  %v13540_v63 = vld [vmem:[#allocation21_spill] sm:$0xff] }
 0x29d   : > { %v4567_v30 = vpack.c.bf16 %v4551_v45, %v11586_v15  ;;  %v13542_v40 = vld [vmem:[#allocation25_spill] sm:$0xff] }
 0x29e   : > { %v8977_v45 = vld [vmem:[%s12739_s3 + $0xe0] sm:$0xff]  }
 0x2a0   : > { %8633 = vmatmul.mubr.msk.bf16.gmra.mxu1 %vm13529_vm2, %v4565_v27  ;;  %vm13536_vm2 = vmmov %vm13491_vm0  ;;  %v5579_v27 = vpack.c.bf16 %v5548_v49, %v11368_v5  ;;  %v5581_v5 = vpack.c.bf16 %v5552_v37, %v11411_v51  ;;  %v8976_v51 = vld [vmem:[%s12739_s3 + $0xe8] sm:$0xff]   ;;  %v5560_v49 = vsel %vm13486_vm5, %v11484_v41, 0.0  ;;  %v5564_v41 = vsel %vm13496_vm1, %v11509_v46, 0.0  ;;  %v13559_v37 = vld [vmem:[#allocation37_spill] sm:$0xff] }
 0x2a1   : > { %8636 = vmatprep.mubr.msk.bf16.mxu1 %vm13531_vm4, %v4566_v59  ;;  %vm13539_vm4 = vmmov %vm13491_vm0  ;;  %v13544_v59 = vld [vmem:[#allocation18_spill] sm:$0xff] }
 0x2a2   : > { %8673 = vmatmul.mubr.msk.bf16.gmra.mxu0 %vm13530_vm10, %v4918_v10  ;;  %vm13537_vm10 = vmmov %vm13491_vm0  ;;  %v8975_v10 = vld [vmem:[%s12739_s3 + $0xf0] sm:$0xff]  }
 0x2a3   : > { %8676 = vmatprep.mubr.msk.bf16.mxu0 %vm13491_vm0, %v4919_v62  ;;  %v13547_v62 = vld [vmem:[#allocation22_spill] sm:$0xff]  ;;  %vm13564_vm5 = vmmov %vm13491_vm0 }
 0x2a8   : > { %8637 = vmatmul.mubr.msk.bf16.gmra.mxu1 %vm13536_vm2, %v4567_v30  ;;  %vm13543_vm2 = vmmov %vm13491_vm0  ;;  %v13553_v30 = vld [vmem:[#allocation26_spill] sm:$0xff] }
 0x2a9   : > { %8688 = vmatprep.mubr.msk.bf16.mxu1 %vm13539_vm4, %v13538_v54  ;;  %vm13546_vm4 = vmmov %vm13491_vm0  ;;  %v13557_v54 = vld [vmem:[#allocation33_spill] sm:$0xff] }
 0x2aa   : > { %8677 = vmatmul.mubr.msk.bf16.gmra.mxu0 %vm13537_vm10, %v4920_v44  ;;  %vm13545_vm10 = vmmov %vm13491_vm0  ;;  %v5585_v44 = vpack.c.bf16 %v5560_v49, %v11490_v14  ;;  %v13563_v14 = vld [vmem:[#allocation97_spill] sm:$0xff]  ;;  %v5594_v49 = vpack.c.bf16 %v5578_v52, %v11407_v47 }
 0x2ab   : > { %8728 = vmatprep.mubr.msk.bf16.mxu0 %vm13491_vm0, %v5579_v27  ;;  %v13555_v27 = vld [vmem:[#allocation43_spill] sm:$0xff] }
 0x2b0   : > { %8689 = vmatmul.mubr.msk.bf16.vlgmr.msra.gmra.mxu1 %vm13541_vm12, %v13540_v63  ;;  %vm13548_vm12 = vmmov %vm13491_vm0  ;;  %v13561_v63 = vld [vmem:[#allocation61_spill] sm:$0xff] }
 0x2b1   : > { %8692 = vmatprep.mubr.msk.bf16.mxu1 %vm13545_vm10, %v13544_v59  ;;  %8761 = vmatpush3.bf16.msra.mxu1 %v11462_v12  ;;  %v8973_v12 = vld [vmem:[%s12739_s3 + $0xc0] sm:$0xff]   ;;  %vm13552_vm10 = vmmov %vm13491_vm0  ;;  %v5572_v59 = vsel %vm13516_vm15, %v11557_v35, 0.0 }
 0x2b2   : > { %8729 = vmatmul.mubr.msk.bf16.vlgmr.msra.gmra.mxu0 %vm13543_vm2, %v13542_v40  ;;  %8762 = vmatprep.subr.bf16.mxu1 %v8971_v9  ;;  %vm13551_vm2 = vmmov %vm13491_vm0  ;;  %v13567_v40 = vld [vmem:[#allocation71_spill] sm:$0xff] }
 0x2b3   : > { %8732 = vmatprep.mubr.msk.bf16.mxu0 %vm13546_vm4, %v5581_v5  ;;  %8801 = vmatpush3.bf16.msra.mxu0 %v11473_v17  ;;  %v5583_v17 = vpack.c.bf16 %v5556_v19, %v11454_v28  ;;  %v11650_v28 = vld [vmem:[%s12739_s3 + $0x118] sm:$0xff]   ;;  %vm13554_vm4 = vmmov %vm13491_vm0  ;;  %v5568_v5 = vsel %vm13508_vm6, %v11533_v61, 0.0  ;;  %v5591_v61 = vpack.c.bf16 %v5572_v59, %v11562_v7  ;;  %v5576_v19 = vsel %vm13473_vm13, %v11581_v6, 0.0  ;;  %v5868_v7 = vld [vmem:[#allocation2 + $0x20] sm:$0xff] }
 0x2b4   : > { %8802 = vmatprep.subr.bf16.mxu0 %v8975_v10  ;;  %v5589_v46 = vpack.c.bf16 %v5568_v5, %v11538_v57  ;;  %v13576_v57 = vld [vmem:[#allocation64_spill] sm:$0xff]  ;;  %v5593_v35 = vpack.c.bf16 %v5576_v19, %v11586_v15  ;;  %vm13584_vm13 = vnez %v13462_v20 }
 0x2b5   : > { %8763 = vmatpush3.bf16.msra.mxu1 %v8971_v9  ;;  %v5587_v9 = vpack.c.bf16 %v5564_v41, %v11514_v53  ;;  %v13569_v53 = vld [vmem:[#allocation46_spill] sm:$0xff]  ;;  %v5900_v6 = vsel %vm13584_vm13, %v5868_v7, 0.0  ;;  %v5870_v20 = vld [vmem:[#allocation2 + $0x30] sm:$0xff]  ;;  %vm13590_vm13 = vmmov %vm13491_vm0 }
 0x2b6   : > { %8764 = vmatprep.subr.bf16.mxu1 %v8972_v58  ;;  %v5875_v19 = vld [vmem:[#allocation2 + $0x58] sm:$0xff] }
 0x2b7   : > { %8803 = vmatpush3.bf16.msra.mxu0 %v8975_v10  ;;  %v13566_v10 = vld [vmem:[#allocation100_spill] sm:$0xff] }
 0x2b8   : > { %8693 = vmatmul.mubr.msk.bf16.gmra.mxu1 %vm13548_vm12, %v13547_v62  ;;  %8804 = vmatprep.subr.bf16.mxu0 %v8976_v51  ;;  %vm13556_vm12 = vmmov %vm13491_vm0  ;;  %v13580_v62 = vld [vmem:[#allocation101_spill] sm:$0xff] }
 0x2b9   : > { %8696 = vmatprep.mubr.msk.bf16.mxu1 %vm13551_vm2, %v13550_v22  ;;  %8765 = vmatpush3.bf16.msra.mxu1 %v8972_v58  ;;  %vm13558_vm2 = vmmov %vm13491_vm0  ;;  %v13572_v58 = vld [vmem:[#allocation62_spill] sm:$0xff]  ;;  %v6228_v7 = vld [vmem:[#allocation2 + $0x59] sm:$0xff] }
 0x2ba   : > { %8733 = vmatmul.mubr.msk.bf16.gmra.mxu0 %vm13491_vm0, %v13549_v8  ;;  %8766 = vmatprep.subr.bf16.mxu1 %v8973_v12  ;;  %v6222_v8 = vld [vmem:[#allocation2 + $0x29] sm:$0xff] }
 0x2bb   : > { %8736 = vmatprep.mubr.msk.bf16.mxu0 %vm13552_vm10, %v5583_v17  ;;  %8805 = vmatpush3.bf16.msra.mxu0 %v8976_v51  ;;  %vm13560_vm10 = vmmov %vm13491_vm0  ;;  %v13574_v51 = vld [vmem:[#allocation103_spill] sm:$0xff] }
 0x2bc   : > { %8806 = vmatprep.subr.bf16.mxu0 %v8977_v45  ;;  %v5225_v17 = vld [vmem:[#allocation2 + $0x109] sm:$0xff] }
 0x2bd   : > { %8767 = vmatpush3.bf16.msra.mxu1 %v8973_v12  ;;  %v13578_v12 = vld [vmem:[#allocation66_spill] sm:$0xff] }
 0x2be   : > { %8840 = vmatprep.subr.bf16.mxu1 %v11650_v28  ;;  %v5869_v22 = vld [vmem:[#allocation2 + $0x28] sm:$0xff] }
 0x2bf   : > { %8807 = vmatpush3.bf16.msra.mxu0 %v8977_v45  ;;  %v5224_v45 = vld [vmem:[#allocation2 + $0x101] sm:$0xff] }
 0x2c0   : > { %8697 = vmatmul.mubr.msk.bf16.gmra.mxu1 %vm13554_vm4, %v13553_v30  ;;  %vm13562_vm4 = vmmov %vm13491_vm0  ;;  %v11713_v15 = vpack.c.bf16 %v5225_v17, %v5224_v45  ;;  %v5932_v30 = vpack.c.bf16 %v5869_v22, %v5900_v6  ;;  %v6230_v6 = vld [vmem:[#allocation2 + $0x69] sm:$0xff] }
 0x2c1   : > { %8700 = vmatprep.mubr.msk.bf16.mxu1 %vm13491_vm0, %v13557_v54  ;;  %v6224_v54 = vld [vmem:[#allocation2 + $0x39] sm:$0xff] }
 0x2c2   : > { %8737 = vmatmul.mubr.msk.bf16.gmra.mxu0 %vm13556_vm12, %v13555_v27  ;;  %vm13565_vm12 = vmmov %vm13491_vm0  ;;  %v5871_v27 = vld [vmem:[#allocation2 + $0x38] sm:$0xff] }
 0x2c3   : > { %8740 = vmatprep.mubr.msk.bf16.mxu0 %vm13558_vm2, %v5585_v44  ;;  %vm13568_vm2 = vmmov %vm13491_vm0 }
 0x2c8   : > { %8701 = vmatmul.mubr.msk.bf16.gmra.mxu1 %vm13560_vm10, %v13559_v37  ;;  %vm13570_vm10 = vmmov %vm13491_vm0  ;;  %v6226_v37 = vld [vmem:[#allocation2 + $0x49] sm:$0xff] }
 0x2c9   : > { %8704 = vmatprep.mubr.msk.bf16.mxu1 %vm13564_vm5, %v13563_v14  ;;  %vm13573_vm5 = vmmov %vm13491_vm0  ;;  %v5873_v14 = vld [vmem:[#allocation2 + $0x48] sm:$0xff] }
 0x2ca   : > { %8741 = vmatmul.mubr.msk.bf16.gmra.mxu0 %vm13562_vm4, %v13561_v63  ;;  %vm13571_vm4 = vmmov %vm13491_vm0  ;;  %v6223_v63 = vld [vmem:[#allocation2 + $0x31] sm:$0xff] }
 0x2cb   : > { %8744 = vmatprep.mubr.msk.bf16.mxu0 %vm13565_vm12, %v5587_v9  ;;  %vm13575_vm12 = vmmov %vm13491_vm0  ;;  %v6254_v5 = vpack.c.bf16 %v6224_v54, %v6223_v63  ;;  %v5878_v63 = vld [vmem:[#allocation2 + $0x70] sm:$0xff] }
 0x2d0   : > { %8705 = vmatmul.mubr.msk.bf16.gmra.mxu1 %vm13491_vm0, %v13566_v10 }
 0x2d1   : > { %8708 = vmatprep.mubr.msk.bf16.mxu1 %vm13570_vm10, %v13569_v53  ;;  %vm13579_vm10 = vmmov %vm13491_vm0 }
 0x2d2   : > { %8745 = vmatmul.mubr.msk.bf16.gmra.mxu0 %vm13568_vm2, %v13567_v40  ;;  %vm13577_vm2 = vmmov %vm13491_vm0  ;;  %v8979_v40 = vld [vmem:[%s12739_s3 + $0x110] sm:$0xff]  }
 0x2d3   : > { %8748 = vmatprep.mubr.msk.bf16.mxu0 %vm13571_vm4, %v5589_v46  ;;  %vm13581_vm4 = vmmov %vm13491_vm0  ;;  %v6225_v46 = vld [vmem:[#allocation2 + $0x41] sm:$0xff] }
 0x2d4   : > { %v6255_v59 = vpack.c.bf16 %v6226_v37, %v6225_v46 }
 0x2d8   : > { %8709 = vmatmul.mubr.msk.bf16.gmra.mxu1 %vm13573_vm5, %v13572_v58  ;;  %vm13582_vm5 = vmmov %vm13491_vm0 }
 0x2d9   : > { %8712 = vmatprep.mubr.msk.bf16.mxu1 %vm13491_vm0, %v13576_v57 }
 0x2da   : > { %8749 = vmatmul.mubr.msk.bf16.gmra.mxu0 %vm13575_vm12, %v13574_v51  ;;  %vm13583_vm12 = vmmov %vm13491_vm0  ;;  %v5874_v51 = vld [vmem:[#allocation2 + $0x50] sm:$0xff] }
 0x2db   : > { %8752 = vmatprep.mubr.msk.bf16.mxu0 %vm13577_vm2, %v5591_v61  ;;  %vm13585_vm2 = vmmov %vm13491_vm0 }
 0x2e0   : > { %8713 = vmatmul.mubr.msk.bf16.gmra.mxu1 %vm13579_vm10, %v13578_v12  ;;  %vm13586_vm10 = vmmov %vm13491_vm0  ;;  %v8980_v12 = vld [vmem:[%s12739_s3 + $0x108] sm:$0xff]  }
 0x2e1   : > { %8716 = vmatprep.mubr.msk.bf16.mxu1 %vm13582_vm5, %v11352_v25  ;;  %v6221_v25 = vld [vmem:[#allocation2 + $0x21] sm:$0xff]  ;;  %vm13588_vm5 = vnez %v13331_v1 }
 0x2e2   : > { %8753 = vmatmul.mubr.msk.bf16.gmra.mxu0 %vm13581_vm4, %v13580_v62  ;;  %v6253_v44 = vpack.c.bf16 %v6222_v8, %v6221_v25  ;;  %vm13587_vm4 = vmmov %vm13491_vm0  ;;  %v5904_v41 = vsel %vm13588_vm5, %v5872_v36, 0.0  ;;  %vm13594_vm5 = vnez %v13345_v32 }
 0x2e3   : > { %8756 = vmatprep.mubr.msk.bf16.mxu0 %vm13583_vm12, %v5593_v35  ;;  %vm13589_vm12 = vnez %v13326_v48  ;;  %v5934_v10 = vpack.c.bf16 %v5873_v14, %v5904_v41  ;;  %v5876_v48 = vld [vmem:[#allocation2 + $0x60] sm:$0xff] }
 0x2e4   : > { %v5902_v47 = vsel %vm13589_vm12, %v5870_v20, 0.0  ;;  %v6229_v20 = vld [vmem:[#allocation2 + $0x61] sm:$0xff]  ;;  %vm13595_vm12 = vmmov %vm13491_vm0 }
 0x2e5   : > { %v5933_v9 = vpack.c.bf16 %v5871_v27, %v5902_v47  ;;  %v6257_v54 = vpack.c.bf16 %v6230_v6, %v6229_v20  ;;  %v5880_v47 = vld [vmem:[#allocation2 + $0x80] sm:$0xff] }
 0x2e8   : > { %8717 = vmatmul.mubr.msk.bf16.gmra.mxu1 %vm13491_vm0, %v11713_v15 }
 0x2e9   : > { %8768 = vmatprep.mubr.msk.bf16.mxu1 %vm13586_vm10, %v5932_v30  ;;  %v8530_v53 = vpop.f32.mrf.mxu1  ;;  %v8570_v1 = vpop.f32.mrf.mxu0  ;;  %vm13592_vm10 = vmmov %vm13491_vm0  ;;  %v5877_v30 = vld [vmem:[#allocation2 + $0x68] sm:$0xff] }
 0x2ea   : > { %8757 = vmatmul.mubr.msk.bf16.gmra.mxu0 %vm13585_vm2, %v5594_v49  ;;  %vm13591_vm2 = vmmov %vm13491_vm0  ;;  %v11731_v58 = vadd.f32 %v8570_v1, %v8530_v53  ;;  %v6227_v49 = vld [vmem:[#allocation2 + $0x51] sm:$0xff] }
 0x2eb   : > { %8808 = vmatprep.mubr.msk.bf16.mxu0 %vm13587_vm4, %v6253_v44  ;;  %v4128_v61 = vpop.f32.mrf.mxu1  ;;  %v4361_v57 = vpop.f32.mrf.mxu0  ;;  %vm13593_vm4 = vnez %v13352_v16  ;;  %v6256_v44 = vpack.c.bf16 %v6228_v7, %v6227_v49  ;;  %v8981_v16 = vld [vmem:[%s12739_s3 + $0x100] sm:$0xff]  }
 0x2ec   : > { %v11738_v35 = vadd.f32 %v4361_v57, %v4128_v61  ;;  %v5908_v17 = vsel %vm13593_vm4, %v5876_v48, 0.0  ;;  %vm13599_vm4 = vnez %v13483_v2  ;;  %v6234_v48 = vld [vmem:[#allocation2 + $0x89] sm:$0xff] }
 0x2ed   : > { %v8531_v62 = vpop.f32.mrf.mxu1  ;;  %v8571_v52 = vpop.f32.mrf.mxu0  ;;  %v5936_v36 = vpack.c.bf16 %v5877_v30, %v5908_v17  ;;  %v5910_v1 = vsel %vm13599_vm4, %v5878_v63, 0.0  ;;  %v5882_v30 = vld [vmem:[#allocation2 + $0x90] sm:$0xff]  ;;  %vm13605_vm4 = vmmov %vm13491_vm0 }
 0x2ee   : > { %v11744_v45 = vadd.f32 %v8571_v52, %v8531_v62  ;;  %v6233_v52 = vld [vmem:[#allocation2 + $0x81] sm:$0xff] }
 0x2ef   : > { %v4131_v8 = vpop.f32.mrf.mxu1  ;;  %v4364_v25 = vpop.f32.mrf.mxu0  ;;  %v6259_v6 = vpack.c.bf16 %v6234_v48, %v6233_v52 }
 0x2f0   : > { %8769 = vmatmul.mubr.msk.bf16.vlgmr.msra.gmra.mxu1 %vm13590_vm13, %v5933_v9  ;;  %v11749_v27 = vadd.f32 %v4364_v25, %v4131_v8  ;;  %vm13596_vm13 = vmmov %vm13491_vm0  ;;  %v5884_v8 = vld [vmem:[#allocation2 + $0xa0] sm:$0xff] }
 0x2f1   : > { %8772 = vmatprep.mubr.msk.bf16.mxu1 %vm13591_vm2, %v5934_v10  ;;  %8841 = vmatpush3.bf16.msra.mxu1 %v11650_v28  ;;  %v5906_v28 = vsel %vm13594_vm5, %v5874_v51, 0.0  ;;  %vm13597_vm2 = vmmov %vm13491_vm0 }
 0x2f2   : > { %8809 = vmatmul.mubr.msk.bf16.vlgmr.msra.gmra.mxu0 %vm13491_vm0, %v6254_v5  ;;  %8842 = vmatprep.subr.bf16.mxu1 %v8979_v40  ;;  %v5935_v22 = vpack.c.bf16 %v5875_v19, %v5906_v28  ;;  %v5879_v5 = vld [vmem:[#allocation2 + $0x78] sm:$0xff]  ;;  %vm13600_vm5 = vmmov %vm13491_vm0 }
 0x2f3   : > { %8812 = vmatprep.mubr.msk.bf16.mxu0 %vm13592_vm10, %v6255_v59  ;;  %v8534_v32 = vpop.f32.mrf.mxu1  ;;  %vm13598_vm10 = vnez %v13488_v55  ;;  %v5937_v57 = vpack.c.bf16 %v5879_v5, %v5910_v1  ;;  %v6231_v19 = vld [vmem:[#allocation2 + $0x71] sm:$0xff]  ;;  %v6237_v1 = vld [vmem:[#allocation2 + $0xa1] sm:$0xff] }
 0x2f4   : > { %v8574_v41 = vpop.f32.mrf.mxu0  ;;  %v5912_v53 = vsel %vm13598_vm10, %v5880_v47, 0.0  ;;  %vm13604_vm10 = vnez %v13493_v39  ;;  %v6238_v47 = vld [vmem:[#allocation2 + $0xa9] sm:$0xff]  ;;  %v6235_v5 = vld [vmem:[#allocation2 + $0x91] sm:$0xff]  ;;  %v5888_v39 = vld [vmem:[#allocation2 + $0xc0] sm:$0xff] }
 0x2f5   : > { %8843 = vmatpush3.bf16.msra.mxu1 %v8979_v40  ;;  %v11754_v37 = vadd.f32 %v8574_v41, %v8534_v32  ;;  %v4144_v9 = vpop.f32.mrf.mxu1  ;;  %v6232_v40 = vld [vmem:[#allocation2 + $0x79] sm:$0xff]  ;;  %v5914_v41 = vsel %vm13604_vm10, %v5882_v30, 0.0  ;;  %v6242_v30 = vld [vmem:[#allocation2 + $0xc9] sm:$0xff]  ;;  %vm13611_vm10 = vmmov %vm13605_vm4 }
 0x2f6   : > { %8844 = vmatprep.subr.bf16.mxu1 %v8980_v12  ;;  %v4377_v14 = vpop.f32.mrf.mxu0  ;;  %v6258_v7 = vpack.c.bf16 %v6232_v40, %v6231_v19 }
 0x2f7   : > { %v11757_v10 = vadd.f32 %v4377_v14, %v4144_v9  ;;  %v8535_v46 = vpop.f32.mrf.mxu1 }
 0x2f8   : > { %8773 = vmatmul.mubr.msk.bf16.gmra.mxu1 %vm13595_vm12, %v5935_v22  ;;  %v8575_v59 = vpop.f32.mrf.mxu0  ;;  %vm13601_vm12 = vmmov %vm13491_vm0 }
 0x2f9   : > { %8776 = vmatprep.mubr.msk.bf16.mxu1 %vm13491_vm0, %v5936_v36  ;;  %8845 = vmatpush3.bf16.msra.mxu1 %v8980_v12  ;;  %v11763_v61 = vadd.f32 %v8575_v59, %v8535_v46  ;;  %v4147_v51 = vpop.f32.mrf.mxu1  ;;  %v5881_v12 = vld [vmem:[#allocation2 + $0x88] sm:$0xff] }
 0x2fa   : > { %8813 = vmatmul.mubr.msk.bf16.gmra.mxu0 %vm13596_vm13, %v6256_v44  ;;  %8846 = vmatprep.subr.bf16.mxu1 %v8981_v16  ;;  %v4380_v62 = vpop.f32.mrf.mxu0  ;;  %v5938_v17 = vpack.c.bf16 %v5881_v12, %v5912_v53  ;;  %vm13602_vm13 = vmmov %vm13491_vm0  ;;  %v5883_v44 = vld [vmem:[#allocation2 + $0x98] sm:$0xff]  ;;  %v5885_v46 = vld [vmem:[#allocation2 + $0xa8] sm:$0xff] }
 0x2fb   : > { %8816 = vmatprep.mubr.msk.bf16.mxu0 %vm13597_vm2, %v6257_v54  ;;  %v11765_v28 = vadd.f32 %v4380_v62, %v4147_v51  ;;  %vm13603_vm2 = vnez %v13499_v3  ;;  %v5939_v14 = vpack.c.bf16 %v5883_v44, %v5914_v41  ;;  %v6261_v3 = vpack.c.bf16 %v6238_v47, %v6237_v1  ;;  %v5886_v62 = vld [vmem:[#allocation2 + $0xb0] sm:$0xff] }
 0x2fc   : > { %v8538_v55 = vpop.f32.mrf.mxu1  ;;  %v5916_v32 = vsel %vm13603_vm2, %v5884_v8, 0.0  ;;  %vm13610_vm2 = vnez %v13505_v26  ;;  %v5892_v26 = vld [vmem:[#allocation2 + $0xe0] sm:$0xff] }
 0x2fd   : > { %8847 = vmatpush3.bf16.msra.mxu1 %v8981_v16  ;;  %v8578_v2 = vpop.f32.mrf.mxu0  ;;  %v6236_v16 = vld [vmem:[#allocation2 + $0x99] sm:$0xff]  ;;  %v5940_v59 = vpack.c.bf16 %v5885_v46, %v5916_v32  ;;  %v5889_v32 = vld [vmem:[#allocation2 + $0xc8] sm:$0xff] }
 0x2fe   : > { %v11770_v22 = vadd.f32 %v8578_v2, %v8538_v55  ;;  %v4160_v49 = vpop.f32.mrf.mxu1  ;;  %v6260_v53 = vpack.c.bf16 %v6236_v16, %v6235_v5  ;;  %v6239_v16 = vld [vmem:[#allocation2 + $0xb1] sm:$0xff] }
 0x2ff   : > { %v4393_v25 = vpop.f32.mrf.mxu0 }
 0x300   : > { %8777 = vmatmul.mubr.msk.bf16.gmra.mxu1 %vm13600_vm5, %v5937_v57  ;;  %v11773_v36 = vadd.f32 %v4393_v25, %v4160_v49  ;;  %v8539_v20 = vpop.f32.mrf.mxu1  ;;  %vm13606_vm5 = vmmov %vm13491_vm0  ;;  %v5918_v49 = vsel %vm13610_vm2, %v5886_v62, 0.0 }
 0x301   : > { %8780 = vmatprep.mubr.msk.bf16.mxu1 %vm13602_vm13, %v5938_v17  ;;  %v8579_v54 = vpop.f32.mrf.mxu0  ;;  %vm13608_vm13 = vmmov %vm13491_vm0  ;;  %v5887_v17 = vld [vmem:[#allocation2 + $0xb8] sm:$0xff] }
 0x302   : > { %8817 = vmatmul.mubr.msk.bf16.gmra.mxu0 %vm13601_vm12, %v6258_v7  ;;  %v11779_v9 = vadd.f32 %v8579_v54, %v8539_v20  ;;  %v4163_v63 = vpop.f32.mrf.mxu1  ;;  %vm13607_vm12 = vmmov %vm13491_vm0  ;;  %v5941_v20 = vpack.c.bf16 %v5887_v17, %v5918_v49  ;;  %v6246_v17 = vld [vmem:[#allocation2 + $0xe9] sm:$0xff] }
 0x303   : > { %8820 = vmatprep.mubr.msk.bf16.mxu0 %vm13491_vm0, %v6259_v6  ;;  %v4396_v40 = vpop.f32.mrf.mxu0  ;;  %v6240_v6 = vld [vmem:[#allocation2 + $0xb9] sm:$0xff]  ;;  %vm13609_vm0 = vnez %v13419_v50  ;;  %v5893_v49 = vld [vmem:[#allocation2 + $0xe8] sm:$0xff] }
 0x304   : > { %v11781_v48 = vadd.f32 %v4396_v40, %v4163_v63  ;;  %v5920_v2 = vsel %vm13609_vm0, %v5888_v39, 0.0  ;;  %v6262_v41 = vpack.c.bf16 %v6240_v6, %v6239_v16  ;;  %v6241_v63 = vld [vmem:[#allocation2 + $0xc1] sm:$0xff]  ;;  %v6244_v39 = vld [vmem:[#allocation2 + $0xd9] sm:$0xff]  ;;  %vm13615_vm0 = vmmov %vm13605_vm4 }
 0x305   : > { %v5942_v47 = vpack.c.bf16 %v5889_v32, %v5920_v2  ;;  %v6263_v50 = vpack.c.bf16 %v6242_v30, %v6241_v63  ;;  %v6245_v16 = vld [vmem:[#allocation2 + $0xe1] sm:$0xff]  ;;  %vm13617_vm2 = vmmov %vm13615_vm0  ;;  %v5894_v63 = vld [vmem:[#allocation2 + $0xf0] sm:$0xff] }
 0x306   : > { %v6265_v29 = vpack.c.bf16 %v6246_v17, %v6245_v16  ;;  %v6252_v16 = vld [vmem:[#allocation2 + $0x119] sm:$0xff] }
 0x307   : > { %v8542_v51 = vpop.f32.mrf.mxu1 }
 0x308   : > { %8781 = vmatmul.mubr.msk.bf16.gmra.mxu1 %vm13605_vm4, %v5939_v14  ;;  %v8582_v57 = vpop.f32.mrf.mxu0 }
 0x309   : > { %8784 = vmatprep.mubr.msk.bf16.mxu1 %vm13607_vm12, %v5940_v59  ;;  %v11786_v19 = vadd.f32 %v8582_v57, %v8542_v51  ;;  %v4176_v12 = vpop.f32.mrf.mxu1  ;;  %vm13613_vm12 = vmmov %vm13605_vm4  ;;  %v5890_v59 = vld [vmem:[#allocation2 + $0xd0] sm:$0xff]  ;;  %v5891_v51 = vld [vmem:[#allocation2 + $0xd8] sm:$0xff] }
 0x30a   : > { %8821 = vmatmul.mubr.msk.bf16.gmra.mxu0 %vm13606_vm5, %v6260_v53  ;;  %v4409_v7 = vpop.f32.mrf.mxu0  ;;  %vm13612_vm5 = vmmov %vm13605_vm4 }
 0x30b   : > { %8824 = vmatprep.mubr.msk.bf16.mxu0 %vm13608_vm13, %v6261_v3  ;;  %v11789_v52 = vadd.f32 %v4409_v7, %v4176_v12  ;;  %v8543_v55 = vpop.f32.mrf.mxu1  ;;  %v5924_v12 = vsel %vm13434_vm7, %v5892_v26, 0.0  ;;  %vm13614_vm13 = vnez %v13513_v13  ;;  %vm13616_vm7 = vmmov %vm13615_vm0 }
 0x30c   : > { %v8583_v8 = vpop.f32.mrf.mxu0  ;;  %v5922_v7 = vsel %vm13614_vm13, %v5890_v59, 0.0  ;;  %vm13624_vm13 = vnez %v13534_v0  ;;  %v6547_v0 = vld [vmem:[#allocation2 + $0x4a] sm:$0xff] }
 0x30d   : > { %v11795_v25 = vadd.f32 %v8583_v8, %v8543_v55  ;;  %v4179_v44 = vpop.f32.mrf.mxu1  ;;  %v5943_v2 = vpack.c.bf16 %v5891_v51, %v5922_v7  ;;  %v6243_v8 = vld [vmem:[#allocation2 + $0xd1] sm:$0xff] }
 0x30e   : > { %v4412_v54 = vpop.f32.mrf.mxu0 }
 0x30f   : > { %v11797_v14 = vadd.f32 %v4412_v54, %v4179_v44  ;;  %v8546_v5 = vpop.f32.mrf.mxu1  ;;  %v6264_v44 = vpack.c.bf16 %v6244_v39, %v6243_v8 }
 0x310   : > { %8785 = vmatmul.mubr.msk.bf16.gmra.mxu1 %vm13611_vm10, %v5941_v20  ;;  %v8586_v46 = vpop.f32.mrf.mxu0  ;;  %v5944_v20 = vpack.c.bf16 %v5893_v49, %v5924_v12  ;;  %vm13618_vm10 = vmmov %vm13615_vm0  ;;  %v6247_v12 = vld [vmem:[#allocation2 + $0xf1] sm:$0xff]  ;;  %v13621_v49 = vld [vmem:[#allocation69_spill] sm:$0xff] }
 0x311   : > { %8788 = vmatprep.mubr.msk.bf16.mxu1 %vm13612_vm5, %v5942_v47  ;;  %v11802_v40 = vadd.f32 %v8586_v46, %v8546_v5  ;;  %v4192_v53 = vpop.f32.mrf.mxu1  ;;  %vm13620_vm5 = vmmov %vm13615_vm0 }
 0x312   : > { %8825 = vmatmul.mubr.msk.bf16.gmra.mxu0 %vm13605_vm4, %v6262_v41  ;;  %v4425_v1 = vpop.f32.mrf.mxu0  ;;  %vm13619_vm4 = vmmov %vm13615_vm0 }
 0x313   : > { %8828 = vmatprep.mubr.msk.bf16.mxu0 %vm13613_vm12, %v6263_v50  ;;  %v11805_v3 = vadd.f32 %v4425_v1, %v4192_v53  ;;  %v8547_v57 = vpop.f32.mrf.mxu1  ;;  %v5895_v50 = vld [vmem:[#allocation2 + $0xf8] sm:$0xff]  ;;  %v5926_v1 = vsel %vm13525_vm8, %v5894_v63, 0.0  ;;  %vm13622_vm12 = vmmov %vm13615_vm0 }
 0x314   : > { %v8587_v62 = vpop.f32.mrf.mxu0  ;;  %v6248_v53 = vld [vmem:[#allocation2 + $0xf9] sm:$0xff]  ;;  %v5945_v39 = vpack.c.bf16 %v5895_v50, %v5926_v1  ;;  %vm13623_vm8 = vmmov %vm13615_vm0  ;;  %v6542_v1 = vld [vmem:[#allocation2 + $0x22] sm:$0xff] }
 0x315   : > { %v11811_v55 = vadd.f32 %v8587_v62, %v8547_v57  ;;  %v4195_v6 = vpop.f32.mrf.mxu1  ;;  %v6266_v7 = vpack.c.bf16 %v6248_v53, %v6247_v12 }
 0x316   : > { %v4428_v30 = vpop.f32.mrf.mxu0 }
 0x317   : > { %v11813_v32 = vadd.f32 %v4428_v30, %v4195_v6  ;;  %v8550_v54 = vpop.f32.mrf.mxu1 }
 0x318   : > { %8789 = vmatmul.mubr.msk.bf16.gmra.mxu1 %vm13615_vm0, %v5943_v2  ;;  %v8590_v41 = vpop.f32.mrf.mxu0  ;;  %v5898_v2 = vld [vmem:[#allocation2 + $0x110] sm:$0xff] }
 0x319   : > { %8792 = vmatprep.mubr.msk.bf16.mxu1 %vm13617_vm2, %v5944_v20  ;;  %v11818_v13 = vadd.f32 %v8590_v41, %v8550_v54  ;;  %v4208_v47 = vpop.f32.mrf.mxu1  ;;  %v6251_v20 = vld [vmem:[#allocation2 + $0x111] sm:$0xff]  ;;  %v5930_v41 = vsel %vm13461_vm3, %v5898_v2, 0.0  ;;  %vm13625_vm3 = vmmov %vm13615_vm0 }
 0x31a   : > { %8829 = vmatmul.mubr.msk.bf16.gmra.mxu0 %vm13616_vm7, %v6264_v44  ;;  %v4441_v5 = vpop.f32.mrf.mxu0  ;;  %vm13626_vm7 = vmmov %vm13615_vm0 }
 0x31b   : > { %8832 = vmatprep.mubr.msk.bf16.mxu0 %vm13618_vm10, %v6265_v29  ;;  %v11821_v46 = vadd.f32 %v4441_v5, %v4208_v47  ;;  %v8551_v26 = vpop.f32.mrf.mxu1  ;;  %v5899_v29 = vld [vmem:[#allocation2 + $0x118] sm:$0xff]  ;;  %v6575_v5 = vsel %vm13624_vm13, %v6543_v60, 0.0  ;;  %v13627_v60 = vld [vmem:[#allocation47_spill] sm:$0xff]  ;;  %vm13629_vm10 = vmmov %vm13615_vm0 }
 0x31c   : > { %v8591_v59 = vpop.f32.mrf.mxu0  ;;  %vm13628_vm2 = vnez %v13627_v60  ;;  %vm13637_vm13 = vmmov %vm13615_vm0 }
 0x31d   : > { %v11825_v51 = vadd.f32 %v8591_v59, %v8551_v26  ;;  %v4211_v57 = vpop.f32.mrf.mxu1  ;;  %v6268_v26 = vpack.c.bf16 %v6252_v16, %v6251_v20 }
 0x31e   : > { %v4444_v62 = vpop.f32.mrf.mxu0 }
 0x31f   : > { %v11827_v17 = vadd.f32 %v4444_v62, %v4211_v57 }
 0x320   : > { %v8554_v6 = vpop.f32.mrf.mxu1  ;;  %8793 = vmatmul.mubr.msk.bf16.gmra.mxu1 %vm13619_vm4, %v5945_v39  ;;  %v8594_v8 = vpop.f32.mrf.mxu0  ;;  %v6606_v39 = vpack.c.bf16 %v6575_v5, %v6542_v1  ;;  %vm13630_vm4 = vmmov %vm13615_vm0 }
 0x321   : > { %8796 = vmatprep.mubr.msk.bf16.mxu1 %vm13622_vm12, %v13621_v49  ;;  %v11833_v30 = vadd.f32 %v8594_v8, %v8554_v6  ;;  %v6544_v49 = vld [vmem:[#allocation2 + $0x32] sm:$0xff]  ;;  %vm13635_vm12 = vnez %v13392_v38 }
 0x322   : > { %8833 = vmatmul.mubr.msk.bf16.gmra.mxu0 %vm13620_vm5, %v6266_v7  ;;  %v4224_v44 = vpop.f32.mrf.mxu1  ;;  %v4457_v54 = vpop.f32.mrf.mxu0  ;;  %vm13633_vm5 = vmmov %vm13615_vm0 }
 0x323   : > { %8836 = vmatprep.mubr.msk.bf16.mxu0 %vm13623_vm8, %v11713_v15  ;;  %v11839_v47 = vadd.f32 %v4457_v54, %v4224_v44  ;;  %v5947_v15 = vpack.c.bf16 %v5899_v29, %v5930_v41  ;;  %v6577_v44 = vsel %vm13628_vm2, %v6545_v42, 0.0  ;;  %v6579_v54 = vsel %vm13084_vm14, %v6547_v0, 0.0 }
 0x324   : > { %v8555_v63 = vpop.f32.mrf.mxu1  ;;  %v8595_v50 = vpop.f32.mrf.mxu0  ;;  %v6607_v5 = vpack.c.bf16 %v6577_v44, %v6544_v49  ;;  %v13631_v49 = vld [vmem:[#allocation49_spill] sm:$0xff]  ;;  %vm13636_vm8 = vnez %v13485_v24  ;;  %vm13641_vm2 = vnez %v13429_v56 }
 0x325   : > { %v11843_v53 = vadd.f32 %v8595_v50, %v8555_v63  ;;  %v6546_v50 = vld [vmem:[#allocation2 + $0x42] sm:$0xff]  ;;  %vm13632_vm14 = vnez %v13631_v49 }
 0x326   : > { %v4227_v59 = vpop.f32.mrf.mxu1  ;;  %v4460_v57 = vpop.f32.mrf.mxu0 }
 0x327   : > { %v11845_v12 = vadd.f32 %v4460_v57, %v4227_v59  ;;  %v6608_v59 = vpack.c.bf16 %v6579_v54, %v6546_v50  ;;  %v6549_v57 = vld [vmem:[#allocation2 + $0x5a] sm:$0xff]  ;;  %v6550_v50 = vld [vmem:[#allocation2 + $0x62] sm:$0xff] }
 0x328   : > { %v8558_v62 = vpop.f32.mrf.mxu1  ;;  %8797 = vmatmul.mubr.msk.bf16.gmra.mxu1 %vm13615_vm0, %v5947_v15  ;;  %v6581_v60 = vsel %vm13632_vm14, %v6549_v57, 0.0  ;;  %v6553_v57 = vld [vmem:[#allocation2 + $0x7a] sm:$0xff]  ;;  %vm13645_vm14 = vmmov %vm13615_vm0 }
 0x329   : > { %8848 = vmatprep.mubr.msk.bf16.mxu1 %vm13625_vm3, %v6606_v39  ;;  %v6585_v49 = vsel %vm13635_vm12, %v6553_v57, 0.0  ;;  %vm13638_vm3 = vnez %v13416_v11  ;;  %vm13650_vm12 = vmmov %vm13615_vm0 }
 0x32a   : > { %v8598_v7 = vpop.f32.mrf.mxu0  ;;  %8837 = vmatmul.mubr.msk.bf16.gmra.mxu0 %vm13626_vm7, %v6268_v26  ;;  %v4240_v2 = vpop.f32.mrf.mxu1  ;;  %vm13639_vm7 = vmmov %vm13615_vm0 }
 0x32b   : > { %v11850_v6 = vadd.f32 %v8598_v7, %v8558_v62 }
 0x32c   : > { %v4473_v8 = vpop.f32.mrf.mxu0  ;;  %v8559_v16 = vpop.f32.mrf.mxu1 }
 0x32d   : > { %v11854_v20 = vadd.f32 %v4473_v8, %v4240_v2  ;;  %v6548_v8 = vld [vmem:[#allocation2 + $0x52] sm:$0xff] }
 0x32e   : > { %v8599_v29 = vpop.f32.mrf.mxu0  ;;  %v4243_v63 = vpop.f32.mrf.mxu1 }
 0x32f   : > { %v11858_v41 = vadd.f32 %v8599_v29, %v8559_v16  ;;  %v6583_v16 = vsel %vm13476_vm9, %v6551_v18, 0.0  ;;  %vm13634_vm9 = vmmov %vm13615_vm0 }
 0x330   : > { %v4476_v26 = vpop.f32.mrf.mxu0  ;;  %v8610_v1 = vpop.f32.mrf.mxu1  ;;  %8849 = vmatmul.mubr.msk.bf16.vlgmr.msra.gmra.mxu1 %vm13629_vm10, %v6607_v5  ;;  %v6609_v5 = vpack.c.bf16 %v6581_v60, %v6548_v8  ;;  %v6552_v8 = vld [vmem:[#allocation2 + $0x72] sm:$0xff]  ;;  %vm13642_vm10 = vmmov %vm13615_vm0 }
 0x331   : > { %v11860_v15 = vadd.f32 %v4476_v26, %v4243_v63  ;;  %v4811_v39 = vadd.f32 %v8610_v1, %v11731_v58  ;;  %8852 = vmatprep.mubr.msk.bf16.mxu1 %vm13630_vm4, %v6608_v59  ;;  %v6610_v1 = vpack.c.bf16 %v6583_v16, %v6550_v50  ;;  %vm13644_vm4 = vnez %v13441_v23 }
 0x332   : > { %v8650_v62 = vpop.f32.mrf.mxu0  ;;  %v4682_v42 = vpop.f32.mrf.mxu1 }
 0x333   : > { %v11865_v7 = vadd.f32 %v8650_v62, %v4811_v39  ;;  %v4809_v0 = vadd.f32 %v4682_v42, %v11738_v35 }
 0x334   : > { %v5035_v2 = vpop.f32.mrf.mxu0  ;;  %v8611_v44 = vpop.f32.mrf.mxu1 }
 0x335   : > { %v11872_v54 = vadd.f32 %v5035_v2, %v4809_v0  ;;  %v4812_v58 = vadd.f32 %v8611_v44, %v11744_v45  ;;  %v6555_v45 = vld [vmem:[#allocation2 + $0x8a] sm:$0xff] }
 0x336   : > { %v8651_v29 = vpop.f32.mrf.mxu0  ;;  %v4685_v63 = vpop.f32.mrf.mxu1  ;;  %v6587_v44 = vsel %vm13636_vm8, %v6555_v45, 0.0  ;;  %vm7094_vm8 = vcmask 519168  }
 0x337   : > { %v11875_v26 = vadd.f32 %v8651_v29, %v4812_v58  ;;  %v4810_v35 = vadd.f32 %v4685_v63, %v11749_v27  ;;  %v6611_v63 = vpack.c.bf16 %v6585_v49, %v6552_v8 }
 0x338   : > { %v5038_v59 = vpop.f32.mrf.mxu0  ;;  %v8614_v39 = vpop.f32.mrf.mxu1  ;;  %8853 = vmatmul.mubr.msk.bf16.gmra.mxu1 %vm13633_vm5, %v6609_v5  ;;  %v6554_v5 = vld [vmem:[#allocation2 + $0x82] sm:$0xff]  ;;  %vm13647_vm5 = vnez %v13522_v34 }
 0x339   : > { %v11879_v43 = vadd.f32 %v5038_v59, %v4810_v35  ;;  %v4815_v62 = vadd.f32 %v8614_v39, %v11754_v37  ;;  %8856 = vmatprep.mubr.msk.bf16.mxu1 %vm13634_vm9, %v6610_v1  ;;  %v6612_v59 = vpack.c.bf16 %v6587_v44, %v6554_v5  ;;  %v6557_v1 = vld [vmem:[#allocation2 + $0x9a] sm:$0xff]  ;;  %vm13648_vm9 = vmmov %vm13615_vm0 }
 0x33a   : > { %v8654_v18 = vpop.f32.mrf.mxu0  ;;  %v4698_v42 = vpop.f32.mrf.mxu1 }
 0x33b   : > { %v11883_v0 = vadd.f32 %v8654_v18, %v4815_v62  ;;  %v4813_v2 = vadd.f32 %v4698_v42, %v11757_v10  ;;  %v6556_v42 = vld [vmem:[#allocation2 + $0x92] sm:$0xff] }
 0x33c   : > { %v5051_v27 = vpop.f32.mrf.mxu0  ;;  %v8615_v60 = vpop.f32.mrf.mxu1 }
 0x33d   : > { %v11890_v16 = vadd.f32 %v5051_v27, %v4813_v2  ;;  %v4816_v37 = vadd.f32 %v8615_v60, %v11763_v61  ;;  %v6559_v61 = vld [vmem:[#allocation2 + $0xaa] sm:$0xff]  ;;  %v6589_v2 = vsel %vm13638_vm3, %v6557_v1, 0.0  ;;  %vm13733_vm3 = vmmov %vm13615_vm0 }
 0x33e   : > { %v8655_v58 = vpop.f32.mrf.mxu0  ;;  %v4701_v29 = vpop.f32.mrf.mxu1  ;;  %v6591_v8 = vsel %vm13496_vm1, %v6559_v61, 0.0  ;;  %vm13640_vm1 = vmmov %vm13615_vm0 }
 0x33f   : > { %v11893_v50 = vadd.f32 %v8655_v58, %v4816_v37  ;;  %v4814_v10 = vadd.f32 %v4701_v29, %v11765_v28  ;;  %v6613_v37 = vpack.c.bf16 %v6589_v2, %v6556_v42  ;;  %v6558_v58 = vld [vmem:[#allocation2 + $0xa2] sm:$0xff] }
 0x340   : > { %v5054_v35 = vpop.f32.mrf.mxu0  ;;  %v8618_v38 = vpop.f32.mrf.mxu1  ;;  %8857 = vmatmul.mubr.msk.bf16.gmra.mxu1 %vm13637_vm13, %v6611_v63  ;;  %v6614_v5 = vpack.c.bf16 %v6591_v8, %v6558_v58  ;;  %v6562_v8 = vld [vmem:[#allocation2 + $0xc2] sm:$0xff]  ;;  %vm13728_vm13 = vmmov %vm13615_vm0 }
 0x341   : > { %v11897_v24 = vadd.f32 %v5054_v35, %v4814_v10  ;;  %v4819_v39 = vadd.f32 %v8618_v38, %v11770_v22  ;;  %8860 = vmatprep.mubr.msk.bf16.mxu1 %vm13615_vm0, %v6612_v59  ;;  %v6561_v10 = vld [vmem:[#allocation2 + $0xba] sm:$0xff] }
 0x342   : > { %v8658_v57 = vpop.f32.mrf.mxu0  ;;  %v4714_v62 = vpop.f32.mrf.mxu1  ;;  %v6593_v61 = vsel %vm13641_vm2, %v6561_v10, 0.0  ;;  %v6564_v10 = vld [vmem:[#allocation2 + $0xd2] sm:$0xff]  ;;  %vm13745_vm2 = vmmov %vm13615_vm0 }
 0x343   : > { %v11901_v18 = vadd.f32 %v8658_v57, %v4819_v39  ;;  %v4817_v45 = vadd.f32 %v4714_v62, %v11773_v36  ;;  %v6560_v57 = vld [vmem:[#allocation2 + $0xb2] sm:$0xff] }
 0x344   : > { %v5067_v28 = vpop.f32.mrf.mxu0  ;;  %v8619_v27 = vpop.f32.mrf.mxu1 }
 0x345   : > { %v11908_v49 = vadd.f32 %v5067_v28, %v4817_v45  ;;  %v4820_v22 = vadd.f32 %v8619_v27, %v11779_v9  ;;  %v6563_v9 = vld [vmem:[#allocation2 + $0xca] sm:$0xff]  ;;  %v6615_v27 = vpack.c.bf16 %v6593_v61, %v6560_v57  ;;  %v6566_v61 = vld [vmem:[#allocation2 + $0xe2] sm:$0xff] }
 0x346   : > { %v8659_v60 = vpop.f32.mrf.mxu0  ;;  %v4717_v44 = vpop.f32.mrf.mxu1  ;;  %v6595_v45 = vsel %vm13508_vm6, %v6563_v9, 0.0  ;;  %vm13643_vm6 = vmmov %vm13615_vm0 }
 0x347   : > { %v11911_v29 = vadd.f32 %v8659_v60, %v4820_v22  ;;  %v4818_v36 = vadd.f32 %v4717_v44, %v11781_v48  ;;  %v6616_v44 = vpack.c.bf16 %v6595_v45, %v6562_v8 }
 0x348   : > { %v5070_v63 = vpop.f32.mrf.mxu0  ;;  %v8622_v11 = vpop.f32.mrf.mxu1  ;;  %8861 = vmatmul.mubr.msk.bf16.gmra.mxu1 %vm13639_vm7, %v6613_v37  ;;  %v6565_v37 = vld [vmem:[#allocation2 + $0xda] sm:$0xff]  ;;  %vm13737_vm7 = vmmov %vm13615_vm0 }
 0x349   : > { %v11915_v33 = vadd.f32 %v5070_v63, %v4818_v36  ;;  %v4823_v35 = vadd.f32 %v8622_v11, %v11786_v19  ;;  %8864 = vmatprep.mubr.msk.bf16.mxu1 %vm13640_vm1, %v6614_v5  ;;  %vm13742_vm1 = vmmov %vm13615_vm0 }
 0x34a   : > { %v8662_v59 = vpop.f32.mrf.mxu0  ;;  %v4730_v38 = vpop.f32.mrf.mxu1 }
 0x34b   : > { %v11919_v1 = vadd.f32 %v8662_v59, %v4823_v35  ;;  %v4821_v39 = vadd.f32 %v4730_v38, %v11789_v52  ;;  %v6597_v35 = vsel %vm13644_vm4, %v6565_v37, 0.0  ;;  %vm13751_vm4 = vmmov %vm13615_vm0 }
 0x34c   : > { %v5083_v48 = vpop.f32.mrf.mxu0  ;;  %v8623_v62 = vpop.f32.mrf.mxu1  ;;  %v6617_v57 = vpack.c.bf16 %v6597_v35, %v6564_v10 }
 0x34d   : > { %v11926_v28 = vadd.f32 %v5083_v48, %v4821_v39  ;;  %v4824_v19 = vadd.f32 %v8623_v62, %v11795_v25  ;;  %v6567_v25 = vld [vmem:[#allocation2 + $0xea] sm:$0xff] }
 0x34e   : > { %v8663_v42 = vpop.f32.mrf.mxu0  ;;  %v4733_v2 = vpop.f32.mrf.mxu1  ;;  %v6599_v9 = vsel %vm13516_vm15, %v6567_v25, 0.0  ;;  %vm13646_vm15 = vmmov %vm13615_vm0 }
 0x34f   : > { %v11929_v22 = vadd.f32 %v8663_v42, %v4824_v19  ;;  %v4822_v52 = vadd.f32 %v4733_v2, %v11797_v14  ;;  %v6618_v19 = vpack.c.bf16 %v6599_v9, %v6566_v61  ;;  %v6569_v42 = vld [vmem:[#allocation2 + $0xfa] sm:$0xff] }
 0x350   : > { %v5086_v60 = vpop.f32.mrf.mxu0  ;;  %v8626_v56 = vpop.f32.mrf.mxu1  ;;  %8865 = vmatmul.mubr.msk.bf16.gmra.mxu1 %vm13642_vm10, %v6615_v27  ;;  %v13649_v9 = vld [vmem:[#allocation68_spill] sm:$0xff]  ;;  %vm13747_vm10 = vmmov %vm13615_vm0 }
 0x351   : > { %v11933_v4 = vadd.f32 %v5086_v60, %v4822_v52  ;;  %v4827_v58 = vadd.f32 %v8626_v56, %v11802_v40  ;;  %8868 = vmatprep.mubr.msk.bf16.mxu1 %vm13643_vm6, %v6616_v44  ;;  %v6601_v44 = vsel %vm13647_vm5, %v6569_v42, 0.0  ;;  %vm13749_vm6 = vmmov %vm13615_vm0 }
 0x352   : > { %v8666_v36 = vpop.f32.mrf.mxu0  ;;  %v4746_v63 = vpop.f32.mrf.mxu1  ;;  %vm13757_vm5 = vmmov %vm13615_vm0 }
 0x353   : > { %v11937_v5 = vadd.f32 %v8666_v36, %v4827_v58  ;;  %v4825_v11 = vadd.f32 %v4746_v63, %v11805_v3  ;;  %v6573_v63 = vld [vmem:[#allocation2 + $0x11a] sm:$0xff] }
 0x354   : > { %v5099_v14 = vpop.f32.mrf.mxu0  ;;  %v8627_v59 = vpop.f32.mrf.mxu1 }
 0x355   : > { %v11944_v38 = vadd.f32 %v5099_v14, %v4825_v11  ;;  %v4828_v40 = vadd.f32 %v8627_v59, %v11811_v55 }
 0x356   : > { %v8667_v39 = vpop.f32.mrf.mxu0  ;;  %v4749_v48 = vpop.f32.mrf.mxu1 }
 0x357   : > { %v11947_v62 = vadd.f32 %v8667_v39, %v4828_v40  ;;  %v4826_v3 = vadd.f32 %v4749_v48, %v11813_v32  ;;  %v6568_v32 = vld [vmem:[#allocation2 + $0xf2] sm:$0xff]  ;;  %v6605_v40 = vsel %vm13533_vm11, %v6573_v63, 0.0  ;;  %vm13651_vm11 = vmmov %vm13615_vm0 }
 0x358   : > { %v5102_v45 = vpop.f32.mrf.mxu0  ;;  %v8630_v23 = vpop.f32.mrf.mxu1  ;;  %8869 = vmatmul.mubr.msk.bf16.gmra.mxu1 %vm13645_vm14, %v6617_v57  ;;  %v6619_v25 = vpack.c.bf16 %v6601_v44, %v6568_v32  ;;  %vm13754_vm14 = vmmov %vm13615_vm0 }
 0x359   : > { %v11951_v21 = vadd.f32 %v5102_v45, %v4826_v3  ;;  %v4831_v2 = vadd.f32 %v8630_v23, %v11818_v13  ;;  %8872 = vmatprep.mubr.msk.bf16.mxu1 %vm13646_vm15, %v6618_v19  ;;  %vm13755_vm15 = vmmov %vm13615_vm0 }
 0x35a   : > { %v8670_v27 = vpop.f32.mrf.mxu0  ;;  %v4762_v55 = vpop.f32.mrf.mxu1 }
 0x35b   : > { %v11955_v8 = vadd.f32 %v8670_v27, %v4831_v2  ;;  %v4829_v52 = vadd.f32 %v4762_v55, %v11821_v46 }
 0x35c   : > { %v5115_v60 = vpop.f32.mrf.mxu0  ;;  %v8631_v56 = vpop.f32.mrf.mxu1 }
 0x35d   : > { %v11960_v37 = vadd.f32 %v5115_v60, %v4829_v52  ;;  %v4832_v58 = vadd.f32 %v8631_v56, %v11825_v51  ;;  %v6572_v51 = vld [vmem:[#allocation2 + $0x112] sm:$0xff] }
 0x35e   : > { %v8671_v36 = vpop.f32.mrf.mxu0  ;;  %v4765_v13 = vpop.f32.mrf.mxu1  ;;  %v6621_v3 = vpack.c.bf16 %v6605_v40, %v6572_v51 }
 0x35f   : > { %v11963_v11 = vadd.f32 %v8671_v36, %v4832_v58  ;;  %v4830_v14 = vadd.f32 %v4765_v13, %v11827_v17 }
 0x360   : > { %v5118_v10 = vpop.f32.mrf.mxu0  ;;  %v8634_v46 = vpop.f32.mrf.mxu1  ;;  %8873 = vmatmul.mubr.msk.bf16.gmra.mxu1 %vm13648_vm9, %v6619_v25  ;;  %vm13759_vm9 = vmmov %vm13615_vm0 }
 0x361   : > { %v11967_v35 = vadd.f32 %v5118_v10, %v4830_v14  ;;  %v4835_v34 = vadd.f32 %v8634_v46, %v11833_v30  ;;  %8876 = vmatprep.mubr.msk.bf16.mxu1 %vm13650_vm12, %v13649_v9  ;;  %vm13762_vm12 = vmmov %vm13615_vm0 }
 0x362   : > { %v8674_v59 = vpop.f32.mrf.mxu0  ;;  %v4778_v39 = vpop.f32.mrf.mxu1 }
 0x363   : > { %v11974_v48 = vadd.f32 %v8674_v59, %v4835_v34  ;;  %v4833_v17 = vadd.f32 %v4778_v39, %v11839_v47 }
 0x364   : > { %v5131_v57 = vpop.f32.mrf.mxu0  ;;  %v8635_v61 = vpop.f32.mrf.mxu1 }
 0x365   : > { %v11977_v45 = vadd.f32 %v5131_v57, %v4833_v17  ;;  %v4836_v30 = vadd.f32 %v8635_v61, %v11843_v53 }
 0x366   : > { %v8675_v19 = vpop.f32.mrf.mxu0  ;;  %v4781_v23 = vpop.f32.mrf.mxu1 }
 0x367   : > { %v11980_v42 = vadd.f32 %v8675_v19, %v4836_v30  ;;  %v4834_v2 = vadd.f32 %v4781_v23, %v11845_v12 }
 0x368   : > { %v5134_v31 = vpop.f32.mrf.mxu0  ;;  %v8638_v27 = vpop.f32.mrf.mxu1  ;;  %8877 = vmatmul.mubr.msk.bf16.gmra.mxu1 %vm13651_vm11, %v6621_v3  ;;  %vm13765_vm11 = vmmov %vm13615_vm0 }
 0x369   : > { %v11984_v55 = vadd.f32 %v5134_v31, %v4834_v2  ;;  %v4839_v47 = vadd.f32 %v8638_v27, %v11850_v6 }
 0x36a   : > { %v8678_v52 = vpop.f32.mrf.mxu0  ;;  %v4794_v60 = vpop.f32.mrf.mxu1 }
 0x36b   : > { %v11987_v32 = vadd.f32 %v8678_v52, %v4839_v47  ;;  %v4837_v53 = vadd.f32 %v4794_v60, %v11854_v20 }
 0x36c   : > { %v5147_v44 = vpop.f32.mrf.mxu0  ;;  %v8639_v56 = vpop.f32.mrf.mxu1 }
 0x36d   : > { %v11990_v58 = vadd.f32 %v5147_v44, %v4837_v53  ;;  %v4840_v12 = vadd.f32 %v8639_v56, %v11858_v41 }
 0x36e   : > { %v8679_v36 = vpop.f32.mrf.mxu0  ;;  %v4797_v13 = vpop.f32.mrf.mxu1 }
 0x36f   : > { %v11993_v25 = vadd.f32 %v8679_v36, %v4840_v12  ;;  %v4838_v63 = vadd.f32 %v4797_v13, %v11860_v15 }
 0x370   : > { %v5150_v14 = vpop.f32.mrf.mxu0  ;;  %v8690_v6 = vpop.f32.mrf.mxu1 }
 0x371   : > { %v11996_v10 = vadd.f32 %v5150_v14, %v4838_v63  ;;  %v11999_v46 = vadd.f32 %v8690_v6, %v11865_v7 }
 0x372   : > { %v12001_v20 = vpop.f32.mrf.mxu0  ;;  %v5356_v34 = vpop.f32.mrf.mxu1 }
 0x373   : > { %v12004_v59 = vadd.f32 %v5356_v34, %v11872_v54 }
 0x374   : > { %v12006_v41 = vpop.f32.mrf.mxu0  ;;  %v8691_v9 = vpop.f32.mrf.mxu1 }
 0x375   : > { %v12009_v51 = vadd.f32 %v8691_v9, %v11875_v26 }
 0x376   : > { %v12011_v15 = vpop.f32.mrf.mxu0  ;;  %v5359_v40 = vpop.f32.mrf.mxu1 }
 0x377   : > { %v12014_v39 = vadd.f32 %v5359_v40, %v11879_v43 }
 0x378   : > { %v12016_v7 = vpop.f32.mrf.mxu0  ;;  %v8694_v17 = vpop.f32.mrf.mxu1 }
 0x379   : > { %v12019_v57 = vadd.f32 %v8694_v17, %v11883_v0 }
 0x37a   : > { %v12021_v54 = vpop.f32.mrf.mxu0  ;;  %v5372_v61 = vpop.f32.mrf.mxu1 }
 0x37b   : > { %v12024_v3 = vadd.f32 %v5372_v61, %v11890_v16 }
 0x37c   : > { %v12026_v26 = vpop.f32.mrf.mxu0  ;;  %v8695_v30 = vpop.f32.mrf.mxu1 }
 0x37d   : > { %v12029_v19 = vadd.f32 %v8695_v30, %v11893_v50 }
 0x37e   : > { %v12031_v43 = vpop.f32.mrf.mxu0  ;;  %v5375_v23 = vpop.f32.mrf.mxu1 }
 0x37f   : > { %v12034_v2 = vadd.f32 %v5375_v23, %v11897_v24 }
 0x380   : > { %v12036_v0 = vpop.f32.mrf.mxu0  ;;  %v8698_v31 = vpop.f32.mrf.mxu1 }
 0x381   : > { %v12039_v27 = vadd.f32 %v8698_v31, %v11901_v18 }
 0x382   : > { %v12041_v16 = vpop.f32.mrf.mxu0  ;;  %v5388_v47 = vpop.f32.mrf.mxu1 }
 0x383   : > { %v12044_v52 = vadd.f32 %v5388_v47, %v11908_v49 }
 0x384   : > { %v12046_v50 = vpop.f32.mrf.mxu0  ;;  %v8699_v60 = vpop.f32.mrf.mxu1 }
 0x385   : > { %v12049_v53 = vadd.f32 %v8699_v60, %v11911_v29 }
 0x386   : > { %v12051_v24 = vpop.f32.mrf.mxu0  ;;  %v5391_v44 = vpop.f32.mrf.mxu1 }
 0x387   : > { %v12054_v56 = vadd.f32 %v5391_v44, %v11915_v33 }
 0x388   : > { %v12056_v18 = vpop.f32.mrf.mxu0  ;;  %v8702_v12 = vpop.f32.mrf.mxu1 }
 0x389   : > { %v12059_v36 = vadd.f32 %v8702_v12, %v11919_v1 }
 0x38a   : > { %v12061_v49 = vpop.f32.mrf.mxu0  ;;  %v5404_v13 = vpop.f32.mrf.mxu1 }
 0x38b   : > { %v12064_v63 = vadd.f32 %v5404_v13, %v11926_v28 }
 0x38c   : > { %v12066_v29 = vpop.f32.mrf.mxu0  ;;  %v8703_v14 = vpop.f32.mrf.mxu1 }
 0x38d   : > { %v12069_v6 = vadd.f32 %v8703_v14, %v11929_v22 }
 0x38e   : > { %v12071_v33 = vpop.f32.mrf.mxu0  ;;  %v5407_v34 = vpop.f32.mrf.mxu1 }
 0x38f   : > { %v12074_v9 = vadd.f32 %v5407_v34, %v11933_v4 }
 0x390   : > { %v12076_v1 = vpop.f32.mrf.mxu0  ;;  %v8706_v40 = vpop.f32.mrf.mxu1 }
 0x391   : > { %v12079_v17 = vadd.f32 %v8706_v40, %v11937_v5 }
 0x392   : > { %v12081_v28 = vpop.f32.mrf.mxu0  ;;  %v5420_v61 = vpop.f32.mrf.mxu1 }
 0x393   : > { %v12084_v30 = vadd.f32 %v5420_v61, %v11944_v38 }
 0x394   : > { %v12086_v22 = vpop.f32.mrf.mxu0  ;;  %v8707_v23 = vpop.f32.mrf.mxu1 }
 0x395   : > { %v12089_v31 = vadd.f32 %v8707_v23, %v11947_v62 }
 0x396   : > { %v12091_v4 = vpop.f32.mrf.mxu0  ;;  %v5423_v47 = vpop.f32.mrf.mxu1 }
 0x397   : > { %v12094_v60 = vadd.f32 %v5423_v47, %v11951_v21 }
 0x398   : > { %v12096_v5 = vpop.f32.mrf.mxu0  ;;  %v8710_v44 = vpop.f32.mrf.mxu1 }
 0x399   : > { %v12099_v12 = vadd.f32 %v8710_v44, %v11955_v8 }
 0x39a   : > { %v12101_v38 = vpop.f32.mrf.mxu0  ;;  %v5436_v13 = vpop.f32.mrf.mxu1 }
 0x39b   : > { %v12104_v14 = vadd.f32 %v5436_v13, %v11960_v37 }
 0x39c   : > { %v12106_v62 = vpop.f32.mrf.mxu0  ;;  %v8711_v34 = vpop.f32.mrf.mxu1 }
 0x39d   : > { %13652 = vst [vmem:[#allocation70_spill] sm:$0xff] %v12106_v62  ;;  %v12109_v40 = vadd.f32 %v8711_v34, %v11963_v11 }
 0x39e   : > { %v12111_v21 = vpop.f32.mrf.mxu0  ;;  %v5439_v61 = vpop.f32.mrf.mxu1 }
 0x39f   : > { %13653 = vst [vmem:[#allocation73_spill] sm:$0xff] %v12111_v21  ;;  %v12114_v23 = vadd.f32 %v5439_v61, %v11967_v35 }
 0x3a0   : > { %v12116_v8 = vpop.f32.mrf.mxu0  ;;  %v8714_v47 = vpop.f32.mrf.mxu1 }
 0x3a1   : > { %13654 = vst [vmem:[#allocation72_spill] sm:$0xff] %v12116_v8  ;;  %v12119_v44 = vadd.f32 %v8714_v47, %v11974_v48 }
 0x3a2   : > { %v12121_v37 = vpop.f32.mrf.mxu0  ;;  %v5452_v13 = vpop.f32.mrf.mxu1 }
 0x3a3   : > { %13655 = vst [vmem:[#allocation102_spill] sm:$0xff] %v12121_v37  ;;  %v12124_v62 = vadd.f32 %v5452_v13, %v11977_v45 }
 0x3a4   : > { %v12126_v11 = vpop.f32.mrf.mxu0  ;;  %v8715_v34 = vpop.f32.mrf.mxu1 }
 0x3a5   : > { %13656 = vst [vmem:[#allocation109_spill] sm:$0xff] %v12124_v62  ;;  %13657 = vst [vmem:[#allocation75_spill] sm:$0xff] %v12126_v11  ;;  %v12129_v21 = vadd.f32 %v8715_v34, %v11980_v42 }
 0x3a6   : > { %v12131_v35 = vpop.f32.mrf.mxu0  ;;  %v5455_v61 = vpop.f32.mrf.mxu1 }
 0x3a7   : > { %13658 = vst [vmem:[#allocation74_spill] sm:$0xff] %v12129_v21  ;;  %13659 = vst [vmem:[#allocation79_spill] sm:$0xff] %v12131_v35  ;;  %v12134_v8 = vadd.f32 %v5455_v61, %v11984_v55 }
 0x3a8   : > { %v12136_v48 = vpop.f32.mrf.mxu0  ;;  %v8718_v47 = vpop.f32.mrf.mxu1 }
 0x3a9   : > { %13660 = vst [vmem:[#allocation77_spill] sm:$0xff] %v12134_v8  ;;  %13661 = vst [vmem:[#allocation76_spill] sm:$0xff] %v12136_v48  ;;  %v12139_v37 = vadd.f32 %v8718_v47, %v11987_v32 }
 0x3aa   : > { %v12141_v45 = vpop.f32.mrf.mxu0  ;;  %v5468_v13 = vpop.f32.mrf.mxu1 }
 0x3ab   : > { %13662 = vst [vmem:[#allocation112_spill] sm:$0xff] %v12139_v37  ;;  %13663 = vst [vmem:[#allocation104_spill] sm:$0xff] %v12141_v45  ;;  %v12144_v11 = vadd.f32 %v5468_v13, %v11990_v58 }
 0x3ac   : > { %v12146_v42 = vpop.f32.mrf.mxu0  ;;  %v8719_v34 = vpop.f32.mrf.mxu1 }
 0x3ad   : > { %13664 = vst [vmem:[#allocation117_spill] sm:$0xff] %v12144_v11  ;;  %13665 = vst [vmem:[#allocation105_spill] sm:$0xff] %v12146_v42  ;;  %v12149_v35 = vadd.f32 %v8719_v34, %v11993_v25 }
 0x3ae   : > { %v12151_v55 = vpop.f32.mrf.mxu0  ;;  %v5471_v61 = vpop.f32.mrf.mxu1 }
 0x3af   : > { %13666 = vst [vmem:[#allocation15_spill] sm:$0xff] %v12149_v35  ;;  %13667 = vst [vmem:[#allocation107_spill] sm:$0xff] %v12151_v55  ;;  %v12154_v48 = vadd.f32 %v5471_v61, %v11996_v10 }
 0x3b0   : > { %v12156_v32 = vpop.f32.mrf.mxu0  ;;  %v8770_v47 = vpop.f32.mrf.mxu1 }
 0x3b1   : > { %13668 = vst [vmem:[#allocation16_spill] sm:$0xff] %v12154_v48  ;;  %13669 = vst [vmem:[#allocation78_spill] sm:$0xff] %v12156_v32 }
 0x3b2   : > { %v12158_v45 = vpop.f32.mrf.mxu0  ;;  %v6062_v37 = vpop.f32.mrf.mxu1 }
 0x3b4   : > { %v12160_v58 = vpop.f32.mrf.mxu0  ;;  %v12162_v13 = vpop.f32.mrf.mxu1 }
 0x3b6   : > { %v12164_v42 = vpop.f32.mrf.mxu1  ;;  %v12166_v25 = vpop.f32.mrf.mxu0 }
 0x3b7   : > { %13670 = vst [vmem:[#allocation81_spill] sm:$0xff] %v12166_v25 }
 0x3b8   : > { %v12168_v34 = vpop.f32.mrf.mxu1  ;;  %v12172_v10 = vpop.f32.mrf.mxu0 }
 0x3b9   : > { %13672 = vst [vmem:[#allocation108_spill] sm:$0xff] %v12172_v10 }
 0x3ba   : > { %v12170_v55 = vpop.f32.mrf.mxu1  ;;  %v12178_v48 = vpop.f32.mrf.mxu0 }
 0x3bb   : > { %13671 = vst [vmem:[#allocation80_spill] sm:$0xff] %v12170_v55  ;;  %13675 = vst [vmem:[#allocation83_spill] sm:$0xff] %v12178_v48 }
 0x3bc   : > { %v12174_v61 = vpop.f32.mrf.mxu1  ;;  %v12184_v8 = vpop.f32.mrf.mxu0 }
 0x3bd   : > { %13673 = vst [vmem:[#allocation120_spill] sm:$0xff] %v12174_v61  ;;  %13678 = vst [vmem:[#allocation96_spill] sm:$0xff] %v12184_v8 }
 0x3be   : > { %v12176_v32 = vpop.f32.mrf.mxu1  ;;  %v12190_v25 = vpop.f32.mrf.mxu0 }
 0x3bf   : > { %13674 = vst [vmem:[#allocation63_spill] sm:$0xff] %v12176_v32  ;;  %13681 = vst [vmem:[#allocation19_spill] sm:$0xff] %v12190_v25 }
 0x3c0   : > { %v12180_v35 = vpop.f32.mrf.mxu1  ;;  %v12196_v61 = vpop.f32.mrf.mxu0 }
 0x3c1   : > { %13676 = vst [vmem:[#allocation82_spill] sm:$0xff] %v12180_v35  ;;  %13684 = vst [vmem:[#allocation87_spill] sm:$0xff] %v12196_v61 }
 0x3c2   : > { %v12182_v11 = vpop.f32.mrf.mxu1  ;;  %v12202_v35 = vpop.f32.mrf.mxu0 }
 0x3c3   : > { %13677 = vst [vmem:[#allocation123_spill] sm:$0xff] %v12182_v11  ;;  %13687 = vst [vmem:[#allocation84_spill] sm:$0xff] %v12202_v35 }
 0x3c4   : > { %v12186_v21 = vpop.f32.mrf.mxu1 }
 0x3c5   : > { %13679 = vst [vmem:[#allocation110_spill] sm:$0xff] %v12186_v21  ;;  %v12208_v21 = vpop.f32.mrf.mxu0 }
 0x3c6   : > { %v12188_v62 = vpop.f32.mrf.mxu1  ;;  %13690 = vst [vmem:[#allocation118_spill] sm:$0xff] %v12208_v21 }
 0x3c7   : > { %13680 = vst [vmem:[#allocation111_spill] sm:$0xff] %v12188_v62 }
 0x3c8   : > { %v12192_v55 = vpop.f32.mrf.mxu1 }
 0x3c9   : > { %13682 = vst [vmem:[#allocation113_spill] sm:$0xff] %v12192_v55  ;;  %v12214_v55 = vpop.f32.mrf.mxu0 }
 0x3ca   : > { %v12194_v10 = vpop.f32.mrf.mxu1  ;;  %13693 = vst [vmem:[#allocation89_spill] sm:$0xff] %v12214_v55 }
 0x3cb   : > { %13683 = vst [vmem:[#allocation20_spill] sm:$0xff] %v12194_v10 }
 0x3cc   : > { %v12198_v32 = vpop.f32.mrf.mxu1 }
 0x3cd   : > { %13685 = vst [vmem:[#allocation114_spill] sm:$0xff] %v12198_v32  ;;  %v12220_v32 = vpop.f32.mrf.mxu0 }
 0x3ce   : > { %v12200_v48 = vpop.f32.mrf.mxu1 }
 0x3cf   : > { %13686 = vst [vmem:[#allocation85_spill] sm:$0xff] %v12200_v48 }
 0x3d0   : > { %v12204_v11 = vpop.f32.mrf.mxu1 }
 0x3d1   : > { %13688 = vst [vmem:[#allocation115_spill] sm:$0xff] %v12204_v11  ;;  %v12226_v11 = vpop.f32.mrf.mxu0 }
 0x3d2   : > { %v12206_v8 = vpop.f32.mrf.mxu1  ;;  %13698 = vst [vmem:[#allocation51_spill] sm:$0xff] %v12226_v11 }
 0x3d3   : > { %13689 = vst [vmem:[#allocation116_spill] sm:$0xff] %v12206_v8 }
 0x3d4   : > { %v12210_v62 = vpop.f32.mrf.mxu1 }
 0x3d5   : > { %13691 = vst [vmem:[#allocation86_spill] sm:$0xff] %v12210_v62  ;;  %v12232_v62 = vpop.f32.mrf.mxu0 }
 0x3d6   : > { %v12212_v25 = vpop.f32.mrf.mxu1  ;;  %13701 = vst [vmem:[#allocation91_spill] sm:$0xff] %v12232_v62 }
 0x3d7   : > { %13692 = vst [vmem:[#allocation119_spill] sm:$0xff] %v12212_v25 }
 0x3d8   : > { %v12216_v10 = vpop.f32.mrf.mxu1 }
 0x3d9   : > { %13694 = vst [vmem:[#allocation88_spill] sm:$0xff] %v12216_v10  ;;  %v12238_v10 = vpop.f32.mrf.mxu0 }
 0x3da   : > { %v12218_v61 = vpop.f32.mrf.mxu1 }
 0x3db   : > { %13695 = vst [vmem:[#allocation95_spill] sm:$0xff] %v12218_v61  ;;  %v12250_v11 = vpop.f32.mrf.mxu0 }
 0x3dc   : > { %v12222_v48 = vpop.f32.mrf.mxu1 }
 0x3dd   : > { %13696 = vst [vmem:[#allocation121_spill] sm:$0xff] %v12222_v48  ;;  %v5838_v48 = vadd.f32 %v12001_v20, %v11999_v46  ;;  %v5840_v46 = vadd.f32 %v12026_v26, %v12024_v3  ;;  %v5843_v20 = vadd.f32 %v12031_v43, %v12029_v19  ;;  %v12290_v26 = vadd.f32 %v12071_v33, %v12069_v6  ;;  %v13706_v6 = vld [vmem:[#allocation73_spill] sm:$0xff] }
 0x3de   : > { %v12224_v35 = vpop.f32.mrf.mxu1  ;;  %v12294_v19 = vadd.f32 %v12076_v1, %v12074_v9  ;;  %v12330_v33 = vadd.f32 %v13706_v6, %v12109_v40  ;;  %v13707_v9 = vld [vmem:[#allocation72_spill] sm:$0xff]  ;;  %v13712_v40 = vld [vmem:[#allocation74_spill] sm:$0xff] }
 0x3df   : > { %13697 = vst [vmem:[#allocation122_spill] sm:$0xff] %v12224_v35  ;;  %v6191_v62 = vadd.f32 %v8770_v47, %v5838_v48  ;;  %v12334_v1 = vadd.f32 %v13707_v9, %v12114_v23 }
 0x3e0   : > { %v12228_v8 = vpop.f32.mrf.mxu1 }
 0x3e1   : > { %13699 = vst [vmem:[#allocation124_spill] sm:$0xff] %v12228_v8  ;;  %v5836_v8 = vadd.f32 %v12006_v41, %v12004_v59  ;;  %v5841_v59 = vadd.f32 %v12036_v0, %v12034_v2  ;;  %v5846_v41 = vadd.f32 %v12041_v16, %v12039_v27  ;;  %v6512_v43 = vadd.f32 %v12158_v45, %v6191_v62  ;;  %v12298_v0 = vpop.f32.mrf.mxu0 }
 0x3e2   : > { %v12230_v21 = vpop.f32.mrf.mxu1  ;;  %v12302_v27 = vadd.f32 %v12081_v28, %v12079_v17  ;;  %v12306_v16 = vadd.f32 %v12086_v22, %v12084_v30  ;;  %v13708_v30 = vld [vmem:[#allocation102_spill] sm:$0xff] }
 0x3e3   : > { %13700 = vst [vmem:[#allocation125_spill] sm:$0xff] %v12230_v21  ;;  %v5839_v21 = vadd.f32 %v12011_v15, %v12009_v51  ;;  %v12268_v51 = vadd.f32 %v12046_v50, %v12044_v52  ;;  %v6189_v15 = vadd.f32 %v6062_v37, %v5836_v8  ;;  %v12310_v52 = vadd.f32 %v12091_v4, %v12089_v31  ;;  %v13709_v31 = vld [vmem:[#allocation81_spill] sm:$0xff]  ;;  %v13714_v8 = vld [vmem:[#allocation80_spill] sm:$0xff] }
 0x3e4   : > { %v12234_v25 = vpop.f32.mrf.mxu1  ;;  %v12314_v50 = vadd.f32 %v12096_v5, %v12094_v60  ;;  %v12339_v22 = vadd.f32 %v13708_v30, %v12119_v44  ;;  %v12342_v60 = vpop.f32.mrf.mxu0  ;;  %v6193_v37 = vadd.f32 %v13714_v8, %v5840_v46  ;;  %v13715_v44 = vld [vmem:[#allocation120_spill] sm:$0xff]  ;;  %v13721_v46 = vld [vmem:[#allocation82_spill] sm:$0xff] }
 0x3e5   : > { %v6192_v2 = vadd.f32 %v12162_v13, %v5839_v21  ;;  %v13713_v21 = vld [vmem:[#allocation79_spill] sm:$0xff]  ;;  %v6196_v48 = vadd.f32 %v13715_v44, %v5843_v20 }
 0x3e6   : > { %v12236_v55 = vpop.f32.mrf.mxu1  ;;  %v12352_v23 = vadd.f32 %v13713_v21, %v13712_v40 }
 0x3e7   : > { %13702 = vst [vmem:[#allocation90_spill] sm:$0xff] %v12236_v55  ;;  %v5837_v55 = vadd.f32 %v12016_v7, %v12014_v39  ;;  %v12272_v39 = vadd.f32 %v12051_v24, %v12049_v53  ;;  %v12276_v7 = vadd.f32 %v12056_v18, %v12054_v56  ;;  %v12316_v24 = vld [vmem:[#allocation8] ss:$0 sm:$0xff]  ;;  %v12320_v56 = vadd.f32 %v12101_v38, %v12099_v12 }
 0x3e8   : > { %v12240_v61 = vpop.f32.mrf.mxu1  ;;  %v6510_v18 = vadd.f32 %v12160_v58, %v6189_v15  ;;  %v6513_v4 = vadd.f32 %v13709_v31, %v6192_v2  ;;  %v13710_v38 = vld [vmem:[#allocation109_spill] sm:$0xff]  ;;  %v13718_v15 = vld [vmem:[#allocation76_spill] sm:$0xff]  ;;  %v13719_v2 = vld [vmem:[#allocation83_spill] sm:$0xff] }
 0x3e9   : > { %13703 = vst [vmem:[#allocation93_spill] sm:$0xff] %v12240_v61  ;;  %v5842_v61 = vadd.f32 %v12021_v54, %v12019_v57  ;;  %v12280_v57 = vadd.f32 %v12061_v49, %v12059_v36  ;;  %v12284_v54 = vadd.f32 %v12066_v29, %v12064_v63  ;;  %v6190_v36 = vadd.f32 %v12164_v42, %v5837_v55  ;;  %v13705_v63 = vld [vmem:[#allocation70_spill] sm:$0xff]  ;;  %v13716_v42 = vld [vmem:[#allocation108_spill] sm:$0xff] }
 0x3ea   : > { %v12244_v35 = vpop.f32.mrf.mxu1  ;;  %v12326_v29 = vadd.f32 %v13705_v63, %v12104_v14  ;;  %v13711_v14 = vld [vmem:[#allocation75_spill] sm:$0xff]  ;;  %v6199_v63 = vadd.f32 %v13721_v46, %v5846_v41  ;;  %v13722_v31 = vld [vmem:[#allocation112_spill] sm:$0xff]  ;;  %v13730_v46 = vld [vmem:[#allocation110_spill] sm:$0xff] }
 0x3eb   : > { %13704 = vst [vmem:[#allocation92_spill] sm:$0xff] %v12244_v35  ;;  %v6195_v17 = vadd.f32 %v12168_v34, %v5842_v61  ;;  %v12348_v62 = vadd.f32 %v13711_v14, %v13710_v38  ;;  %v6511_v55 = vadd.f32 %v13716_v42, %v6190_v36  ;;  %v12358_v34 = vld [vmem:[#allocation9] ss:$0 sm:$0xff]  ;;  %v12372_v36 = vpop.f32.mrf.mxu0 }
 0x3ec   : > { %v12260_v35 = vpop.f32.mrf.mxu1  ;;  %v13717_v61 = vld [vmem:[#allocation77_spill] sm:$0xff] }
 0x3ee   : > { %v12286_v3 = vpop.f32.mrf.mxu1 }
 0x3f0   : > { %v8850_v53 = vpop.f32.mrf.mxu1 }
 0x3f1   : > { %v6865_v49 = vadd.f32 %v8850_v53, %v6512_v43  ;;  %v12362_v43 = vadd.f32 %v13718_v15, %v13717_v61  ;;  %v6516_v53 = vadd.f32 %v13719_v2, %v6195_v17  ;;  %v13723_v17 = vld [vmem:[#allocation104_spill] sm:$0xff]  ;;  %v12389_v61 = vpop.f32.mrf.mxu0 }
 0x3f2   : > { %v6736_v28 = vpop.f32.mrf.mxu1 }
 0x3f3   : > { %v6904_v5 = vadd.f32 %v12316_v24, %v6865_v49  ;;  %v6863_v12 = vadd.f32 %v6736_v28, %v6510_v18  ;;  %v13720_v18 = vld [vmem:[#allocation63_spill] sm:$0xff] }
 0x3f4   : > { %v8851_v45 = vpop.f32.mrf.mxu1  ;;  %v6194_v49 = vadd.f32 %v13720_v18, %v5841_v59  ;;  %v13724_v59 = vld [vmem:[#allocation96_spill] sm:$0xff] }
 0x3f5   : > { %v6936_v47 = vmax.f32 %v6904_v5, 0.0  ;;  %v6902_v58 = vadd.f32 %v12316_v24, %v6863_v12  ;;  %v6866_v13 = vadd.f32 %v8851_v45, %v6513_v4  ;;  %v12377_v4 = vadd.f32 %v13723_v17, %v13722_v31  ;;  %v13725_v5 = vld [vmem:[#allocation19_spill] sm:$0xff] }
 0x3f6   : > { %v6739_v20 = vpop.f32.mrf.mxu1  ;;  %v6514_v41 = vadd.f32 %v13724_v59, %v6193_v37  ;;  %v6517_v12 = vadd.f32 %v13725_v5, %v6196_v48  ;;  %v13726_v45 = vld [vmem:[#allocation87_spill] sm:$0xff] }
 0x3f7   : > { %v7851_v6 = vpack.c.bf16 %v6936_v47, %v6936_v47  ;;  %v6934_v9 = vmax.f32 %v6902_v58, 0.0  ;;  %v6905_v28 = vadd.f32 %v12316_v24, %v6866_v13  ;;  %v6864_v30 = vadd.f32 %v6739_v20, %v6511_v55  ;;  %v13727_v55 = vld [vmem:[#allocation84_spill] sm:$0xff]  ;;  %v13731_v59 = vld [vmem:[#allocation111_spill] sm:$0xff] }
 0x3f8   : > { %v8854_v38 = vpop.f32.mrf.mxu1  ;;  %v7136_v14 = vmul.f32 %v12358_v34, %v6936_v47  ;;  %v6515_v42 = vadd.f32 %v13726_v45, %v6194_v49  ;;  %v6520_v58 = vadd.f32 %v13727_v55, %v6199_v63  ;;  %v6200_v63 = vadd.f32 %v13730_v46, %v12272_v39  ;;  %v13735_v45 = vld [vmem:[#allocation105_spill] sm:$0xff] }
 0x3f9   : > { %7097 = vst.msk [vmem:[%s12370_s9 + $0x8] sm:$0xf] %vm7094_vm8, %v7851_v6  ;;  %v7849_v40 = vpack.c.bf16 %v6934_v9, %v6934_v9  ;;  %v6937_v21 = vmax.f32 %v6905_v28, 0.0  ;;  %v6903_v8 = vadd.f32 %v12316_v24, %v6864_v30  ;;  %v6869_v44 = vadd.f32 %v8854_v38, %v6516_v53  ;;  %v13729_v53 = vld [vmem:[#allocation123_spill] sm:$0xff] }
 0x3fa   : > { %v6752_v13 = vpop.f32.mrf.mxu1  ;;  %v7172_v37 = vsel %vm13728_vm13, %v7136_v14, 0.0  ;;  %v7134_v48 = vmul.f32 %v12358_v34, %v6934_v9  ;;  %v6197_v49 = vadd.f32 %v13729_v53, %v12268_v51  ;;  %v6198_v51 = vadd.f32 %v13731_v59, %v12276_v7  ;;  %v13734_v7 = vld [vmem:[#allocation117_spill] sm:$0xff]  ;;  %vm13766_vm13 = vmmov %vm13615_vm0 }
 0x3fb   : > { %7095 = vst.msk [vmem:[%s12370_s9] sm:$0xf] %vm7094_vm8, %v7849_v40  ;;  %v7852_v47 = vpack.c.bf16 %v6937_v21, %v6937_v21  ;;  %v6935_v15 = vmax.f32 %v6903_v8, 0.0  ;;  %v6908_v2 = vadd.f32 %v12316_v24, %v6869_v44  ;;  %v6867_v18 = vadd.f32 %v6752_v13, %v6514_v41  ;;  %7173 = vadd.xlane.f32.xlu1 %v7172_v37  ;;  %v13732_v41 = vld [vmem:[#allocation113_spill] sm:$0xff]  ;;  %v12409_v40 = vpop.f32.mrf.mxu0 }
 0x3fc   : > { %v8855_v20 = vpop.f32.mrf.mxu1  ;;  %v7166_v6 = vsel %vm13615_vm0, %v7134_v48, 0.0  ;;  %v7137_v9 = vmul.f32 %v12358_v34, %v6937_v21  ;;  %v6203_v39 = vadd.f32 %v13732_v41, %v12280_v57  ;;  %v12416_v55 = vadd.f32 %v13735_v45, %v13734_v7  ;;  %v13736_v57 = vld [vmem:[#allocation118_spill] sm:$0xff]  ;;  %v13738_v53 = vld [vmem:[#allocation89_spill] sm:$0xff] }
 0x3fd   : > { %7098 = vst.msk [vmem:[%s12370_s9 + $0xc] sm:$0xf] %vm7094_vm8, %v7852_v47  ;;  %v7850_v28 = vpack.c.bf16 %v6935_v15, %v6935_v15  ;;  %v6940_v30 = vmax.f32 %v6908_v2, 0.0  ;;  %v6906_v31 = vadd.f32 %v12316_v24, %v6867_v18  ;;  %v6870_v17 = vadd.f32 %v8855_v20, %v6517_v12  ;;  %7167 = vadd.xlane.f32.xlu0 %v7166_v6 }
 0x3fe   : > { %v6755_v5 = vpop.f32.mrf.mxu1  ;;  %v7175_v38 = vsel %vm13733_vm3, %v7137_v9, 0.0  ;;  %v7135_v14 = vmul.f32 %v12358_v34, %v6935_v15  ;;  %v6518_v13 = vadd.f32 %v13736_v57, %v6197_v49  ;;  %v6521_v46 = vadd.f32 %v13738_v53, %v6200_v63  ;;  %v13739_v49 = vld [vmem:[#allocation51_spill] sm:$0xff]  ;;  %v13740_v9 = vld [vmem:[#allocation20_spill] sm:$0xff]  ;;  %v13741_v63 = vld [vmem:[#allocation114_spill] sm:$0xff] }
 0x3ff   : > { %7096 = vst.msk [vmem:[%s12370_s9 + $0x4] sm:$0xf] %vm7094_vm8, %v7850_v28  ;;  %v7855_v21 = vpack.c.bf16 %v6940_v30, %v6940_v30  ;;  %v6938_v8 = vmax.f32 %v6906_v31, 0.0  ;;  %v6909_v12 = vadd.f32 %v12316_v24, %v6870_v17  ;;  %v6868_v44 = vadd.f32 %v6755_v5, %v6515_v42  ;;  %7176 = vadd.xlane.f32.xlu1 %v7175_v38  ;;  %vm13769_vm3 = vmmov %vm13615_vm0 }
 0x400   : > { %v8858_v37 = vpop.f32.mrf.mxu1  ;;  %v7169_v48 = vsel %vm13737_vm7, %v7135_v14, 0.0  ;;  %v7140_v47 = vmul.f32 %v12358_v34, %v6940_v30  ;;  %v6519_v20 = vadd.f32 %v12220_v32, %v6198_v51  ;;  %v6524_v6 = vadd.f32 %v13739_v49, %v6203_v39  ;;  %v12429_v30 = vpop.f32.mrf.mxu0  ;;  %vm13772_vm7 = vmmov %vm13615_vm0 }
 0x401   : > { %7101 = vst.msk [vmem:[%s12370_s9 + $0x18] sm:$0xf] %vm7094_vm8, %v7855_v21  ;;  %v7853_v15 = vpack.c.bf16 %v6938_v8, %v6938_v8  ;;  %v6941_v2 = vmax.f32 %v6909_v12, 0.0  ;;  %v6907_v18 = vadd.f32 %v12316_v24, %v6868_v44  ;;  %v6873_v42 = vadd.f32 %v8858_v37, %v6520_v58  ;;  %7170 = vadd.xlane.f32.xlu0 %v7169_v48  ;;  %v13743_v44 = vld [vmem:[#allocation85_spill] sm:$0xff] }
 0x402   : > { %v6201_v28 = vadd.f32 %v13740_v9, %v12284_v54  ;;  %v6768_v31 = vpop.f32.mrf.mxu1  ;;  %v6204_v5 = vadd.f32 %v13741_v63, %v12290_v26  ;;  %v7184_v32 = vsel %vm13742_vm1, %v7140_v47, 0.0  ;;  %v7138_v54 = vmul.f32 %v12358_v34, %v6938_v8  ;;  %v13744_v26 = vld [vmem:[#allocation115_spill] sm:$0xff]  ;;  %v12448_v37 = vpop.f32.mrf.mxu0  ;;  %vm13774_vm1 = vmmov %vm13615_vm0 }
 0x403   : > { %7099 = vst.msk [vmem:[%s12370_s9 + $0x10] sm:$0xf] %vm7094_vm8, %v7853_v15  ;;  %v7856_v17 = vpack.c.bf16 %v6941_v2, %v6941_v2  ;;  %v6939_v59 = vmax.f32 %v6907_v18, 0.0  ;;  %v6912_v58 = vadd.f32 %v12316_v24, %v6873_v42  ;;  %v6871_v41 = vadd.f32 %v6768_v31, %v6518_v13 }
 0x404   : > { %v8859_v38 = vpop.f32.mrf.mxu1  ;;  %v7141_v51 = vmul.f32 %v12358_v34, %v6941_v2  ;;  %v6202_v7 = vadd.f32 %v13743_v44, %v12294_v19  ;;  %v6207_v45 = vadd.f32 %v13744_v26, %v12302_v27  ;;  %v13746_v19 = vld [vmem:[#allocation91_spill] sm:$0xff]  ;;  %v6525_v27 = vadd.f32 %v12238_v10, %v6204_v5  ;;  %v13748_v10 = vld [vmem:[#allocation116_spill] sm:$0xff]  ;;  %v12465_v63 = vpop.f32.mrf.mxu0 }
 0x405   : > { %7102 = vst.msk [vmem:[%s12370_s9 + $0x1c] sm:$0xf] %vm7094_vm8, %v7856_v17  ;;  %v7854_v39 = vpack.c.bf16 %v6939_v59, %v6939_v59  ;;  %v6944_v14 = vmax.f32 %v6912_v58, 0.0  ;;  %v6910_v21 = vadd.f32 %v12316_v24, %v6871_v41  ;;  %v6874_v12 = vadd.f32 %v8859_v38, %v6521_v46  ;;  %7185 = vadd.xlane.f32.xlu0 %v7184_v32 }
 0x406   : > { %v6771_v57 = vpop.f32.mrf.mxu1  ;;  %v7187_v13 = vsel %vm13745_vm2, %v7141_v51, 0.0  ;;  %v7139_v8 = vmul.f32 %v12358_v34, %v6939_v59  ;;  %v6522_v18 = vadd.f32 %v13746_v19, %v6201_v28  ;;  %v7178_v53 = vsel %vm13747_vm10, %v7138_v54, 0.0  ;;  %vm13776_vm2 = vmmov %vm13615_vm0 }
 0x407   : > { %7100 = vst.msk [vmem:[%s12370_s9 + $0x14] sm:$0xf] %vm7094_vm8, %v7854_v39  ;;  %v7859_v48 = vpack.c.bf16 %v6944_v14, %v6944_v14  ;;  %v6942_v47 = vmax.f32 %v6910_v21, 0.0  ;;  %v6913_v15 = vadd.f32 %v12316_v24, %v6874_v12  ;;  %v6872_v2 = vadd.f32 %v6771_v57, %v6519_v20  ;;  %7188 = vadd.xlane.f32.xlu1 %v7187_v13  ;;  %vm13777_vm10 = vmmov %vm13615_vm0 }
 0x408   : > { %v8862_v42 = vpop.f32.mrf.mxu1  ;;  %v7144_v46 = vmul.f32 %v12358_v34, %v6944_v14  ;;  %v6523_v20 = vadd.f32 %v12250_v11, %v6202_v7  ;;  %v6528_v28 = vadd.f32 %v12298_v0, %v6207_v45  ;;  %v6205_v59 = vadd.f32 %v13748_v10, %v12306_v16  ;;  %v13750_v11 = vld [vmem:[#allocation86_spill] sm:$0xff]  ;;  %v13752_v7 = vld [vmem:[#allocation119_spill] sm:$0xff] }
 0x409   : > { %7105 = vst.msk [vmem:[%s12370_s9 + $0x28] sm:$0xf] %vm7094_vm8, %v7859_v48  ;;  %v7857_v49 = vpack.c.bf16 %v6942_v47, %v6942_v47  ;;  %v6945_v9 = vmax.f32 %v6913_v15, 0.0  ;;  %v6911_v31 = vadd.f32 %v12316_v24, %v6872_v2  ;;  %v6877_v17 = vadd.f32 %v8862_v42, %v6524_v6  ;;  %7179 = vadd.xlane.f32.xlu0 %v7178_v53  ;;  %v12484_v48 = vpop.f32.mrf.mxu0 }
 0x40a   : > { %v6784_v58 = vpop.f32.mrf.mxu1  ;;  %v7181_v41 = vsel %vm13749_vm6, %v7139_v8, 0.0  ;;  %v6208_v0 = vadd.f32 %v13750_v11, %v12310_v52  ;;  %v7196_v16 = vsel %vm13751_vm4, %v7144_v46, 0.0  ;;  %v7142_v39 = vmul.f32 %v12358_v34, %v6942_v47  ;;  %v13753_v52 = vld [vmem:[#allocation88_spill] sm:$0xff]  ;;  %vm13778_vm6 = vmmov %vm13615_vm0 }
 0x40b   : > { %7103 = vst.msk [vmem:[%s12370_s9 + $0x20] sm:$0xf] %vm7094_vm8, %v7857_v49  ;;  %v7860_v5 = vpack.c.bf16 %v6945_v9, %v6945_v9  ;;  %v6943_v38 = vmax.f32 %v6911_v31, 0.0  ;;  %v6916_v6 = vadd.f32 %v12316_v24, %v6877_v17  ;;  %v6875_v32 = vadd.f32 %v6784_v58, %v6522_v18  ;;  %7182 = vadd.xlane.f32.xlu1 %v7181_v41  ;;  %vm13779_vm4 = vmmov %vm13615_vm0 }
 0x40c   : > { %v8863_v51 = vpop.f32.mrf.mxu1  ;;  %v7145_v54 = vmul.f32 %v12358_v34, %v6945_v9  ;;  %v6206_v26 = vadd.f32 %v13752_v7, %v12314_v50  ;;  %v6211_v45 = vadd.f32 %v13753_v52, %v12320_v56  ;;  %v6526_v50 = vadd.f32 %v12342_v60, %v6205_v59  ;;  %v12501_v59 = vpop.f32.mrf.mxu0 }
 0x40d   : > { %7106 = vst.msk [vmem:[%s12370_s9 + $0x2c] sm:$0xf] %vm7094_vm8, %v7860_v5  ;;  %v7858_v14 = vpack.c.bf16 %v6943_v38, %v6943_v38  ;;  %v6948_v21 = vmax.f32 %v6916_v6, 0.0  ;;  %v6914_v12 = vadd.f32 %v12316_v24, %v6875_v32  ;;  %v6878_v44 = vadd.f32 %v8863_v51, %v6525_v27  ;;  %7197 = vadd.xlane.f32.xlu0 %v7196_v16 }
 0x40e   : > { %v6787_v57 = vpop.f32.mrf.mxu1  ;;  %v7199_v13 = vsel %vm13754_vm14, %v7145_v54, 0.0  ;;  %v7143_v8 = vmul.f32 %v12358_v34, %v6943_v38  ;;  %v6529_v56 = vadd.f32 %v12372_v36, %v6208_v0  ;;  %v7190_v27 = vsel %vm13755_vm15, %v7142_v39, 0.0  ;;  %v13756_v36 = vld [vmem:[#allocation95_spill] sm:$0xff]  ;;  %v13760_v54 = vld [vmem:[#allocation122_spill] sm:$0xff]  ;;  %v12520_v7 = vpop.f32.mrf.mxu0  ;;  %vm13780_vm14 = vmmov %vm13615_vm0 }
 0x40f   : > { %7104 = vst.msk [vmem:[%s12370_s9 + $0x24] sm:$0xf] %vm7094_vm8, %v7858_v14  ;;  %v7863_v47 = vpack.c.bf16 %v6948_v21, %v6948_v21  ;;  %v6946_v15 = vmax.f32 %v6914_v12, 0.0  ;;  %v6917_v2 = vadd.f32 %v12316_v24, %v6878_v44  ;;  %v6876_v19 = vadd.f32 %v6787_v57, %v6523_v20  ;;  %7200 = vadd.xlane.f32.xlu1 %v7199_v13  ;;  %v13764_v13 = vld [vmem:[#allocation107_spill] sm:$0xff]  ;;  %vm13781_vm15 = vmmov %vm13615_vm0 }
 0x410   : > { %v8866_v18 = vpop.f32.mrf.mxu1  ;;  %v7148_v42 = vmul.f32 %v12358_v34, %v6948_v21  ;;  %v6527_v31 = vadd.f32 %v12389_v61, %v6206_v26  ;;  %v6532_v60 = vadd.f32 %v12409_v40, %v6211_v45  ;;  %v6209_v17 = vadd.f32 %v13756_v36, %v12326_v29  ;;  %v13758_v61 = vld [vmem:[#allocation121_spill] sm:$0xff] }
 0x411   : > { %7109 = vst.msk [vmem:[%s12370_s9 + $0x38] sm:$0xf] %vm7094_vm8, %v7863_v47  ;;  %v7861_v53 = vpack.c.bf16 %v6946_v15, %v6946_v15  ;;  %v6949_v46 = vmax.f32 %v6917_v2, 0.0  ;;  %v6915_v49 = vadd.f32 %v12316_v24, %v6876_v19  ;;  %v6881_v9 = vadd.f32 %v8866_v18, %v6528_v28  ;;  %7191 = vadd.xlane.f32.xlu0 %v7190_v27 }
 0x412   : > { %v6800_v20 = vpop.f32.mrf.mxu1  ;;  %v7193_v10 = vsel %vm13757_vm5, %v7143_v8, 0.0  ;;  %v6212_v40 = vadd.f32 %v13758_v61, %v12330_v33  ;;  %v7208_v29 = vsel %vm13759_vm9, %v7148_v42, 0.0  ;;  %v7146_v32 = vmul.f32 %v12358_v34, %v6946_v15  ;;  %v13761_v33 = vld [vmem:[#allocation124_spill] sm:$0xff]  ;;  %vm13782_vm5 = vmmov %vm13615_vm0 }
 0x413   : > { %7107 = vst.msk [vmem:[%s12370_s9 + $0x30] sm:$0xf] %vm7094_vm8, %v7861_v53  ;;  %v7864_v58 = vpack.c.bf16 %v6949_v46, %v6949_v46  ;;  %v6947_v41 = vmax.f32 %v6915_v49, 0.0  ;;  %v6920_v28 = vadd.f32 %v12316_v24, %v6881_v9  ;;  %v6879_v5 = vadd.f32 %v6800_v20, %v6526_v50  ;;  %7194 = vadd.xlane.f32.xlu1 %v7193_v10  ;;  %v6482_v49 = vpop.f32.mrf.mxu0  ;;  %vm13783_vm9 = vmmov %vm13615_vm0 }
 0x414   : > { %v8867_v38 = vpop.f32.mrf.mxu1  ;;  %v7149_v6 = vmul.f32 %v12358_v34, %v6949_v46  ;;  %v6210_v39 = vadd.f32 %v13760_v54, %v12334_v1  ;;  %v6215_v14 = vadd.f32 %v13761_v33, %v12339_v22  ;;  %v13763_v1 = vld [vmem:[#allocation15_spill] sm:$0xff]  ;;  %v6530_v22 = vadd.f32 %v12429_v30, %v6209_v17  ;;  %v13770_v54 = vld [vmem:[#allocation16_spill] sm:$0xff] }
 0x415   : > { %7110 = vst.msk [vmem:[%s12370_s9 + $0x3c] sm:$0xf] %vm7094_vm8, %v7864_v58  ;;  %v7862_v11 = vpack.c.bf16 %v6947_v41, %v6947_v41  ;;  %v6952_v0 = vmax.f32 %v6920_v28, 0.0  ;;  %v6918_v51 = vadd.f32 %v12316_v24, %v6879_v5  ;;  %v6882_v16 = vadd.f32 %v8867_v38, %v6529_v56  ;;  %7209 = vadd.xlane.f32.xlu0 %v7208_v29  ;;  %v8838_v58 = vpop.f32.mrf.mxu0 }
 0x416   : > { %v6803_v21 = vpop.f32.mrf.mxu1  ;;  %v7211_v12 = vsel %vm13762_vm12, %v7149_v6, 0.0  ;;  %v7147_v44 = vmul.f32 %v12358_v34, %v6947_v41  ;;  %v12527_v8 = vadd.f32 %v13764_v13, %v13763_v1  ;;  %v7202_v15 = vsel %vm13765_vm11, %v7146_v32, 0.0  ;;  %vm13784_vm12 = vmmov %vm13615_vm0 }
 0x417   : > { %7108 = vst.msk [vmem:[%s12370_s9 + $0x34] sm:$0xf] %vm7094_vm8, %v7862_v11  ;;  %v7867_v26 = vpack.c.bf16 %v6952_v0, %v6952_v0  ;;  %v6950_v52 = vmax.f32 %v6918_v51, 0.0  ;;  %v6921_v45 = vadd.f32 %v12316_v24, %v6882_v16  ;;  %v6880_v57 = vadd.f32 %v6803_v21, %v6527_v31  ;;  %7212 = vadd.xlane.f32.xlu1 %v7211_v12  ;;  %v6495_v21 = vpop.f32.mrf.mxu0  ;;  %vm13785_vm11 = vmmov %vm13615_vm0 }
 0x418   : > { %v8870_v47 = vpop.f32.mrf.mxu1  ;;  %v7152_v2 = vmul.f32 %v12358_v34, %v6952_v0  ;;  %v6533_v27 = vadd.f32 %v12448_v37, %v6212_v40  ;;  %v6531_v42 = vadd.f32 %v12465_v63, %v6210_v39  ;;  %v6536_v30 = vadd.f32 %v12484_v48, %v6215_v14  ;;  %v13768_v40 = vld [vmem:[#allocation90_spill] sm:$0xff] }
 0x419   : > { %7113 = vst.msk [vmem:[%s12370_s9 + $0x48] sm:$0xf] %vm7094_vm8, %v7867_v26  ;;  %v7865_v19 = vpack.c.bf16 %v6950_v52, %v6950_v52  ;;  %v6953_v50 = vmax.f32 %v6921_v45, 0.0  ;;  %v6919_v56 = vadd.f32 %v12316_v24, %v6880_v57  ;;  %v6885_v18 = vadd.f32 %v8870_v47, %v6532_v60  ;;  %7203 = vadd.xlane.f32.xlu0 %v7202_v15  ;;  %v13767_v60 = vld [vmem:[#allocation125_spill] sm:$0xff]  ;;  %v13771_v39 = vld [vmem:[#allocation78_spill] sm:$0xff] }
 0x41a   : > { %v6816_v53 = vpop.f32.mrf.mxu1  ;;  %v7205_v46 = vsel %vm13766_vm13, %v7147_v44, 0.0  ;;  %v6213_v37 = vadd.f32 %v13767_v60, %v12348_v62  ;;  %v7220_v63 = vsel %vm13615_vm0, %v7152_v2, 0.0  ;;  %v7150_v10 = vmul.f32 %v12358_v34, %v6950_v52  ;;  %vm13786_vm13 = vmmov %vm13615_vm0 }
 0x41b   : > { %7111 = vst.msk [vmem:[%s12370_s9 + $0x40] sm:$0xf] %vm7094_vm8, %v7865_v19  ;;  %v7868_v9 = vpack.c.bf16 %v6953_v50, %v6953_v50  ;;  %v6951_v31 = vmax.f32 %v6919_v56, 0.0  ;;  %v6924_v36 = vadd.f32 %v12316_v24, %v6885_v18  ;;  %v6883_v17 = vadd.f32 %v6816_v53, %v6530_v22  ;;  %7206 = vadd.xlane.f32.xlu1 %v7205_v46 }
 0x41c   : > { %v8871_v20 = vpop.f32.mrf.mxu1  ;;  %v7153_v48 = vmul.f32 %v12358_v34, %v6953_v50  ;;  %v6216_v62 = vadd.f32 %v12234_v25, %v12352_v23  ;;  %v6214_v38 = vadd.f32 %v13768_v40, %v12362_v43  ;;  %v5865_v25 = vadd.f32 %v13771_v39, %v13770_v54  ;;  %v13775_v50 = vld [vmem:[#allocation92_spill] sm:$0xff] }
 0x41d   : > { %7114 = vst.msk [vmem:[%s12370_s9 + $0x4c] sm:$0xf] %vm7094_vm8, %v7868_v9  ;;  %v7866_v41 = vpack.c.bf16 %v6951_v31, %v6951_v31  ;;  %v6956_v28 = vmax.f32 %v6924_v36, 0.0  ;;  %v6922_v5 = vadd.f32 %v12316_v24, %v6883_v17  ;;  %v6886_v61 = vadd.f32 %v8871_v20, %v6533_v27  ;;  %7221 = vadd.xlane.f32.xlu0 %v7220_v63 }
 0x41e   : > { %v6819_v29 = vpop.f32.mrf.mxu1  ;;  %v7223_v6 = vsel %vm13769_vm3, %v7153_v48, 0.0  ;;  %v7151_v32 = vmul.f32 %v12358_v34, %v6951_v31  ;;  %v6534_v23 = vadd.f32 %v12501_v59, %v6213_v37  ;;  %v7214_v33 = vsel %vm13772_vm7, %v7150_v10, 0.0  ;;  %v13773_v59 = vld [vmem:[#allocation93_spill] sm:$0xff] }
 0x41f   : > { %7112 = vst.msk [vmem:[%s12370_s9 + $0x44] sm:$0xf] %vm7094_vm8, %v7866_v41  ;;  %v7871_v11 = vpack.c.bf16 %v6956_v28, %v6956_v28  ;;  %v6954_v0 = vmax.f32 %v6922_v5, 0.0  ;;  %v6925_v51 = vadd.f32 %v12316_v24, %v6886_v61  ;;  %v6884_v16 = vadd.f32 %v6819_v29, %v6531_v42  ;;  %7224 = vadd.xlane.f32.xlu1 %v7223_v6  ;;  %v8839_v42 = vpop.f32.mrf.mxu0 }
 0x420   : > { %v8874_v43 = vpop.f32.mrf.mxu1  ;;  %v7156_v14 = vmul.f32 %v12358_v34, %v6956_v28  ;;  %v6537_v45 = vadd.f32 %v12520_v7, %v6216_v62  ;;  %v6535_v57 = vadd.f32 %v6482_v49, %v6214_v38  ;;  %v6219_v1 = vadd.f32 %v13773_v59, %v12377_v4 }
 0x421   : > { %7117 = vst.msk [vmem:[%s12370_s9 + $0x58] sm:$0xf] %vm7094_vm8, %v7871_v11  ;;  %v7869_v12 = vpack.c.bf16 %v6954_v0, %v6954_v0  ;;  %v6957_v44 = vmax.f32 %v6925_v51, 0.0  ;;  %v6923_v26 = vadd.f32 %v12316_v24, %v6884_v16  ;;  %v6889_v52 = vadd.f32 %v8874_v43, %v6536_v30  ;;  %7215 = vadd.xlane.f32.xlu0 %v7214_v33  ;;  %v6498_v41 = vpop.f32.mrf.mxu0 }
 0x422   : > { %v6832_v13 = vpop.f32.mrf.mxu1  ;;  %v7217_v22 = vsel %vm13774_vm1, %v7151_v32, 0.0  ;;  %v6217_v56 = vadd.f32 %v13775_v50, %v12416_v55  ;;  %v7232_v18 = vsel %vm13776_vm2, %v7156_v14, 0.0  ;;  %v7154_v27 = vmul.f32 %v12358_v34, %v6954_v0 }
 0x423   : > { %7115 = vst.msk [vmem:[%s12370_s9 + $0x50] sm:$0xf] %vm7094_vm8, %v7869_v12  ;;  %v7872_v47 = vpack.c.bf16 %v6957_v44, %v6957_v44  ;;  %v6955_v15 = vmax.f32 %v6923_v26, 0.0  ;;  %v6928_v2 = vadd.f32 %v12316_v24, %v6889_v52  ;;  %v6887_v19 = vadd.f32 %v6832_v13, %v6534_v23  ;;  %7218 = vadd.xlane.f32.xlu1 %v7217_v22 }
 0x424   : > { %v8875_v7 = vpop.f32.mrf.mxu1  ;;  %v7157_v4 = vmul.f32 %v12358_v34, %v6957_v44  ;;  %v6540_v9 = vadd.f32 %v8838_v58, %v6219_v1  ;;  %v6220_v55 = vadd.f32 %v12260_v35, %v12527_v8  ;;  %v6538_v48 = vadd.f32 %v6495_v21, %v6217_v56 }
 0x425   : > { %7118 = vst.msk [vmem:[%s12370_s9 + $0x5c] sm:$0xf] %vm7094_vm8, %v7872_v47  ;;  %v7870_v30 = vpack.c.bf16 %v6955_v15, %v6955_v15  ;;  %v6960_v53 = vmax.f32 %v6928_v2, 0.0  ;;  %v6926_v46 = vadd.f32 %v12316_v24, %v6887_v19  ;;  %v6890_v49 = vadd.f32 %v8875_v7, %v6537_v45  ;;  %7233 = vadd.xlane.f32.xlu0 %v7232_v18 }
 0x426   : > { %v6835_v31 = vpop.f32.mrf.mxu1  ;;  %v7235_v36 = vsel %vm13777_vm10, %v7157_v4, 0.0  ;;  %v7155_v17 = vmul.f32 %v12358_v34, %v6955_v15  ;;  %v6218_v10 = vadd.f32 %v12286_v3, %v5865_v25  ;;  %v7226_v35 = vsel %vm13778_vm6, %v7154_v27, 0.0 }
 0x427   : > { %7116 = vst.msk [vmem:[%s12370_s9 + $0x54] sm:$0xf] %vm7094_vm8, %v7870_v30  ;;  %v7875_v60 = vpack.c.bf16 %v6960_v53, %v6960_v53  ;;  %v6958_v37 = vmax.f32 %v6926_v46, 0.0  ;;  %v6929_v20 = vadd.f32 %v12316_v24, %v6890_v49  ;;  %v6888_v63 = vadd.f32 %v6835_v31, %v6535_v57  ;;  %7236 = vadd.xlane.f32.xlu1 %v7235_v36 }
 0x428   : > { %v8878_v58 = vpop.f32.mrf.mxu1  ;;  %v7160_v8 = vmul.f32 %v12358_v34, %v6960_v53  ;;  %v6541_v40 = vadd.f32 %v8839_v42, %v6220_v55  ;;  %v7229_v29 = vsel %vm13779_vm4, %v7155_v17, 0.0  ;;  %v6539_v0 = vadd.f32 %v6498_v41, %v6218_v10  ;;  %v12630_v42 = vld [vmem:[#allocation3] ss:$0 sm:$0xff] }
 0x429   : > { %7121 = vst.msk [vmem:[%s12370_s9 + $0x68] sm:$0xf] %vm7094_vm8, %v7875_v60  ;;  %v7873_v28 = vpack.c.bf16 %v6958_v37, %v6958_v37  ;;  %v6961_v5 = vmax.f32 %v6929_v20, 0.0  ;;  %v6927_v61 = vadd.f32 %v12316_v24, %v6888_v63  ;;  %v6893_v62 = vadd.f32 %v8878_v58, %v6540_v9  ;;  %7227 = vadd.xlane.f32.xlu0 %v7226_v35 }
 0x42a   : > { %v6848_v38 = vpop.f32.mrf.mxu1  ;;  %v7244_v16 = vsel %vm13780_vm14, %v7160_v8, 0.0  ;;  %v7158_v39 = vmul.f32 %v12358_v34, %v6958_v37 }
 0x42b   : > { %7119 = vst.msk [vmem:[%s12370_s9 + $0x60] sm:$0xf] %vm7094_vm8, %v7873_v28  ;;  %v7876_v3 = vpack.c.bf16 %v6961_v5, %v6961_v5  ;;  %v6959_v6 = vmax.f32 %v6927_v61, 0.0  ;;  %v6932_v32 = vadd.f32 %v12316_v24, %v6893_v62  ;;  %v6891_v11 = vadd.f32 %v6848_v38, %v6538_v48  ;;  %7230 = vadd.xlane.f32.xlu1 %v7229_v29 }
 0x42c   : > { %v8879_v51 = vpop.f32.mrf.mxu1  ;;  %v7161_v54 = vmul.f32 %v12358_v34, %v6961_v5  ;;  %v7238_v57 = vsel %vm13782_vm5, %v7158_v39, 0.0 }
 0x42d   : > { %7122 = vst.msk [vmem:[%s12370_s9 + $0x6c] sm:$0xf] %vm7094_vm8, %v7876_v3  ;;  %v7874_v25 = vpack.c.bf16 %v6959_v6, %v6959_v6  ;;  %v6964_v23 = vmax.f32 %v6932_v32, 0.0  ;;  %v6930_v43 = vadd.f32 %v12316_v24, %v6891_v11  ;;  %v6894_v33 = vadd.f32 %v8879_v51, %v6541_v40  ;;  %7245 = vadd.xlane.f32.xlu0 %v7244_v16 }
 0x42e   : > { %v6851_v14 = vpop.f32.mrf.mxu1  ;;  %v7247_v21 = vsel %vm13781_vm15, %v7161_v54, 0.0  ;;  %v7159_v12 = vmul.f32 %v12358_v34, %v6959_v6 }
 0x42f   : > { %7120 = vst.msk [vmem:[%s12370_s9 + $0x64] sm:$0xf] %vm7094_vm8, %v7874_v25  ;;  %v7879_v44 = vpack.c.bf16 %v6964_v23, %v6964_v23  ;;  %v6962_v26 = vmax.f32 %v6930_v43, 0.0  ;;  %v6933_v52 = vadd.f32 %v12316_v24, %v6894_v33  ;;  %v6892_v45 = vadd.f32 %v6851_v14, %v6539_v0  ;;  %7248 = vadd.xlane.f32.xlu1 %v7247_v21 }
 0x430   : > { %v7241_v47 = vsel %vm13783_vm9, %v7159_v12, 0.0  ;;  %v7164_v56 = vmul.f32 %v12358_v34, %v6964_v23 }
 0x431   : > { %7125 = vst.msk [vmem:[%s12370_s9 + $0x78] sm:$0xf] %vm7094_vm8, %v7879_v44  ;;  %v7877_v59 = vpack.c.bf16 %v6962_v26, %v6962_v26  ;;  %v6965_v1 = vmax.f32 %v6933_v52, 0.0  ;;  %v6931_v13 = vadd.f32 %v12316_v24, %v6892_v45  ;;  %7239 = vadd.xlane.f32.xlu0 %v7238_v57  ;;  %v7162_v22 = vmul.f32 %v12358_v34, %v6962_v26 }
 0x432   : > { %v7256_v4 = vsel %vm13786_vm13, %v7164_v56, 0.0 }
 0x433   : > { %7123 = vst.msk [vmem:[%s12370_s9 + $0x70] sm:$0xf] %vm7094_vm8, %v7877_v59  ;;  %v7880_v15 = vpack.c.bf16 %v6965_v1, %v6965_v1  ;;  %v6963_v2 = vmax.f32 %v6931_v13, 0.0  ;;  %7242 = vadd.xlane.f32.xlu1 %v7241_v47  ;;  %v7250_v19 = vsel %vm13784_vm12, %v7162_v22, 0.0  ;;  %v7165_v50 = vmul.f32 %v12358_v34, %v6965_v1 }
 0x435   : > { %7126 = vst.msk [vmem:[%s12370_s9 + $0x7c] sm:$0xf] %vm7094_vm8, %v7880_v15  ;;  %v7878_v24 = vpack.c.bf16 %v6963_v2, %v6963_v2  ;;  %7251 = vadd.xlane.f32.xlu0 %v7250_v19  ;;  %v7163_v7 = vmul.f32 %v12358_v34, %v6963_v2  ;;  %v7259_v27 = vsel %vm13615_vm0, %v7165_v50, 0.0 }
 0x437   : > { %7124 = vst.msk [vmem:[%s12370_s9 + $0x74] sm:$0xf] %vm7094_vm8, %v7878_v24  ;;  %v7253_v18 = vsel %vm13785_vm11, %v7163_v7, 0.0  ;;  %vm7301_vm8 = vcmask 7168  }
 0x438   : > { %7254 = vadd.xlane.f32.xlu1 %v7253_v18 }
 0x439   : > { %7257 = vadd.xlane.f32.xlu0 %v7256_v4 }
 0x43c   : > { %7260 = vadd.xlane.f32.xlu1 %v7259_v27 }
 0x484   : > { %v7174_v34 = vpop.xlane.xlu1 %7173 }
 0x485   : > { %v7271_v30 = vadd.f32 %v12630_v42, %v7174_v34 }
 0x486   : > { %v7168_v53 = vpop.xlane.xlu0 %7167 }
 0x487   : > { %7304 = vst.msk [vmem:[%s12635_s16 + $0x10] sm:$0xff] %vm7301_vm8, %v7271_v30  ;;  %v7269_v46 = vadd.f32 %v12630_v42, %v7168_v53 }
 0x488   : > { %v7177_v49 = vpop.xlane.xlu1 %7176 }
 0x489   : > { %7302 = vst.msk [vmem:[%s12635_s16] sm:$0xff] %vm7301_vm8, %v7269_v46  ;;  %v7272_v9 = vadd.f32 %v12630_v42, %v7177_v49 }
 0x48a   : > { %v7171_v55 = vpop.xlane.xlu0 %7170 }
 0x48b   : > { %7305 = vst.msk [vmem:[%s12635_s16 + $0x18] sm:$0xff] %vm7301_vm8, %v7272_v9  ;;  %v7270_v31 = vadd.f32 %v12630_v42, %v7171_v55 }
 0x48d   : > { %7303 = vst.msk [vmem:[%s12635_s16 + $0x8] sm:$0xff] %vm7301_vm8, %v7270_v31 }
 0x48e   : > { %v7186_v36 = vpop.xlane.xlu0 %7185 }
 0x48f   : > { %v7275_v17 = vadd.f32 %v12630_v42, %v7186_v36 }
 0x490   : > { %v7189_v60 = vpop.xlane.xlu1 %7188 }
 0x491   : > { %7308 = vst.msk [vmem:[%s12635_s16 + $0x30] sm:$0xff] %vm7301_vm8, %v7275_v17  ;;  %v7276_v37 = vadd.f32 %v12630_v42, %v7189_v60 }
 0x492   : > { %v7180_v20 = vpop.xlane.xlu0 %7179 }
 0x493   : > { %7309 = vst.msk [vmem:[%s12635_s16 + $0x38] sm:$0xff] %vm7301_vm8, %v7276_v37  ;;  %v7273_v63 = vadd.f32 %v12630_v42, %v7180_v20 }
 0x494   : > { %v7183_v48 = vpop.xlane.xlu1 %7182 }
 0x495   : > { %7306 = vst.msk [vmem:[%s12635_s16 + $0x20] sm:$0xff] %vm7301_vm8, %v7273_v63  ;;  %v7274_v10 = vadd.f32 %v12630_v42, %v7183_v48 }
 0x496   : > { %v7198_v58 = vpop.xlane.xlu0 %7197 }
 0x497   : > { %7307 = vst.msk [vmem:[%s12635_s16 + $0x28] sm:$0xff] %vm7301_vm8, %v7274_v10  ;;  %v7279_v35 = vadd.f32 %v12630_v42, %v7198_v58 }
 0x498   : > { %v7201_v8 = vpop.xlane.xlu1 %7200 }
 0x499   : > { %7312 = vst.msk [vmem:[%s12635_s16 + $0x50] sm:$0xff] %vm7301_vm8, %v7279_v35  ;;  %v7280_v41 = vadd.f32 %v12630_v42, %v7201_v8 }
 0x49a   : > { %v7192_v28 = vpop.xlane.xlu0 %7191 }
 0x49b   : > { %7313 = vst.msk [vmem:[%s12635_s16 + $0x58] sm:$0xff] %vm7301_vm8, %v7280_v41  ;;  %v7277_v5 = vadd.f32 %v12630_v42, %v7192_v28 }
 0x49c   : > { %v7195_v61 = vpop.xlane.xlu1 %7194 }
 0x49d   : > { %7310 = vst.msk [vmem:[%s12635_s16 + $0x40] sm:$0xff] %vm7301_vm8, %v7277_v5  ;;  %v7278_v62 = vadd.f32 %v12630_v42, %v7195_v61 }
 0x49e   : > { %v7210_v40 = vpop.xlane.xlu0 %7209 }
 0x49f   : > { %7311 = vst.msk [vmem:[%s12635_s16 + $0x48] sm:$0xff] %vm7301_vm8, %v7278_v62  ;;  %v7283_v38 = vadd.f32 %v12630_v42, %v7210_v40 }
 0x4a0   : > { %v7213_v29 = vpop.xlane.xlu1 %7212 }
 0x4a1   : > { %7316 = vst.msk [vmem:[%s12635_s16 + $0x70] sm:$0xff] %vm7301_vm8, %v7283_v38  ;;  %v7284_v3 = vadd.f32 %v12630_v42, %v7213_v29 }
 0x4a2   : > { %v7204_v6 = vpop.xlane.xlu0 %7203 }
 0x4a3   : > { %7317 = vst.msk [vmem:[%s12635_s16 + $0x78] sm:$0xff] %vm7301_vm8, %v7284_v3  ;;  %v7281_v32 = vadd.f32 %v12630_v42, %v7204_v6 }
 0x4a4   : > { %v7207_v11 = vpop.xlane.xlu1 %7206 }
 0x4a5   : > { %7314 = vst.msk [vmem:[%s12635_s16 + $0x60] sm:$0xff] %vm7301_vm8, %v7281_v32  ;;  %v7282_v0 = vadd.f32 %v12630_v42, %v7207_v11 }
 0x4a6   : > { %v7222_v51 = vpop.xlane.xlu0 %7221 }
 0x4a7   : > { %7315 = vst.msk [vmem:[%s12635_s16 + $0x68] sm:$0xff] %vm7301_vm8, %v7282_v0  ;;  %v7287_v16 = vadd.f32 %v12630_v42, %v7222_v51 }
 0x4a8   : > { %v7225_v54 = vpop.xlane.xlu1 %7224 }
 0x4a9   : > { %7320 = vst.msk [vmem:[%s12635_s16 + $0x90] sm:$0xff] %vm7301_vm8, %v7287_v16  ;;  %v7288_v39 = vadd.f32 %v12630_v42, %v7225_v54 }
 0x4aa   : > { %v7216_v25 = vpop.xlane.xlu0 %7215 }
 0x4ab   : > { %7321 = vst.msk [vmem:[%s12635_s16 + $0x98] sm:$0xff] %vm7301_vm8, %v7288_v39  ;;  %v7285_v23 = vadd.f32 %v12630_v42, %v7216_v25 }
 0x4ac   : > { %v7219_v43 = vpop.xlane.xlu1 %7218 }
 0x4ad   : > { %7318 = vst.msk [vmem:[%s12635_s16 + $0x80] sm:$0xff] %vm7301_vm8, %v7285_v23  ;;  %v7286_v33 = vadd.f32 %v12630_v42, %v7219_v43 }
 0x4ae   : > { %v7234_v14 = vpop.xlane.xlu0 %7233 }
 0x4af   : > { %7319 = vst.msk [vmem:[%s12635_s16 + $0x88] sm:$0xff] %vm7301_vm8, %v7286_v33  ;;  %v7291_v21 = vadd.f32 %v12630_v42, %v7234_v14 }
 0x4b0   : > { %v7237_v12 = vpop.xlane.xlu1 %7236 }
 0x4b1   : > { %7324 = vst.msk [vmem:[%s12635_s16 + $0xb0] sm:$0xff] %vm7301_vm8, %v7291_v21  ;;  %v7292_v44 = vadd.f32 %v12630_v42, %v7237_v12 }
 0x4b2   : > { %v7228_v26 = vpop.xlane.xlu0 %7227 }
 0x4b3   : > { %7325 = vst.msk [vmem:[%s12635_s16 + $0xb8] sm:$0xff] %vm7301_vm8, %v7292_v44  ;;  %v7289_v52 = vadd.f32 %v12630_v42, %v7228_v26 }
 0x4b4   : > { %v7231_v45 = vpop.xlane.xlu1 %7230 }
 0x4b5   : > { %7322 = vst.msk [vmem:[%s12635_s16 + $0xa0] sm:$0xff] %vm7301_vm8, %v7289_v52  ;;  %v7290_v57 = vadd.f32 %v12630_v42, %v7231_v45 }
 0x4b6   : > { %v7246_v59 = vpop.xlane.xlu0 %7245 }
 0x4b7   : > { %7323 = vst.msk [vmem:[%s12635_s16 + $0xa8] sm:$0xff] %vm7301_vm8, %v7290_v57  ;;  %v7295_v1 = vadd.f32 %v12630_v42, %v7246_v59 }
 0x4b8   : > { %v7249_v13 = vpop.xlane.xlu1 %7248 }
 0x4b9   : > { %7328 = vst.msk [vmem:[%s12635_s16 + $0xd0] sm:$0xff] %vm7301_vm8, %v7295_v1  ;;  %v7296_v22 = vadd.f32 %v12630_v42, %v7249_v13 }
 0x4ba   : > { %v7240_v47 = vpop.xlane.xlu0 %7239 }
 0x4bb   : > { %7329 = vst.msk [vmem:[%s12635_s16 + $0xd8] sm:$0xff] %vm7301_vm8, %v7296_v22  ;;  %v7293_v15 = vadd.f32 %v12630_v42, %v7240_v47 }
 0x4bc   : > { %v7243_v2 = vpop.xlane.xlu1 %7242 }
 0x4bd   : > { %7326 = vst.msk [vmem:[%s12635_s16 + $0xc0] sm:$0xff] %vm7301_vm8, %v7293_v15  ;;  %v7294_v19 = vadd.f32 %v12630_v42, %v7243_v2 }
 0x4be   : > { %v7252_v50 = vpop.xlane.xlu0 %7251 }
 0x4bf   : > { %7327 = vst.msk [vmem:[%s12635_s16 + $0xc8] sm:$0xff] %vm7301_vm8, %v7294_v19  ;;  %v7297_v56 = vadd.f32 %v12630_v42, %v7252_v50 }
 0x4c1   : > { %7330 = vst.msk [vmem:[%s12635_s16 + $0xe0] sm:$0xff] %vm7301_vm8, %v7297_v56  ;;  %v7255_v24 = vpop.xlane.xlu1 %7254 }
 0x4c2   : > { %v7298_v7 = vadd.f32 %v12630_v42, %v7255_v24  ;;  %v7258_v18 = vpop.xlane.xlu0 %7257 }
 0x4c3   : > { %v7299_v4 = vadd.f32 %v12630_v42, %v7258_v18 }
 0x4c4   : > { %7331 = vst.msk [vmem:[%s12635_s16 + $0xe8] sm:$0xff] %vm7301_vm8, %v7298_v7 }
 0x4c5   : > { %7332 = vst.msk [vmem:[%s12635_s16 + $0xf0] sm:$0xff] %vm7301_vm8, %v7299_v4  ;;  %v7261_v27 = vpop.xlane.xlu1 %7260 }
 0x4c6   : > { %v7300_v34 = vadd.f32 %v12630_v42, %v7261_v27 }
 0x4c8   : > { %7333 = vst.msk [vmem:[%s12635_s16 + $0xf8] sm:$0xff] %vm7301_vm8, %v7300_v34 }
 0x4c9 PF: > { %s24_s29 = sadd.s32 1, %s9104_s29  }
 0x4ca   : > { %p21_p2 = scmp.ge.s32.totalorder %s24_s29, 4  }
 0x4cc   :  { %23 = sbr.rel (!%p21_p2) target bundleno = 6 (0x6), region = 107 }
 0x4d1   :  { %7371 = vsyncpa [#allocation5], 1 }
 0x4d2   :  { %7373 = vsyncpa [#allocation5 + $0x1], 1 }
 0x4d3   :  { %7374 = vsyncpa [#allocation7], 1 }
 0x4d4   :  { %7375 = vsyncpa [#allocation10], 1 }

// kernel: forward.3
= control target key start
LH: loop header
LB: loop body
LE: loop exit
PB: predicated region body
PF: predicated region fallthrough
CT: control target
= control target key end

     0   :  { %8 = vsyncpa [#allocation4], 0  ;;  %s7932_s12 = smov 0   ;;  %s8608_s0 = inlined_call_operand.vmem [shape: bf16[2,16384], index: 0, kind: input, shape index: {}]   ;;  %s8609_s1 = inlined_call_operand.vmem [shape: bf16[16384,10], index: 1, kind: input, shape index: {}]   ;;  %s8610_s2 = inlined_call_operand.vmem [shape: f32[1,10], index: 2, kind: input, shape index: {}]   ;;  %s8611_s3 = inlined_call_operand.hbm [shape: f32[2,10], index: 3, kind: output, shape index: {}]  }
   0x1 LB: > { %s7938_s13 = sadd.s32 4294967295, %s7907_s12   ;;  %p6109_p0 = scmp.ge.s32.totalorder %s7907_s12, 1  ;;  %s7907_s12 = sphi %s7932_s12, %s14_s12  }
   0x2   : > { %p144_p1 = scmp.lt.s32.totalorder %s7907_s12, 3 }
   0x4   : > { %p145_p2 = pnand %p6109_p0, %p144_p1 }
   0x5   : > { %s6110_s14 = sshll.u32 (!%p145_p2), %s7938_s13, 6  ;;  %s6111_s15 = sshll.u32 (!%p145_p2), %s7938_s13, 10 }
   0x6   : > { %148 = sbr.rel (%p145_p2) target bundleno = 763 (0x2fb), region = 32  ;;  %p168_p3 = scmp.lt.s32.totalorder (!%p145_p2), %s6110_s14, 127 }
   0x7   : > { %p173_p4 = scmp.lt.s32.totalorder (!%p145_p2), %s6111_s15, 2047  ;;  %p6113_p5 = scmp.ne.s32.totalorder (!%p145_p2), %s7938_s13, 0 }
   0xb   : > { %s8613_s14 = smov (!%p168_p3, %s6110_s14), 127  ;;  %s8615_s15 = smov (!%p173_p4, %s6111_s15), 2047 }
   0xc   : > { %s7947_s18 = scalar_lea.vmem %s8608_s0, %s8613_s14  ;;  %s6112_s19 = sshll.u32 %s8615_s15, 2 }
   0xd   : > { %s7952_s22 = scalar_lea.vmem %s8609_s1, %s6112_s19  ;;  %182 = sbr.rel (%p6113_p5) target bundleno = 20 (0x14), region = 36 }
  0x12   : > { %vm183_vm0 = vcmask 74752   ;;  %v7909_v0 = vmov 0.0  }
  0x13   : > { %184 = vst.msk [vmem:[#allocation2] sm:$0x3] %vm183_vm0, %v7909_v0 }
  0x14 PF: > { %v7353_v1 = vld [vmem:[%s7952_s22 + $0x78] sm:$0xff]   ;;  %v7357_v5 = vld [vmem:[%s7952_s22 + $0x70] sm:$0xff]   ;;  %v7361_v9 = vld [vmem:[%s7952_s22 + $0x68] sm:$0xff]   ;;  %v1230_v29 = vlaneseq  ;;  %v7910_v37 = vmov 1966171168   ;;  %vm6035_vm1 = vcmask 74752  }
  0x15   : > { %v7354_v2 = vld [vmem:[%s7952_s22 + $0xf8] sm:$0xff]   ;;  %6632 = vmatprep.subr.bf16.mxu0 %v7353_v1  ;;  %v7358_v6 = vld [vmem:[%s7952_s22 + $0xf0] sm:$0xff]   ;;  %v7362_v10 = vld [vmem:[%s7952_s22 + $0xe8] sm:$0xff]   ;;  %v1228_v38 = vunpack.c.l.s4 %v7910_v37  ;;  %p6626_p6 = scmp.ne.s32.totalorder %s7938_s13, 1 }
  0x16   : > { %v7355_v3 = vld [vmem:[%s7952_s22 + $0x38] sm:$0xff]   ;;  %6654 = vmatprep.subr.bf16.mxu1 %v7354_v2  ;;  %v7359_v7 = vld [vmem:[%s7952_s22 + $0x30] sm:$0xff]   ;;  %v7363_v11 = vld [vmem:[%s7952_s22 + $0x28] sm:$0xff]   ;;  %v1231_v34 = vshrl.u32 %v1230_v29, 7 }
  0x17   : > { %v7356_v4 = vld [vmem:[%s7952_s22 + $0xb8] sm:$0xff]   ;;  %6633 = vmatpush3.bf16.msra.mxu0 %v7355_v3  ;;  %v7360_v8 = vld [vmem:[%s7952_s22 + $0xb0] sm:$0xff]   ;;  %v7364_v12 = vld [vmem:[%s7952_s22 + $0xa8] sm:$0xff]   ;;  %v1229_v41 = vunpack.c.0.s8 %v1228_v38 }
  0x18   : > { %6655 = vmatpush3.bf16.msra.mxu1 %v7356_v4  ;;  %6634 = vmatprep.subr.bf16.mxu0 %v7357_v5  ;;  %v7365_v13 = vld [vmem:[%s7952_s22 + $0x60] sm:$0xff]   ;;  %v7369_v17 = vld [vmem:[%s7952_s22 + $0x58] sm:$0xff]   ;;  %v7373_v21 = vld [vmem:[%s7952_s22 + $0x50] sm:$0xff]  }
  0x19   : > { %6656 = vmatprep.subr.bf16.mxu1 %v7358_v6  ;;  %v7366_v14 = vld [vmem:[%s7952_s22 + $0xe0] sm:$0xff]   ;;  %v7370_v18 = vld [vmem:[%s7952_s22 + $0xd8] sm:$0xff]   ;;  %v7374_v22 = vld [vmem:[%s7952_s22 + $0xd0] sm:$0xff]   ;;  %v7990_v42 = vsub.s32 %v1229_v41, %v1231_v34 }
  0x1a   : > { %v7367_v15 = vld [vmem:[%s7952_s22 + $0x20] sm:$0xff]   ;;  %v7371_v19 = vld [vmem:[%s7952_s22 + $0x18] sm:$0xff]   ;;  %v7375_v23 = vld [vmem:[%s7952_s22 + $0x10] sm:$0xff]  }
  0x1b   : > { %6635 = vmatpush3.bf16.msra.mxu0 %v7359_v7  ;;  %v7368_v16 = vld [vmem:[%s7952_s22 + $0xa0] sm:$0xff]   ;;  %v7372_v20 = vld [vmem:[%s7952_s22 + $0x98] sm:$0xff]   ;;  %v7376_v24 = vld [vmem:[%s7952_s22 + $0x90] sm:$0xff]  }
  0x1c   : > { %6657 = vmatpush3.bf16.msra.mxu1 %v7360_v8  ;;  %6636 = vmatprep.subr.bf16.mxu0 %v7361_v9  ;;  %v7377_v25 = vld [vmem:[%s7952_s22 + $0x48] sm:$0xff]   ;;  %v7381_v30 = vld [vmem:[%s7952_s22 + $0x40] sm:$0xff]   ;;  %v7386_v36 = vld [vmem:[%s7952_s22 + $0x178] sm:$0xff]  }
  0x1d   : > { %6658 = vmatprep.subr.bf16.mxu1 %v7362_v10  ;;  %v7378_v26 = vld [vmem:[%s7952_s22 + $0xc8] sm:$0xff]   ;;  %v7382_v31 = vld [vmem:[%s7952_s22 + $0xc0] sm:$0xff]   ;;  %v7387_v39 = vld [vmem:[%s7952_s22 + $0x1f8] sm:$0xff]  }
  0x1e   : > { %v7379_v27 = vld [vmem:[%s7952_s22 + $0x8] sm:$0xff]   ;;  %v7383_v32 = vld [vmem:[%s7952_s22] sm:$0xff]   ;;  %v7388_v48 = vld [vmem:[%s7952_s22 + $0x138] sm:$0xff]  }
  0x1f   : > { %6637 = vmatpush3.bf16.msra.mxu0 %v7363_v11  ;;  %v7380_v28 = vld [vmem:[%s7952_s22 + $0x88] sm:$0xff]   ;;  %v7384_v33 = vld [vmem:[%s7952_s22 + $0x80] sm:$0xff]   ;;  %v7389_v50 = vld [vmem:[%s7952_s22 + $0x1b8] sm:$0xff]  }
  0x20   : > { %6659 = vmatpush3.bf16.msra.mxu1 %v7364_v12  ;;  %6638 = vmatprep.subr.bf16.mxu0 %v7365_v13  ;;  %v186_v35 = vld [vmem:[%s7947_s18] sm:$0xff]  ;;  %v7390_v53 = vld [vmem:[%s7952_s22 + $0x170] sm:$0xff]   ;;  %v7394_v59 = vld [vmem:[%s7952_s22 + $0x168] sm:$0xff]  }
  0x21   : > { %6660 = vmatprep.subr.bf16.mxu1 %v7366_v14  ;;  %v1226_v40 = vcombine.high %v186_v35, %v186_v35  ;;  %v1233_v43 = vrot.slane %v186_v35, %v7990_v42  ;;  %v7391_v55 = vld [vmem:[%s7952_s22 + $0x1f0] sm:$0xff]   ;;  %v7395_v60 = vld [vmem:[%s7952_s22 + $0x1e8] sm:$0xff]   ;;  %v7398_v63 = vld [vmem:[%s7952_s22 + $0x160] sm:$0xff]  }
  0x22   : > { %v7392_v56 = vld [vmem:[%s7952_s22 + $0x130] sm:$0xff]   ;;  %v7396_v61 = vld [vmem:[%s7952_s22 + $0x128] sm:$0xff]   ;;  %v7399_v0 = vld [vmem:[%s7952_s22 + $0x1e0] sm:$0xff]  }
  0x23   : > { %6639 = vmatpush3.bf16.msra.mxu0 %v7367_v15  ;;  %v7994_v44 = vrot.slane %v1226_v40, %v7990_v42  ;;  %v1241_v45 = vcombine.high %v1233_v43, %v1233_v43  ;;  %v1249_v46 = vrot.slane %v1233_v43, %v7990_v42  ;;  %v7393_v58 = vld [vmem:[%s7952_s22 + $0x1b0] sm:$0xff]   ;;  %v7397_v62 = vld [vmem:[%s7952_s22 + $0x1a8] sm:$0xff]   ;;  %v7400_v1 = vld [vmem:[%s7952_s22 + $0x120] sm:$0xff]  }
  0x24   : > { %6661 = vmatpush3.bf16.msra.mxu1 %v7368_v16  ;;  %6640 = vmatprep.subr.bf16.mxu0 %v7369_v17  ;;  %v7401_v2 = vld [vmem:[%s7952_s22 + $0x1a0] sm:$0xff]   ;;  %v7402_v3 = vld [vmem:[%s7952_s22 + $0x158] sm:$0xff]   ;;  %v7406_v7 = vld [vmem:[%s7952_s22 + $0x150] sm:$0xff]  }
  0x25   : > { %6662 = vmatprep.subr.bf16.mxu1 %v7370_v18  ;;  %v1242_v47 = vcombine.high %v7994_v44, %v7994_v44  ;;  %v1263_v49 = vrot.slane %v1241_v45, %v7990_v42  ;;  %v1271_v52 = vcombine.high %v1249_v46, %v1249_v46  ;;  %v7403_v4 = vld [vmem:[%s7952_s22 + $0x1d8] sm:$0xff]   ;;  %v7407_v8 = vld [vmem:[%s7952_s22 + $0x1d0] sm:$0xff]   ;;  %v7410_v11 = vld [vmem:[%s7952_s22 + $0x148] sm:$0xff]  }
  0x26   : > { %v7404_v5 = vld [vmem:[%s7952_s22 + $0x118] sm:$0xff]   ;;  %v7408_v9 = vld [vmem:[%s7952_s22 + $0x110] sm:$0xff]   ;;  %v7411_v12 = vld [vmem:[%s7952_s22 + $0x1c8] sm:$0xff]  }
  0x27   : > { %6641 = vmatpush3.bf16.msra.mxu0 %v7371_v19  ;;  %v1270_v51 = vrot.slane %v1242_v47, %v7990_v42  ;;  %4786 = vmatprep.mubr.bf16.mxu0 %v1263_v49  ;;  %v1273_v54 = vcombine.high %v1263_v49, %v1263_v49  ;;  %v7405_v6 = vld [vmem:[%s7952_s22 + $0x198] sm:$0xff]   ;;  %v7409_v10 = vld [vmem:[%s7952_s22 + $0x190] sm:$0xff]   ;;  %v7412_v13 = vld [vmem:[%s7952_s22 + $0x108] sm:$0xff]   ;;  %v1256_v19 = vrot.slane %v7994_v44, %v7990_v42 }
  0x28   : > { %6663 = vmatpush3.bf16.msra.mxu1 %v7372_v20  ;;  %6642 = vmatprep.subr.bf16.mxu0 %v7373_v21  ;;  %v7413_v14 = vld [vmem:[%s7952_s22 + $0x188] sm:$0xff]   ;;  %v7414_v15 = vld [vmem:[%s7952_s22 + $0x140] sm:$0xff]   ;;  %v7418_v20 = vld [vmem:[%s7952_s22 + $0x278] sm:$0xff]  }
  0x29   : > { %6664 = vmatprep.subr.bf16.mxu1 %v7374_v22  ;;  %v1274_v57 = vcombine.high %v1270_v51, %v1270_v51  ;;  %4826 = vmatprep.mubr.bf16.mxu1 %v1273_v54  ;;  %v7415_v16 = vld [vmem:[%s7952_s22 + $0x1c0] sm:$0xff]   ;;  %v7419_v21 = vld [vmem:[%s7952_s22 + $0x2f8] sm:$0xff]   ;;  %v7426_v29 = vld [vmem:[%s7952_s22 + $0x268] sm:$0xff]  }
  0x2a   : > { %v7416_v17 = vld [vmem:[%s7952_s22 + $0x100] sm:$0xff]   ;;  %v7420_v22 = vld [vmem:[%s7952_s22 + $0x238] sm:$0xff]   ;;  %v7438_v41 = vld [vmem:[%s7952_s22 + $0x250] sm:$0xff]  }
  0x2b   : > { %6643 = vmatpush3.bf16.msra.mxu0 %v7375_v23  ;;  %v7417_v18 = vld [vmem:[%s7952_s22 + $0x180] sm:$0xff]   ;;  %v7421_v23 = vld [vmem:[%s7952_s22 + $0x2b8] sm:$0xff]   ;;  %v7439_v43 = vld [vmem:[%s7952_s22 + $0x2d0] sm:$0xff]  }
  0x2c   : > { %6665 = vmatpush3.bf16.msra.mxu1 %v7376_v24  ;;  %6644 = vmatprep.subr.bf16.mxu0 %v7377_v25  ;;  %v1272_v24 = vcombine.high %v1256_v19, %v1256_v19  ;;  %v7422_v25 = vld [vmem:[%s7952_s22 + $0x270] sm:$0xff]   ;;  %v7431_v34 = vld [vmem:[%s7952_s22 + $0x2e0] sm:$0xff]   ;;  %v7434_v37 = vld [vmem:[%s7952_s22 + $0x258] sm:$0xff]  }
  0x2d   : > { %6666 = vmatprep.subr.bf16.mxu1 %v7378_v26  ;;  %v7423_v26 = vld [vmem:[%s7952_s22 + $0x2f0] sm:$0xff]   ;;  %v7432_v35 = vld [vmem:[%s7952_s22 + $0x220] sm:$0xff]   ;;  %v7435_v38 = vld [vmem:[%s7952_s22 + $0x2d8] sm:$0xff]  }
  0x2e   : > { %v7437_v40 = vld [vmem:[%s7952_s22 + $0x298] sm:$0xff]   ;;  %v7440_v44 = vld [vmem:[%s7952_s22 + $0x210] sm:$0xff]   ;;  %v187_v47 = vld [vmem:[%s7947_s18 + $0x8] sm:$0xff] }
  0x2f   : > { %6645 = vmatpush3.bf16.msra.mxu0 %v7379_v27  ;;  %v7424_v27 = vld [vmem:[%s7952_s22 + $0x230] sm:$0xff]   ;;  %v1282_v49 = vrot.slane %v187_v47, %v7990_v42 }
  0x30   : > { %6667 = vmatpush3.bf16.msra.mxu1 %v7380_v28  ;;  %6646 = vmatprep.subr.bf16.mxu0 %v7381_v30  ;;  %v7425_v28 = vld [vmem:[%s7952_s22 + $0x2b0] sm:$0xff]   ;;  %v7427_v30 = vld [vmem:[%s7952_s22 + $0x2e8] sm:$0xff]  }
  0x31   : > { %6668 = vmatprep.subr.bf16.mxu1 %v7382_v31  ;;  %v7428_v31 = vld [vmem:[%s7952_s22 + $0x228] sm:$0xff]   ;;  %v7441_v45 = vld [vmem:[%s7952_s22 + $0x290] sm:$0xff]  }
  0x33   : > { %6647 = vmatpush3.bf16.msra.mxu0 %v7383_v32  ;;  %v7429_v32 = vld [vmem:[%s7952_s22 + $0x2a8] sm:$0xff]  }
  0x34   : > { %6669 = vmatpush3.bf16.msra.mxu1 %v7384_v33  ;;  %6676 = vmatprep.subr.bf16.mxu0 %v7386_v36  ;;  %v7430_v33 = vld [vmem:[%s7952_s22 + $0x260] sm:$0xff]  }
  0x35   : > { %6698 = vmatprep.subr.bf16.mxu1 %v7387_v39  ;;  %v7433_v36 = vld [vmem:[%s7952_s22 + $0x2a0] sm:$0xff]   ;;  %v7436_v39 = vld [vmem:[%s7952_s22 + $0x218] sm:$0xff]  }
  0x36   : > { %4787 = vmatmul.mubr.bf16.vlgmr.msra.gmra.mxu0 %v1249_v46  ;;  %v7442_v46 = vld [vmem:[%s7952_s22 + $0x248] sm:$0xff]  }
  0x37   : > { %6677 = vmatpush3.bf16.msra.mxu0 %v7388_v48  ;;  %4827 = vmatmul.mubr.bf16.vlgmr.msra.gmra.mxu1 %v1271_v52  ;;  %v7443_v48 = vld [vmem:[%s7952_s22 + $0x2c8] sm:$0xff]  }
  0x38   : > { %6678 = vmatprep.subr.bf16.mxu0 %v7390_v53  ;;  %6699 = vmatpush3.bf16.msra.mxu1 %v7389_v50  ;;  %v1275_v50 = vcombine.high %v187_v47, %v187_v47  ;;  %v7445_v52 = vld [vmem:[%s7952_s22 + $0x288] sm:$0xff]   ;;  %v1290_v53 = vcombine.high %v1282_v49, %v1282_v49 }
  0x39   : > { %4866 = vmatprep.mubr.bf16.mxu0 %v1270_v51  ;;  %6700 = vmatprep.subr.bf16.mxu1 %v7391_v55  ;;  %v7444_v51 = vld [vmem:[%s7952_s22 + $0x208] sm:$0xff]   ;;  %v7446_v55 = vld [vmem:[%s7952_s22 + $0x240] sm:$0xff]  }
  0x3a   : > { %4906 = vmatprep.mubr.bf16.mxu1 %v1274_v57  ;;  %v8064_v54 = vrot.slane %v1275_v50, %v7990_v42  ;;  %v1312_v57 = vrot.slane %v1290_v53, %v7990_v42  ;;  %v7493_v47 = vld [vmem:[%s7952_s22 + $0x428] sm:$0xff]   ;;  %v7496_v50 = vld [vmem:[%s7952_s22 + $0x4e0] sm:$0xff]   ;;  %v7499_v53 = vld [vmem:[%s7952_s22 + $0x458] sm:$0xff]  }
  0x3b   : > { %6679 = vmatpush3.bf16.msra.mxu0 %v7392_v56  ;;  %v7447_v56 = vld [vmem:[%s7952_s22 + $0x2c0] sm:$0xff]  }
  0x3c   : > { %6680 = vmatprep.subr.bf16.mxu0 %v7394_v59  ;;  %6701 = vmatpush3.bf16.msra.mxu1 %v7393_v58  ;;  %v1291_v58 = vcombine.high %v8064_v54, %v8064_v54  ;;  %v7448_v59 = vld [vmem:[%s7952_s22 + $0x200] sm:$0xff]  }
  0x3d   : > { %6702 = vmatprep.subr.bf16.mxu1 %v7395_v60  ;;  %v7449_v60 = vld [vmem:[%s7952_s22 + $0x280] sm:$0xff]  }
  0x3f   : > { %6681 = vmatpush3.bf16.msra.mxu0 %v7396_v61  ;;  %v1322_v61 = vcombine.high %v1312_v57, %v1312_v57 }
  0x40   : > { %6682 = vmatprep.subr.bf16.mxu0 %v7398_v63  ;;  %6703 = vmatpush3.bf16.msra.mxu1 %v7397_v62  ;;  %v1298_v62 = vrot.slane %v1282_v49, %v7990_v42  ;;  %v7450_v63 = vld [vmem:[%s7952_s22 + $0x378] sm:$0xff]   ;;  %v7495_v49 = vld [vmem:[%s7952_s22 + $0x460] sm:$0xff]  }
  0x41   : > { %6704 = vmatprep.subr.bf16.mxu1 %v7399_v0  ;;  %v7451_v0 = vld [vmem:[%s7952_s22 + $0x3f8] sm:$0xff]  }
  0x43   : > { %6683 = vmatpush3.bf16.msra.mxu0 %v7400_v1  ;;  %v1319_v1 = vrot.slane %v1291_v58, %v7990_v42  ;;  %v7504_v58 = vld [vmem:[%s7952_s22 + $0x4d0] sm:$0xff]  }
  0x44   : > { %6684 = vmatprep.subr.bf16.mxu0 %v7402_v3  ;;  %6705 = vmatpush3.bf16.msra.mxu1 %v7401_v2  ;;  %v7452_v2 = vld [vmem:[%s7952_s22 + $0x338] sm:$0xff]  }
  0x45   : > { %6706 = vmatprep.subr.bf16.mxu1 %v7403_v4  ;;  %v7453_v3 = vld [vmem:[%s7952_s22 + $0x3b8] sm:$0xff]   ;;  %v1320_v4 = vcombine.high %v1298_v62, %v1298_v62 }
  0x47   : > { %6685 = vmatpush3.bf16.msra.mxu0 %v7404_v5  ;;  %v7454_v5 = vld [vmem:[%s7952_s22 + $0x370] sm:$0xff]  }
  0x48   : > { %6686 = vmatprep.subr.bf16.mxu0 %v7406_v7  ;;  %6707 = vmatpush3.bf16.msra.mxu1 %v7405_v6  ;;  %v7455_v6 = vld [vmem:[%s7952_s22 + $0x3f0] sm:$0xff]   ;;  %v1323_v7 = vcombine.high %v1319_v1, %v1319_v1 }
  0x49   : > { %6708 = vmatprep.subr.bf16.mxu1 %v7407_v8  ;;  %v7456_v8 = vld [vmem:[%s7952_s22 + $0x330] sm:$0xff]  }
  0x4b   : > { %6687 = vmatpush3.bf16.msra.mxu0 %v7408_v9  ;;  %v7457_v9 = vld [vmem:[%s7952_s22 + $0x3b0] sm:$0xff]  }
  0x4c   : > { %6688 = vmatprep.subr.bf16.mxu0 %v7410_v11  ;;  %6709 = vmatpush3.bf16.msra.mxu1 %v7409_v10  ;;  %v7458_v10 = vld [vmem:[%s7952_s22 + $0x368] sm:$0xff]  }
  0x4d   : > { %6710 = vmatprep.subr.bf16.mxu1 %v7411_v12  ;;  %v7459_v11 = vld [vmem:[%s7952_s22 + $0x3e8] sm:$0xff]  }
  0x4e   : > { %v7460_v12 = vld [vmem:[%s7952_s22 + $0x328] sm:$0xff]  }
  0x4f   : > { %6689 = vmatpush3.bf16.msra.mxu0 %v7412_v13  ;;  %v7461_v13 = vld [vmem:[%s7952_s22 + $0x3a8] sm:$0xff]  }
  0x50   : > { %6690 = vmatprep.subr.bf16.mxu0 %v7414_v15  ;;  %6711 = vmatpush3.bf16.msra.mxu1 %v7413_v14  ;;  %v7462_v14 = vld [vmem:[%s7952_s22 + $0x360] sm:$0xff]  }
  0x51   : > { %6712 = vmatprep.subr.bf16.mxu1 %v7415_v16  ;;  %v7463_v15 = vld [vmem:[%s7952_s22 + $0x3e0] sm:$0xff]  }
  0x52   : > { %v7464_v16 = vld [vmem:[%s7952_s22 + $0x320] sm:$0xff]  }
  0x53   : > { %6691 = vmatpush3.bf16.msra.mxu0 %v7416_v17  ;;  %v7465_v17 = vld [vmem:[%s7952_s22 + $0x3a0] sm:$0xff]  }
  0x54   : > { %6720 = vmatprep.subr.bf16.mxu0 %v7418_v20  ;;  %6713 = vmatpush3.bf16.msra.mxu1 %v7417_v18  ;;  %v7466_v18 = vld [vmem:[%s7952_s22 + $0x358] sm:$0xff]  }
  0x55   : > { %6742 = vmatprep.subr.bf16.mxu1 %v7419_v21  ;;  %v7468_v20 = vld [vmem:[%s7952_s22 + $0x318] sm:$0xff]  }
  0x56   : > { %4867 = vmatmul.mubr.bf16.vlgmr.msra.gmra.mxu0 %v1256_v19  ;;  %v7467_v19 = vld [vmem:[%s7952_s22 + $0x3d8] sm:$0xff]  }
  0x57   : > { %6721 = vmatpush3.bf16.msra.mxu0 %v7420_v22  ;;  %4907 = vmatmul.mubr.bf16.vlgmr.msra.gmra.mxu1 %v1272_v24  ;;  %v7469_v21 = vld [vmem:[%s7952_s22 + $0x398] sm:$0xff]   ;;  %v7470_v22 = vld [vmem:[%s7952_s22 + $0x350] sm:$0xff]  }
  0x58   : > { %6722 = vmatprep.subr.bf16.mxu0 %v7422_v25  ;;  %6743 = vmatpush3.bf16.msra.mxu1 %v7421_v23  ;;  %v7471_v23 = vld [vmem:[%s7952_s22 + $0x3d0] sm:$0xff]  }
  0x59   : > { %6744 = vmatprep.subr.bf16.mxu1 %v7423_v26  ;;  %4946 = vmatprep.mubr.bf16.mxu0 %v1312_v57  ;;  %v7472_v24 = vld [vmem:[%s7952_s22 + $0x310] sm:$0xff]   ;;  %v7474_v26 = vld [vmem:[%s7952_s22 + $0x348] sm:$0xff]  }
  0x5a   : > { %4986 = vmatprep.mubr.bf16.mxu1 %v1322_v61  ;;  %v7473_v25 = vld [vmem:[%s7952_s22 + $0x390] sm:$0xff]   ;;  %v7507_v61 = vld [vmem:[%s7952_s22 + $0x448] sm:$0xff]  }
  0x5b   : > { %6723 = vmatpush3.bf16.msra.mxu0 %v7424_v27  ;;  %v7475_v27 = vld [vmem:[%s7952_s22 + $0x3c8] sm:$0xff]   ;;  %v7503_v57 = vld [vmem:[%s7952_s22 + $0x450] sm:$0xff]  }
  0x5c   : > { %6724 = vmatprep.subr.bf16.mxu0 %v7426_v29  ;;  %6745 = vmatpush3.bf16.msra.mxu1 %v7425_v28  ;;  %v7476_v28 = vld [vmem:[%s7952_s22 + $0x308] sm:$0xff]  }
  0x5d   : > { %6746 = vmatprep.subr.bf16.mxu1 %v7427_v30  ;;  %v7477_v29 = vld [vmem:[%s7952_s22 + $0x388] sm:$0xff]   ;;  %v7478_v30 = vld [vmem:[%s7952_s22 + $0x340] sm:$0xff]  }
  0x5f   : > { %6725 = vmatpush3.bf16.msra.mxu0 %v7428_v31  ;;  %v7479_v31 = vld [vmem:[%s7952_s22 + $0x3c0] sm:$0xff]  }
  0x60   : > { %6726 = vmatprep.subr.bf16.mxu0 %v7430_v33  ;;  %6747 = vmatpush3.bf16.msra.mxu1 %v7429_v32  ;;  %v7480_v32 = vld [vmem:[%s7952_s22 + $0x300] sm:$0xff]  }
  0x61   : > { %6748 = vmatprep.subr.bf16.mxu1 %v7431_v34  ;;  %v7481_v33 = vld [vmem:[%s7952_s22 + $0x380] sm:$0xff]   ;;  %v1305_v34 = vrot.slane %v8064_v54, %v7990_v42  ;;  %v7500_v54 = vld [vmem:[%s7952_s22 + $0x4d8] sm:$0xff]  }
  0x63   : > { %6727 = vmatpush3.bf16.msra.mxu0 %v7432_v35  ;;  %v7483_v35 = vld [vmem:[%s7952_s22 + $0x478] sm:$0xff]  }
  0x64   : > { %6728 = vmatprep.subr.bf16.mxu0 %v7434_v37  ;;  %6749 = vmatpush3.bf16.msra.mxu1 %v7433_v36  ;;  %v7484_v36 = vld [vmem:[%s7952_s22 + $0x4f8] sm:$0xff]  }
  0x65   : > { %6750 = vmatprep.subr.bf16.mxu1 %v7435_v38  ;;  %v7485_v37 = vld [vmem:[%s7952_s22 + $0x438] sm:$0xff]  }
  0x66   : > { %v7486_v38 = vld [vmem:[%s7952_s22 + $0x4b8] sm:$0xff]  }
  0x67   : > { %6729 = vmatpush3.bf16.msra.mxu0 %v7436_v39  ;;  %v1321_v39 = vcombine.high %v1305_v34, %v1305_v34 }
  0x68   : > { %6730 = vmatprep.subr.bf16.mxu0 %v7438_v41  ;;  %6751 = vmatpush3.bf16.msra.mxu1 %v7437_v40  ;;  %v7487_v40 = vld [vmem:[%s7952_s22 + $0x470] sm:$0xff]  }
  0x69   : > { %6752 = vmatprep.subr.bf16.mxu1 %v7439_v43  ;;  %v7488_v41 = vld [vmem:[%s7952_s22 + $0x4f0] sm:$0xff]  }
  0x6a   : > { %v7489_v43 = vld [vmem:[%s7952_s22 + $0x430] sm:$0xff]  }
  0x6b   : > { %6731 = vmatpush3.bf16.msra.mxu0 %v7440_v44  ;;  %v7490_v44 = vld [vmem:[%s7952_s22 + $0x4b0] sm:$0xff]  }
  0x6c   : > { %6732 = vmatprep.subr.bf16.mxu0 %v7442_v46  ;;  %6753 = vmatpush3.bf16.msra.mxu1 %v7441_v45  ;;  %v7491_v45 = vld [vmem:[%s7952_s22 + $0x468] sm:$0xff]  }
  0x6d   : > { %6754 = vmatprep.subr.bf16.mxu1 %v7443_v48  ;;  %v7492_v46 = vld [vmem:[%s7952_s22 + $0x4e8] sm:$0xff]  }
  0x6e   : > { %v7494_v48 = vld [vmem:[%s7952_s22 + $0x4a8] sm:$0xff]  }
  0x6f   : > { %6733 = vmatpush3.bf16.msra.mxu0 %v7444_v51  ;;  %v7497_v51 = vld [vmem:[%s7952_s22 + $0x420] sm:$0xff]  }
  0x70   : > { %6734 = vmatprep.subr.bf16.mxu0 %v7446_v55  ;;  %6755 = vmatpush3.bf16.msra.mxu1 %v7445_v52  ;;  %v7498_v52 = vld [vmem:[%s7952_s22 + $0x4a0] sm:$0xff]   ;;  %v7501_v55 = vld [vmem:[%s7952_s22 + $0x418] sm:$0xff]  }
  0x71   : > { %6756 = vmatprep.subr.bf16.mxu1 %v7447_v56  ;;  %v7502_v56 = vld [vmem:[%s7952_s22 + $0x498] sm:$0xff]  }
  0x73   : > { %6735 = vmatpush3.bf16.msra.mxu0 %v7448_v59  ;;  %v7505_v59 = vld [vmem:[%s7952_s22 + $0x410] sm:$0xff]  }
  0x74   : > { %6764 = vmatprep.subr.bf16.mxu0 %v7450_v63  ;;  %6757 = vmatpush3.bf16.msra.mxu1 %v7449_v60  ;;  %v7506_v60 = vld [vmem:[%s7952_s22 + $0x490] sm:$0xff]   ;;  %v7508_v63 = vld [vmem:[%s7952_s22 + $0x4c8] sm:$0xff]  }
  0x75   : > { %6786 = vmatprep.subr.bf16.mxu1 %v7451_v0 }
  0x76   : > { %4947 = vmatmul.mubr.bf16.vlgmr.msra.gmra.mxu0 %v1298_v62  ;;  %v188_v62 = vld [vmem:[%s7947_s18 + $0x10] sm:$0xff] }
  0x77   : > { %6765 = vmatpush3.bf16.msra.mxu0 %v7452_v2  ;;  %5026 = vmatprep.mubr.bf16.mxu0 %v1319_v1  ;;  %v1331_v0 = vrot.slane %v188_v62, %v7990_v42  ;;  %v1324_v1 = vcombine.high %v188_v62, %v188_v62  ;;  %v7509_v2 = vld [vmem:[%s7952_s22 + $0x408] sm:$0xff]  }
  0x78   : > { %4987 = vmatmul.mubr.bf16.vlgmr.msra.gmra.mxu1 %v1320_v4  ;;  %6766 = vmatprep.subr.bf16.mxu0 %v7454_v5  ;;  %v7558_v62 = vld [vmem:[%s7952_s22 + $0x628] sm:$0xff]  }
  0x79   : > { %6787 = vmatpush3.bf16.msra.mxu1 %v7453_v3  ;;  %5066 = vmatprep.mubr.bf16.mxu1 %v1323_v7  ;;  %v7510_v3 = vld [vmem:[%s7952_s22 + $0x488] sm:$0xff]   ;;  %v1339_v4 = vcombine.high %v1331_v0, %v1331_v0  ;;  %v8140_v5 = vrot.slane %v1324_v1, %v7990_v42  ;;  %v7512_v7 = vld [vmem:[%s7952_s22 + $0x4c0] sm:$0xff]  }
  0x7a   : > { %6788 = vmatprep.subr.bf16.mxu1 %v7455_v6  ;;  %v7511_v6 = vld [vmem:[%s7952_s22 + $0x440] sm:$0xff]  }
  0x7b   : > { %6767 = vmatpush3.bf16.msra.mxu0 %v7456_v8  ;;  %v1361_v8 = vrot.slane %v1339_v4, %v7990_v42  ;;  %v7561_v1 = vld [vmem:[%s7952_s22 + $0x6e0] sm:$0xff]   ;;  %v7564_v4 = vld [vmem:[%s7952_s22 + $0x658] sm:$0xff]  }
  0x7c   : > { %6768 = vmatprep.subr.bf16.mxu0 %v7458_v10  ;;  %v7513_v10 = vld [vmem:[%s7952_s22 + $0x400] sm:$0xff]  }
  0x7d   : > { %6789 = vmatpush3.bf16.msra.mxu1 %v7457_v9  ;;  %v1340_v9 = vcombine.high %v8140_v5, %v8140_v5 }
  0x7e   : > { %6790 = vmatprep.subr.bf16.mxu1 %v7459_v11  ;;  %v7514_v11 = vld [vmem:[%s7952_s22 + $0x480] sm:$0xff]  }
  0x7f   : > { %6769 = vmatpush3.bf16.msra.mxu0 %v7460_v12  ;;  %v1371_v12 = vcombine.high %v1361_v8, %v1361_v8 }
  0x80   : > { %6770 = vmatprep.subr.bf16.mxu0 %v7462_v14  ;;  %v7515_v14 = vld [vmem:[%s7952_s22 + $0x578] sm:$0xff]  }
  0x81   : > { %6791 = vmatpush3.bf16.msra.mxu1 %v7461_v13  ;;  %v1347_v13 = vrot.slane %v1331_v0, %v7990_v42  ;;  %v7560_v0 = vld [vmem:[%s7952_s22 + $0x660] sm:$0xff]  }
  0x82   : > { %6792 = vmatprep.subr.bf16.mxu1 %v7463_v15  ;;  %v7516_v15 = vld [vmem:[%s7952_s22 + $0x5f8] sm:$0xff]  }
  0x83   : > { %6771 = vmatpush3.bf16.msra.mxu0 %v7464_v16  ;;  %v1368_v16 = vrot.slane %v1340_v9, %v7990_v42  ;;  %v7569_v9 = vld [vmem:[%s7952_s22 + $0x6d0] sm:$0xff]  }
  0x84   : > { %6772 = vmatprep.subr.bf16.mxu0 %v7466_v18  ;;  %v7518_v18 = vld [vmem:[%s7952_s22 + $0x5b8] sm:$0xff]  }
  0x85   : > { %6793 = vmatpush3.bf16.msra.mxu1 %v7465_v17  ;;  %v7517_v17 = vld [vmem:[%s7952_s22 + $0x538] sm:$0xff]  }
  0x86   : > { %6794 = vmatprep.subr.bf16.mxu1 %v7467_v19  ;;  %v1369_v19 = vcombine.high %v1347_v13, %v1347_v13 }
  0x87   : > { %6773 = vmatpush3.bf16.msra.mxu0 %v7468_v20  ;;  %v7519_v20 = vld [vmem:[%s7952_s22 + $0x570] sm:$0xff]  }
  0x88   : > { %6774 = vmatprep.subr.bf16.mxu0 %v7470_v22  ;;  %v1372_v22 = vcombine.high %v1368_v16, %v1368_v16 }
  0x89   : > { %6795 = vmatpush3.bf16.msra.mxu1 %v7469_v21  ;;  %v7520_v21 = vld [vmem:[%s7952_s22 + $0x5f0] sm:$0xff]  }
  0x8a   : > { %6796 = vmatprep.subr.bf16.mxu1 %v7471_v23  ;;  %v7521_v23 = vld [vmem:[%s7952_s22 + $0x530] sm:$0xff]  }
  0x8b   : > { %6775 = vmatpush3.bf16.msra.mxu0 %v7472_v24  ;;  %v7522_v24 = vld [vmem:[%s7952_s22 + $0x5b0] sm:$0xff]  }
  0x8c   : > { %6776 = vmatprep.subr.bf16.mxu0 %v7474_v26  ;;  %v7524_v26 = vld [vmem:[%s7952_s22 + $0x5e8] sm:$0xff]  }
  0x8d   : > { %6797 = vmatpush3.bf16.msra.mxu1 %v7473_v25  ;;  %v7523_v25 = vld [vmem:[%s7952_s22 + $0x568] sm:$0xff]  }
  0x8e   : > { %6798 = vmatprep.subr.bf16.mxu1 %v7475_v27  ;;  %v7525_v27 = vld [vmem:[%s7952_s22 + $0x528] sm:$0xff]  }
  0x8f   : > { %6777 = vmatpush3.bf16.msra.mxu0 %v7476_v28  ;;  %v7526_v28 = vld [vmem:[%s7952_s22 + $0x5a8] sm:$0xff]  }
  0x90   : > { %6778 = vmatprep.subr.bf16.mxu0 %v7478_v30  ;;  %v7528_v30 = vld [vmem:[%s7952_s22 + $0x5e0] sm:$0xff]  }
  0x91   : > { %6799 = vmatpush3.bf16.msra.mxu1 %v7477_v29  ;;  %v7527_v29 = vld [vmem:[%s7952_s22 + $0x560] sm:$0xff]  }
  0x92   : > { %6800 = vmatprep.subr.bf16.mxu1 %v7479_v31  ;;  %v7529_v31 = vld [vmem:[%s7952_s22 + $0x520] sm:$0xff]  }
  0x93   : > { %6779 = vmatpush3.bf16.msra.mxu0 %v7480_v32  ;;  %v7530_v32 = vld [vmem:[%s7952_s22 + $0x5a0] sm:$0xff]  }
  0x94   : > { %6808 = vmatprep.subr.bf16.mxu0 %v7483_v35  ;;  %v7533_v35 = vld [vmem:[%s7952_s22 + $0x518] sm:$0xff]  }
  0x95   : > { %6801 = vmatpush3.bf16.msra.mxu1 %v7481_v33  ;;  %v7531_v33 = vld [vmem:[%s7952_s22 + $0x558] sm:$0xff]  }
  0x96   : > { %5027 = vmatmul.mubr.bf16.vlgmr.msra.gmra.mxu0 %v1305_v34  ;;  %6830 = vmatprep.subr.bf16.mxu1 %v7484_v36  ;;  %v7532_v34 = vld [vmem:[%s7952_s22 + $0x5d8] sm:$0xff]  }
  0x97   : > { %6809 = vmatpush3.bf16.msra.mxu0 %v7485_v37  ;;  %5106 = vmatprep.mubr.bf16.mxu0 %v1361_v8  ;;  %v7534_v36 = vld [vmem:[%s7952_s22 + $0x598] sm:$0xff]   ;;  %v7535_v37 = vld [vmem:[%s7952_s22 + $0x550] sm:$0xff]  }
  0x98   : > { %5067 = vmatmul.mubr.bf16.vlgmr.msra.gmra.mxu1 %v1321_v39  ;;  %6810 = vmatprep.subr.bf16.mxu0 %v7487_v40  ;;  %v7537_v39 = vld [vmem:[%s7952_s22 + $0x510] sm:$0xff]  }
  0x99   : > { %6831 = vmatpush3.bf16.msra.mxu1 %v7486_v38  ;;  %5146 = vmatprep.mubr.bf16.mxu1 %v1371_v12  ;;  %v7536_v38 = vld [vmem:[%s7952_s22 + $0x5d0] sm:$0xff]   ;;  %v7572_v12 = vld [vmem:[%s7952_s22 + $0x648] sm:$0xff]  }
  0x9a   : > { %6832 = vmatprep.subr.bf16.mxu1 %v7488_v41  ;;  %v7538_v40 = vld [vmem:[%s7952_s22 + $0x590] sm:$0xff]   ;;  %v7539_v41 = vld [vmem:[%s7952_s22 + $0x548] sm:$0xff]  }
  0x9b   : > { %6811 = vmatpush3.bf16.msra.mxu0 %v7489_v43  ;;  %v7540_v43 = vld [vmem:[%s7952_s22 + $0x5c8] sm:$0xff]   ;;  %v7568_v8 = vld [vmem:[%s7952_s22 + $0x650] sm:$0xff]  }
  0x9c   : > { %6812 = vmatprep.subr.bf16.mxu0 %v7491_v45  ;;  %v7542_v45 = vld [vmem:[%s7952_s22 + $0x588] sm:$0xff]  }
  0x9d   : > { %6833 = vmatpush3.bf16.msra.mxu1 %v7490_v44  ;;  %v7541_v44 = vld [vmem:[%s7952_s22 + $0x508] sm:$0xff]  }
  0x9e   : > { %6834 = vmatprep.subr.bf16.mxu1 %v7492_v46  ;;  %v7543_v46 = vld [vmem:[%s7952_s22 + $0x540] sm:$0xff]  }
  0x9f   : > { %6813 = vmatpush3.bf16.msra.mxu0 %v7493_v47  ;;  %v7544_v47 = vld [vmem:[%s7952_s22 + $0x5c0] sm:$0xff]  }
  0xa0   : > { %6814 = vmatprep.subr.bf16.mxu0 %v7495_v49  ;;  %v7546_v49 = vld [vmem:[%s7952_s22 + $0x580] sm:$0xff]  }
  0xa1   : > { %6835 = vmatpush3.bf16.msra.mxu1 %v7494_v48  ;;  %v7545_v48 = vld [vmem:[%s7952_s22 + $0x500] sm:$0xff]  }
  0xa2   : > { %6836 = vmatprep.subr.bf16.mxu1 %v7496_v50  ;;  %v1354_v50 = vrot.slane %v8140_v5, %v7990_v42  ;;  %v7565_v5 = vld [vmem:[%s7952_s22 + $0x6d8] sm:$0xff]  }
  0xa3   : > { %6815 = vmatpush3.bf16.msra.mxu0 %v7497_v51  ;;  %v7548_v51 = vld [vmem:[%s7952_s22 + $0x678] sm:$0xff]  }
  0xa4   : > { %6816 = vmatprep.subr.bf16.mxu0 %v7499_v53  ;;  %v7550_v53 = vld [vmem:[%s7952_s22 + $0x638] sm:$0xff]  }
  0xa5   : > { %6837 = vmatpush3.bf16.msra.mxu1 %v7498_v52  ;;  %v7549_v52 = vld [vmem:[%s7952_s22 + $0x6f8] sm:$0xff]  }
  0xa6   : > { %6838 = vmatprep.subr.bf16.mxu1 %v7500_v54  ;;  %v7551_v54 = vld [vmem:[%s7952_s22 + $0x6b8] sm:$0xff]  }
  0xa7   : > { %6817 = vmatpush3.bf16.msra.mxu0 %v7501_v55  ;;  %v1370_v55 = vcombine.high %v1354_v50, %v1354_v50 }
  0xa8   : > { %6818 = vmatprep.subr.bf16.mxu0 %v7503_v57  ;;  %v7553_v57 = vld [vmem:[%s7952_s22 + $0x6f0] sm:$0xff]  }
  0xa9   : > { %6839 = vmatpush3.bf16.msra.mxu1 %v7502_v56  ;;  %v7552_v56 = vld [vmem:[%s7952_s22 + $0x670] sm:$0xff]  }
  0xaa   : > { %6840 = vmatprep.subr.bf16.mxu1 %v7504_v58  ;;  %v7554_v58 = vld [vmem:[%s7952_s22 + $0x630] sm:$0xff]  }
  0xab   : > { %6819 = vmatpush3.bf16.msra.mxu0 %v7505_v59  ;;  %v7555_v59 = vld [vmem:[%s7952_s22 + $0x6b0] sm:$0xff]  }
  0xac   : > { %6820 = vmatprep.subr.bf16.mxu0 %v7507_v61  ;;  %v7557_v61 = vld [vmem:[%s7952_s22 + $0x6e8] sm:$0xff]  }
  0xad   : > { %6841 = vmatpush3.bf16.msra.mxu1 %v7506_v60  ;;  %v7556_v60 = vld [vmem:[%s7952_s22 + $0x668] sm:$0xff]  }
  0xae   : > { %6842 = vmatprep.subr.bf16.mxu1 %v7508_v63  ;;  %v7559_v63 = vld [vmem:[%s7952_s22 + $0x6a8] sm:$0xff]  }
  0xaf   : > { %6821 = vmatpush3.bf16.msra.mxu0 %v7509_v2  ;;  %v7562_v2 = vld [vmem:[%s7952_s22 + $0x620] sm:$0xff]  }
  0xb0   : > { %6822 = vmatprep.subr.bf16.mxu0 %v7511_v6  ;;  %v7566_v6 = vld [vmem:[%s7952_s22 + $0x618] sm:$0xff]  }
  0xb1   : > { %6843 = vmatpush3.bf16.msra.mxu1 %v7510_v3  ;;  %v7563_v3 = vld [vmem:[%s7952_s22 + $0x6a0] sm:$0xff]  }
  0xb2   : > { %6844 = vmatprep.subr.bf16.mxu1 %v7512_v7  ;;  %v7567_v7 = vld [vmem:[%s7952_s22 + $0x698] sm:$0xff]  }
  0xb3   : > { %6823 = vmatpush3.bf16.msra.mxu0 %v7513_v10  ;;  %v7570_v10 = vld [vmem:[%s7952_s22 + $0x610] sm:$0xff]  }
  0xb4   : > { %6852 = vmatprep.subr.bf16.mxu0 %v7515_v14  ;;  %v189_v14 = vld [vmem:[%s7947_s18 + $0x18] sm:$0xff] }
  0xb5   : > { %6845 = vmatpush3.bf16.msra.mxu1 %v7514_v11  ;;  %v7571_v11 = vld [vmem:[%s7952_s22 + $0x690] sm:$0xff]  }
  0xb6   : > { %5107 = vmatmul.mubr.bf16.vlgmr.msra.gmra.mxu0 %v1347_v13  ;;  %6874 = vmatprep.subr.bf16.mxu1 %v7516_v15  ;;  %v7573_v13 = vld [vmem:[%s7952_s22 + $0x6c8] sm:$0xff]  }
  0xb7   : > { %6853 = vmatpush3.bf16.msra.mxu0 %v7517_v17  ;;  %5186 = vmatprep.mubr.bf16.mxu0 %v1368_v16  ;;  %v7574_v15 = vld [vmem:[%s7952_s22 + $0x608] sm:$0xff]   ;;  %v1380_v16 = vrot.slane %v189_v14, %v7990_v42  ;;  %v1373_v17 = vcombine.high %v189_v14, %v189_v14  ;;  %v7614_v14 = vld [vmem:[%s7952_s22 + $0x8f8] sm:$0xff]  }
  0xb8   : > { %5147 = vmatmul.mubr.bf16.vlgmr.msra.gmra.mxu1 %v1369_v19  ;;  %6854 = vmatprep.subr.bf16.mxu0 %v7519_v20  ;;  %v7576_v19 = vld [vmem:[%s7952_s22 + $0x640] sm:$0xff]  }
  0xb9   : > { %6875 = vmatpush3.bf16.msra.mxu1 %v7518_v18  ;;  %5226 = vmatprep.mubr.bf16.mxu1 %v1372_v22  ;;  %v7575_v18 = vld [vmem:[%s7952_s22 + $0x688] sm:$0xff]   ;;  %v1388_v20 = vcombine.high %v1380_v16, %v1380_v16  ;;  %v7577_v22 = vld [vmem:[%s7952_s22 + $0x6c0] sm:$0xff]  }
  0xba   : > { %6876 = vmatprep.subr.bf16.mxu1 %v7520_v21  ;;  %v8217_v21 = vrot.slane %v1373_v17, %v7990_v42 }
  0xbb   : > { %6855 = vmatpush3.bf16.msra.mxu0 %v7521_v23  ;;  %v7578_v23 = vld [vmem:[%s7952_s22 + $0x600] sm:$0xff]  }
  0xbc   : > { %6856 = vmatprep.subr.bf16.mxu0 %v7523_v25  ;;  %v1389_v25 = vcombine.high %v8217_v21, %v8217_v21 }
  0xbd   : > { %6877 = vmatpush3.bf16.msra.mxu1 %v7522_v24  ;;  %v1410_v24 = vrot.slane %v1388_v20, %v7990_v42 }
  0xbe   : > { %6878 = vmatprep.subr.bf16.mxu1 %v7524_v26  ;;  %v7579_v26 = vld [vmem:[%s7952_s22 + $0x680] sm:$0xff]  }
  0xbf   : > { %6857 = vmatpush3.bf16.msra.mxu0 %v7525_v27  ;;  %v1420_v27 = vcombine.high %v1410_v24, %v1410_v24 }
  0xc0   : > { %6858 = vmatprep.subr.bf16.mxu0 %v7527_v29  ;;  %v7580_v29 = vld [vmem:[%s7952_s22 + $0x778] sm:$0xff]  }
  0xc1   : > { %6879 = vmatpush3.bf16.msra.mxu1 %v7526_v28  ;;  %v1396_v28 = vrot.slane %v1380_v16, %v7990_v42  ;;  %v7616_v16 = vld [vmem:[%s7952_s22 + $0x8b8] sm:$0xff]  }
  0xc2   : > { %6880 = vmatprep.subr.bf16.mxu1 %v7528_v30  ;;  %v7581_v30 = vld [vmem:[%s7952_s22 + $0x7f8] sm:$0xff]  }
  0xc3   : > { %6859 = vmatpush3.bf16.msra.mxu0 %v7529_v31  ;;  %v1417_v31 = vrot.slane %v1389_v25, %v7990_v42  ;;  %v7621_v25 = vld [vmem:[%s7952_s22 + $0x868] sm:$0xff]  }
  0xc4   : > { %6860 = vmatprep.subr.bf16.mxu0 %v7531_v33  ;;  %v7583_v33 = vld [vmem:[%s7952_s22 + $0x7b8] sm:$0xff]  }
  0xc5   : > { %6881 = vmatpush3.bf16.msra.mxu1 %v7530_v32  ;;  %v7582_v32 = vld [vmem:[%s7952_s22 + $0x738] sm:$0xff]  }
  0xc6   : > { %6882 = vmatprep.subr.bf16.mxu1 %v7532_v34  ;;  %v1418_v34 = vcombine.high %v1396_v28, %v1396_v28 }
  0xc7   : > { %6861 = vmatpush3.bf16.msra.mxu0 %v7533_v35  ;;  %v7584_v35 = vld [vmem:[%s7952_s22 + $0x770] sm:$0xff]  }
  0xc8   : > { %6862 = vmatprep.subr.bf16.mxu0 %v7535_v37  ;;  %v1421_v37 = vcombine.high %v1417_v31, %v1417_v31 }
  0xc9   : > { %6883 = vmatpush3.bf16.msra.mxu1 %v7534_v36  ;;  %v7585_v36 = vld [vmem:[%s7952_s22 + $0x7f0] sm:$0xff]  }
  0xca   : > { %6884 = vmatprep.subr.bf16.mxu1 %v7536_v38 }
  0xcb   : > { %6863 = vmatpush3.bf16.msra.mxu0 %v7537_v39  ;;  %v7586_v39 = vld [vmem:[%s7952_s22 + $0x730] sm:$0xff]  }
  0xcc   : > { %6864 = vmatprep.subr.bf16.mxu0 %v7539_v41 }
  0xcd   : > { %6885 = vmatpush3.bf16.msra.mxu1 %v7538_v40  ;;  %v7587_v40 = vld [vmem:[%s7952_s22 + $0x7b0] sm:$0xff]  }
  0xce   : > { %6886 = vmatprep.subr.bf16.mxu1 %v7540_v43 }
  0xcf   : > { %6865 = vmatpush3.bf16.msra.mxu0 %v7541_v44  ;;  %v7588_v44 = vld [vmem:[%s7952_s22 + $0x768] sm:$0xff]  }
  0xd0   : > { %6866 = vmatprep.subr.bf16.mxu0 %v7543_v46  ;;  %v7589_v46 = vld [vmem:[%s7952_s22 + $0x7e8] sm:$0xff]  }
  0xd1   : > { %6887 = vmatpush3.bf16.msra.mxu1 %v7542_v45 }
  0xd2   : > { %6888 = vmatprep.subr.bf16.mxu1 %v7544_v47 }
  0xd3   : > { %6867 = vmatpush3.bf16.msra.mxu0 %v7545_v48 }
  0xd4   : > { %6896 = vmatprep.subr.bf16.mxu0 %v7548_v51  ;;  %v7591_v51 = vld [vmem:[%s7952_s22 + $0x7a8] sm:$0xff]  }
  0xd5   : > { %6889 = vmatpush3.bf16.msra.mxu1 %v7546_v49  ;;  %v7590_v49 = vld [vmem:[%s7952_s22 + $0x728] sm:$0xff]  }
  0xd6   : > { %5187 = vmatmul.mubr.bf16.vlgmr.msra.gmra.mxu0 %v1354_v50  ;;  %6918 = vmatprep.subr.bf16.mxu1 %v7549_v52 }
  0xd7   : > { %6897 = vmatpush3.bf16.msra.mxu0 %v7550_v53  ;;  %5266 = vmatprep.mubr.bf16.mxu0 %v1410_v24 }
  0xd8   : > { %5227 = vmatmul.mubr.bf16.vlgmr.msra.gmra.mxu1 %v1370_v55  ;;  %6898 = vmatprep.subr.bf16.mxu0 %v7552_v56  ;;  %v7593_v56 = vld [vmem:[%s7952_s22 + $0x7e0] sm:$0xff]  }
  0xd9   : > { %6919 = vmatpush3.bf16.msra.mxu1 %v7551_v54  ;;  %5306 = vmatprep.mubr.bf16.mxu1 %v1420_v27  ;;  %v7592_v54 = vld [vmem:[%s7952_s22 + $0x760] sm:$0xff]   ;;  %v7622_v27 = vld [vmem:[%s7952_s22 + $0x8e8] sm:$0xff]  }
  0xda   : > { %6920 = vmatprep.subr.bf16.mxu1 %v7553_v57 }
  0xdb   : > { %6899 = vmatpush3.bf16.msra.mxu0 %v7554_v58  ;;  %v7594_v58 = vld [vmem:[%s7952_s22 + $0x720] sm:$0xff]  }
  0xdc   : > { %6900 = vmatprep.subr.bf16.mxu0 %v7556_v60  ;;  %v7596_v60 = vld [vmem:[%s7952_s22 + $0x758] sm:$0xff]  }
  0xdd   : > { %6921 = vmatpush3.bf16.msra.mxu1 %v7555_v59  ;;  %v7595_v59 = vld [vmem:[%s7952_s22 + $0x7a0] sm:$0xff]  }
  0xde   : > { %6922 = vmatprep.subr.bf16.mxu1 %v7557_v61  ;;  %v7597_v61 = vld [vmem:[%s7952_s22 + $0x7d8] sm:$0xff]  }
  0xdf   : > { %6901 = vmatpush3.bf16.msra.mxu0 %v7558_v62  ;;  %v7598_v62 = vld [vmem:[%s7952_s22 + $0x718] sm:$0xff]  }
  0xe0   : > { %6902 = vmatprep.subr.bf16.mxu0 %v7560_v0  ;;  %v7600_v0 = vld [vmem:[%s7952_s22 + $0x750] sm:$0xff]  }
  0xe1   : > { %6923 = vmatpush3.bf16.msra.mxu1 %v7559_v63  ;;  %v7599_v63 = vld [vmem:[%s7952_s22 + $0x798] sm:$0xff]  }
  0xe2   : > { %6924 = vmatprep.subr.bf16.mxu1 %v7561_v1  ;;  %v7601_v1 = vld [vmem:[%s7952_s22 + $0x7d0] sm:$0xff]  }
  0xe3   : > { %6903 = vmatpush3.bf16.msra.mxu0 %v7562_v2  ;;  %v7602_v2 = vld [vmem:[%s7952_s22 + $0x710] sm:$0xff]  }
  0xe4   : > { %6904 = vmatprep.subr.bf16.mxu0 %v7564_v4  ;;  %v7604_v4 = vld [vmem:[%s7952_s22 + $0x748] sm:$0xff]  }
  0xe5   : > { %6925 = vmatpush3.bf16.msra.mxu1 %v7563_v3  ;;  %v7603_v3 = vld [vmem:[%s7952_s22 + $0x790] sm:$0xff]  }
  0xe6   : > { %6926 = vmatprep.subr.bf16.mxu1 %v7565_v5  ;;  %v7605_v5 = vld [vmem:[%s7952_s22 + $0x7c8] sm:$0xff]  }
  0xe7   : > { %6905 = vmatpush3.bf16.msra.mxu0 %v7566_v6  ;;  %v7606_v6 = vld [vmem:[%s7952_s22 + $0x708] sm:$0xff]  }
  0xe8   : > { %6906 = vmatprep.subr.bf16.mxu0 %v7568_v8  ;;  %v7608_v8 = vld [vmem:[%s7952_s22 + $0x740] sm:$0xff]  }
  0xe9   : > { %6927 = vmatpush3.bf16.msra.mxu1 %v7567_v7  ;;  %v7607_v7 = vld [vmem:[%s7952_s22 + $0x788] sm:$0xff]  }
  0xea   : > { %6928 = vmatprep.subr.bf16.mxu1 %v7569_v9  ;;  %v7609_v9 = vld [vmem:[%s7952_s22 + $0x7c0] sm:$0xff]  }
  0xeb   : > { %6907 = vmatpush3.bf16.msra.mxu0 %v7570_v10  ;;  %v7610_v10 = vld [vmem:[%s7952_s22 + $0x700] sm:$0xff]  }
  0xec   : > { %6908 = vmatprep.subr.bf16.mxu0 %v7572_v12  ;;  %v1403_v12 = vrot.slane %v8217_v21, %v7990_v42  ;;  %v7619_v21 = vld [vmem:[%s7952_s22 + $0x830] sm:$0xff]  }
  0xed   : > { %6929 = vmatpush3.bf16.msra.mxu1 %v7571_v11  ;;  %v7611_v11 = vld [vmem:[%s7952_s22 + $0x780] sm:$0xff]  }
  0xee   : > { %6930 = vmatprep.subr.bf16.mxu1 %v7573_v13  ;;  %v7613_v13 = vld [vmem:[%s7952_s22 + $0x878] sm:$0xff]   ;;  %v1419_v17 = vcombine.high %v1403_v12, %v1403_v12 }
  0xef   : > { %6909 = vmatpush3.bf16.msra.mxu0 %v7574_v15  ;;  %v7615_v15 = vld [vmem:[%s7952_s22 + $0x838] sm:$0xff]  }
  0xf0   : > { %6910 = vmatprep.subr.bf16.mxu0 %v7576_v19  ;;  %v7618_v19 = vld [vmem:[%s7952_s22 + $0x8f0] sm:$0xff]  }
  0xf1   : > { %6931 = vmatpush3.bf16.msra.mxu1 %v7575_v18  ;;  %v7617_v18 = vld [vmem:[%s7952_s22 + $0x870] sm:$0xff]  }
  0xf2   : > { %6932 = vmatprep.subr.bf16.mxu1 %v7577_v22  ;;  %v7620_v22 = vld [vmem:[%s7952_s22 + $0x8b0] sm:$0xff]  }
  0xf3   : > { %6911 = vmatpush3.bf16.msra.mxu0 %v7578_v23 }
  0xf4   : > { %6940 = vmatprep.subr.bf16.mxu0 %v7580_v29 }
  0xf5   : > { %6933 = vmatpush3.bf16.msra.mxu1 %v7579_v26 }
  0xf6   : > { %v6648_v38 = vpop.f32.mrf.mxu0  ;;  %5267 = vmatmul.mubr.bf16.vlgmr.msra.gmra.mxu0 %v1396_v28  ;;  %6962 = vmatprep.subr.bf16.mxu1 %v7581_v30  ;;  %v7623_v30 = vld [vmem:[%s7952_s22 + $0x828] sm:$0xff]  }
  0xf7   : > { %6941 = vmatpush3.bf16.msra.mxu0 %v7582_v32  ;;  %5346 = vmatprep.mubr.bf16.mxu0 %v1417_v31  ;;  %v6670_v41 = vpop.f32.mrf.mxu1 }
  0xf8   : > { %5307 = vmatmul.mubr.bf16.vlgmr.msra.gmra.mxu1 %v1418_v34  ;;  %v6649_v43 = vpop.f32.mrf.mxu0  ;;  %6942 = vmatprep.subr.bf16.mxu0 %v7584_v35 }
  0xf9   : > { %6963 = vmatpush3.bf16.msra.mxu1 %v7583_v33  ;;  %v6650_v45 = vadd.f32 %v6649_v43, %v6648_v38  ;;  %5386 = vmatprep.mubr.bf16.mxu1 %v1421_v37  ;;  %v6671_v47 = vpop.f32.mrf.mxu1  ;;  %v7624_v33 = vld [vmem:[%s7952_s22 + $0x8a8] sm:$0xff]   ;;  %v7626_v38 = vld [vmem:[%s7952_s22 + $0x8e0] sm:$0xff]   ;;  %v7629_v43 = vld [vmem:[%s7952_s22 + $0x858] sm:$0xff]  }
  0xfa   : > { %v6651_v48 = vpop.f32.mrf.mxu0  ;;  %6964 = vmatprep.subr.bf16.mxu1 %v7585_v36  ;;  %v6672_v50 = vadd.f32 %v6671_v47, %v6670_v41  ;;  %v7625_v36 = vld [vmem:[%s7952_s22 + $0x860] sm:$0xff]   ;;  %v7633_v47 = vld [vmem:[%s7952_s22 + $0x850] sm:$0xff]  }
  0xfb   : > { %6943 = vmatpush3.bf16.msra.mxu0 %v7586_v39  ;;  %v6673_v52 = vpop.f32.mrf.mxu1  ;;  %v7628_v41 = vld [vmem:[%s7952_s22 + $0x8a0] sm:$0xff]   ;;  %v7634_v48 = vld [vmem:[%s7952_s22 + $0x8d0] sm:$0xff]  }
  0xfc   : > { %v6652_v53 = vpop.f32.mrf.mxu0  ;;  %6944 = vmatprep.subr.bf16.mxu0 %v7588_v44  ;;  %v8240_v55 = vadd.f32 %v6672_v50, %v6650_v45  ;;  %v7630_v44 = vld [vmem:[%s7952_s22 + $0x8d8] sm:$0xff]   ;;  %v7636_v50 = vld [vmem:[%s7952_s22 + $0x890] sm:$0xff]   ;;  %v7638_v52 = vld [vmem:[%s7952_s22 + $0x8c8] sm:$0xff]  }
  0xfd   : > { %6965 = vmatpush3.bf16.msra.mxu1 %v7587_v40  ;;  %v6674_v57 = vpop.f32.mrf.mxu1  ;;  %v7627_v40 = vld [vmem:[%s7952_s22 + $0x820] sm:$0xff]   ;;  %v7631_v45 = vld [vmem:[%s7952_s22 + $0x818] sm:$0xff]  }
  0xfe   : > { %6966 = vmatprep.subr.bf16.mxu1 %v7589_v46  ;;  %v7632_v46 = vld [vmem:[%s7952_s22 + $0x898] sm:$0xff]   ;;  %v190_v53 = vld [vmem:[%s7947_s18 + $0x20] sm:$0xff]  ;;  %v7640_v57 = vld [vmem:[%s7952_s22 + $0x888] sm:$0xff]  }
  0xff   : > { %6945 = vmatpush3.bf16.msra.mxu0 %v7590_v49  ;;  %v7635_v49 = vld [vmem:[%s7952_s22 + $0x810] sm:$0xff]  }
 0x100   : > { %6946 = vmatprep.subr.bf16.mxu0 %v7592_v54  ;;  %v7639_v54 = vld [vmem:[%s7952_s22 + $0x808] sm:$0xff]  }
 0x101   : > { %6967 = vmatpush3.bf16.msra.mxu1 %v7591_v51  ;;  %v7637_v51 = vld [vmem:[%s7952_s22 + $0x848] sm:$0xff]  }
 0x102   : > { %6968 = vmatprep.subr.bf16.mxu1 %v7593_v56  ;;  %v1422_v56 = vcombine.high %v190_v53, %v190_v53 }
 0x103   : > { %6947 = vmatpush3.bf16.msra.mxu0 %v7594_v58  ;;  %v7641_v58 = vld [vmem:[%s7952_s22 + $0x840] sm:$0xff]  }
 0x104   : > { %6948 = vmatprep.subr.bf16.mxu0 %v7596_v60  ;;  %v8298_v60 = vrot.slane %v1422_v56, %v7990_v42  ;;  %v7681_v56 = vld [vmem:[%s7952_s22 + $0xab8] sm:$0xff]  }
 0x105   : > { %6969 = vmatpush3.bf16.msra.mxu1 %v7595_v59 }
 0x106   : > { %6970 = vmatprep.subr.bf16.mxu1 %v7597_v61  ;;  %v7642_v61 = vld [vmem:[%s7952_s22 + $0x8c0] sm:$0xff]  }
 0x107   : > { %6949 = vmatpush3.bf16.msra.mxu0 %v7598_v62  ;;  %v7643_v62 = vld [vmem:[%s7952_s22 + $0x800] sm:$0xff]  }
 0x108   : > { %6950 = vmatprep.subr.bf16.mxu0 %v7600_v0  ;;  %v1438_v0 = vcombine.high %v8298_v60, %v8298_v60 }
 0x109   : > { %6971 = vmatpush3.bf16.msra.mxu1 %v7599_v63 }
 0x10a   : > { %6972 = vmatprep.subr.bf16.mxu1 %v7601_v1  ;;  %v7644_v1 = vld [vmem:[%s7952_s22 + $0x880] sm:$0xff]  }
 0x10b   : > { %6951 = vmatpush3.bf16.msra.mxu0 %v7602_v2 }
 0x10c   : > { %6952 = vmatprep.subr.bf16.mxu0 %v7604_v4  ;;  %v7645_v4 = vld [vmem:[%s7952_s22 + $0x978] sm:$0xff]  }
 0x10d   : > { %6973 = vmatpush3.bf16.msra.mxu1 %v7603_v3 }
 0x10e   : > { %6974 = vmatprep.subr.bf16.mxu1 %v7605_v5  ;;  %v7646_v5 = vld [vmem:[%s7952_s22 + $0x9f8] sm:$0xff]  }
 0x10f   : > { %6953 = vmatpush3.bf16.msra.mxu0 %v7606_v6  ;;  %v1466_v6 = vrot.slane %v1438_v0, %v7990_v42 }
 0x110   : > { %6954 = vmatprep.subr.bf16.mxu0 %v7608_v8  ;;  %v7648_v8 = vld [vmem:[%s7952_s22 + $0x9b8] sm:$0xff]  }
 0x111   : > { %6975 = vmatpush3.bf16.msra.mxu1 %v7607_v7  ;;  %v7647_v7 = vld [vmem:[%s7952_s22 + $0x938] sm:$0xff]  }
 0x112   : > { %6976 = vmatprep.subr.bf16.mxu1 %v7609_v9 }
 0x113   : > { %6955 = vmatpush3.bf16.msra.mxu0 %v7610_v10  ;;  %v7649_v10 = vld [vmem:[%s7952_s22 + $0x970] sm:$0xff]  }
 0x114   : > { %6984 = vmatprep.subr.bf16.mxu0 %v7613_v13 }
 0x115   : > { %6977 = vmatpush3.bf16.msra.mxu1 %v7611_v11  ;;  %v7650_v11 = vld [vmem:[%s7952_s22 + $0x9f0] sm:$0xff]  }
 0x116   : > { %v6692_v20 = vpop.f32.mrf.mxu0  ;;  %5347 = vmatmul.mubr.bf16.vlgmr.msra.gmra.mxu0 %v1403_v12  ;;  %7006 = vmatprep.subr.bf16.mxu1 %v7614_v14  ;;  %v1470_v12 = vcombine.high %v1466_v6, %v1466_v6  ;;  %v7651_v14 = vld [vmem:[%s7952_s22 + $0x930] sm:$0xff]  }
 0x117   : > { %6985 = vmatpush3.bf16.msra.mxu0 %v7615_v15  ;;  %v6714_v23 = vpop.f32.mrf.mxu1  ;;  %v7652_v15 = vld [vmem:[%s7952_s22 + $0x9b0] sm:$0xff]  }
 0x118   : > { %5387 = vmatmul.mubr.bf16.vlgmr.msra.gmra.mxu1 %v1419_v17  ;;  %v6693_v24 = vpop.f32.mrf.mxu0  ;;  %6986 = vmatprep.subr.bf16.mxu0 %v7617_v18  ;;  %v7653_v18 = vld [vmem:[%s7952_s22 + $0x968] sm:$0xff]  }
 0x119   : > { %7007 = vmatpush3.bf16.msra.mxu1 %v7616_v16  ;;  %v6694_v26 = vadd.f32 %v6693_v24, %v6692_v20  ;;  %v6715_v28 = vpop.f32.mrf.mxu1  ;;  %v7654_v20 = vld [vmem:[%s7952_s22 + $0x9e8] sm:$0xff]  }
 0x11a   : > { %v6695_v29 = vpop.f32.mrf.mxu0  ;;  %7008 = vmatprep.subr.bf16.mxu1 %v7618_v19  ;;  %v6716_v32 = vadd.f32 %v6715_v28, %v6714_v23  ;;  %v7655_v23 = vld [vmem:[%s7952_s22 + $0x928] sm:$0xff]  }
 0x11b   : > { %v4869_v31 = vadd.f32 %v6694_v26, %v8240_v55  ;;  %6987 = vmatpush3.bf16.msra.mxu0 %v7619_v21  ;;  %v6717_v34 = vpop.f32.mrf.mxu1  ;;  %v1429_v55 = vrot.slane %v190_v53, %v7990_v42  ;;  %v7656_v26 = vld [vmem:[%s7952_s22 + $0x9a8] sm:$0xff]   ;;  %v7657_v29 = vld [vmem:[%s7952_s22 + $0x960] sm:$0xff]   ;;  %v7678_v53 = vld [vmem:[%s7952_s22 + $0xa78] sm:$0xff]  }
 0x11c   : > { %v6696_v35 = vpop.f32.mrf.mxu0  ;;  %6988 = vmatprep.subr.bf16.mxu0 %v7621_v25  ;;  %v7660_v34 = vld [vmem:[%s7952_s22 + $0x9a0] sm:$0xff]  }
 0x11d   : > { %v8277_v37 = vadd.f32 %v6716_v32, %v4869_v31  ;;  %7009 = vmatpush3.bf16.msra.mxu1 %v7620_v22  ;;  %v6718_v39 = vpop.f32.mrf.mxu1  ;;  %v1437_v59 = vcombine.high %v1429_v55, %v1429_v55  ;;  %v1445_v3 = vrot.slane %v1429_v55, %v7990_v42  ;;  %v7658_v31 = vld [vmem:[%s7952_s22 + $0x9e0] sm:$0xff]   ;;  %v7661_v35 = vld [vmem:[%s7952_s22 + $0x958] sm:$0xff]  }
 0x11e   : > { %7010 = vmatprep.subr.bf16.mxu1 %v7622_v27  ;;  %v7665_v39 = vld [vmem:[%s7952_s22 + $0x950] sm:$0xff]   ;;  %v7680_v55 = vld [vmem:[%s7952_s22 + $0xa38] sm:$0xff]  }
 0x11f   : > { %6989 = vmatpush3.bf16.msra.mxu0 %v7623_v30  ;;  %v1459_v63 = vrot.slane %v1437_v59, %v7990_v42  ;;  %v1467_v9 = vcombine.high %v1445_v3, %v1445_v3  ;;  %v7683_v59 = vld [vmem:[%s7952_s22 + $0xaf0] sm:$0xff]  }
 0x120   : > { %6990 = vmatprep.subr.bf16.mxu0 %v7625_v36  ;;  %v7662_v36 = vld [vmem:[%s7952_s22 + $0x9d8] sm:$0xff]  }
 0x121   : > { %7011 = vmatpush3.bf16.msra.mxu1 %v7624_v33  ;;  %5426 = vmatprep.mubr.bf16.mxu0 %v1459_v63  ;;  %v1469_v2 = vcombine.high %v1459_v63, %v1459_v63  ;;  %v7659_v33 = vld [vmem:[%s7952_s22 + $0x920] sm:$0xff]  }
 0x122   : > { %7012 = vmatprep.subr.bf16.mxu1 %v7626_v38  ;;  %v7664_v38 = vld [vmem:[%s7952_s22 + $0x998] sm:$0xff]  }
 0x123   : > { %6991 = vmatpush3.bf16.msra.mxu0 %v7627_v40  ;;  %5466 = vmatprep.mubr.bf16.mxu1 %v1469_v2  ;;  %v7666_v40 = vld [vmem:[%s7952_s22 + $0x9d0] sm:$0xff]  }
 0x124   : > { %6992 = vmatprep.subr.bf16.mxu0 %v7629_v43  ;;  %v7668_v43 = vld [vmem:[%s7952_s22 + $0x990] sm:$0xff]  }
 0x125   : > { %7013 = vmatpush3.bf16.msra.mxu1 %v7628_v41  ;;  %v7667_v41 = vld [vmem:[%s7952_s22 + $0x910] sm:$0xff]  }
 0x126   : > { %7014 = vmatprep.subr.bf16.mxu1 %v7630_v44  ;;  %v7669_v44 = vld [vmem:[%s7952_s22 + $0x948] sm:$0xff]  }
 0x127   : > { %6993 = vmatpush3.bf16.msra.mxu0 %v7631_v45  ;;  %v7670_v45 = vld [vmem:[%s7952_s22 + $0x9c8] sm:$0xff]  }
 0x128   : > { %6994 = vmatprep.subr.bf16.mxu0 %v7633_v47  ;;  %v7672_v47 = vld [vmem:[%s7952_s22 + $0x988] sm:$0xff]  }
 0x129   : > { %7015 = vmatpush3.bf16.msra.mxu1 %v7632_v46  ;;  %v7671_v46 = vld [vmem:[%s7952_s22 + $0x908] sm:$0xff]  }
 0x12a   : > { %7016 = vmatprep.subr.bf16.mxu1 %v7634_v48  ;;  %v7673_v48 = vld [vmem:[%s7952_s22 + $0x940] sm:$0xff]  }
 0x12b   : > { %6995 = vmatpush3.bf16.msra.mxu0 %v7635_v49  ;;  %v7674_v49 = vld [vmem:[%s7952_s22 + $0x9c0] sm:$0xff]  }
 0x12c   : > { %6996 = vmatprep.subr.bf16.mxu0 %v7637_v51  ;;  %v7676_v51 = vld [vmem:[%s7952_s22 + $0x980] sm:$0xff]  }
 0x12d   : > { %7017 = vmatpush3.bf16.msra.mxu1 %v7636_v50  ;;  %v7675_v50 = vld [vmem:[%s7952_s22 + $0x900] sm:$0xff]  }
 0x12e   : > { %7018 = vmatprep.subr.bf16.mxu1 %v7638_v52  ;;  %v1452_v52 = vrot.slane %v8298_v60, %v7990_v42  ;;  %v7684_v60 = vld [vmem:[%s7952_s22 + $0xa30] sm:$0xff]  }
 0x12f   : > { %6997 = vmatpush3.bf16.msra.mxu0 %v7639_v54  ;;  %v7679_v54 = vld [vmem:[%s7952_s22 + $0xaf8] sm:$0xff]  }
 0x130   : > { %6998 = vmatprep.subr.bf16.mxu0 %v7641_v58  ;;  %v7682_v58 = vld [vmem:[%s7952_s22 + $0xa70] sm:$0xff]  }
 0x131   : > { %7019 = vmatpush3.bf16.msra.mxu1 %v7640_v57  ;;  %v1468_v57 = vcombine.high %v1452_v52, %v1452_v52 }
 0x132   : > { %7020 = vmatprep.subr.bf16.mxu1 %v7642_v61 }
 0x133   : > { %6999 = vmatpush3.bf16.msra.mxu0 %v7643_v62  ;;  %v7685_v62 = vld [vmem:[%s7952_s22 + $0xab0] sm:$0xff]  }
 0x134   : > { %7028 = vmatprep.subr.bf16.mxu0 %v7645_v4 }
 0x135   : > { %7021 = vmatpush3.bf16.msra.mxu1 %v7644_v1  ;;  %v7686_v1 = vld [vmem:[%s7952_s22 + $0xa68] sm:$0xff]  }
 0x136   : > { %v6736_v13 = vpop.f32.mrf.mxu0  ;;  %5427 = vmatmul.mubr.bf16.vlgmr.msra.gmra.mxu0 %v1445_v3  ;;  %7050 = vmatprep.subr.bf16.mxu1 %v7646_v5  ;;  %v7687_v3 = vld [vmem:[%s7952_s22 + $0xae8] sm:$0xff]  }
 0x137   : > { %7029 = vmatpush3.bf16.msra.mxu0 %v7647_v7  ;;  %5506 = vmatprep.mubr.bf16.mxu0 %v1466_v6  ;;  %v7688_v6 = vld [vmem:[%s7952_s22 + $0xa28] sm:$0xff]  }
 0x138   : > { %v6758_v16 = vpop.f32.mrf.mxu1  ;;  %5467 = vmatmul.mubr.bf16.vlgmr.msra.gmra.mxu1 %v1467_v9  ;;  %v6737_v17 = vpop.f32.mrf.mxu0  ;;  %7030 = vmatprep.subr.bf16.mxu0 %v7649_v10  ;;  %v7689_v9 = vld [vmem:[%s7952_s22 + $0xaa8] sm:$0xff]  }
 0x139   : > { %7051 = vmatpush3.bf16.msra.mxu1 %v7648_v8  ;;  %v6738_v19 = vadd.f32 %v6737_v17, %v6736_v13  ;;  %5546 = vmatprep.mubr.bf16.mxu1 %v1470_v12  ;;  %v7690_v12 = vld [vmem:[%s7952_s22 + $0xa60] sm:$0xff]  }
 0x13a   : > { %v6759_v21 = vpop.f32.mrf.mxu1  ;;  %v6739_v22 = vpop.f32.mrf.mxu0  ;;  %7052 = vmatprep.subr.bf16.mxu1 %v7650_v11  ;;  %v7693_v17 = vld [vmem:[%s7952_s22 + $0xaa0] sm:$0xff]  }
 0x13b   : > { %v4949_v24 = vadd.f32 %v6738_v19, %v8277_v37  ;;  %v6760_v25 = vadd.f32 %v6759_v21, %v6758_v16  ;;  %7031 = vmatpush3.bf16.msra.mxu0 %v7651_v14  ;;  %v7663_v37 = vld [vmem:[%s7952_s22 + $0x918] sm:$0xff]   ;;  %v7691_v14 = vld [vmem:[%s7952_s22 + $0xae0] sm:$0xff]   ;;  %v7698_v22 = vld [vmem:[%s7952_s22 + $0xa50] sm:$0xff]  }
 0x13c   : > { %v6761_v27 = vpop.f32.mrf.mxu1  ;;  %v6740_v28 = vpop.f32.mrf.mxu0  ;;  %7032 = vmatprep.subr.bf16.mxu0 %v7653_v18  ;;  %v7692_v16 = vld [vmem:[%s7952_s22 + $0xa20] sm:$0xff]   ;;  %v7694_v18 = vld [vmem:[%s7952_s22 + $0xa58] sm:$0xff]  }
 0x13d   : > { %v8322_v30 = vadd.f32 %v6760_v25, %v4949_v24  ;;  %7053 = vmatpush3.bf16.msra.mxu1 %v7652_v15  ;;  %v7695_v19 = vld [vmem:[%s7952_s22 + $0xad8] sm:$0xff]   ;;  %v7700_v24 = vld [vmem:[%s7952_s22 + $0xa10] sm:$0xff]   ;;  %v7703_v27 = vld [vmem:[%s7952_s22 + $0xac8] sm:$0xff]  }
 0x13e   : > { %v6762_v32 = vpop.f32.mrf.mxu1  ;;  %7054 = vmatprep.subr.bf16.mxu1 %v7654_v20  ;;  %v7696_v20 = vld [vmem:[%s7952_s22 + $0xa18] sm:$0xff]   ;;  %v7701_v25 = vld [vmem:[%s7952_s22 + $0xa90] sm:$0xff]   ;;  %v191_v28 = vld [vmem:[%s7947_s18 + $0x28] sm:$0xff] }
 0x13f   : > { %7033 = vmatpush3.bf16.msra.mxu0 %v7655_v23  ;;  %v7697_v21 = vld [vmem:[%s7952_s22 + $0xa98] sm:$0xff]   ;;  %v7699_v23 = vld [vmem:[%s7952_s22 + $0xad0] sm:$0xff]   ;;  %v7705_v32 = vld [vmem:[%s7952_s22 + $0xa88] sm:$0xff]  }
 0x140   : > { %7034 = vmatprep.subr.bf16.mxu0 %v7657_v29  ;;  %v7704_v29 = vld [vmem:[%s7952_s22 + $0xa08] sm:$0xff]  }
 0x141   : > { %7055 = vmatpush3.bf16.msra.mxu1 %v7656_v26  ;;  %v7702_v26 = vld [vmem:[%s7952_s22 + $0xa48] sm:$0xff]  }
 0x142   : > { %7056 = vmatprep.subr.bf16.mxu1 %v7658_v31  ;;  %v1471_v31 = vcombine.high %v191_v28, %v191_v28 }
 0x143   : > { %7035 = vmatpush3.bf16.msra.mxu0 %v7659_v33  ;;  %v7706_v33 = vld [vmem:[%s7952_s22 + $0xa40] sm:$0xff]  }
 0x144   : > { %7036 = vmatprep.subr.bf16.mxu0 %v7661_v35  ;;  %v8380_v35 = vrot.slane %v1471_v31, %v7990_v42  ;;  %v7746_v31 = vld [vmem:[%s7952_s22 + $0xcb8] sm:$0xff]  }
 0x145   : > { %7057 = vmatpush3.bf16.msra.mxu1 %v7660_v34 }
 0x146   : > { %7058 = vmatprep.subr.bf16.mxu1 %v7662_v36  ;;  %v7707_v36 = vld [vmem:[%s7952_s22 + $0xac0] sm:$0xff]  }
 0x147   : > { %7037 = vmatpush3.bf16.msra.mxu0 %v7663_v37  ;;  %v7708_v37 = vld [vmem:[%s7952_s22 + $0xa00] sm:$0xff]  }
 0x148   : > { %7038 = vmatprep.subr.bf16.mxu0 %v7665_v39  ;;  %v1487_v39 = vcombine.high %v8380_v35, %v8380_v35 }
 0x149   : > { %7059 = vmatpush3.bf16.msra.mxu1 %v7664_v38 }
 0x14a   : > { %7060 = vmatprep.subr.bf16.mxu1 %v7666_v40  ;;  %v7709_v40 = vld [vmem:[%s7952_s22 + $0xa80] sm:$0xff]  }
 0x14b   : > { %7039 = vmatpush3.bf16.msra.mxu0 %v7667_v41 }
 0x14c   : > { %7040 = vmatprep.subr.bf16.mxu0 %v7669_v44  ;;  %v7710_v44 = vld [vmem:[%s7952_s22 + $0xb78] sm:$0xff]  }
 0x14d   : > { %7061 = vmatpush3.bf16.msra.mxu1 %v7668_v43 }
 0x14e   : > { %7062 = vmatprep.subr.bf16.mxu1 %v7670_v45  ;;  %v7711_v45 = vld [vmem:[%s7952_s22 + $0xbf8] sm:$0xff]  }
 0x14f   : > { %7041 = vmatpush3.bf16.msra.mxu0 %v7671_v46  ;;  %v1515_v46 = vrot.slane %v1487_v39, %v7990_v42 }
 0x150   : > { %7042 = vmatprep.subr.bf16.mxu0 %v7673_v48  ;;  %v7713_v48 = vld [vmem:[%s7952_s22 + $0xbb8] sm:$0xff]  }
 0x151   : > { %7063 = vmatpush3.bf16.msra.mxu1 %v7672_v47  ;;  %v7712_v47 = vld [vmem:[%s7952_s22 + $0xb38] sm:$0xff]  }
 0x152   : > { %7064 = vmatprep.subr.bf16.mxu1 %v7674_v49 }
 0x153   : > { %7043 = vmatpush3.bf16.msra.mxu0 %v7675_v50  ;;  %v7714_v50 = vld [vmem:[%s7952_s22 + $0xb70] sm:$0xff]  }
 0x154   : > { %7072 = vmatprep.subr.bf16.mxu0 %v7678_v53 }
 0x155   : > { %7065 = vmatpush3.bf16.msra.mxu1 %v7676_v51  ;;  %v7715_v51 = vld [vmem:[%s7952_s22 + $0xbf0] sm:$0xff]  }
 0x156   : > { %v6780_v61 = vpop.f32.mrf.mxu0  ;;  %5507 = vmatmul.mubr.bf16.vlgmr.msra.gmra.mxu0 %v1452_v52  ;;  %7094 = vmatprep.subr.bf16.mxu1 %v7679_v54  ;;  %v1519_v52 = vcombine.high %v1515_v46, %v1515_v46  ;;  %v7716_v54 = vld [vmem:[%s7952_s22 + $0xb30] sm:$0xff]  }
 0x157   : > { %7073 = vmatpush3.bf16.msra.mxu0 %v7680_v55  ;;  %v7717_v55 = vld [vmem:[%s7952_s22 + $0xbb0] sm:$0xff]  }
 0x158   : > { %v6802_v63 = vpop.f32.mrf.mxu1  ;;  %5547 = vmatmul.mubr.bf16.vlgmr.msra.gmra.mxu1 %v1468_v57  ;;  %v6781_v0 = vpop.f32.mrf.mxu0  ;;  %7074 = vmatprep.subr.bf16.mxu0 %v7682_v58  ;;  %v7718_v58 = vld [vmem:[%s7952_s22 + $0xb68] sm:$0xff]  }
 0x159   : > { %7095 = vmatpush3.bf16.msra.mxu1 %v7681_v56  ;;  %v6782_v2 = vadd.f32 %v6781_v0, %v6780_v61  ;;  %v7719_v61 = vld [vmem:[%s7952_s22 + $0xbe8] sm:$0xff]  }
 0x15a   : > { %v6803_v4 = vpop.f32.mrf.mxu1  ;;  %v6783_v5 = vpop.f32.mrf.mxu0  ;;  %7096 = vmatprep.subr.bf16.mxu1 %v7683_v59 }
 0x15b   : > { %v5029_v7 = vadd.f32 %v6782_v2, %v8322_v30  ;;  %v6804_v8 = vadd.f32 %v6803_v4, %v6802_v63  ;;  %7075 = vmatpush3.bf16.msra.mxu0 %v7684_v60  ;;  %v1478_v30 = vrot.slane %v191_v28, %v7990_v42  ;;  %v7720_v63 = vld [vmem:[%s7952_s22 + $0xb28] sm:$0xff]   ;;  %v7722_v5 = vld [vmem:[%s7952_s22 + $0xb60] sm:$0xff]   ;;  %v7743_v28 = vld [vmem:[%s7952_s22 + $0xc78] sm:$0xff]  }
 0x15c   : > { %v6805_v10 = vpop.f32.mrf.mxu1  ;;  %v6784_v11 = vpop.f32.mrf.mxu0  ;;  %7076 = vmatprep.subr.bf16.mxu0 %v7686_v1  ;;  %v7721_v2 = vld [vmem:[%s7952_s22 + $0xba8] sm:$0xff]  }
 0x15d   : > { %v8359_v13 = vadd.f32 %v6804_v8, %v5029_v7  ;;  %7097 = vmatpush3.bf16.msra.mxu1 %v7685_v62  ;;  %v1486_v34 = vcombine.high %v1478_v30, %v1478_v30  ;;  %v1494_v43 = vrot.slane %v1478_v30, %v7990_v42  ;;  %v7723_v7 = vld [vmem:[%s7952_s22 + $0xbe0] sm:$0xff]   ;;  %v7726_v11 = vld [vmem:[%s7952_s22 + $0xb58] sm:$0xff]  }
 0x15e   : > { %v6806_v15 = vpop.f32.mrf.mxu1  ;;  %7098 = vmatprep.subr.bf16.mxu1 %v7687_v3  ;;  %v7725_v10 = vld [vmem:[%s7952_s22 + $0xba0] sm:$0xff]   ;;  %v7745_v30 = vld [vmem:[%s7952_s22 + $0xc38] sm:$0xff]  }
 0x15f   : > { %7077 = vmatpush3.bf16.msra.mxu0 %v7688_v6  ;;  %v1508_v38 = vrot.slane %v1486_v34, %v7990_v42  ;;  %v1516_v49 = vcombine.high %v1494_v43, %v1494_v43  ;;  %v7730_v15 = vld [vmem:[%s7952_s22 + $0xb50] sm:$0xff]  }
 0x160   : > { %7078 = vmatprep.subr.bf16.mxu0 %v7690_v12  ;;  %v7727_v12 = vld [vmem:[%s7952_s22 + $0xbd8] sm:$0xff]   ;;  %v7748_v34 = vld [vmem:[%s7952_s22 + $0xcf0] sm:$0xff]  }
 0x161   : > { %7099 = vmatpush3.bf16.msra.mxu1 %v7689_v9  ;;  %5586 = vmatprep.mubr.bf16.mxu0 %v1508_v38  ;;  %v1518_v41 = vcombine.high %v1508_v38, %v1508_v38  ;;  %v7724_v9 = vld [vmem:[%s7952_s22 + $0xb20] sm:$0xff]  }
 0x162   : > { %7100 = vmatprep.subr.bf16.mxu1 %v7691_v14  ;;  %v7729_v14 = vld [vmem:[%s7952_s22 + $0xb98] sm:$0xff]  }
 0x163   : > { %7079 = vmatpush3.bf16.msra.mxu0 %v7692_v16  ;;  %5626 = vmatprep.mubr.bf16.mxu1 %v1518_v41  ;;  %v7731_v16 = vld [vmem:[%s7952_s22 + $0xbd0] sm:$0xff]  }
 0x164   : > { %7080 = vmatprep.subr.bf16.mxu0 %v7694_v18  ;;  %v7733_v18 = vld [vmem:[%s7952_s22 + $0xb90] sm:$0xff]  }
 0x165   : > { %7101 = vmatpush3.bf16.msra.mxu1 %v7693_v17  ;;  %v7732_v17 = vld [vmem:[%s7952_s22 + $0xb10] sm:$0xff]  }
 0x166   : > { %7102 = vmatprep.subr.bf16.mxu1 %v7695_v19  ;;  %v7734_v19 = vld [vmem:[%s7952_s22 + $0xb48] sm:$0xff]  }
 0x167   : > { %7081 = vmatpush3.bf16.msra.mxu0 %v7696_v20  ;;  %v7735_v20 = vld [vmem:[%s7952_s22 + $0xbc8] sm:$0xff]  }
 0x168   : > { %7082 = vmatprep.subr.bf16.mxu0 %v7698_v22  ;;  %v7737_v22 = vld [vmem:[%s7952_s22 + $0xb88] sm:$0xff]  }
 0x169   : > { %7103 = vmatpush3.bf16.msra.mxu1 %v7697_v21  ;;  %v7736_v21 = vld [vmem:[%s7952_s22 + $0xb08] sm:$0xff]  }
 0x16a   : > { %7104 = vmatprep.subr.bf16.mxu1 %v7699_v23  ;;  %v7738_v23 = vld [vmem:[%s7952_s22 + $0xb40] sm:$0xff]  }
 0x16b   : > { %7083 = vmatpush3.bf16.msra.mxu0 %v7700_v24  ;;  %v7739_v24 = vld [vmem:[%s7952_s22 + $0xbc0] sm:$0xff]  }
 0x16c   : > { %7084 = vmatprep.subr.bf16.mxu0 %v7702_v26  ;;  %v7741_v26 = vld [vmem:[%s7952_s22 + $0xb80] sm:$0xff]  }
 0x16d   : > { %7105 = vmatpush3.bf16.msra.mxu1 %v7701_v25  ;;  %v7740_v25 = vld [vmem:[%s7952_s22 + $0xb00] sm:$0xff]  }
 0x16e   : > { %7106 = vmatprep.subr.bf16.mxu1 %v7703_v27  ;;  %v1501_v27 = vrot.slane %v8380_v35, %v7990_v42  ;;  %v7749_v35 = vld [vmem:[%s7952_s22 + $0xc30] sm:$0xff]  }
 0x16f   : > { %7085 = vmatpush3.bf16.msra.mxu0 %v7704_v29  ;;  %v7744_v29 = vld [vmem:[%s7952_s22 + $0xcf8] sm:$0xff]  }
 0x170   : > { %7086 = vmatprep.subr.bf16.mxu0 %v7706_v33  ;;  %v7747_v33 = vld [vmem:[%s7952_s22 + $0xc70] sm:$0xff]  }
 0x171   : > { %7107 = vmatpush3.bf16.msra.mxu1 %v7705_v32  ;;  %v1517_v32 = vcombine.high %v1501_v27, %v1501_v27 }
 0x172   : > { %7108 = vmatprep.subr.bf16.mxu1 %v7707_v36 }
 0x173   : > { %7087 = vmatpush3.bf16.msra.mxu0 %v7708_v37  ;;  %v7750_v37 = vld [vmem:[%s7952_s22 + $0xcb0] sm:$0xff]  }
 0x174   : > { %7116 = vmatprep.subr.bf16.mxu0 %v7710_v44 }
 0x175   : > { %7109 = vmatpush3.bf16.msra.mxu1 %v7709_v40  ;;  %v7751_v40 = vld [vmem:[%s7952_s22 + $0xc68] sm:$0xff]  }
 0x176   : > { %v6824_v53 = vpop.f32.mrf.mxu0  ;;  %5587 = vmatmul.mubr.bf16.vlgmr.msra.gmra.mxu0 %v1494_v43  ;;  %7138 = vmatprep.subr.bf16.mxu1 %v7711_v45  ;;  %v7752_v43 = vld [vmem:[%s7952_s22 + $0xce8] sm:$0xff]  }
 0x177   : > { %7117 = vmatpush3.bf16.msra.mxu0 %v7712_v47  ;;  %5666 = vmatprep.mubr.bf16.mxu0 %v1515_v46  ;;  %v7753_v46 = vld [vmem:[%s7952_s22 + $0xc28] sm:$0xff]  }
 0x178   : > { %v6846_v56 = vpop.f32.mrf.mxu1  ;;  %5627 = vmatmul.mubr.bf16.vlgmr.msra.gmra.mxu1 %v1516_v49  ;;  %v6825_v57 = vpop.f32.mrf.mxu0  ;;  %7118 = vmatprep.subr.bf16.mxu0 %v7714_v50  ;;  %v7754_v49 = vld [vmem:[%s7952_s22 + $0xca8] sm:$0xff]  }
 0x179   : > { %7139 = vmatpush3.bf16.msra.mxu1 %v7713_v48  ;;  %v6826_v59 = vadd.f32 %v6825_v57, %v6824_v53  ;;  %5706 = vmatprep.mubr.bf16.mxu1 %v1519_v52  ;;  %v7755_v52 = vld [vmem:[%s7952_s22 + $0xc60] sm:$0xff]  }
 0x17a   : > { %v6847_v60 = vpop.f32.mrf.mxu1  ;;  %v6827_v62 = vpop.f32.mrf.mxu0  ;;  %7140 = vmatprep.subr.bf16.mxu1 %v7715_v51  ;;  %v7758_v57 = vld [vmem:[%s7952_s22 + $0xca0] sm:$0xff]  }
 0x17b   : > { %v5109_v0 = vadd.f32 %v6826_v59, %v8359_v13  ;;  %v6848_v1 = vadd.f32 %v6847_v60, %v6846_v56  ;;  %7119 = vmatpush3.bf16.msra.mxu0 %v7716_v54  ;;  %v7728_v13 = vld [vmem:[%s7952_s22 + $0xb18] sm:$0xff]   ;;  %v7756_v54 = vld [vmem:[%s7952_s22 + $0xce0] sm:$0xff]   ;;  %v7763_v62 = vld [vmem:[%s7952_s22 + $0xc50] sm:$0xff]  }
 0x17c   : > { %v6849_v3 = vpop.f32.mrf.mxu1  ;;  %v6828_v4 = vpop.f32.mrf.mxu0  ;;  %7120 = vmatprep.subr.bf16.mxu0 %v7718_v58  ;;  %v7757_v56 = vld [vmem:[%s7952_s22 + $0xc20] sm:$0xff]   ;;  %v7759_v58 = vld [vmem:[%s7952_s22 + $0xc58] sm:$0xff]  }
 0x17d   : > { %v8404_v6 = vadd.f32 %v6848_v1, %v5109_v0  ;;  %7141 = vmatpush3.bf16.msra.mxu1 %v7717_v55  ;;  %v7760_v59 = vld [vmem:[%s7952_s22 + $0xcd8] sm:$0xff]   ;;  %v7765_v0 = vld [vmem:[%s7952_s22 + $0xc10] sm:$0xff]   ;;  %v7768_v3 = vld [vmem:[%s7952_s22 + $0xcc8] sm:$0xff]  }
 0x17e   : > { %v6850_v8 = vpop.f32.mrf.mxu1  ;;  %7142 = vmatprep.subr.bf16.mxu1 %v7719_v61  ;;  %v7761_v61 = vld [vmem:[%s7952_s22 + $0xc18] sm:$0xff]   ;;  %v7766_v1 = vld [vmem:[%s7952_s22 + $0xc90] sm:$0xff]  }
 0x17f   : > { %7121 = vmatpush3.bf16.msra.mxu0 %v7720_v63  ;;  %v7762_v60 = vld [vmem:[%s7952_s22 + $0xc98] sm:$0xff]   ;;  %v7764_v63 = vld [vmem:[%s7952_s22 + $0xcd0] sm:$0xff]   ;;  %v7771_v8 = vld [vmem:[%s7952_s22 + $0xc40] sm:$0xff]  }
 0x180   : > { %7122 = vmatprep.subr.bf16.mxu0 %v7722_v5  ;;  %v192_v4 = vld [vmem:[%s7947_s18 + $0x30] sm:$0xff]  ;;  %v7769_v5 = vld [vmem:[%s7952_s22 + $0xc08] sm:$0xff]  }
 0x181   : > { %7143 = vmatpush3.bf16.msra.mxu1 %v7721_v2  ;;  %v7767_v2 = vld [vmem:[%s7952_s22 + $0xc48] sm:$0xff]  }
 0x182   : > { %7144 = vmatprep.subr.bf16.mxu1 %v7723_v7  ;;  %v1520_v7 = vcombine.high %v192_v4, %v192_v4 }
 0x183   : > { %7123 = vmatpush3.bf16.msra.mxu0 %v7724_v9  ;;  %v7770_v9 = vld [vmem:[%s7952_s22 + $0xc88] sm:$0xff]  }
 0x184   : > { %7124 = vmatprep.subr.bf16.mxu0 %v7726_v11  ;;  %v8462_v11 = vrot.slane %v1520_v7, %v7990_v42 }
 0x185   : > { %7145 = vmatpush3.bf16.msra.mxu1 %v7725_v10 }
 0x186   : > { %7146 = vmatprep.subr.bf16.mxu1 %v7727_v12  ;;  %v7772_v12 = vld [vmem:[%s7952_s22 + $0xcc0] sm:$0xff]  }
 0x187   : > { %7125 = vmatpush3.bf16.msra.mxu0 %v7728_v13  ;;  %v7773_v13 = vld [vmem:[%s7952_s22 + $0xc00] sm:$0xff]  }
 0x188   : > { %7126 = vmatprep.subr.bf16.mxu0 %v7730_v15  ;;  %v1536_v15 = vcombine.high %v8462_v11, %v8462_v11 }
 0x189   : > { %7147 = vmatpush3.bf16.msra.mxu1 %v7729_v14 }
 0x18a   : > { %7148 = vmatprep.subr.bf16.mxu1 %v7731_v16 }
 0x18b   : > { %7127 = vmatpush3.bf16.msra.mxu0 %v7732_v17  ;;  %v7775_v17 = vld [vmem:[%s7952_s22 + $0xd78] sm:$0xff]  }
 0x18c   : > { %7128 = vmatprep.subr.bf16.mxu0 %v7734_v19 }
 0x18d   : > { %7149 = vmatpush3.bf16.msra.mxu1 %v7733_v18  ;;  %v7774_v18 = vld [vmem:[%s7952_s22 + $0xc80] sm:$0xff]  }
 0x18e   : > { %7150 = vmatprep.subr.bf16.mxu1 %v7735_v20  ;;  %v1564_v20 = vrot.slane %v1536_v15, %v7990_v42  ;;  %v7816_v15 = vld [vmem:[%s7952_s22 + $0xe68] sm:$0xff]  }
 0x18f   : > { %7129 = vmatpush3.bf16.msra.mxu0 %v7736_v21  ;;  %v7776_v21 = vld [vmem:[%s7952_s22 + $0xdf8] sm:$0xff]  }
 0x190   : > { %7130 = vmatprep.subr.bf16.mxu0 %v7738_v23 }
 0x191   : > { %7151 = vmatpush3.bf16.msra.mxu1 %v7737_v22  ;;  %v7777_v22 = vld [vmem:[%s7952_s22 + $0xd38] sm:$0xff]  }
 0x192   : > { %7152 = vmatprep.subr.bf16.mxu1 %v7739_v24  ;;  %v7779_v24 = vld [vmem:[%s7952_s22 + $0xd70] sm:$0xff]  }
 0x193   : > { %7131 = vmatpush3.bf16.msra.mxu0 %v7740_v25  ;;  %v7778_v25 = vld [vmem:[%s7952_s22 + $0xdb8] sm:$0xff]  }
 0x194   : > { %7160 = vmatprep.subr.bf16.mxu0 %v7743_v28  ;;  %v7780_v28 = vld [vmem:[%s7952_s22 + $0xdf0] sm:$0xff]  }
 0x195   : > { %7153 = vmatpush3.bf16.msra.mxu1 %v7741_v26  ;;  %v1568_v26 = vcombine.high %v1564_v20, %v1564_v20 }
 0x196   : > { %v6868_v36 = vpop.f32.mrf.mxu0  ;;  %5667 = vmatmul.mubr.bf16.vlgmr.msra.gmra.mxu0 %v1501_v27  ;;  %7182 = vmatprep.subr.bf16.mxu1 %v7744_v29  ;;  %v7781_v29 = vld [vmem:[%s7952_s22 + $0xd30] sm:$0xff]  }
 0x197   : > { %7161 = vmatpush3.bf16.msra.mxu0 %v7745_v30 }
 0x198   : > { %v6890_v38 = vpop.f32.mrf.mxu1  ;;  %5707 = vmatmul.mubr.bf16.vlgmr.msra.gmra.mxu1 %v1517_v32  ;;  %v6869_v39 = vpop.f32.mrf.mxu0  ;;  %7162 = vmatprep.subr.bf16.mxu0 %v7747_v33  ;;  %v7783_v32 = vld [vmem:[%s7952_s22 + $0xd68] sm:$0xff]  }
 0x199   : > { %7183 = vmatpush3.bf16.msra.mxu1 %v7746_v31  ;;  %v6870_v41 = vadd.f32 %v6869_v39, %v6868_v36 }
 0x19a   : > { %v6891_v44 = vpop.f32.mrf.mxu1  ;;  %v6871_v45 = vpop.f32.mrf.mxu0  ;;  %7184 = vmatprep.subr.bf16.mxu1 %v7748_v34  ;;  %v7782_v34 = vld [vmem:[%s7952_s22 + $0xdb0] sm:$0xff]  }
 0x19b   : > { %v5189_v47 = vadd.f32 %v6870_v41, %v8404_v6  ;;  %v6892_v48 = vadd.f32 %v6891_v44, %v6890_v38  ;;  %7163 = vmatpush3.bf16.msra.mxu0 %v7749_v35  ;;  %v1527_v6 = vrot.slane %v192_v4, %v7990_v42  ;;  %v7787_v44 = vld [vmem:[%s7952_s22 + $0xd60] sm:$0xff]  }
 0x19c   : > { %v6893_v50 = vpop.f32.mrf.mxu1  ;;  %v6872_v51 = vpop.f32.mrf.mxu0  ;;  %7164 = vmatprep.subr.bf16.mxu0 %v7751_v40  ;;  %v7785_v40 = vld [vmem:[%s7952_s22 + $0xd28] sm:$0xff]   ;;  %v7806_v4 = vld [vmem:[%s7952_s22 + $0xd80] sm:$0xff]  }
 0x19d   : > { %v8441_v53 = vadd.f32 %v6892_v48, %v5189_v47  ;;  %7185 = vmatpush3.bf16.msra.mxu1 %v7750_v37  ;;  %v1535_v10 = vcombine.high %v1527_v6, %v1527_v6  ;;  %v1543_v16 = vrot.slane %v1527_v6, %v7990_v42  ;;  %v7784_v37 = vld [vmem:[%s7952_s22 + $0xde8] sm:$0xff]   ;;  %v7788_v48 = vld [vmem:[%s7952_s22 + $0xde0] sm:$0xff]   ;;  %v7791_v50 = vld [vmem:[%s7952_s22 + $0xd58] sm:$0xff]  }
 0x19e   : > { %v6894_v55 = vpop.f32.mrf.mxu1  ;;  %7186 = vmatprep.subr.bf16.mxu1 %v7752_v43  ;;  %v7790_v51 = vld [vmem:[%s7952_s22 + $0xda0] sm:$0xff]   ;;  %v7810_v6 = vld [vmem:[%s7952_s22 + $0xe38] sm:$0xff]  }
 0x19f   : > { %7165 = vmatpush3.bf16.msra.mxu0 %v7753_v46  ;;  %v1557_v14 = vrot.slane %v1535_v10, %v7990_v42  ;;  %v1565_v23 = vcombine.high %v1543_v16, %v1543_v16  ;;  %v7786_v46 = vld [vmem:[%s7952_s22 + $0xda8] sm:$0xff]   ;;  %v7794_v55 = vld [vmem:[%s7952_s22 + $0xd98] sm:$0xff]  }
 0x1a0   : > { %7166 = vmatprep.subr.bf16.mxu0 %v7755_v52  ;;  %v7792_v52 = vld [vmem:[%s7952_s22 + $0xdd8] sm:$0xff]  }
 0x1a1   : > { %7187 = vmatpush3.bf16.msra.mxu1 %v7754_v49  ;;  %5746 = vmatprep.mubr.bf16.mxu0 %v1557_v14  ;;  %v1567_v19 = vcombine.high %v1557_v14, %v1557_v14  ;;  %v7789_v49 = vld [vmem:[%s7952_s22 + $0xd20] sm:$0xff]  }
 0x1a2   : > { %7188 = vmatprep.subr.bf16.mxu1 %v7756_v54  ;;  %v7795_v54 = vld [vmem:[%s7952_s22 + $0xd50] sm:$0xff]  }
 0x1a3   : > { %7167 = vmatpush3.bf16.msra.mxu0 %v7757_v56  ;;  %5786 = vmatprep.mubr.bf16.mxu1 %v1567_v19  ;;  %v7796_v56 = vld [vmem:[%s7952_s22 + $0xdd0] sm:$0xff]  }
 0x1a4   : > { %7168 = vmatprep.subr.bf16.mxu0 %v7759_v58  ;;  %v7799_v58 = vld [vmem:[%s7952_s22 + $0xd48] sm:$0xff]  }
 0x1a5   : > { %7189 = vmatpush3.bf16.msra.mxu1 %v7758_v57  ;;  %v7797_v57 = vld [vmem:[%s7952_s22 + $0xd10] sm:$0xff]  }
 0x1a6   : > { %7190 = vmatprep.subr.bf16.mxu1 %v7760_v59  ;;  %v7798_v59 = vld [vmem:[%s7952_s22 + $0xd90] sm:$0xff]  }
 0x1a7   : > { %7169 = vmatpush3.bf16.msra.mxu0 %v7761_v61  ;;  %v7800_v61 = vld [vmem:[%s7952_s22 + $0xdc8] sm:$0xff]  }
 0x1a8   : > { %7170 = vmatprep.subr.bf16.mxu0 %v7763_v62  ;;  %v7803_v62 = vld [vmem:[%s7952_s22 + $0xd40] sm:$0xff]  }
 0x1a9   : > { %7191 = vmatpush3.bf16.msra.mxu1 %v7762_v60  ;;  %v7801_v60 = vld [vmem:[%s7952_s22 + $0xd08] sm:$0xff]  }
 0x1aa   : > { %7192 = vmatprep.subr.bf16.mxu1 %v7764_v63  ;;  %v7802_v63 = vld [vmem:[%s7952_s22 + $0xd88] sm:$0xff]  }
 0x1ab   : > { %7171 = vmatpush3.bf16.msra.mxu0 %v7765_v0  ;;  %v7804_v0 = vld [vmem:[%s7952_s22 + $0xdc0] sm:$0xff]  }
 0x1ac   : > { %7172 = vmatprep.subr.bf16.mxu0 %v7767_v2  ;;  %v1550_v2 = vrot.slane %v8462_v11, %v7990_v42  ;;  %v7813_v11 = vld [vmem:[%s7952_s22 + $0xef0] sm:$0xff]  }
 0x1ad   : > { %7193 = vmatpush3.bf16.msra.mxu1 %v7766_v1  ;;  %v7805_v1 = vld [vmem:[%s7952_s22 + $0xd00] sm:$0xff]  }
 0x1ae   : > { %7194 = vmatprep.subr.bf16.mxu1 %v7768_v3  ;;  %v7808_v3 = vld [vmem:[%s7952_s22 + $0xe78] sm:$0xff]   ;;  %v1566_v7 = vcombine.high %v1550_v2, %v1550_v2 }
 0x1af   : > { %7173 = vmatpush3.bf16.msra.mxu0 %v7769_v5  ;;  %v7809_v5 = vld [vmem:[%s7952_s22 + $0xef8] sm:$0xff]  }
 0x1b0   : > { %7174 = vmatprep.subr.bf16.mxu0 %v7771_v8  ;;  %v7812_v8 = vld [vmem:[%s7952_s22 + $0xe70] sm:$0xff]  }
 0x1b1   : > { %7195 = vmatpush3.bf16.msra.mxu1 %v7770_v9  ;;  %v7811_v9 = vld [vmem:[%s7952_s22 + $0xeb8] sm:$0xff]  }
 0x1b2   : > { %7196 = vmatprep.subr.bf16.mxu1 %v7772_v12  ;;  %v7814_v12 = vld [vmem:[%s7952_s22 + $0xe30] sm:$0xff]  }
 0x1b3   : > { %7175 = vmatpush3.bf16.msra.mxu0 %v7773_v13 }
 0x1b4   : > { %7204 = vmatprep.subr.bf16.mxu0 %v7775_v17  ;;  %v7815_v17 = vld [vmem:[%s7952_s22 + $0xeb0] sm:$0xff]  }
 0x1b5   : > { %7197 = vmatpush3.bf16.msra.mxu1 %v7774_v18 }
 0x1b6   : > { %v6912_v27 = vpop.f32.mrf.mxu0  ;;  %5747 = vmatmul.mubr.bf16.vlgmr.msra.gmra.mxu0 %v1543_v16  ;;  %7226 = vmatprep.subr.bf16.mxu1 %v7776_v21 }
 0x1b7   : > { %7205 = vmatpush3.bf16.msra.mxu0 %v7777_v22  ;;  %5826 = vmatprep.mubr.bf16.mxu0 %v1564_v20  ;;  %v7817_v20 = vld [vmem:[%s7952_s22 + $0xee8] sm:$0xff]  }
 0x1b8   : > { %v6934_v30 = vpop.f32.mrf.mxu1  ;;  %5787 = vmatmul.mubr.bf16.vlgmr.msra.gmra.mxu1 %v1565_v23  ;;  %v6913_v31 = vpop.f32.mrf.mxu0  ;;  %7206 = vmatprep.subr.bf16.mxu0 %v7779_v24  ;;  %v7818_v23 = vld [vmem:[%s7952_s22 + $0xe28] sm:$0xff]  }
 0x1b9   : > { %7227 = vmatpush3.bf16.msra.mxu1 %v7778_v25  ;;  %v6914_v33 = vadd.f32 %v6913_v31, %v6912_v27  ;;  %5866 = vmatprep.mubr.bf16.mxu1 %v1568_v26  ;;  %v7820_v26 = vld [vmem:[%s7952_s22 + $0xe60] sm:$0xff]  }
 0x1ba   : > { %v6935_v36 = vpop.f32.mrf.mxu1  ;;  %v6915_v35 = vpop.f32.mrf.mxu0  ;;  %7228 = vmatprep.subr.bf16.mxu1 %v7780_v28  ;;  %v7819_v28 = vld [vmem:[%s7952_s22 + $0xea8] sm:$0xff]   ;;  %v7822_v31 = vld [vmem:[%s7952_s22 + $0xe20] sm:$0xff]  }
 0x1bb   : > { %v5269_v38 = vadd.f32 %v6914_v33, %v8441_v53  ;;  %v6936_v39 = vadd.f32 %v6935_v36, %v6934_v30  ;;  %7207 = vmatpush3.bf16.msra.mxu0 %v7781_v29  ;;  %v7793_v53 = vld [vmem:[%s7952_s22 + $0xd18] sm:$0xff]   ;;  %v7821_v30 = vld [vmem:[%s7952_s22 + $0xee0] sm:$0xff]   ;;  %v7828_v35 = vld [vmem:[%s7952_s22 + $0xe50] sm:$0xff]  }
 0x1bc   : > { %v6937_v41 = vpop.f32.mrf.mxu1  ;;  %v6916_v43 = vpop.f32.mrf.mxu0  ;;  %7208 = vmatprep.subr.bf16.mxu0 %v7783_v32  ;;  %v7824_v32 = vld [vmem:[%s7952_s22 + $0xe58] sm:$0xff]   ;;  %v7823_v33 = vld [vmem:[%s7952_s22 + $0xea0] sm:$0xff]  }
 0x1bd   : > { %v8485_v45 = vadd.f32 %v6936_v39, %v5269_v38  ;;  %7229 = vmatpush3.bf16.msra.mxu1 %v7782_v34  ;;  %v7825_v34 = vld [vmem:[%s7952_s22 + $0xed8] sm:$0xff]   ;;  %v7829_v38 = vld [vmem:[%s7952_s22 + $0xed0] sm:$0xff]   ;;  %v7833_v43 = vld [vmem:[%s7952_s22 + $0xec8] sm:$0xff]  }
 0x1be   : > { %v6938_v47 = vpop.f32.mrf.mxu1  ;;  %7230 = vmatprep.subr.bf16.mxu1 %v7784_v37  ;;  %v7826_v36 = vld [vmem:[%s7952_s22 + $0xe18] sm:$0xff]   ;;  %v7830_v39 = vld [vmem:[%s7952_s22 + $0xe10] sm:$0xff]  }
 0x1bf   : > { %7209 = vmatpush3.bf16.msra.mxu0 %v7785_v40  ;;  %v7827_v37 = vld [vmem:[%s7952_s22 + $0xe98] sm:$0xff]   ;;  %v7832_v40 = vld [vmem:[%s7952_s22 + $0xe48] sm:$0xff]   ;;  %v7831_v41 = vld [vmem:[%s7952_s22 + $0xe90] sm:$0xff]  }
 0x1c0   : > { %7210 = vmatprep.subr.bf16.mxu0 %v7787_v44  ;;  %v193_v44 = vld [vmem:[%s7947_s18 + $0x38] sm:$0xff] }
 0x1c1   : > { %7231 = vmatpush3.bf16.msra.mxu1 %v7786_v46  ;;  %v1576_v46 = vrot.slane %v193_v44, %v7990_v42  ;;  %v1569_v47 = vcombine.high %v193_v44, %v193_v44 }
 0x1c2   : > { %7232 = vmatprep.subr.bf16.mxu1 %v7788_v48  ;;  %v7836_v48 = vld [vmem:[%s7952_s22 + $0xe40] sm:$0xff]  }
 0x1c3   : > { %7211 = vmatpush3.bf16.msra.mxu0 %v7789_v49  ;;  %v7835_v49 = vld [vmem:[%s7952_s22 + $0xe88] sm:$0xff]  }
 0x1c4   : > { %7212 = vmatprep.subr.bf16.mxu0 %v7791_v50  ;;  %v1584_v50 = vcombine.high %v1576_v46, %v1576_v46 }
 0x1c5   : > { %7233 = vmatpush3.bf16.msra.mxu1 %v7790_v51  ;;  %v8544_v51 = vrot.slane %v1569_v47, %v7990_v42 }
 0x1c6   : > { %7234 = vmatprep.subr.bf16.mxu1 %v7792_v52  ;;  %v7837_v52 = vld [vmem:[%s7952_s22 + $0xec0] sm:$0xff]  }
 0x1c7   : > { %7213 = vmatpush3.bf16.msra.mxu0 %v7793_v53  ;;  %v7838_v53 = vld [vmem:[%s7952_s22 + $0xe00] sm:$0xff]  }
 0x1c8   : > { %7214 = vmatprep.subr.bf16.mxu0 %v7795_v54  ;;  %v1606_v54 = vrot.slane %v1584_v50, %v7990_v42 }
 0x1c9   : > { %7235 = vmatpush3.bf16.msra.mxu1 %v7794_v55  ;;  %v1585_v55 = vcombine.high %v8544_v51, %v8544_v51 }
 0x1ca   : > { %7236 = vmatprep.subr.bf16.mxu1 %v7796_v56  ;;  %v1592_v56 = vrot.slane %v1576_v46, %v7990_v42 }
 0x1cb   : > { %7215 = vmatpush3.bf16.msra.mxu0 %v7797_v57  ;;  %v7840_v57 = vld [vmem:[%s7952_s22 + $0xf78] sm:$0xff]  }
 0x1cc   : > { %7216 = vmatprep.subr.bf16.mxu0 %v7799_v58  ;;  %v7839_v58 = vld [vmem:[%s7952_s22 + $0xe80] sm:$0xff]  }
 0x1cd   : > { %7237 = vmatpush3.bf16.msra.mxu1 %v7798_v59  ;;  %v1616_v59 = vcombine.high %v1606_v54, %v1606_v54 }
 0x1ce   : > { %7238 = vmatprep.subr.bf16.mxu1 %v7800_v61  ;;  %v1613_v61 = vrot.slane %v1585_v55, %v7990_v42 }
 0x1cf   : > { %7217 = vmatpush3.bf16.msra.mxu0 %v7801_v60  ;;  %v7841_v60 = vld [vmem:[%s7952_s22 + $0xff8] sm:$0xff]  }
 0x1d0   : > { %7218 = vmatprep.subr.bf16.mxu0 %v7803_v62  ;;  %v7842_v62 = vld [vmem:[%s7952_s22 + $0xf38] sm:$0xff]  }
 0x1d1   : > { %7239 = vmatpush3.bf16.msra.mxu1 %v7802_v63  ;;  %v1614_v63 = vcombine.high %v1592_v56, %v1592_v56 }
 0x1d2   : > { %7240 = vmatprep.subr.bf16.mxu1 %v7804_v0  ;;  %v7844_v0 = vld [vmem:[%s7952_s22 + $0xf70] sm:$0xff]  }
 0x1d3   : > { %7219 = vmatpush3.bf16.msra.mxu0 %v7805_v1  ;;  %v7843_v1 = vld [vmem:[%s7952_s22 + $0xfb8] sm:$0xff]  }
 0x1d4   : > { %7248 = vmatprep.subr.bf16.mxu0 %v7808_v3 }
 0x1d5   : > { %7241 = vmatpush3.bf16.msra.mxu1 %v7806_v4  ;;  %v7845_v4 = vld [vmem:[%s7952_s22 + $0xff0] sm:$0xff]  }
 0x1d6   : > { %v6956_v10 = vpop.f32.mrf.mxu0  ;;  %5827 = vmatmul.mubr.bf16.vlgmr.msra.gmra.mxu0 %v1550_v2  ;;  %7270 = vmatprep.subr.bf16.mxu1 %v7809_v5  ;;  %v1617_v2 = vcombine.high %v1613_v61, %v1613_v61  ;;  %v7846_v5 = vld [vmem:[%s7952_s22 + $0xf30] sm:$0xff]  }
 0x1d7   : > { %7249 = vmatpush3.bf16.msra.mxu0 %v7810_v6  ;;  %5906 = vmatprep.mubr.bf16.mxu0 %v1606_v54 }
 0x1d8   : > { %v6978_v13 = vpop.f32.mrf.mxu1  ;;  %5867 = vmatmul.mubr.bf16.vlgmr.msra.gmra.mxu1 %v1566_v7  ;;  %v6957_v14 = vpop.f32.mrf.mxu0  ;;  %7250 = vmatprep.subr.bf16.mxu0 %v7812_v8  ;;  %v7848_v8 = vld [vmem:[%s7952_s22 + $0xf68] sm:$0xff]  }
 0x1d9   : > { %7271 = vmatpush3.bf16.msra.mxu1 %v7811_v9  ;;  %v6958_v16 = vadd.f32 %v6957_v14, %v6956_v10  ;;  %5946 = vmatprep.mubr.bf16.mxu1 %v1616_v59  ;;  %v7847_v10 = vld [vmem:[%s7952_s22 + $0xfb0] sm:$0xff]  }
 0x1da   : > { %v6979_v18 = vpop.f32.mrf.mxu1  ;;  %v6959_v19 = vpop.f32.mrf.mxu0  ;;  %7272 = vmatprep.subr.bf16.mxu1 %v7813_v11 }
 0x1db   : > { %v5349_v21 = vadd.f32 %v6958_v16, %v8485_v45  ;;  %v6980_v22 = vadd.f32 %v6979_v18, %v6978_v13  ;;  %7251 = vmatpush3.bf16.msra.mxu0 %v7814_v12  ;;  %v7834_v45 = vld [vmem:[%s7952_s22 + $0xe08] sm:$0xff]   ;;  %v7852_v19 = vld [vmem:[%s7952_s22 + $0xf60] sm:$0xff]  }
 0x1dc   : > { %v6981_v24 = vpop.f32.mrf.mxu1  ;;  %v6960_v25 = vpop.f32.mrf.mxu0  ;;  %7252 = vmatprep.subr.bf16.mxu0 %v7816_v15  ;;  %v7849_v13 = vld [vmem:[%s7952_s22 + $0xfe8] sm:$0xff]  }
 0x1dd   : > { %v8522_v27 = vadd.f32 %v6980_v22, %v5349_v21  ;;  %7273 = vmatpush3.bf16.msra.mxu1 %v7815_v17  ;;  %v7850_v16 = vld [vmem:[%s7952_s22 + $0xf28] sm:$0xff]   ;;  %v7854_v24 = vld [vmem:[%s7952_s22 + $0xf20] sm:$0xff]   ;;  %v7856_v25 = vld [vmem:[%s7952_s22 + $0xf58] sm:$0xff]  }
 0x1de   : > { %v6982_v29 = vpop.f32.mrf.mxu1  ;;  %7274 = vmatprep.subr.bf16.mxu1 %v7817_v20  ;;  %v7851_v21 = vld [vmem:[%s7952_s22 + $0xfa8] sm:$0xff]  }
 0x1df   : > { %7253 = vmatpush3.bf16.msra.mxu0 %v7818_v23  ;;  %v7853_v23 = vld [vmem:[%s7952_s22 + $0xfe0] sm:$0xff]   ;;  %v7860_v29 = vld [vmem:[%s7952_s22 + $0xf50] sm:$0xff]  }
 0x1e0   : > { %7254 = vmatprep.subr.bf16.mxu0 %v7820_v26  ;;  %v7855_v26 = vld [vmem:[%s7952_s22 + $0xfa0] sm:$0xff]  }
 0x1e1   : > { %7275 = vmatpush3.bf16.msra.mxu1 %v7819_v28  ;;  %v7858_v28 = vld [vmem:[%s7952_s22 + $0xf18] sm:$0xff]  }
 0x1e2   : > { %7276 = vmatprep.subr.bf16.mxu1 %v7821_v30  ;;  %v7859_v30 = vld [vmem:[%s7952_s22 + $0xf98] sm:$0xff]  }
 0x1e3   : > { %7255 = vmatpush3.bf16.msra.mxu0 %v7822_v31  ;;  %v7861_v31 = vld [vmem:[%s7952_s22 + $0xfd0] sm:$0xff]  }
 0x1e4   : > { %7256 = vmatprep.subr.bf16.mxu0 %v7824_v32  ;;  %v7862_v32 = vld [vmem:[%s7952_s22 + $0xf10] sm:$0xff]  }
 0x1e5   : > { %7277 = vmatpush3.bf16.msra.mxu1 %v7823_v33  ;;  %v7864_v33 = vld [vmem:[%s7952_s22 + $0xf48] sm:$0xff]  }
 0x1e6   : > { %7278 = vmatprep.subr.bf16.mxu1 %v7825_v34  ;;  %v7863_v34 = vld [vmem:[%s7952_s22 + $0xf90] sm:$0xff]  }
 0x1e7   : > { %7257 = vmatpush3.bf16.msra.mxu0 %v7826_v36  ;;  %v7865_v36 = vld [vmem:[%s7952_s22 + $0xfc8] sm:$0xff]  }
 0x1e8   : > { %7258 = vmatprep.subr.bf16.mxu0 %v7828_v35  ;;  %v7866_v35 = vld [vmem:[%s7952_s22 + $0xf08] sm:$0xff]  }
 0x1e9   : > { %7279 = vmatpush3.bf16.msra.mxu1 %v7827_v37  ;;  %v7868_v37 = vld [vmem:[%s7952_s22 + $0xf40] sm:$0xff]  }
 0x1ea   : > { %7280 = vmatprep.subr.bf16.mxu1 %v7829_v38  ;;  %v7867_v38 = vld [vmem:[%s7952_s22 + $0xf88] sm:$0xff]  }
 0x1eb   : > { %7259 = vmatpush3.bf16.msra.mxu0 %v7830_v39  ;;  %v7869_v39 = vld [vmem:[%s7952_s22 + $0xfc0] sm:$0xff]  }
 0x1ec   : > { %7260 = vmatprep.subr.bf16.mxu0 %v7832_v40  ;;  %v7870_v40 = vld [vmem:[%s7952_s22 + $0xf00] sm:$0xff]  }
 0x1ed   : > { %7281 = vmatpush3.bf16.msra.mxu1 %v7831_v41  ;;  %v1599_v41 = vrot.slane %v8544_v51, %v7990_v42 }
 0x1ee   : > { %7282 = vmatprep.subr.bf16.mxu1 %v7833_v43  ;;  %v7871_v43 = vld [vmem:[%s7952_s22 + $0xf80] sm:$0xff]  }
 0x1ef   : > { %7261 = vmatpush3.bf16.msra.mxu0 %v7834_v45  ;;  %v1615_v44 = vcombine.high %v1599_v41, %v1599_v41 }
 0x1f0   : > { %7262 = vmatprep.subr.bf16.mxu0 %v7836_v48 }
 0x1f1   : > { %7283 = vmatpush3.bf16.msra.mxu1 %v7835_v49 }
 0x1f2   : > { %7284 = vmatprep.subr.bf16.mxu1 %v7837_v52 }
 0x1f3   : > { %7263 = vmatpush3.bf16.msra.mxu0 %v7838_v53 }
 0x1f4   : > { %7292 = vmatprep.subr.bf16.mxu0 %v7840_v57 }
 0x1f5   : > { %7285 = vmatpush3.bf16.msra.mxu1 %v7839_v58 }
 0x1f6   : > { %v7000_v3 = vpop.f32.mrf.mxu0  ;;  %5907 = vmatmul.mubr.bf16.vlgmr.msra.gmra.mxu0 %v1592_v56  ;;  %7314 = vmatprep.subr.bf16.mxu1 %v7841_v60 }
 0x1f7   : > { %7293 = vmatpush3.bf16.msra.mxu0 %v7842_v62  ;;  %5986 = vmatprep.mubr.bf16.mxu0 %v1613_v61 }
 0x1f8   : > { %v7022_v6 = vpop.f32.mrf.mxu1  ;;  %5947 = vmatmul.mubr.bf16.vlgmr.msra.gmra.mxu1 %v1614_v63  ;;  %v7001_v7 = vpop.f32.mrf.mxu0  ;;  %7294 = vmatprep.subr.bf16.mxu0 %v7844_v0 }
 0x1f9   : > { %7315 = vmatpush3.bf16.msra.mxu1 %v7843_v1  ;;  %v7002_v9 = vadd.f32 %v7001_v7, %v7000_v3  ;;  %6026 = vmatprep.mubr.bf16.mxu1 %v1617_v2 }
 0x1fa   : > { %v7023_v11 = vpop.f32.mrf.mxu1  ;;  %v7003_v12 = vpop.f32.mrf.mxu0  ;;  %7316 = vmatprep.subr.bf16.mxu1 %v7845_v4 }
 0x1fb   : > { %v5429_v14 = vadd.f32 %v7002_v9, %v8522_v27  ;;  %v7024_v15 = vadd.f32 %v7023_v11, %v7022_v6  ;;  %7295 = vmatpush3.bf16.msra.mxu0 %v7846_v5  ;;  %v7857_v27 = vld [vmem:[%s7952_s22 + $0xfd8] sm:$0xff]  }
 0x1fc   : > { %v7025_v17 = vpop.f32.mrf.mxu1  ;;  %v7004_v18 = vpop.f32.mrf.mxu0  ;;  %7296 = vmatprep.subr.bf16.mxu0 %v7848_v8 }
 0x1fd   : > { %v5469_v20 = vadd.f32 %v7024_v15, %v5429_v14  ;;  %7317 = vmatpush3.bf16.msra.mxu1 %v7847_v10 }
 0x1fe   : > { %v7026_v22 = vpop.f32.mrf.mxu1  ;;  %7318 = vmatprep.subr.bf16.mxu1 %v7849_v13 }
 0x1ff   : > { %7297 = vmatpush3.bf16.msra.mxu0 %v7850_v16 }
 0x200   : > { %7298 = vmatprep.subr.bf16.mxu0 %v7852_v19 }
 0x201   : > { %7319 = vmatpush3.bf16.msra.mxu1 %v7851_v21 }
 0x202   : > { %7320 = vmatprep.subr.bf16.mxu1 %v7853_v23 }
 0x203   : > { %7299 = vmatpush3.bf16.msra.mxu0 %v7854_v24 }
 0x204   : > { %7300 = vmatprep.subr.bf16.mxu0 %v7856_v25 }
 0x205   : > { %7321 = vmatpush3.bf16.msra.mxu1 %v7855_v26 }
 0x206   : > { %7322 = vmatprep.subr.bf16.mxu1 %v7857_v27 }
 0x207   : > { %7301 = vmatpush3.bf16.msra.mxu0 %v7858_v28 }
 0x208   : > { %7302 = vmatprep.subr.bf16.mxu0 %v7860_v29 }
 0x209   : > { %7323 = vmatpush3.bf16.msra.mxu1 %v7859_v30 }
 0x20a   : > { %7324 = vmatprep.subr.bf16.mxu1 %v7861_v31 }
 0x20b   : > { %7303 = vmatpush3.bf16.msra.mxu0 %v7862_v32 }
 0x20c   : > { %7304 = vmatprep.subr.bf16.mxu0 %v7864_v33 }
 0x20d   : > { %7325 = vmatpush3.bf16.msra.mxu1 %v7863_v34 }
 0x20e   : > { %7326 = vmatprep.subr.bf16.mxu1 %v7865_v36 }
 0x20f   : > { %7305 = vmatpush3.bf16.msra.mxu0 %v7866_v35 }
 0x210   : > { %7306 = vmatprep.subr.bf16.mxu0 %v7868_v37 }
 0x211   : > { %7327 = vmatpush3.bf16.msra.mxu1 %v7867_v38 }
 0x212   : > { %7328 = vmatprep.subr.bf16.mxu1 %v7869_v39 }
 0x213   : > { %7307 = vmatpush3.bf16.msra.mxu0 %v7870_v40 }
 0x215   : > { %7329 = vmatpush3.bf16.msra.mxu1 %v7871_v43 }
 0x216   : > { %v7044_v45 = vpop.f32.mrf.mxu0  ;;  %5987 = vmatmul.mubr.bf16.vlgmr.msra.gmra.mxu0 %v1599_v41 }
 0x218   : > { %v7066_v46 = vpop.f32.mrf.mxu1  ;;  %6027 = vmatmul.mubr.bf16.vlgmr.msra.gmra.mxu1 %v1615_v44  ;;  %v7045_v47 = vpop.f32.mrf.mxu0 }
 0x219   : > { %v7046_v48 = vadd.f32 %v7045_v47, %v7044_v45 }
 0x21a   : > { %v7067_v49 = vpop.f32.mrf.mxu1  ;;  %v7047_v50 = vpop.f32.mrf.mxu0 }
 0x21b   : > { %v5509_v52 = vadd.f32 %v7046_v48, %v5469_v20  ;;  %v7068_v53 = vadd.f32 %v7067_v49, %v7066_v46 }
 0x21c   : > { %v7069_v54 = vpop.f32.mrf.mxu1  ;;  %v7048_v55 = vpop.f32.mrf.mxu0 }
 0x21d   : > { %v5549_v56 = vadd.f32 %v7068_v53, %v5509_v52 }
 0x21e   : > { %v7070_v42 = vpop.f32.mrf.mxu1 }
 0x236   : > { %v7088_v51 = vpop.f32.mrf.mxu0 }
 0x238   : > { %v7110_v57 = vpop.f32.mrf.mxu1  ;;  %v7089_v58 = vpop.f32.mrf.mxu0 }
 0x239   : > { %v7090_v59 = vadd.f32 %v7089_v58, %v7088_v51 }
 0x23a   : > { %v7111_v61 = vpop.f32.mrf.mxu1  ;;  %v7091_v60 = vpop.f32.mrf.mxu0 }
 0x23b   : > { %v5589_v62 = vadd.f32 %v7090_v59, %v5549_v56  ;;  %v7112_v63 = vadd.f32 %v7111_v61, %v7110_v57  ;;  %v185_v61 = vld [vmem:[#allocation2] sm:$0x3] }
 0x23c   : > { %v7113_v0 = vpop.f32.mrf.mxu1  ;;  %v7092_v1 = vpop.f32.mrf.mxu0 }
 0x23d   : > { %v5629_v2 = vadd.f32 %v7112_v63, %v5589_v62 }
 0x23e   : > { %v7114_v3 = vpop.f32.mrf.mxu1 }
 0x256   : > { %v7132_v4 = vpop.f32.mrf.mxu0 }
 0x258   : > { %v7154_v5 = vpop.f32.mrf.mxu1  ;;  %v7133_v6 = vpop.f32.mrf.mxu0 }
 0x259   : > { %v7134_v7 = vadd.f32 %v7133_v6, %v7132_v4 }
 0x25a   : > { %v7155_v8 = vpop.f32.mrf.mxu1  ;;  %v7135_v9 = vpop.f32.mrf.mxu0 }
 0x25b   : > { %v5669_v10 = vadd.f32 %v7134_v7, %v5629_v2  ;;  %v7156_v11 = vadd.f32 %v7155_v8, %v7154_v5 }
 0x25c   : > { %v7157_v12 = vpop.f32.mrf.mxu1  ;;  %v7136_v13 = vpop.f32.mrf.mxu0 }
 0x25d   : > { %v5709_v14 = vadd.f32 %v7156_v11, %v5669_v10 }
 0x25e   : > { %v7158_v15 = vpop.f32.mrf.mxu1 }
 0x276   : > { %v7176_v16 = vpop.f32.mrf.mxu0 }
 0x278   : > { %v7198_v17 = vpop.f32.mrf.mxu1  ;;  %v7177_v18 = vpop.f32.mrf.mxu0 }
 0x279   : > { %v7178_v19 = vadd.f32 %v7177_v18, %v7176_v16 }
 0x27a   : > { %v7199_v20 = vpop.f32.mrf.mxu1  ;;  %v7179_v21 = vpop.f32.mrf.mxu0 }
 0x27b   : > { %v5749_v22 = vadd.f32 %v7178_v19, %v5709_v14  ;;  %v7200_v23 = vadd.f32 %v7199_v20, %v7198_v17 }
 0x27c   : > { %v7201_v24 = vpop.f32.mrf.mxu1  ;;  %v7180_v25 = vpop.f32.mrf.mxu0 }
 0x27d   : > { %v5789_v26 = vadd.f32 %v7200_v23, %v5749_v22 }
 0x27e   : > { %v7202_v27 = vpop.f32.mrf.mxu1 }
 0x296   : > { %v7220_v28 = vpop.f32.mrf.mxu0 }
 0x298   : > { %v7242_v29 = vpop.f32.mrf.mxu1  ;;  %v7221_v30 = vpop.f32.mrf.mxu0 }
 0x299   : > { %v7222_v45 = vadd.f32 %v7221_v30, %v7220_v28 }
 0x29a   : > { %v7243_v31 = vpop.f32.mrf.mxu1  ;;  %v7223_v32 = vpop.f32.mrf.mxu0 }
 0x29b   : > { %v5829_v46 = vadd.f32 %v7222_v45, %v5789_v26  ;;  %v7244_v47 = vadd.f32 %v7243_v31, %v7242_v29 }
 0x29c   : > { %v7245_v33 = vpop.f32.mrf.mxu1  ;;  %v7224_v34 = vpop.f32.mrf.mxu0 }
 0x29d   : > { %v5869_v49 = vadd.f32 %v7244_v47, %v5829_v46 }
 0x29e   : > { %v7246_v36 = vpop.f32.mrf.mxu1 }
 0x2b6   : > { %v7264_v35 = vpop.f32.mrf.mxu0 }
 0x2b8   : > { %v7286_v37 = vpop.f32.mrf.mxu1  ;;  %v7265_v38 = vpop.f32.mrf.mxu0 }
 0x2b9   : > { %v7266_v48 = vadd.f32 %v7265_v38, %v7264_v35 }
 0x2ba   : > { %v7287_v39 = vpop.f32.mrf.mxu1  ;;  %v7267_v40 = vpop.f32.mrf.mxu0 }
 0x2bb   : > { %v5909_v50 = vadd.f32 %v7266_v48, %v5869_v49  ;;  %v7288_v52 = vadd.f32 %v7287_v39, %v7286_v37 }
 0x2bc   : > { %v7289_v41 = vpop.f32.mrf.mxu1  ;;  %v7268_v43 = vpop.f32.mrf.mxu0 }
 0x2bd   : > { %v5949_v56 = vadd.f32 %v7288_v52, %v5909_v50 }
 0x2be   : > { %v7290_v44 = vpop.f32.mrf.mxu1 }
 0x2d6   : > { %v7308_v53 = vpop.f32.mrf.mxu0 }
 0x2d8   : > { %v7330_v54 = vpop.f32.mrf.mxu1  ;;  %v7309_v55 = vpop.f32.mrf.mxu0 }
 0x2d9   : > { %v7310_v42 = vadd.f32 %v7309_v55, %v7308_v53 }
 0x2da   : > { %v7331_v51 = vpop.f32.mrf.mxu1  ;;  %v7311_v57 = vpop.f32.mrf.mxu0 }
 0x2db   : > { %v5989_v58 = vadd.f32 %v7310_v42, %v5949_v56  ;;  %v7332_v59 = vadd.f32 %v7331_v51, %v7330_v54 }
 0x2dc   : > { %v7333_v60 = vpop.f32.mrf.mxu1  ;;  %v7312_v62 = vpop.f32.mrf.mxu0 }
 0x2dd   : > { %v6029_v63 = vadd.f32 %v7332_v59, %v5989_v58  ;;  %6040 = sbr.rel (%p6626_p6) target bundleno = 748 (0x2ec), region = 40 }
 0x2de   : > { %v7334_v0 = vpop.f32.mrf.mxu1 }
 0x2df   : > { %v6034_v1 = vadd.f32 %v6029_v63, %v185_v61 }
 0x2e1   : > { %6036 = vst.msk [vmem:[#allocation2] sm:$0x3] %vm6035_vm1, %v6034_v1 }
 0x2e2   : > { %v6627_v3 = vld [vmem:[%s8610_s2] ss:$0 sm:$0xff] }
 0x2e8   : > { %v6041_v2 = vld [vmem:[#allocation2] sm:$0x3] }
 0x2e9   : > { %v6049_v4 = vadd.f32 %v6627_v3, %v6041_v2 }
 0x2eb   : > { %6050 = vst.msk [vmem:[#allocation3] sm:$0x3] %vm6035_vm1, %v6049_v4 }
 0x2ec PF: > { %p7340_p7 = scmp.eq.s32.totalorder %s7938_s13, 1  ;;  %s7911_s25 = smov [#allocation3]  }
 0x2ed   : > { %s6058_s26 = sshll.u32 %s7911_s25, 4  ;;  %s6059_s26 = int_to_ptr.vmem [resolvable:$true] %s6058_s26 }
 0x2ee   : > { %s7873_s27 = scalar_lea.vmem %s6059_s26, 32  ;;  %p7880_p11 = scmp.lt.s32.totalorder %s6059_s26, %s6059_s26 }
 0x2ef   : > { %p7874_p8 = scmp.ne.s32.totalorder %s6059_s26, %s7873_s27  ;;  %p7881_p12 = scmp.lt.s32.totalorder %s7873_s27, %s7873_s27 }
 0x2f1   : > { %p7875_p9 = pnand %p7874_p8, %p7340_p7  ;;  %p7882_p13 = por %p7881_p12, %p7880_p11 }
 0x2f3   : > { %p7876_p10 = pneg %p7875_p9 }
 0x2f5   : > { %p7883_p0 = pnand %p7882_p13, %p7876_p10 }
 0x2f7   : > { %7886 = shalt.err (!%p7883_p0)
}
 0x2f8   : > { %7337 = dma.vmem_to_hbm [thread:$0]  (%p7340_p7), %s6059_s26, 32, %s8611_s3, [#allocation4]  }
 0x2f9   : > { %7902 = dma.done.wait (%p7340_p7), [#allocation4], 32  }
 0x2fa   : > { %7904 = vsyncadd (%p7340_p7), [#allocation4], 4294967264 }
 0x2fb PF: > { %s14_s12 = sadd.s32 1, %s7907_s12  }
 0x2fc   : > { %p11_p1 = scmp.ge.s32.totalorder %s14_s12, 4  }
 0x2fe   :  { %13 = sbr.rel (!%p11_p1) target bundleno = 1 (0x1), region = 70 }
 0x303   :  { %6071 = vsyncpa [#allocation4], 1 }
 0x304   :  { %6073 = vsyncpa [#allocation4 + $0x1], 1 }

</bundles_post_ra>
